<compile_context>
chip_gen: v5e
topology: v5e:2x2
jax: 0.10.0
libtpu: 0.0.40
codegen_flags: <defaults>
</compile_context>

<pallas_src>
import functools

import jax
import jax.numpy as jnp
import numpy as np
from jax.experimental import pallas as pl
from jax.experimental.pallas import tpu as pltpu

KSIZE = 5          # conv kernel size
PAD = 2            # conv padding
C_LANE = 128       # lane width / max channel count


# ---------------------------------------------------------------------------
# In-kernel helpers
# ---------------------------------------------------------------------------
def _relu_pool(acc, y_ref, NB, H, W, C):
    """acc: (NB*H*W, >=C) f32 conv output (bias already added).
    Stores the ReLU map (C real channels) to y_ref (NB*H, W, C) and returns the
    2x2 stride-2 max-pooled value of shape (NB, H//2, W//2, C) in f32."""
    Ho, Wo = H // 2, W // 2
    y_ref[...] = jnp.maximum(acc[:, :C], 0.0).reshape(NB * H, W, C)
    mw = jnp.maximum(y_ref[:, pl.ds(0, Wo, 2), :],        # even columns
                     y_ref[:, pl.ds(1, Wo, 2), :])        # odd  columns
    mw = mw.reshape(NB * Ho, 2, Wo, C)                    # pair rows (leading-dim split)
    return jnp.maximum(mw[:, 0], mw[:, 1]).reshape(NB, Ho, Wo, C)


def _store_halo(xp_ref, pooled, NB, Ho, Wo, C):
    """Write pooled (NB, Ho, Wo, C) into the interior of xp_ref (NB, Ho+4, Wo+4, C).
    Only the 2-wide halo frame is zeroed (interior is fully overwritten)."""
    ztb = jnp.zeros((NB, PAD, Wo + 2 * PAD, C), jnp.float32)
    xp_ref[:, 0:PAD, :, :] = ztb
    xp_ref[:, PAD + Ho:2 * PAD + Ho, :, :] = ztb
    zlr = jnp.zeros((NB, Ho, PAD, C), jnp.float32)
    xp_ref[:, PAD:PAD + Ho, 0:PAD, :] = zlr
    xp_ref[:, PAD:PAD + Ho, PAD + Wo:2 * PAD + Wo, :] = zlr
    xp_ref[:, PAD:PAD + Ho, PAD:PAD + Wo, :] = pooled


def _conv_direct(xp_ref, w_ref, b_ref, NB, H, W, Cin):
    """5x5 conv (pad 2) via direct shifted accumulation; bf16 operands, f32 accumulate.
    xp_ref: (NB, H+4, W+4, Cin) f32 (native channel width); w_ref: (25, Cin, 128) bf16;
    b_ref: (1, 128) f32.  Returns (NB*H*W, 128) f32."""
    M = NB * H * W
    acc = jnp.broadcast_to(b_ref[...], (M, C_LANE)).astype(jnp.float32)
    for kh in range(KSIZE):
        for kw in range(KSIZE):
            tap = kh * KSIZE + kw
            piece = xp_ref[:, kh:kh + H, kw:kw + W, :].reshape(M, Cin)
            acc = acc + jnp.dot(piece.astype(jnp.bfloat16), w_ref[tap],
                                preferred_element_type=jnp.float32)
    return acc


def _encoder_kernel(p1_ref, w1_ref, b1_ref, w2_ref, b2_ref, w3_ref, b3_ref,
                    w4_ref, b4_ref, fcw_ref, fcb_ref, o_ref,
                    y1_ref, xp2_ref, y2_ref, xp3_ref, y3_ref, xp4_ref, y4_ref,
                    *, NB, H, W):
    C1, C2, C3, C4 = 16, 32, 64, 128           # real output channels per conv layer
    H1, W1 = H, W
    H2, W2 = H1 // 2, W1 // 2
    H3, W3 = H2 // 2, W2 // 2
    H4, W4 = H3 // 2, W3 // 2

    # ---- layer 1: prebuilt im2col patches (K = 25*3 padded to 128) -> ONE bf16 matmul
    M1 = NB * H1 * W1
    acc = jnp.dot(p1_ref[...].reshape(M1, p1_ref.shape[-1]), w1_ref[...],
                  preferred_element_type=jnp.float32) + b1_ref[...]
    pooled = _relu_pool(acc, y1_ref, NB, H1, W1, C1)            # (NB, H2, W2, 16)
    _store_halo(xp2_ref, pooled, NB, H2, W2, C1)

    # ---- layer 2: 16 -> 32, direct shifted bf16 accumulation (native Cin=16)
    acc = _conv_direct(xp2_ref, w2_ref, b2_ref, NB, H2, W2, C1)
    pooled = _relu_pool(acc, y2_ref, NB, H2, W2, C2)            # (NB, H3, W3, 32)
    _store_halo(xp3_ref, pooled, NB, H3, W3, C2)

    # ---- layer 3: 32 -> 64, direct (tiny M; im2col would be pure overhead)
    acc = _conv_direct(xp3_ref, w3_ref, b3_ref, NB, H3, W3, C2)
    pooled = _relu_pool(acc, y3_ref, NB, H3, W3, C3)            # (NB, H4, W4, 64)
    _store_halo(xp4_ref, pooled, NB, H4, W4, C3)

    # ---- layer 4: 64 -> 128, direct
    acc = _conv_direct(xp4_ref, w4_ref, b4_ref, NB, H4, W4, C3)
    pooled = _relu_pool(acc, y4_ref, NB, H4, W4, C4)            # (NB, H4/2, W4/2, 128)

    # ---- head: spatial mean + Linear(128, 3) in f32, 128-lane-dense output store
    Hf, Wf = H4 // 2, W4 // 2
    feat = jnp.mean(pooled.reshape(NB, Hf * Wf, C4), axis=1)    # (NB, 128)
    out = jnp.dot(feat, fcw_ref[...],
                  preferred_element_type=jnp.float32) + fcb_ref[...]
    o_ref[...] = out.reshape(1, NB, C_LANE)


# ---------------------------------------------------------------------------
# Weight packing / wrapper
# ---------------------------------------------------------------------------
def _pack_conv1_im2col(w, b, k_pad):
    """(5,5,3,16) HWIO -> (k_pad, 128) bf16 rows ordered (kh, kw, cin); bias -> (1,128) f32."""
    cin, cout = w.shape[2], w.shape[3]
    k_used = KSIZE * KSIZE * cin
    wp = jnp.zeros((k_pad, C_LANE), jnp.float32).at[:k_used, :cout].set(
        w.reshape(k_used, cout))
    bp = jnp.zeros((C_LANE,), jnp.float32).at[:cout].set(b)
    return wp.astype(jnp.bfloat16), bp.reshape(1, C_LANE)


def _pack_conv_direct(w, b):
    """(5,5,Cin,Cout) HWIO -> (25, Cin, 128) bf16 (cout zero-padded); bias -> (1,128) f32."""
    cin, cout = w.shape[2], w.shape[3]
    wp = jnp.zeros((KSIZE * KSIZE, cin, C_LANE), jnp.float32).at[:, :, :cout].set(
        w.reshape(KSIZE * KSIZE, cin, cout))
    bp = jnp.zeros((C_LANE,), jnp.float32).at[:cout].set(b)
    return wp.astype(jnp.bfloat16), bp.reshape(1, C_LANE)


def _pack_fc(w, b):
    """(128,3) -> (128,128) f32 zero-padded (head kept in f32); bias -> (1,128) f32."""
    din, dout = w.shape
    wp = jnp.zeros((C_LANE, C_LANE), jnp.float32).at[:din, :dout].set(w)
    bp = jnp.zeros((C_LANE,), jnp.float32).at[:dout].set(b)
    return wp, bp.reshape(1, C_LANE)


def _grid_splits(n):
    """Split the batch across the grid only on dual-TensorCore chips (v7x); on
    single-TC v5e/v6e fold the whole batch into the matmul M dimension instead."""
    try:
        kind = jax.devices()[0].device_kind.lower()
    except Exception:
        kind = ""
    if ("v7" in kind or "7x" in kind) and n >= 2 and n % 2 == 0:
        return 2
    return 1


@jax.jit
def encoder_forward(x_nchw, convs, fc_w, fc_b):
    N, cin, H, W = x_nchw.shape          # requires H, W divisible by 16
    (w1, b1), (w2, b2), (w3, b3), (w4, b4) = convs

    # NCHW -> NHWC f32, spatial pad (=2). Layer-1 im2col patches are built here (one
    # fused XLA op, ~128 KiB bf16) so the kernel's first conv is a single aligned matmul.
    x = jnp.transpose(x_nchw, (0, 2, 3, 1)).astype(jnp.float32)
    xp = jnp.pad(x, ((0, 0), (PAD, PAD), (PAD, PAD), (0, 0)))
    cols = [xp[:, kh:kh + H, kw:kw + W, :]
            for kh in range(KSIZE) for kw in range(KSIZE)]
    k_used = KSIZE * KSIZE * cin                        # 75
    K1 = 128                                            # pad K to one lane group
    patches1 = jnp.concatenate(cols, axis=-1).reshape(N, H * W, k_used)
    patches1 = jnp.pad(patches1, ((0, 0), (0, 0), (0, K1 - k_used))).astype(jnp.bfloat16)

    w1p, b1p = _pack_conv1_im2col(w1, b1, K1)
    w2p, b2p = _pack_conv_direct(w2, b2)
    w3p, b3p = _pack_conv_direct(w3, b3)
    w4p, b4p = _pack_conv_direct(w4, b4)
    fcwp, fcbp = _pack_fc(fc_w, fc_b)

    H1, W1 = H, W
    H2, W2 = H1 // 2, W1 // 2
    H3, W3 = H2 // 2, W2 // 2
    H4, W4 = H3 // 2, W3 // 2

    G = _grid_splits(N)                  # 2 on v7x (one image per TensorCore), else 1
    NB = N // G

    kernel = functools.partial(_encoder_kernel, NB=NB, H=H, W=W)
    bspec = pl.BlockSpec((1, C_LANE), lambda g: (0, 0))

    out = pl.pallas_call(
        kernel,
        out_shape=jax.ShapeDtypeStruct((G, NB, C_LANE), jnp.float32),
        grid=(G,),
        in_specs=[
            pl.BlockSpec((NB, H * W, K1), lambda g: (g, 0, 0)),                  # patches1
            pl.BlockSpec((K1, C_LANE), lambda g: (0, 0)), bspec,                 # w1, b1
            pl.BlockSpec((KSIZE * KSIZE, 16, C_LANE), lambda g: (0, 0, 0)), bspec,  # w2, b2
            pl.BlockSpec((KSIZE * KSIZE, 32, C_LANE), lambda g: (0, 0, 0)), bspec,  # w3, b3
            pl.BlockSpec((KSIZE * KSIZE, 64, C_LANE), lambda g: (0, 0, 0)), bspec,  # w4, b4
            pl.BlockSpec((C_LANE, C_LANE), lambda g: (0, 0)), bspec,             # fc w, b
        ],
        out_specs=pl.BlockSpec((1, NB, C_LANE), lambda g: (g, 0, 0)),
        scratch_shapes=[
            pltpu.VMEM((NB * H1, W1, 16), jnp.float32),                          # y1
            pltpu.VMEM((NB, H2 + 2 * PAD, W2 + 2 * PAD, 16), jnp.float32),       # xp2
            pltpu.VMEM((NB * H2, W2, 32), jnp.float32),                          # y2
            pltpu.VMEM((NB, H3 + 2 * PAD, W3 + 2 * PAD, 32), jnp.float32),       # xp3
            pltpu.VMEM((NB * H3, W3, 64), jnp.float32),                          # y3
            pltpu.VMEM((NB, H4 + 2 * PAD, W4 + 2 * PAD, 64), jnp.float32),       # xp4
            pltpu.VMEM((NB * H4, W4, 128), jnp.float32),                         # y4
        ],
        compiler_params=pltpu.CompilerParams(dimension_semantics=("parallel",)),
    )(patches1, w1p, b1p, w2p, b2p, w3p, b3p, w4p, b4p, fcwp, fcbp)
    return out.reshape(N, C_LANE)[:, :3]


# ---------------------------------------------------------------------------
# Params / reference
# ---------------------------------------------------------------------------
def init_params(key):
    """Deterministic PyTorch-default-style (uniform +-1/sqrt(fan_in)) init."""
    chans = [3, 16, 32, 64, 128]
    convs = []
    for i in range(4):
        key, k1, k2 = jax.random.split(key, 3)
        cin, cout = chans[i], chans[i + 1]
        bound = 1.0 / np.sqrt(cin * KSIZE * KSIZE)
        w = jax.random.uniform(k1, (KSIZE, KSIZE, cin, cout), jnp.float32, -bound, bound)  # HWIO
        b = jax.random.uniform(k2, (cout,), jnp.float32, -bound, bound)
        convs.append((w, b))
    key, k1, k2 = jax.random.split(key, 3)
    bound = 1.0 / np.sqrt(128)
    fc_w = jax.random.uniform(k1, (128, 3), jnp.float32, -bound, bound)  # (in, out) = W.T
    fc_b = jax.random.uniform(k2, (3,), jnp.float32, -bound, bound)
    return convs, fc_w, fc_b


def reference_forward(x_nchw, convs, fc_w, fc_b):
    """Pure-JAX reference mirroring the PyTorch forward."""
    x = jnp.transpose(x_nchw, (0, 2, 3, 1)).astype(jnp.float32)
    for w, b in convs:
        y = jax.lax.conv_general_dilated(
            x, w, window_strides=(1, 1), padding=((PAD, PAD), (PAD, PAD)),
            dimension_numbers=("NHWC", "HWIO", "NHWC"))
        y = jnp.maximum(y + b, 0.0)
        x = jax.lax.reduce_window(y, -jnp.inf, jax.lax.max,
                                  (1, 2, 2, 1), (1, 2, 2, 1), "VALID")
    feat = jnp.mean(x, axis=(1, 2))
    return feat @ fc_w + fc_b


if __name__ == "__main__":
    key = jax.random.PRNGKey(0)
    kx, kp = jax.random.split(key)
    # PyTorch forward implies NCHW input with 3 channels; 16x16 spatial -> 1x1 before mean.
    x = jax.random.normal(kx, (2, 3, 16, 16), jnp.float32)
    convs, fc_w, fc_b = init_params(kp)

    out = jax.block_until_ready(encoder_forward(x, convs, fc_w, fc_b))
    ref = jax.block_until_ready(reference_forward(x, convs, fc_w, fc_b))

    assert out.shape == (2, 3), out.shape
    # bf16 conv matmul operands with f32 accumulation (fc head kept in f32).
    np.testing.assert_allclose(np.asarray(out), np.asarray(ref), rtol=2e-2, atol=2e-2)
    print("KERNEL_OK")
</pallas_src>

<mosaic_0001>
module attributes {stable_mosaic.version = 11 : i64} {
  func.func @_encoder_kernel(%arg0: i32, %arg1: memref<2x256x128xbf16, #tpu.memory_space<vmem>>, %arg2: memref<128x128xbf16, #tpu.memory_space<vmem>>, %arg3: memref<1x128xf32, #tpu.memory_space<vmem>>, %arg4: memref<25x16x128xbf16, #tpu.memory_space<vmem>>, %arg5: memref<1x128xf32, #tpu.memory_space<vmem>>, %arg6: memref<25x32x128xbf16, #tpu.memory_space<vmem>>, %arg7: memref<1x128xf32, #tpu.memory_space<vmem>>, %arg8: memref<25x64x128xbf16, #tpu.memory_space<vmem>>, %arg9: memref<1x128xf32, #tpu.memory_space<vmem>>, %arg10: memref<128x128xf32, #tpu.memory_space<vmem>>, %arg11: memref<1x128xf32, #tpu.memory_space<vmem>>, %arg12: memref<1x2x128xf32, #tpu.memory_space<vmem>>, %arg13: memref<32x16x16xf32, #tpu.memory_space<vmem>>, %arg14: memref<2x12x12x16xf32, #tpu.memory_space<vmem>>, %arg15: memref<16x8x32xf32, #tpu.memory_space<vmem>>, %arg16: memref<2x8x8x32xf32, #tpu.memory_space<vmem>>, %arg17: memref<8x4x64xf32, #tpu.memory_space<vmem>>, %arg18: memref<2x6x6x64xf32, #tpu.memory_space<vmem>>, %arg19: memref<4x2x128xf32, #tpu.memory_space<vmem>>) attributes {dimension_semantics = [#tpu.dimension_semantics<parallel>], iteration_bounds = array<i64: 1>, scalar_prefetch = 0 : i64, scratch_operands = 7 : i64, tpu.core_type = #tpu.core_type<tc>, window_params = [{transform_indices = @transform_0, window_bounds = array<i64: 2, 256, 128>}, {pipeline_mode = #tpu.pipeline_mode<synchronous>, transform_indices = @transform_1, window_bounds = array<i64: 128, 128>}, {pipeline_mode = #tpu.pipeline_mode<synchronous>, transform_indices = @transform_2, window_bounds = array<i64: 1, 128>}, {pipeline_mode = #tpu.pipeline_mode<synchronous>, transform_indices = @transform_3, window_bounds = array<i64: 25, 16, 128>}, {pipeline_mode = #tpu.pipeline_mode<synchronous>, transform_indices = @transform_4, window_bounds = array<i64: 1, 128>}, {pipeline_mode = #tpu.pipeline_mode<synchronous>, transform_indices = @transform_5, window_bounds = array<i64: 25, 32, 128>}, {pipeline_mode = #tpu.pipeline_mode<synchronous>, transform_indices = @transform_6, window_bounds = array<i64: 1, 128>}, {pipeline_mode = #tpu.pipeline_mode<synchronous>, transform_indices = @transform_7, window_bounds = array<i64: 25, 64, 128>}, {pipeline_mode = #tpu.pipeline_mode<synchronous>, transform_indices = @transform_8, window_bounds = array<i64: 1, 128>}, {pipeline_mode = #tpu.pipeline_mode<synchronous>, transform_indices = @transform_9, window_bounds = array<i64: 128, 128>}, {pipeline_mode = #tpu.pipeline_mode<synchronous>, transform_indices = @transform_10, window_bounds = array<i64: 1, 128>}, {transform_indices = @transform_11, window_bounds = array<i64: 1, 2, 128>}]} {
    %c0 = arith.constant 0 : index
    %c0_0 = arith.constant 0 : index
    %c0_1 = arith.constant 0 : index
    %0 = vector.load %arg1[%c0, %c0_0, %c0_1] : memref<2x256x128xbf16, #tpu.memory_space<vmem>>, vector<2x256x128xbf16>
    %1 = vector.shape_cast %0 : vector<2x256x128xbf16> to vector<512x128xbf16>
    %c0_2 = arith.constant 0 : index
    %c0_3 = arith.constant 0 : index
    %2 = vector.load %arg2[%c0_2, %c0_3] : memref<128x128xbf16, #tpu.memory_space<vmem>>, vector<128x128xbf16>
    %cst = arith.constant dense<0.000000e+00> : vector<512x128xf32>
    %3 = tpu.matmul %1, %2, %cst {dimension_numbers = #tpu.dot_dimension_numbers<[1], [0], [0], [1], [0, 0, 1, 1], [], []>} : vector<512x128xbf16>, vector<128x128xbf16>, vector<512x128xf32> -> vector<512x128xf32>
    %c0_4 = arith.constant 0 : index
    %c0_5 = arith.constant 0 : index
    %4 = vector.load %arg3[%c0_4, %c0_5] : memref<1x128xf32, #tpu.memory_space<vmem>>, vector<1x128xf32>
    %5 = vector.broadcast %4 : vector<1x128xf32> to vector<512x128xf32>
    %6 = arith.addf %3, %5 : vector<512x128xf32>
    %7 = vector.extract_strided_slice %6 {offsets = [0, 0], sizes = [512, 16], strides = [1, 1]} : vector<512x128xf32> to vector<512x16xf32>
    %cst_6 = arith.constant 0.000000e+00 : f32
    %8 = vector.broadcast %cst_6 : f32 to vector<512x16xf32>
    %9 = arith.maximumf %7, %8 : vector<512x16xf32>
    %10 = vector.shape_cast %9 : vector<512x16xf32> to vector<32x16x16xf32>
    %c0_7 = arith.constant 0 : index
    %c0_8 = arith.constant 0 : index
    %c0_9 = arith.constant 0 : index
    %11 = vector.load %arg13[%c0_7, %c0_8, %c0_9] : memref<32x16x16xf32, #tpu.memory_space<vmem>>, vector<32x16x16xf32>
    tpu.vector_store %arg13[%c0_7, %c0_8, %c0_9], %10 {strides = array<i32>} : memref<32x16x16xf32, #tpu.memory_space<vmem>>, vector<32x16x16xf32>,
    %c0_10 = arith.constant 0 : index
    %c0_11 = arith.constant 0 : index
    %c0_12 = arith.constant 0 : index
    %12 = tpu.strided_load %arg13[%c0_10, %c0_11, %c0_12] {strides = array<i32: 1, 2, 1>} : memref<32x16x16xf32, #tpu.memory_space<vmem>>, vector<32x8x16xf32>
    %c0_13 = arith.constant 0 : index
    %c1 = arith.constant 1 : index
    %c0_14 = arith.constant 0 : index
    %13 = tpu.strided_load %arg13[%c0_13, %c1, %c0_14] {strides = array<i32: 1, 2, 1>} : memref<32x16x16xf32, #tpu.memory_space<vmem>>, vector<32x8x16xf32>
    %14 = arith.maximumf %12, %13 : vector<32x8x16xf32>
    %15 = vector.shape_cast %14 : vector<32x8x16xf32> to vector<16x2x8x16xf32>
    %16 = vector.extract_strided_slice %15 {offsets = [0, 0, 0, 0], sizes = [16, 1, 8, 16], strides = [1, 1, 1, 1]} : vector<16x2x8x16xf32> to vector<16x1x8x16xf32>
    %17 = vector.shape_cast %16 : vector<16x1x8x16xf32> to vector<16x8x16xf32>
    %18 = vector.extract_strided_slice %15 {offsets = [0, 1, 0, 0], sizes = [16, 1, 8, 16], strides = [1, 1, 1, 1]} : vector<16x2x8x16xf32> to vector<16x1x8x16xf32>
    %19 = vector.shape_cast %18 : vector<16x1x8x16xf32> to vector<16x8x16xf32>
    %20 = arith.maximumf %17, %19 : vector<16x8x16xf32>
    %21 = vector.shape_cast %20 : vector<16x8x16xf32> to vector<2x8x8x16xf32>
    %cst_15 = arith.constant 0.000000e+00 : f32
    %22 = vector.broadcast %cst_15 : f32 to vector<2x2x12x16xf32>
    %c0_16 = arith.constant 0 : index
    %c0_17 = arith.constant 0 : index
    %c0_18 = arith.constant 0 : index
    %c0_19 = arith.constant 0 : index
    %23 = vector.load %arg14[%c0_16, %c0_17, %c0_18, %c0_19] : memref<2x12x12x16xf32, #tpu.memory_space<vmem>>, vector<2x2x12x16xf32>
    tpu.vector_store %arg14[%c0_16, %c0_17, %c0_18, %c0_19], %22 {strides = array<i32>} : memref<2x12x12x16xf32, #tpu.memory_space<vmem>>, vector<2x2x12x16xf32>,
    %c0_20 = arith.constant 0 : index
    %c10 = arith.constant 10 : index
    %c0_21 = arith.constant 0 : index
    %c0_22 = arith.constant 0 : index
    %24 = vector.load %arg14[%c0_20, %c10, %c0_21, %c0_22] : memref<2x12x12x16xf32, #tpu.memory_space<vmem>>, vector<2x2x12x16xf32>
    tpu.vector_store %arg14[%c0_20, %c10, %c0_21, %c0_22], %22 {strides = array<i32>} : memref<2x12x12x16xf32, #tpu.memory_space<vmem>>, vector<2x2x12x16xf32>,
    %cst_23 = arith.constant 0.000000e+00 : f32
    %25 = vector.broadcast %cst_23 : f32 to vector<2x8x2x16xf32>
    %c0_24 = arith.constant 0 : index
    %c2 = arith.constant 2 : index
    %c0_25 = arith.constant 0 : index
    %c0_26 = arith.constant 0 : index
    %26 = vector.load %arg14[%c0_24, %c2, %c0_25, %c0_26] : memref<2x12x12x16xf32, #tpu.memory_space<vmem>>, vector<2x8x2x16xf32>
    tpu.vector_store %arg14[%c0_24, %c2, %c0_25, %c0_26], %25 {strides = array<i32>} : memref<2x12x12x16xf32, #tpu.memory_space<vmem>>, vector<2x8x2x16xf32>,
    %c0_27 = arith.constant 0 : index
    %c2_28 = arith.constant 2 : index
    %c10_29 = arith.constant 10 : index
    %c0_30 = arith.constant 0 : index
    %27 = vector.load %arg14[%c0_27, %c2_28, %c10_29, %c0_30] : memref<2x12x12x16xf32, #tpu.memory_space<vmem>>, vector<2x8x2x16xf32>
    tpu.vector_store %arg14[%c0_27, %c2_28, %c10_29, %c0_30], %25 {strides = array<i32>} : memref<2x12x12x16xf32, #tpu.memory_space<vmem>>, vector<2x8x2x16xf32>,
    %c0_31 = arith.constant 0 : index
    %c2_32 = arith.constant 2 : index
    %c2_33 = arith.constant 2 : index
    %c0_34 = arith.constant 0 : index
    %28 = vector.load %arg14[%c0_31, %c2_32, %c2_33, %c0_34] : memref<2x12x12x16xf32, #tpu.memory_space<vmem>>, vector<2x8x8x16xf32>
    tpu.vector_store %arg14[%c0_31, %c2_32, %c2_33, %c0_34], %21 {strides = array<i32>} : memref<2x12x12x16xf32, #tpu.memory_space<vmem>>, vector<2x8x8x16xf32>,
    %c0_35 = arith.constant 0 : index
    %c0_36 = arith.constant 0 : index
    %29 = vector.load %arg5[%c0_35, %c0_36] : memref<1x128xf32, #tpu.memory_space<vmem>>, vector<1x128xf32>
    %30 = vector.shape_cast %29 : vector<1x128xf32> to vector<1x128xf32>
    %31 = vector.broadcast %30 : vector<1x128xf32> to vector<128x128xf32>
    %c0_37 = arith.constant 0 : index
    %c0_38 = arith.constant 0 : index
    %c0_39 = arith.constant 0 : index
    %c0_40 = arith.constant 0 : index
    %32 = vector.load %arg14[%c0_37, %c0_38, %c0_39, %c0_40] : memref<2x12x12x16xf32, #tpu.memory_space<vmem>>, vector<2x8x8x16xf32>
    %33 = vector.shape_cast %32 : vector<2x8x8x16xf32> to vector<128x16xf32>
    %34 = arith.truncf %33 : vector<128x16xf32> to vector<128x16xbf16>
    %c0_41 = arith.constant 0 : index
    %c0_42 = arith.constant 0 : index
    %c0_43 = arith.constant 0 : index
    %35 = vector.load %arg4[%c0_41, %c0_42, %c0_43] : memref<25x16x128xbf16, #tpu.memory_space<vmem>>, vector<1x16x128xbf16>
    %36 = vector.shape_cast %35 : vector<1x16x128xbf16> to vector<16x128xbf16>
    %cst_44 = arith.constant dense<0.000000e+00> : vector<128x128xf32>
    %37 = tpu.matmul %34, %36, %cst_44 {dimension_numbers = #tpu.dot_dimension_numbers<[1], [0], [0], [1], [0, 0, 1, 1], [], []>} : vector<128x16xbf16>, vector<16x128xbf16>, vector<128x128xf32> -> vector<128x128xf32>
    %38 = arith.addf %31, %37 : vector<128x128xf32>
    %c0_45 = arith.constant 0 : index
    %c0_46 = arith.constant 0 : index
    %c1_47 = arith.constant 1 : index
    %c0_48 = arith.constant 0 : index
    %39 = vector.load %arg14[%c0_45, %c0_46, %c1_47, %c0_48] : memref<2x12x12x16xf32, #tpu.memory_space<vmem>>, vector<2x8x8x16xf32>
    %40 = vector.shape_cast %39 : vector<2x8x8x16xf32> to vector<128x16xf32>
    %41 = arith.truncf %40 : vector<128x16xf32> to vector<128x16xbf16>
    %c1_49 = arith.constant 1 : index
    %c0_50 = arith.constant 0 : index
    %c0_51 = arith.constant 0 : index
    %42 = vector.load %arg4[%c1_49, %c0_50, %c0_51] : memref<25x16x128xbf16, #tpu.memory_space<vmem>>, vector<1x16x128xbf16>
    %43 = vector.shape_cast %42 : vector<1x16x128xbf16> to vector<16x128xbf16>
    %cst_52 = arith.constant dense<0.000000e+00> : vector<128x128xf32>
    %44 = tpu.matmul %41, %43, %cst_52 {dimension_numbers = #tpu.dot_dimension_numbers<[1], [0], [0], [1], [0, 0, 1, 1], [], []>} : vector<128x16xbf16>, vector<16x128xbf16>, vector<128x128xf32> -> vector<128x128xf32>
    %45 = arith.addf %38, %44 : vector<128x128xf32>
    %c0_53 = arith.constant 0 : index
    %c0_54 = arith.constant 0 : index
    %c2_55 = arith.constant 2 : index
    %c0_56 = arith.constant 0 : index
    %46 = vector.load %arg14[%c0_53, %c0_54, %c2_55, %c0_56] : memref<2x12x12x16xf32, #tpu.memory_space<vmem>>, vector<2x8x8x16xf32>
    %47 = vector.shape_cast %46 : vector<2x8x8x16xf32> to vector<128x16xf32>
    %48 = arith.truncf %47 : vector<128x16xf32> to vector<128x16xbf16>
    %c2_57 = arith.constant 2 : index
    %c0_58 = arith.constant 0 : index
    %c0_59 = arith.constant 0 : index
    %49 = vector.load %arg4[%c2_57, %c0_58, %c0_59] : memref<25x16x128xbf16, #tpu.memory_space<vmem>>, vector<1x16x128xbf16>
    %50 = vector.shape_cast %49 : vector<1x16x128xbf16> to vector<16x128xbf16>
    %cst_60 = arith.constant dense<0.000000e+00> : vector<128x128xf32>
    %51 = tpu.matmul %48, %50, %cst_60 {dimension_numbers = #tpu.dot_dimension_numbers<[1], [0], [0], [1], [0, 0, 1, 1], [], []>} : vector<128x16xbf16>, vector<16x128xbf16>, vector<128x128xf32> -> vector<128x128xf32>
    %52 = arith.addf %45, %51 : vector<128x128xf32>
    %c0_61 = arith.constant 0 : index
    %c0_62 = arith.constant 0 : index
    %c3 = arith.constant 3 : index
    %c0_63 = arith.constant 0 : index
    %53 = vector.load %arg14[%c0_61, %c0_62, %c3, %c0_63] : memref<2x12x12x16xf32, #tpu.memory_space<vmem>>, vector<2x8x8x16xf32>
    %54 = vector.shape_cast %53 : vector<2x8x8x16xf32> to vector<128x16xf32>
    %55 = arith.truncf %54 : vector<128x16xf32> to vector<128x16xbf16>
    %c3_64 = arith.constant 3 : index
    %c0_65 = arith.constant 0 : index
    %c0_66 = arith.constant 0 : index
    %56 = vector.load %arg4[%c3_64, %c0_65, %c0_66] : memref<25x16x128xbf16, #tpu.memory_space<vmem>>, vector<1x16x128xbf16>
    %57 = vector.shape_cast %56 : vector<1x16x128xbf16> to vector<16x128xbf16>
    %cst_67 = arith.constant dense<0.000000e+00> : vector<128x128xf32>
    %58 = tpu.matmul %55, %57, %cst_67 {dimension_numbers = #tpu.dot_dimension_numbers<[1], [0], [0], [1], [0, 0, 1, 1], [], []>} : vector<128x16xbf16>, vector<16x128xbf16>, vector<128x128xf32> -> vector<128x128xf32>
    %59 = arith.addf %52, %58 : vector<128x128xf32>
    %c0_68 = arith.constant 0 : index
    %c0_69 = arith.constant 0 : index
    %c4 = arith.constant 4 : index
    %c0_70 = arith.constant 0 : index
    %60 = vector.load %arg14[%c0_68, %c0_69, %c4, %c0_70] : memref<2x12x12x16xf32, #tpu.memory_space<vmem>>, vector<2x8x8x16xf32>
    %61 = vector.shape_cast %60 : vector<2x8x8x16xf32> to vector<128x16xf32>
    %62 = arith.truncf %61 : vector<128x16xf32> to vector<128x16xbf16>
    %c4_71 = arith.constant 4 : index
    %c0_72 = arith.constant 0 : index
    %c0_73 = arith.constant 0 : index
    %63 = vector.load %arg4[%c4_71, %c0_72, %c0_73] : memref<25x16x128xbf16, #tpu.memory_space<vmem>>, vector<1x16x128xbf16>
    %64 = vector.shape_cast %63 : vector<1x16x128xbf16> to vector<16x128xbf16>
    %cst_74 = arith.constant dense<0.000000e+00> : vector<128x128xf32>
    %65 = tpu.matmul %62, %64, %cst_74 {dimension_numbers = #tpu.dot_dimension_numbers<[1], [0], [0], [1], [0, 0, 1, 1], [], []>} : vector<128x16xbf16>, vector<16x128xbf16>, vector<128x128xf32> -> vector<128x128xf32>
    %66 = arith.addf %59, %65 : vector<128x128xf32>
    %c0_75 = arith.constant 0 : index
    %c1_76 = arith.constant 1 : index
    %c0_77 = arith.constant 0 : index
    %c0_78 = arith.constant 0 : index
    %67 = vector.load %arg14[%c0_75, %c1_76, %c0_77, %c0_78] : memref<2x12x12x16xf32, #tpu.memory_space<vmem>>, vector<2x8x8x16xf32>
    %68 = vector.shape_cast %67 : vector<2x8x8x16xf32> to vector<128x16xf32>
    %69 = arith.truncf %68 : vector<128x16xf32> to vector<128x16xbf16>
    %c5 = arith.constant 5 : index
    %c0_79 = arith.constant 0 : index
    %c0_80 = arith.constant 0 : index
    %70 = vector.load %arg4[%c5, %c0_79, %c0_80] : memref<25x16x128xbf16, #tpu.memory_space<vmem>>, vector<1x16x128xbf16>
    %71 = vector.shape_cast %70 : vector<1x16x128xbf16> to vector<16x128xbf16>
    %cst_81 = arith.constant dense<0.000000e+00> : vector<128x128xf32>
    %72 = tpu.matmul %69, %71, %cst_81 {dimension_numbers = #tpu.dot_dimension_numbers<[1], [0], [0], [1], [0, 0, 1, 1], [], []>} : vector<128x16xbf16>, vector<16x128xbf16>, vector<128x128xf32> -> vector<128x128xf32>
    %73 = arith.addf %66, %72 : vector<128x128xf32>
    %c0_82 = arith.constant 0 : index
    %c1_83 = arith.constant 1 : index
    %c1_84 = arith.constant 1 : index
    %c0_85 = arith.constant 0 : index
    %74 = vector.load %arg14[%c0_82, %c1_83, %c1_84, %c0_85] : memref<2x12x12x16xf32, #tpu.memory_space<vmem>>, vector<2x8x8x16xf32>
    %75 = vector.shape_cast %74 : vector<2x8x8x16xf32> to vector<128x16xf32>
    %76 = arith.truncf %75 : vector<128x16xf32> to vector<128x16xbf16>
    %c6 = arith.constant 6 : index
    %c0_86 = arith.constant 0 : index
    %c0_87 = arith.constant 0 : index
    %77 = vector.load %arg4[%c6, %c0_86, %c0_87] : memref<25x16x128xbf16, #tpu.memory_space<vmem>>, vector<1x16x128xbf16>
    %78 = vector.shape_cast %77 : vector<1x16x128xbf16> to vector<16x128xbf16>
    %cst_88 = arith.constant dense<0.000000e+00> : vector<128x128xf32>
    %79 = tpu.matmul %76, %78, %cst_88 {dimension_numbers = #tpu.dot_dimension_numbers<[1], [0], [0], [1], [0, 0, 1, 1], [], []>} : vector<128x16xbf16>, vector<16x128xbf16>, vector<128x128xf32> -> vector<128x128xf32>
    %80 = arith.addf %73, %79 : vector<128x128xf32>
    %c0_89 = arith.constant 0 : index
    %c1_90 = arith.constant 1 : index
    %c2_91 = arith.constant 2 : index
    %c0_92 = arith.constant 0 : index
    %81 = vector.load %arg14[%c0_89, %c1_90, %c2_91, %c0_92] : memref<2x12x12x16xf32, #tpu.memory_space<vmem>>, vector<2x8x8x16xf32>
    %82 = vector.shape_cast %81 : vector<2x8x8x16xf32> to vector<128x16xf32>
    %83 = arith.truncf %82 : vector<128x16xf32> to vector<128x16xbf16>
    %c7 = arith.constant 7 : index
    %c0_93 = arith.constant 0 : index
    %c0_94 = arith.constant 0 : index
    %84 = vector.load %arg4[%c7, %c0_93, %c0_94] : memref<25x16x128xbf16, #tpu.memory_space<vmem>>, vector<1x16x128xbf16>
    %85 = vector.shape_cast %84 : vector<1x16x128xbf16> to vector<16x128xbf16>
    %cst_95 = arith.constant dense<0.000000e+00> : vector<128x128xf32>
    %86 = tpu.matmul %83, %85, %cst_95 {dimension_numbers = #tpu.dot_dimension_numbers<[1], [0], [0], [1], [0, 0, 1, 1], [], []>} : vector<128x16xbf16>, vector<16x128xbf16>, vector<128x128xf32> -> vector<128x128xf32>
    %87 = arith.addf %80, %86 : vector<128x128xf32>
    %c0_96 = arith.constant 0 : index
    %c1_97 = arith.constant 1 : index
    %c3_98 = arith.constant 3 : index
    %c0_99 = arith.constant 0 : index
    %88 = vector.load %arg14[%c0_96, %c1_97, %c3_98, %c0_99] : memref<2x12x12x16xf32, #tpu.memory_space<vmem>>, vector<2x8x8x16xf32>
    %89 = vector.shape_cast %88 : vector<2x8x8x16xf32> to vector<128x16xf32>
    %90 = arith.truncf %89 : vector<128x16xf32> to vector<128x16xbf16>
    %c8 = arith.constant 8 : index
    %c0_100 = arith.constant 0 : index
    %c0_101 = arith.constant 0 : index
    %91 = vector.load %arg4[%c8, %c0_100, %c0_101] : memref<25x16x128xbf16, #tpu.memory_space<vmem>>, vector<1x16x128xbf16>
    %92 = vector.shape_cast %91 : vector<1x16x128xbf16> to vector<16x128xbf16>
    %cst_102 = arith.constant dense<0.000000e+00> : vector<128x128xf32>
    %93 = tpu.matmul %90, %92, %cst_102 {dimension_numbers = #tpu.dot_dimension_numbers<[1], [0], [0], [1], [0, 0, 1, 1], [], []>} : vector<128x16xbf16>, vector<16x128xbf16>, vector<128x128xf32> -> vector<128x128xf32>
    %94 = arith.addf %87, %93 : vector<128x128xf32>
    %c0_103 = arith.constant 0 : index
    %c1_104 = arith.constant 1 : index
    %c4_105 = arith.constant 4 : index
    %c0_106 = arith.constant 0 : index
    %95 = vector.load %arg14[%c0_103, %c1_104, %c4_105, %c0_106] : memref<2x12x12x16xf32, #tpu.memory_space<vmem>>, vector<2x8x8x16xf32>
    %96 = vector.shape_cast %95 : vector<2x8x8x16xf32> to vector<128x16xf32>
    %97 = arith.truncf %96 : vector<128x16xf32> to vector<128x16xbf16>
    %c9 = arith.constant 9 : index
    %c0_107 = arith.constant 0 : index
    %c0_108 = arith.constant 0 : index
    %98 = vector.load %arg4[%c9, %c0_107, %c0_108] : memref<25x16x128xbf16, #tpu.memory_space<vmem>>, vector<1x16x128xbf16>
    %99 = vector.shape_cast %98 : vector<1x16x128xbf16> to vector<16x128xbf16>
    %cst_109 = arith.constant dense<0.000000e+00> : vector<128x128xf32>
    %100 = tpu.matmul %97, %99, %cst_109 {dimension_numbers = #tpu.dot_dimension_numbers<[1], [0], [0], [1], [0, 0, 1, 1], [], []>} : vector<128x16xbf16>, vector<16x128xbf16>, vector<128x128xf32> -> vector<128x128xf32>
    %101 = arith.addf %94, %100 : vector<128x128xf32>
    %c0_110 = arith.constant 0 : index
    %c2_111 = arith.constant 2 : index
    %c0_112 = arith.constant 0 : index
    %c0_113 = arith.constant 0 : index
    %102 = vector.load %arg14[%c0_110, %c2_111, %c0_112, %c0_113] : memref<2x12x12x16xf32, #tpu.memory_space<vmem>>, vector<2x8x8x16xf32>
    %103 = vector.shape_cast %102 : vector<2x8x8x16xf32> to vector<128x16xf32>
    %104 = arith.truncf %103 : vector<128x16xf32> to vector<128x16xbf16>
    %c10_114 = arith.constant 10 : index
    %c0_115 = arith.constant 0 : index
    %c0_116 = arith.constant 0 : index
    %105 = vector.load %arg4[%c10_114, %c0_115, %c0_116] : memref<25x16x128xbf16, #tpu.memory_space<vmem>>, vector<1x16x128xbf16>
    %106 = vector.shape_cast %105 : vector<1x16x128xbf16> to vector<16x128xbf16>
    %cst_117 = arith.constant dense<0.000000e+00> : vector<128x128xf32>
    %107 = tpu.matmul %104, %106, %cst_117 {dimension_numbers = #tpu.dot_dimension_numbers<[1], [0], [0], [1], [0, 0, 1, 1], [], []>} : vector<128x16xbf16>, vector<16x128xbf16>, vector<128x128xf32> -> vector<128x128xf32>
    %108 = arith.addf %101, %107 : vector<128x128xf32>
    %c0_118 = arith.constant 0 : index
    %c2_119 = arith.constant 2 : index
    %c1_120 = arith.constant 1 : index
    %c0_121 = arith.constant 0 : index
    %109 = vector.load %arg14[%c0_118, %c2_119, %c1_120, %c0_121] : memref<2x12x12x16xf32, #tpu.memory_space<vmem>>, vector<2x8x8x16xf32>
    %110 = vector.shape_cast %109 : vector<2x8x8x16xf32> to vector<128x16xf32>
    %111 = arith.truncf %110 : vector<128x16xf32> to vector<128x16xbf16>
    %c11 = arith.constant 11 : index
    %c0_122 = arith.constant 0 : index
    %c0_123 = arith.constant 0 : index
    %112 = vector.load %arg4[%c11, %c0_122, %c0_123] : memref<25x16x128xbf16, #tpu.memory_space<vmem>>, vector<1x16x128xbf16>
    %113 = vector.shape_cast %112 : vector<1x16x128xbf16> to vector<16x128xbf16>
    %cst_124 = arith.constant dense<0.000000e+00> : vector<128x128xf32>
    %114 = tpu.matmul %111, %113, %cst_124 {dimension_numbers = #tpu.dot_dimension_numbers<[1], [0], [0], [1], [0, 0, 1, 1], [], []>} : vector<128x16xbf16>, vector<16x128xbf16>, vector<128x128xf32> -> vector<128x128xf32>
    %115 = arith.addf %108, %114 : vector<128x128xf32>
    %c0_125 = arith.constant 0 : index
    %c2_126 = arith.constant 2 : index
    %c2_127 = arith.constant 2 : index
    %c0_128 = arith.constant 0 : index
    %116 = vector.load %arg14[%c0_125, %c2_126, %c2_127, %c0_128] : memref<2x12x12x16xf32, #tpu.memory_space<vmem>>, vector<2x8x8x16xf32>
    %117 = vector.shape_cast %116 : vector<2x8x8x16xf32> to vector<128x16xf32>
    %118 = arith.truncf %117 : vector<128x16xf32> to vector<128x16xbf16>
    %c12 = arith.constant 12 : index
    %c0_129 = arith.constant 0 : index
    %c0_130 = arith.constant 0 : index
    %119 = vector.load %arg4[%c12, %c0_129, %c0_130] : memref<25x16x128xbf16, #tpu.memory_space<vmem>>, vector<1x16x128xbf16>
    %120 = vector.shape_cast %119 : vector<1x16x128xbf16> to vector<16x128xbf16>
    %cst_131 = arith.constant dense<0.000000e+00> : vector<128x128xf32>
    %121 = tpu.matmul %118, %120, %cst_131 {dimension_numbers = #tpu.dot_dimension_numbers<[1], [0], [0], [1], [0, 0, 1, 1], [], []>} : vector<128x16xbf16>, vector<16x128xbf16>, vector<128x128xf32> -> vector<128x128xf32>
    %122 = arith.addf %115, %121 : vector<128x128xf32>
    %c0_132 = arith.constant 0 : index
    %c2_133 = arith.constant 2 : index
    %c3_134 = arith.constant 3 : index
    %c0_135 = arith.constant 0 : index
    %123 = vector.load %arg14[%c0_132, %c2_133, %c3_134, %c0_135] : memref<2x12x12x16xf32, #tpu.memory_space<vmem>>, vector<2x8x8x16xf32>
    %124 = vector.shape_cast %123 : vector<2x8x8x16xf32> to vector<128x16xf32>
    %125 = arith.truncf %124 : vector<128x16xf32> to vector<128x16xbf16>
    %c13 = arith.constant 13 : index
    %c0_136 = arith.constant 0 : index
    %c0_137 = arith.constant 0 : index
    %126 = vector.load %arg4[%c13, %c0_136, %c0_137] : memref<25x16x128xbf16, #tpu.memory_space<vmem>>, vector<1x16x128xbf16>
    %127 = vector.shape_cast %126 : vector<1x16x128xbf16> to vector<16x128xbf16>
    %cst_138 = arith.constant dense<0.000000e+00> : vector<128x128xf32>
    %128 = tpu.matmul %125, %127, %cst_138 {dimension_numbers = #tpu.dot_dimension_numbers<[1], [0], [0], [1], [0, 0, 1, 1], [], []>} : vector<128x16xbf16>, vector<16x128xbf16>, vector<128x128xf32> -> vector<128x128xf32>
    %129 = arith.addf %122, %128 : vector<128x128xf32>
    %c0_139 = arith.constant 0 : index
    %c2_140 = arith.constant 2 : index
    %c4_141 = arith.constant 4 : index
    %c0_142 = arith.constant 0 : index
    %130 = vector.load %arg14[%c0_139, %c2_140, %c4_141, %c0_142] : memref<2x12x12x16xf32, #tpu.memory_space<vmem>>, vector<2x8x8x16xf32>
    %131 = vector.shape_cast %130 : vector<2x8x8x16xf32> to vector<128x16xf32>
    %132 = arith.truncf %131 : vector<128x16xf32> to vector<128x16xbf16>
    %c14 = arith.constant 14 : index
    %c0_143 = arith.constant 0 : index
    %c0_144 = arith.constant 0 : index
    %133 = vector.load %arg4[%c14, %c0_143, %c0_144] : memref<25x16x128xbf16, #tpu.memory_space<vmem>>, vector<1x16x128xbf16>
    %134 = vector.shape_cast %133 : vector<1x16x128xbf16> to vector<16x128xbf16>
    %cst_145 = arith.constant dense<0.000000e+00> : vector<128x128xf32>
    %135 = tpu.matmul %132, %134, %cst_145 {dimension_numbers = #tpu.dot_dimension_numbers<[1], [0], [0], [1], [0, 0, 1, 1], [], []>} : vector<128x16xbf16>, vector<16x128xbf16>, vector<128x128xf32> -> vector<128x128xf32>
    %136 = arith.addf %129, %135 : vector<128x128xf32>
    %c0_146 = arith.constant 0 : index
    %c3_147 = arith.constant 3 : index
    %c0_148 = arith.constant 0 : index
    %c0_149 = arith.constant 0 : index
    %137 = vector.load %arg14[%c0_146, %c3_147, %c0_148, %c0_149] : memref<2x12x12x16xf32, #tpu.memory_space<vmem>>, vector<2x8x8x16xf32>
    %138 = vector.shape_cast %137 : vector<2x8x8x16xf32> to vector<128x16xf32>
    %139 = arith.truncf %138 : vector<128x16xf32> to vector<128x16xbf16>
    %c15 = arith.constant 15 : index
    %c0_150 = arith.constant 0 : index
    %c0_151 = arith.constant 0 : index
    %140 = vector.load %arg4[%c15, %c0_150, %c0_151] : memref<25x16x128xbf16, #tpu.memory_space<vmem>>, vector<1x16x128xbf16>
    %141 = vector.shape_cast %140 : vector<1x16x128xbf16> to vector<16x128xbf16>
    %cst_152 = arith.constant dense<0.000000e+00> : vector<128x128xf32>
    %142 = tpu.matmul %139, %141, %cst_152 {dimension_numbers = #tpu.dot_dimension_numbers<[1], [0], [0], [1], [0, 0, 1, 1], [], []>} : vector<128x16xbf16>, vector<16x128xbf16>, vector<128x128xf32> -> vector<128x128xf32>
    %143 = arith.addf %136, %142 : vector<128x128xf32>
    %c0_153 = arith.constant 0 : index
    %c3_154 = arith.constant 3 : index
    %c1_155 = arith.constant 1 : index
    %c0_156 = arith.constant 0 : index
    %144 = vector.load %arg14[%c0_153, %c3_154, %c1_155, %c0_156] : memref<2x12x12x16xf32, #tpu.memory_space<vmem>>, vector<2x8x8x16xf32>
    %145 = vector.shape_cast %144 : vector<2x8x8x16xf32> to vector<128x16xf32>
    %146 = arith.truncf %145 : vector<128x16xf32> to vector<128x16xbf16>
    %c16 = arith.constant 16 : index
    %c0_157 = arith.constant 0 : index
    %c0_158 = arith.constant 0 : index
    %147 = vector.load %arg4[%c16, %c0_157, %c0_158] : memref<25x16x128xbf16, #tpu.memory_space<vmem>>, vector<1x16x128xbf16>
    %148 = vector.shape_cast %147 : vector<1x16x128xbf16> to vector<16x128xbf16>
    %cst_159 = arith.constant dense<0.000000e+00> : vector<128x128xf32>
    %149 = tpu.matmul %146, %148, %cst_159 {dimension_numbers = #tpu.dot_dimension_numbers<[1], [0], [0], [1], [0, 0, 1, 1], [], []>} : vector<128x16xbf16>, vector<16x128xbf16>, vector<128x128xf32> -> vector<128x128xf32>
    %150 = arith.addf %143, %149 : vector<128x128xf32>
    %c0_160 = arith.constant 0 : index
    %c3_161 = arith.constant 3 : index
    %c2_162 = arith.constant 2 : index
    %c0_163 = arith.constant 0 : index
    %151 = vector.load %arg14[%c0_160, %c3_161, %c2_162, %c0_163] : memref<2x12x12x16xf32, #tpu.memory_space<vmem>>, vector<2x8x8x16xf32>
    %152 = vector.shape_cast %151 : vector<2x8x8x16xf32> to vector<128x16xf32>
    %153 = arith.truncf %152 : vector<128x16xf32> to vector<128x16xbf16>
    %c17 = arith.constant 17 : index
    %c0_164 = arith.constant 0 : index
    %c0_165 = arith.constant 0 : index
    %154 = vector.load %arg4[%c17, %c0_164, %c0_165] : memref<25x16x128xbf16, #tpu.memory_space<vmem>>, vector<1x16x128xbf16>
    %155 = vector.shape_cast %154 : vector<1x16x128xbf16> to vector<16x128xbf16>
    %cst_166 = arith.constant dense<0.000000e+00> : vector<128x128xf32>
    %156 = tpu.matmul %153, %155, %cst_166 {dimension_numbers = #tpu.dot_dimension_numbers<[1], [0], [0], [1], [0, 0, 1, 1], [], []>} : vector<128x16xbf16>, vector<16x128xbf16>, vector<128x128xf32> -> vector<128x128xf32>
    %157 = arith.addf %150, %156 : vector<128x128xf32>
    %c0_167 = arith.constant 0 : index
    %c3_168 = arith.constant 3 : index
    %c3_169 = arith.constant 3 : index
    %c0_170 = arith.constant 0 : index
    %158 = vector.load %arg14[%c0_167, %c3_168, %c3_169, %c0_170] : memref<2x12x12x16xf32, #tpu.memory_space<vmem>>, vector<2x8x8x16xf32>
    %159 = vector.shape_cast %158 : vector<2x8x8x16xf32> to vector<128x16xf32>
    %160 = arith.truncf %159 : vector<128x16xf32> to vector<128x16xbf16>
    %c18 = arith.constant 18 : index
    %c0_171 = arith.constant 0 : index
    %c0_172 = arith.constant 0 : index
    %161 = vector.load %arg4[%c18, %c0_171, %c0_172] : memref<25x16x128xbf16, #tpu.memory_space<vmem>>, vector<1x16x128xbf16>
    %162 = vector.shape_cast %161 : vector<1x16x128xbf16> to vector<16x128xbf16>
    %cst_173 = arith.constant dense<0.000000e+00> : vector<128x128xf32>
    %163 = tpu.matmul %160, %162, %cst_173 {dimension_numbers = #tpu.dot_dimension_numbers<[1], [0], [0], [1], [0, 0, 1, 1], [], []>} : vector<128x16xbf16>, vector<16x128xbf16>, vector<128x128xf32> -> vector<128x128xf32>
    %164 = arith.addf %157, %163 : vector<128x128xf32>
    %c0_174 = arith.constant 0 : index
    %c3_175 = arith.constant 3 : index
    %c4_176 = arith.constant 4 : index
    %c0_177 = arith.constant 0 : index
    %165 = vector.load %arg14[%c0_174, %c3_175, %c4_176, %c0_177] : memref<2x12x12x16xf32, #tpu.memory_space<vmem>>, vector<2x8x8x16xf32>
    %166 = vector.shape_cast %165 : vector<2x8x8x16xf32> to vector<128x16xf32>
    %167 = arith.truncf %166 : vector<128x16xf32> to vector<128x16xbf16>
    %c19 = arith.constant 19 : index
    %c0_178 = arith.constant 0 : index
    %c0_179 = arith.constant 0 : index
    %168 = vector.load %arg4[%c19, %c0_178, %c0_179] : memref<25x16x128xbf16, #tpu.memory_space<vmem>>, vector<1x16x128xbf16>
    %169 = vector.shape_cast %168 : vector<1x16x128xbf16> to vector<16x128xbf16>
    %cst_180 = arith.constant dense<0.000000e+00> : vector<128x128xf32>
    %170 = tpu.matmul %167, %169, %cst_180 {dimension_numbers = #tpu.dot_dimension_numbers<[1], [0], [0], [1], [0, 0, 1, 1], [], []>} : vector<128x16xbf16>, vector<16x128xbf16>, vector<128x128xf32> -> vector<128x128xf32>
    %171 = arith.addf %164, %170 : vector<128x128xf32>
    %c0_181 = arith.constant 0 : index
    %c4_182 = arith.constant 4 : index
    %c0_183 = arith.constant 0 : index
    %c0_184 = arith.constant 0 : index
    %172 = vector.load %arg14[%c0_181, %c4_182, %c0_183, %c0_184] : memref<2x12x12x16xf32, #tpu.memory_space<vmem>>, vector<2x8x8x16xf32>
    %173 = vector.shape_cast %172 : vector<2x8x8x16xf32> to vector<128x16xf32>
    %174 = arith.truncf %173 : vector<128x16xf32> to vector<128x16xbf16>
    %c20 = arith.constant 20 : index
    %c0_185 = arith.constant 0 : index
    %c0_186 = arith.constant 0 : index
    %175 = vector.load %arg4[%c20, %c0_185, %c0_186] : memref<25x16x128xbf16, #tpu.memory_space<vmem>>, vector<1x16x128xbf16>
    %176 = vector.shape_cast %175 : vector<1x16x128xbf16> to vector<16x128xbf16>
    %cst_187 = arith.constant dense<0.000000e+00> : vector<128x128xf32>
    %177 = tpu.matmul %174, %176, %cst_187 {dimension_numbers = #tpu.dot_dimension_numbers<[1], [0], [0], [1], [0, 0, 1, 1], [], []>} : vector<128x16xbf16>, vector<16x128xbf16>, vector<128x128xf32> -> vector<128x128xf32>
    %178 = arith.addf %171, %177 : vector<128x128xf32>
    %c0_188 = arith.constant 0 : index
    %c4_189 = arith.constant 4 : index
    %c1_190 = arith.constant 1 : index
    %c0_191 = arith.constant 0 : index
    %179 = vector.load %arg14[%c0_188, %c4_189, %c1_190, %c0_191] : memref<2x12x12x16xf32, #tpu.memory_space<vmem>>, vector<2x8x8x16xf32>
    %180 = vector.shape_cast %179 : vector<2x8x8x16xf32> to vector<128x16xf32>
    %181 = arith.truncf %180 : vector<128x16xf32> to vector<128x16xbf16>
    %c21 = arith.constant 21 : index
    %c0_192 = arith.constant 0 : index
    %c0_193 = arith.constant 0 : index
    %182 = vector.load %arg4[%c21, %c0_192, %c0_193] : memref<25x16x128xbf16, #tpu.memory_space<vmem>>, vector<1x16x128xbf16>
    %183 = vector.shape_cast %182 : vector<1x16x128xbf16> to vector<16x128xbf16>
    %cst_194 = arith.constant dense<0.000000e+00> : vector<128x128xf32>
    %184 = tpu.matmul %181, %183, %cst_194 {dimension_numbers = #tpu.dot_dimension_numbers<[1], [0], [0], [1], [0, 0, 1, 1], [], []>} : vector<128x16xbf16>, vector<16x128xbf16>, vector<128x128xf32> -> vector<128x128xf32>
    %185 = arith.addf %178, %184 : vector<128x128xf32>
    %c0_195 = arith.constant 0 : index
    %c4_196 = arith.constant 4 : index
    %c2_197 = arith.constant 2 : index
    %c0_198 = arith.constant 0 : index
    %186 = vector.load %arg14[%c0_195, %c4_196, %c2_197, %c0_198] : memref<2x12x12x16xf32, #tpu.memory_space<vmem>>, vector<2x8x8x16xf32>
    %187 = vector.shape_cast %186 : vector<2x8x8x16xf32> to vector<128x16xf32>
    %188 = arith.truncf %187 : vector<128x16xf32> to vector<128x16xbf16>
    %c22 = arith.constant 22 : index
    %c0_199 = arith.constant 0 : index
    %c0_200 = arith.constant 0 : index
    %189 = vector.load %arg4[%c22, %c0_199, %c0_200] : memref<25x16x128xbf16, #tpu.memory_space<vmem>>, vector<1x16x128xbf16>
    %190 = vector.shape_cast %189 : vector<1x16x128xbf16> to vector<16x128xbf16>
    %cst_201 = arith.constant dense<0.000000e+00> : vector<128x128xf32>
    %191 = tpu.matmul %188, %190, %cst_201 {dimension_numbers = #tpu.dot_dimension_numbers<[1], [0], [0], [1], [0, 0, 1, 1], [], []>} : vector<128x16xbf16>, vector<16x128xbf16>, vector<128x128xf32> -> vector<128x128xf32>
    %192 = arith.addf %185, %191 : vector<128x128xf32>
    %c0_202 = arith.constant 0 : index
    %c4_203 = arith.constant 4 : index
    %c3_204 = arith.constant 3 : index
    %c0_205 = arith.constant 0 : index
    %193 = vector.load %arg14[%c0_202, %c4_203, %c3_204, %c0_205] : memref<2x12x12x16xf32, #tpu.memory_space<vmem>>, vector<2x8x8x16xf32>
    %194 = vector.shape_cast %193 : vector<2x8x8x16xf32> to vector<128x16xf32>
    %195 = arith.truncf %194 : vector<128x16xf32> to vector<128x16xbf16>
    %c23 = arith.constant 23 : index
    %c0_206 = arith.constant 0 : index
    %c0_207 = arith.constant 0 : index
    %196 = vector.load %arg4[%c23, %c0_206, %c0_207] : memref<25x16x128xbf16, #tpu.memory_space<vmem>>, vector<1x16x128xbf16>
    %197 = vector.shape_cast %196 : vector<1x16x128xbf16> to vector<16x128xbf16>
    %cst_208 = arith.constant dense<0.000000e+00> : vector<128x128xf32>
    %198 = tpu.matmul %195, %197, %cst_208 {dimension_numbers = #tpu.dot_dimension_numbers<[1], [0], [0], [1], [0, 0, 1, 1], [], []>} : vector<128x16xbf16>, vector<16x128xbf16>, vector<128x128xf32> -> vector<128x128xf32>
    %199 = arith.addf %192, %198 : vector<128x128xf32>
    %c0_209 = arith.constant 0 : index
    %c4_210 = arith.constant 4 : index
    %c4_211 = arith.constant 4 : index
    %c0_212 = arith.constant 0 : index
    %200 = vector.load %arg14[%c0_209, %c4_210, %c4_211, %c0_212] : memref<2x12x12x16xf32, #tpu.memory_space<vmem>>, vector<2x8x8x16xf32>
    %201 = vector.shape_cast %200 : vector<2x8x8x16xf32> to vector<128x16xf32>
    %202 = arith.truncf %201 : vector<128x16xf32> to vector<128x16xbf16>
    %c24 = arith.constant 24 : index
    %c0_213 = arith.constant 0 : index
    %c0_214 = arith.constant 0 : index
    %203 = vector.load %arg4[%c24, %c0_213, %c0_214] : memref<25x16x128xbf16, #tpu.memory_space<vmem>>, vector<1x16x128xbf16>
    %204 = vector.shape_cast %203 : vector<1x16x128xbf16> to vector<16x128xbf16>
    %cst_215 = arith.constant dense<0.000000e+00> : vector<128x128xf32>
    %205 = tpu.matmul %202, %204, %cst_215 {dimension_numbers = #tpu.dot_dimension_numbers<[1], [0], [0], [1], [0, 0, 1, 1], [], []>} : vector<128x16xbf16>, vector<16x128xbf16>, vector<128x128xf32> -> vector<128x128xf32>
    %206 = arith.addf %199, %205 : vector<128x128xf32>
    %207 = vector.extract_strided_slice %206 {offsets = [0, 0], sizes = [128, 32], strides = [1, 1]} : vector<128x128xf32> to vector<128x32xf32>
    %cst_216 = arith.constant 0.000000e+00 : f32
    %208 = vector.broadcast %cst_216 : f32 to vector<128x32xf32>
    %209 = arith.maximumf %207, %208 : vector<128x32xf32>
    %210 = vector.shape_cast %209 : vector<128x32xf32> to vector<16x8x32xf32>
    %c0_217 = arith.constant 0 : index
    %c0_218 = arith.constant 0 : index
    %c0_219 = arith.constant 0 : index
    %211 = vector.load %arg15[%c0_217, %c0_218, %c0_219] : memref<16x8x32xf32, #tpu.memory_space<vmem>>, vector<16x8x32xf32>
    tpu.vector_store %arg15[%c0_217, %c0_218, %c0_219], %210 {strides = array<i32>} : memref<16x8x32xf32, #tpu.memory_space<vmem>>, vector<16x8x32xf32>,
    %c0_220 = arith.constant 0 : index
    %c0_221 = arith.constant 0 : index
    %c0_222 = arith.constant 0 : index
    %212 = tpu.strided_load %arg15[%c0_220, %c0_221, %c0_222] {strides = array<i32: 1, 2, 1>} : memref<16x8x32xf32, #tpu.memory_space<vmem>>, vector<16x4x32xf32>
    %c0_223 = arith.constant 0 : index
    %c1_224 = arith.constant 1 : index
    %c0_225 = arith.constant 0 : index
    %213 = tpu.strided_load %arg15[%c0_223, %c1_224, %c0_225] {strides = array<i32: 1, 2, 1>} : memref<16x8x32xf32, #tpu.memory_space<vmem>>, vector<16x4x32xf32>
    %214 = arith.maximumf %212, %213 : vector<16x4x32xf32>
    %215 = vector.shape_cast %214 : vector<16x4x32xf32> to vector<8x2x4x32xf32>
    %216 = vector.extract_strided_slice %215 {offsets = [0, 0, 0, 0], sizes = [8, 1, 4, 32], strides = [1, 1, 1, 1]} : vector<8x2x4x32xf32> to vector<8x1x4x32xf32>
    %217 = vector.shape_cast %216 : vector<8x1x4x32xf32> to vector<8x4x32xf32>
    %218 = vector.extract_strided_slice %215 {offsets = [0, 1, 0, 0], sizes = [8, 1, 4, 32], strides = [1, 1, 1, 1]} : vector<8x2x4x32xf32> to vector<8x1x4x32xf32>
    %219 = vector.shape_cast %218 : vector<8x1x4x32xf32> to vector<8x4x32xf32>
    %220 = arith.maximumf %217, %219 : vector<8x4x32xf32>
    %221 = vector.shape_cast %220 : vector<8x4x32xf32> to vector<2x4x4x32xf32>
    %cst_226 = arith.constant 0.000000e+00 : f32
    %222 = vector.broadcast %cst_226 : f32 to vector<2x2x8x32xf32>
    %c0_227 = arith.constant 0 : index
    %c0_228 = arith.constant 0 : index
    %c0_229 = arith.constant 0 : index
    %c0_230 = arith.constant 0 : index
    %223 = vector.load %arg16[%c0_227, %c0_228, %c0_229, %c0_230] : memref<2x8x8x32xf32, #tpu.memory_space<vmem>>, vector<2x2x8x32xf32>
    tpu.vector_store %arg16[%c0_227, %c0_228, %c0_229, %c0_230], %222 {strides = array<i32>} : memref<2x8x8x32xf32, #tpu.memory_space<vmem>>, vector<2x2x8x32xf32>,
    %c0_231 = arith.constant 0 : index
    %c6_232 = arith.constant 6 : index
    %c0_233 = arith.constant 0 : index
    %c0_234 = arith.constant 0 : index
    %224 = vector.load %arg16[%c0_231, %c6_232, %c0_233, %c0_234] : memref<2x8x8x32xf32, #tpu.memory_space<vmem>>, vector<2x2x8x32xf32>
    tpu.vector_store %arg16[%c0_231, %c6_232, %c0_233, %c0_234], %222 {strides = array<i32>} : memref<2x8x8x32xf32, #tpu.memory_space<vmem>>, vector<2x2x8x32xf32>,
    %cst_235 = arith.constant 0.000000e+00 : f32
    %225 = vector.broadcast %cst_235 : f32 to vector<2x4x2x32xf32>
    %c0_236 = arith.constant 0 : index
    %c2_237 = arith.constant 2 : index
    %c0_238 = arith.constant 0 : index
    %c0_239 = arith.constant 0 : index
    %226 = vector.load %arg16[%c0_236, %c2_237, %c0_238, %c0_239] : memref<2x8x8x32xf32, #tpu.memory_space<vmem>>, vector<2x4x2x32xf32>
    tpu.vector_store %arg16[%c0_236, %c2_237, %c0_238, %c0_239], %225 {strides = array<i32>} : memref<2x8x8x32xf32, #tpu.memory_space<vmem>>, vector<2x4x2x32xf32>,
    %c0_240 = arith.constant 0 : index
    %c2_241 = arith.constant 2 : index
    %c6_242 = arith.constant 6 : index
    %c0_243 = arith.constant 0 : index
    %227 = vector.load %arg16[%c0_240, %c2_241, %c6_242, %c0_243] : memref<2x8x8x32xf32, #tpu.memory_space<vmem>>, vector<2x4x2x32xf32>
    tpu.vector_store %arg16[%c0_240, %c2_241, %c6_242, %c0_243], %225 {strides = array<i32>} : memref<2x8x8x32xf32, #tpu.memory_space<vmem>>, vector<2x4x2x32xf32>,
    %c0_244 = arith.constant 0 : index
    %c2_245 = arith.constant 2 : index
    %c2_246 = arith.constant 2 : index
    %c0_247 = arith.constant 0 : index
    %228 = vector.load %arg16[%c0_244, %c2_245, %c2_246, %c0_247] : memref<2x8x8x32xf32, #tpu.memory_space<vmem>>, vector<2x4x4x32xf32>
    tpu.vector_store %arg16[%c0_244, %c2_245, %c2_246, %c0_247], %221 {strides = array<i32>} : memref<2x8x8x32xf32, #tpu.memory_space<vmem>>, vector<2x4x4x32xf32>,
    %c0_248 = arith.constant 0 : index
    %c0_249 = arith.constant 0 : index
    %229 = vector.load %arg7[%c0_248, %c0_249] : memref<1x128xf32, #tpu.memory_space<vmem>>, vector<1x128xf32>
    %230 = vector.shape_cast %229 : vector<1x128xf32> to vector<1x128xf32>
    %231 = vector.broadcast %230 : vector<1x128xf32> to vector<32x128xf32>
    %c0_250 = arith.constant 0 : index
    %c0_251 = arith.constant 0 : index
    %c0_252 = arith.constant 0 : index
    %c0_253 = arith.constant 0 : index
    %232 = vector.load %arg16[%c0_250, %c0_251, %c0_252, %c0_253] : memref<2x8x8x32xf32, #tpu.memory_space<vmem>>, vector<2x4x4x32xf32>
    %233 = vector.shape_cast %232 : vector<2x4x4x32xf32> to vector<32x32xf32>
    %234 = arith.truncf %233 : vector<32x32xf32> to vector<32x32xbf16>
    %c0_254 = arith.constant 0 : index
    %c0_255 = arith.constant 0 : index
    %c0_256 = arith.constant 0 : index
    %235 = vector.load %arg6[%c0_254, %c0_255, %c0_256] : memref<25x32x128xbf16, #tpu.memory_space<vmem>>, vector<1x32x128xbf16>
    %236 = vector.shape_cast %235 : vector<1x32x128xbf16> to vector<32x128xbf16>
    %cst_257 = arith.constant dense<0.000000e+00> : vector<32x128xf32>
    %237 = tpu.matmul %234, %236, %cst_257 {dimension_numbers = #tpu.dot_dimension_numbers<[1], [0], [0], [1], [0, 0, 1, 1], [], []>} : vector<32x32xbf16>, vector<32x128xbf16>, vector<32x128xf32> -> vector<32x128xf32>
    %238 = arith.addf %231, %237 : vector<32x128xf32>
    %c0_258 = arith.constant 0 : index
    %c0_259 = arith.constant 0 : index
    %c1_260 = arith.constant 1 : index
    %c0_261 = arith.constant 0 : index
    %239 = vector.load %arg16[%c0_258, %c0_259, %c1_260, %c0_261] : memref<2x8x8x32xf32, #tpu.memory_space<vmem>>, vector<2x4x4x32xf32>
    %240 = vector.shape_cast %239 : vector<2x4x4x32xf32> to vector<32x32xf32>
    %241 = arith.truncf %240 : vector<32x32xf32> to vector<32x32xbf16>
    %c1_262 = arith.constant 1 : index
    %c0_263 = arith.constant 0 : index
    %c0_264 = arith.constant 0 : index
    %242 = vector.load %arg6[%c1_262, %c0_263, %c0_264] : memref<25x32x128xbf16, #tpu.memory_space<vmem>>, vector<1x32x128xbf16>
    %243 = vector.shape_cast %242 : vector<1x32x128xbf16> to vector<32x128xbf16>
    %cst_265 = arith.constant dense<0.000000e+00> : vector<32x128xf32>
    %244 = tpu.matmul %241, %243, %cst_265 {dimension_numbers = #tpu.dot_dimension_numbers<[1], [0], [0], [1], [0, 0, 1, 1], [], []>} : vector<32x32xbf16>, vector<32x128xbf16>, vector<32x128xf32> -> vector<32x128xf32>
    %245 = arith.addf %238, %244 : vector<32x128xf32>
    %c0_266 = arith.constant 0 : index
    %c0_267 = arith.constant 0 : index
    %c2_268 = arith.constant 2 : index
    %c0_269 = arith.constant 0 : index
    %246 = vector.load %arg16[%c0_266, %c0_267, %c2_268, %c0_269] : memref<2x8x8x32xf32, #tpu.memory_space<vmem>>, vector<2x4x4x32xf32>
    %247 = vector.shape_cast %246 : vector<2x4x4x32xf32> to vector<32x32xf32>
    %248 = arith.truncf %247 : vector<32x32xf32> to vector<32x32xbf16>
    %c2_270 = arith.constant 2 : index
    %c0_271 = arith.constant 0 : index
    %c0_272 = arith.constant 0 : index
    %249 = vector.load %arg6[%c2_270, %c0_271, %c0_272] : memref<25x32x128xbf16, #tpu.memory_space<vmem>>, vector<1x32x128xbf16>
    %250 = vector.shape_cast %249 : vector<1x32x128xbf16> to vector<32x128xbf16>
    %cst_273 = arith.constant dense<0.000000e+00> : vector<32x128xf32>
    %251 = tpu.matmul %248, %250, %cst_273 {dimension_numbers = #tpu.dot_dimension_numbers<[1], [0], [0], [1], [0, 0, 1, 1], [], []>} : vector<32x32xbf16>, vector<32x128xbf16>, vector<32x128xf32> -> vector<32x128xf32>
    %252 = arith.addf %245, %251 : vector<32x128xf32>
    %c0_274 = arith.constant 0 : index
    %c0_275 = arith.constant 0 : index
    %c3_276 = arith.constant 3 : index
    %c0_277 = arith.constant 0 : index
    %253 = vector.load %arg16[%c0_274, %c0_275, %c3_276, %c0_277] : memref<2x8x8x32xf32, #tpu.memory_space<vmem>>, vector<2x4x4x32xf32>
    %254 = vector.shape_cast %253 : vector<2x4x4x32xf32> to vector<32x32xf32>
    %255 = arith.truncf %254 : vector<32x32xf32> to vector<32x32xbf16>
    %c3_278 = arith.constant 3 : index
    %c0_279 = arith.constant 0 : index
    %c0_280 = arith.constant 0 : index
    %256 = vector.load %arg6[%c3_278, %c0_279, %c0_280] : memref<25x32x128xbf16, #tpu.memory_space<vmem>>, vector<1x32x128xbf16>
    %257 = vector.shape_cast %256 : vector<1x32x128xbf16> to vector<32x128xbf16>
    %cst_281 = arith.constant dense<0.000000e+00> : vector<32x128xf32>
    %258 = tpu.matmul %255, %257, %cst_281 {dimension_numbers = #tpu.dot_dimension_numbers<[1], [0], [0], [1], [0, 0, 1, 1], [], []>} : vector<32x32xbf16>, vector<32x128xbf16>, vector<32x128xf32> -> vector<32x128xf32>
    %259 = arith.addf %252, %258 : vector<32x128xf32>
    %c0_282 = arith.constant 0 : index
    %c0_283 = arith.constant 0 : index
    %c4_284 = arith.constant 4 : index
    %c0_285 = arith.constant 0 : index
    %260 = vector.load %arg16[%c0_282, %c0_283, %c4_284, %c0_285] : memref<2x8x8x32xf32, #tpu.memory_space<vmem>>, vector<2x4x4x32xf32>
    %261 = vector.shape_cast %260 : vector<2x4x4x32xf32> to vector<32x32xf32>
    %262 = arith.truncf %261 : vector<32x32xf32> to vector<32x32xbf16>
    %c4_286 = arith.constant 4 : index
    %c0_287 = arith.constant 0 : index
    %c0_288 = arith.constant 0 : index
    %263 = vector.load %arg6[%c4_286, %c0_287, %c0_288] : memref<25x32x128xbf16, #tpu.memory_space<vmem>>, vector<1x32x128xbf16>
    %264 = vector.shape_cast %263 : vector<1x32x128xbf16> to vector<32x128xbf16>
    %cst_289 = arith.constant dense<0.000000e+00> : vector<32x128xf32>
    %265 = tpu.matmul %262, %264, %cst_289 {dimension_numbers = #tpu.dot_dimension_numbers<[1], [0], [0], [1], [0, 0, 1, 1], [], []>} : vector<32x32xbf16>, vector<32x128xbf16>, vector<32x128xf32> -> vector<32x128xf32>
    %266 = arith.addf %259, %265 : vector<32x128xf32>
    %c0_290 = arith.constant 0 : index
    %c1_291 = arith.constant 1 : index
    %c0_292 = arith.constant 0 : index
    %c0_293 = arith.constant 0 : index
    %267 = vector.load %arg16[%c0_290, %c1_291, %c0_292, %c0_293] : memref<2x8x8x32xf32, #tpu.memory_space<vmem>>, vector<2x4x4x32xf32>
    %268 = vector.shape_cast %267 : vector<2x4x4x32xf32> to vector<32x32xf32>
    %269 = arith.truncf %268 : vector<32x32xf32> to vector<32x32xbf16>
    %c5_294 = arith.constant 5 : index
    %c0_295 = arith.constant 0 : index
    %c0_296 = arith.constant 0 : index
    %270 = vector.load %arg6[%c5_294, %c0_295, %c0_296] : memref<25x32x128xbf16, #tpu.memory_space<vmem>>, vector<1x32x128xbf16>
    %271 = vector.shape_cast %270 : vector<1x32x128xbf16> to vector<32x128xbf16>
    %cst_297 = arith.constant dense<0.000000e+00> : vector<32x128xf32>
    %272 = tpu.matmul %269, %271, %cst_297 {dimension_numbers = #tpu.dot_dimension_numbers<[1], [0], [0], [1], [0, 0, 1, 1], [], []>} : vector<32x32xbf16>, vector<32x128xbf16>, vector<32x128xf32> -> vector<32x128xf32>
    %273 = arith.addf %266, %272 : vector<32x128xf32>
    %c0_298 = arith.constant 0 : index
    %c1_299 = arith.constant 1 : index
    %c1_300 = arith.constant 1 : index
    %c0_301 = arith.constant 0 : index
    %274 = vector.load %arg16[%c0_298, %c1_299, %c1_300, %c0_301] : memref<2x8x8x32xf32, #tpu.memory_space<vmem>>, vector<2x4x4x32xf32>
    %275 = vector.shape_cast %274 : vector<2x4x4x32xf32> to vector<32x32xf32>
    %276 = arith.truncf %275 : vector<32x32xf32> to vector<32x32xbf16>
    %c6_302 = arith.constant 6 : index
    %c0_303 = arith.constant 0 : index
    %c0_304 = arith.constant 0 : index
    %277 = vector.load %arg6[%c6_302, %c0_303, %c0_304] : memref<25x32x128xbf16, #tpu.memory_space<vmem>>, vector<1x32x128xbf16>
    %278 = vector.shape_cast %277 : vector<1x32x128xbf16> to vector<32x128xbf16>
    %cst_305 = arith.constant dense<0.000000e+00> : vector<32x128xf32>
    %279 = tpu.matmul %276, %278, %cst_305 {dimension_numbers = #tpu.dot_dimension_numbers<[1], [0], [0], [1], [0, 0, 1, 1], [], []>} : vector<32x32xbf16>, vector<32x128xbf16>, vector<32x128xf32> -> vector<32x128xf32>
    %280 = arith.addf %273, %279 : vector<32x128xf32>
    %c0_306 = arith.constant 0 : index
    %c1_307 = arith.constant 1 : index
    %c2_308 = arith.constant 2 : index
    %c0_309 = arith.constant 0 : index
    %281 = vector.load %arg16[%c0_306, %c1_307, %c2_308, %c0_309] : memref<2x8x8x32xf32, #tpu.memory_space<vmem>>, vector<2x4x4x32xf32>
    %282 = vector.shape_cast %281 : vector<2x4x4x32xf32> to vector<32x32xf32>
    %283 = arith.truncf %282 : vector<32x32xf32> to vector<32x32xbf16>
    %c7_310 = arith.constant 7 : index
    %c0_311 = arith.constant 0 : index
    %c0_312 = arith.constant 0 : index
    %284 = vector.load %arg6[%c7_310, %c0_311, %c0_312] : memref<25x32x128xbf16, #tpu.memory_space<vmem>>, vector<1x32x128xbf16>
    %285 = vector.shape_cast %284 : vector<1x32x128xbf16> to vector<32x128xbf16>
    %cst_313 = arith.constant dense<0.000000e+00> : vector<32x128xf32>
    %286 = tpu.matmul %283, %285, %cst_313 {dimension_numbers = #tpu.dot_dimension_numbers<[1], [0], [0], [1], [0, 0, 1, 1], [], []>} : vector<32x32xbf16>, vector<32x128xbf16>, vector<32x128xf32> -> vector<32x128xf32>
    %287 = arith.addf %280, %286 : vector<32x128xf32>
    %c0_314 = arith.constant 0 : index
    %c1_315 = arith.constant 1 : index
    %c3_316 = arith.constant 3 : index
    %c0_317 = arith.constant 0 : index
    %288 = vector.load %arg16[%c0_314, %c1_315, %c3_316, %c0_317] : memref<2x8x8x32xf32, #tpu.memory_space<vmem>>, vector<2x4x4x32xf32>
    %289 = vector.shape_cast %288 : vector<2x4x4x32xf32> to vector<32x32xf32>
    %290 = arith.truncf %289 : vector<32x32xf32> to vector<32x32xbf16>
    %c8_318 = arith.constant 8 : index
    %c0_319 = arith.constant 0 : index
    %c0_320 = arith.constant 0 : index
    %291 = vector.load %arg6[%c8_318, %c0_319, %c0_320] : memref<25x32x128xbf16, #tpu.memory_space<vmem>>, vector<1x32x128xbf16>
    %292 = vector.shape_cast %291 : vector<1x32x128xbf16> to vector<32x128xbf16>
    %cst_321 = arith.constant dense<0.000000e+00> : vector<32x128xf32>
    %293 = tpu.matmul %290, %292, %cst_321 {dimension_numbers = #tpu.dot_dimension_numbers<[1], [0], [0], [1], [0, 0, 1, 1], [], []>} : vector<32x32xbf16>, vector<32x128xbf16>, vector<32x128xf32> -> vector<32x128xf32>
    %294 = arith.addf %287, %293 : vector<32x128xf32>
    %c0_322 = arith.constant 0 : index
    %c1_323 = arith.constant 1 : index
    %c4_324 = arith.constant 4 : index
    %c0_325 = arith.constant 0 : index
    %295 = vector.load %arg16[%c0_322, %c1_323, %c4_324, %c0_325] : memref<2x8x8x32xf32, #tpu.memory_space<vmem>>, vector<2x4x4x32xf32>
    %296 = vector.shape_cast %295 : vector<2x4x4x32xf32> to vector<32x32xf32>
    %297 = arith.truncf %296 : vector<32x32xf32> to vector<32x32xbf16>
    %c9_326 = arith.constant 9 : index
    %c0_327 = arith.constant 0 : index
    %c0_328 = arith.constant 0 : index
    %298 = vector.load %arg6[%c9_326, %c0_327, %c0_328] : memref<25x32x128xbf16, #tpu.memory_space<vmem>>, vector<1x32x128xbf16>
    %299 = vector.shape_cast %298 : vector<1x32x128xbf16> to vector<32x128xbf16>
    %cst_329 = arith.constant dense<0.000000e+00> : vector<32x128xf32>
    %300 = tpu.matmul %297, %299, %cst_329 {dimension_numbers = #tpu.dot_dimension_numbers<[1], [0], [0], [1], [0, 0, 1, 1], [], []>} : vector<32x32xbf16>, vector<32x128xbf16>, vector<32x128xf32> -> vector<32x128xf32>
    %301 = arith.addf %294, %300 : vector<32x128xf32>
    %c0_330 = arith.constant 0 : index
    %c2_331 = arith.constant 2 : index
    %c0_332 = arith.constant 0 : index
    %c0_333 = arith.constant 0 : index
    %302 = vector.load %arg16[%c0_330, %c2_331, %c0_332, %c0_333] : memref<2x8x8x32xf32, #tpu.memory_space<vmem>>, vector<2x4x4x32xf32>
    %303 = vector.shape_cast %302 : vector<2x4x4x32xf32> to vector<32x32xf32>
    %304 = arith.truncf %303 : vector<32x32xf32> to vector<32x32xbf16>
    %c10_334 = arith.constant 10 : index
    %c0_335 = arith.constant 0 : index
    %c0_336 = arith.constant 0 : index
    %305 = vector.load %arg6[%c10_334, %c0_335, %c0_336] : memref<25x32x128xbf16, #tpu.memory_space<vmem>>, vector<1x32x128xbf16>
    %306 = vector.shape_cast %305 : vector<1x32x128xbf16> to vector<32x128xbf16>
    %cst_337 = arith.constant dense<0.000000e+00> : vector<32x128xf32>
    %307 = tpu.matmul %304, %306, %cst_337 {dimension_numbers = #tpu.dot_dimension_numbers<[1], [0], [0], [1], [0, 0, 1, 1], [], []>} : vector<32x32xbf16>, vector<32x128xbf16>, vector<32x128xf32> -> vector<32x128xf32>
    %308 = arith.addf %301, %307 : vector<32x128xf32>
    %c0_338 = arith.constant 0 : index
    %c2_339 = arith.constant 2 : index
    %c1_340 = arith.constant 1 : index
    %c0_341 = arith.constant 0 : index
    %309 = vector.load %arg16[%c0_338, %c2_339, %c1_340, %c0_341] : memref<2x8x8x32xf32, #tpu.memory_space<vmem>>, vector<2x4x4x32xf32>
    %310 = vector.shape_cast %309 : vector<2x4x4x32xf32> to vector<32x32xf32>
    %311 = arith.truncf %310 : vector<32x32xf32> to vector<32x32xbf16>
    %c11_342 = arith.constant 11 : index
    %c0_343 = arith.constant 0 : index
    %c0_344 = arith.constant 0 : index
    %312 = vector.load %arg6[%c11_342, %c0_343, %c0_344] : memref<25x32x128xbf16, #tpu.memory_space<vmem>>, vector<1x32x128xbf16>
    %313 = vector.shape_cast %312 : vector<1x32x128xbf16> to vector<32x128xbf16>
    %cst_345 = arith.constant dense<0.000000e+00> : vector<32x128xf32>
    %314 = tpu.matmul %311, %313, %cst_345 {dimension_numbers = #tpu.dot_dimension_numbers<[1], [0], [0], [1], [0, 0, 1, 1], [], []>} : vector<32x32xbf16>, vector<32x128xbf16>, vector<32x128xf32> -> vector<32x128xf32>
    %315 = arith.addf %308, %314 : vector<32x128xf32>
    %c0_346 = arith.constant 0 : index
    %c2_347 = arith.constant 2 : index
    %c2_348 = arith.constant 2 : index
    %c0_349 = arith.constant 0 : index
    %316 = vector.load %arg16[%c0_346, %c2_347, %c2_348, %c0_349] : memref<2x8x8x32xf32, #tpu.memory_space<vmem>>, vector<2x4x4x32xf32>
    %317 = vector.shape_cast %316 : vector<2x4x4x32xf32> to vector<32x32xf32>
    %318 = arith.truncf %317 : vector<32x32xf32> to vector<32x32xbf16>
    %c12_350 = arith.constant 12 : index
    %c0_351 = arith.constant 0 : index
    %c0_352 = arith.constant 0 : index
    %319 = vector.load %arg6[%c12_350, %c0_351, %c0_352] : memref<25x32x128xbf16, #tpu.memory_space<vmem>>, vector<1x32x128xbf16>
    %320 = vector.shape_cast %319 : vector<1x32x128xbf16> to vector<32x128xbf16>
    %cst_353 = arith.constant dense<0.000000e+00> : vector<32x128xf32>
    %321 = tpu.matmul %318, %320, %cst_353 {dimension_numbers = #tpu.dot_dimension_numbers<[1], [0], [0], [1], [0, 0, 1, 1], [], []>} : vector<32x32xbf16>, vector<32x128xbf16>, vector<32x128xf32> -> vector<32x128xf32>
    %322 = arith.addf %315, %321 : vector<32x128xf32>
    %c0_354 = arith.constant 0 : index
    %c2_355 = arith.constant 2 : index
    %c3_356 = arith.constant 3 : index
    %c0_357 = arith.constant 0 : index
    %323 = vector.load %arg16[%c0_354, %c2_355, %c3_356, %c0_357] : memref<2x8x8x32xf32, #tpu.memory_space<vmem>>, vector<2x4x4x32xf32>
    %324 = vector.shape_cast %323 : vector<2x4x4x32xf32> to vector<32x32xf32>
    %325 = arith.truncf %324 : vector<32x32xf32> to vector<32x32xbf16>
    %c13_358 = arith.constant 13 : index
    %c0_359 = arith.constant 0 : index
    %c0_360 = arith.constant 0 : index
    %326 = vector.load %arg6[%c13_358, %c0_359, %c0_360] : memref<25x32x128xbf16, #tpu.memory_space<vmem>>, vector<1x32x128xbf16>
    %327 = vector.shape_cast %326 : vector<1x32x128xbf16> to vector<32x128xbf16>
    %cst_361 = arith.constant dense<0.000000e+00> : vector<32x128xf32>
    %328 = tpu.matmul %325, %327, %cst_361 {dimension_numbers = #tpu.dot_dimension_numbers<[1], [0], [0], [1], [0, 0, 1, 1], [], []>} : vector<32x32xbf16>, vector<32x128xbf16>, vector<32x128xf32> -> vector<32x128xf32>
    %329 = arith.addf %322, %328 : vector<32x128xf32>
    %c0_362 = arith.constant 0 : index
    %c2_363 = arith.constant 2 : index
    %c4_364 = arith.constant 4 : index
    %c0_365 = arith.constant 0 : index
    %330 = vector.load %arg16[%c0_362, %c2_363, %c4_364, %c0_365] : memref<2x8x8x32xf32, #tpu.memory_space<vmem>>, vector<2x4x4x32xf32>
    %331 = vector.shape_cast %330 : vector<2x4x4x32xf32> to vector<32x32xf32>
    %332 = arith.truncf %331 : vector<32x32xf32> to vector<32x32xbf16>
    %c14_366 = arith.constant 14 : index
    %c0_367 = arith.constant 0 : index
    %c0_368 = arith.constant 0 : index
    %333 = vector.load %arg6[%c14_366, %c0_367, %c0_368] : memref<25x32x128xbf16, #tpu.memory_space<vmem>>, vector<1x32x128xbf16>
    %334 = vector.shape_cast %333 : vector<1x32x128xbf16> to vector<32x128xbf16>
    %cst_369 = arith.constant dense<0.000000e+00> : vector<32x128xf32>
    %335 = tpu.matmul %332, %334, %cst_369 {dimension_numbers = #tpu.dot_dimension_numbers<[1], [0], [0], [1], [0, 0, 1, 1], [], []>} : vector<32x32xbf16>, vector<32x128xbf16>, vector<32x128xf32> -> vector<32x128xf32>
    %336 = arith.addf %329, %335 : vector<32x128xf32>
    %c0_370 = arith.constant 0 : index
    %c3_371 = arith.constant 3 : index
    %c0_372 = arith.constant 0 : index
    %c0_373 = arith.constant 0 : index
    %337 = vector.load %arg16[%c0_370, %c3_371, %c0_372, %c0_373] : memref<2x8x8x32xf32, #tpu.memory_space<vmem>>, vector<2x4x4x32xf32>
    %338 = vector.shape_cast %337 : vector<2x4x4x32xf32> to vector<32x32xf32>
    %339 = arith.truncf %338 : vector<32x32xf32> to vector<32x32xbf16>
    %c15_374 = arith.constant 15 : index
    %c0_375 = arith.constant 0 : index
    %c0_376 = arith.constant 0 : index
    %340 = vector.load %arg6[%c15_374, %c0_375, %c0_376] : memref<25x32x128xbf16, #tpu.memory_space<vmem>>, vector<1x32x128xbf16>
    %341 = vector.shape_cast %340 : vector<1x32x128xbf16> to vector<32x128xbf16>
    %cst_377 = arith.constant dense<0.000000e+00> : vector<32x128xf32>
    %342 = tpu.matmul %339, %341, %cst_377 {dimension_numbers = #tpu.dot_dimension_numbers<[1], [0], [0], [1], [0, 0, 1, 1], [], []>} : vector<32x32xbf16>, vector<32x128xbf16>, vector<32x128xf32> -> vector<32x128xf32>
    %343 = arith.addf %336, %342 : vector<32x128xf32>
    %c0_378 = arith.constant 0 : index
    %c3_379 = arith.constant 3 : index
    %c1_380 = arith.constant 1 : index
    %c0_381 = arith.constant 0 : index
    %344 = vector.load %arg16[%c0_378, %c3_379, %c1_380, %c0_381] : memref<2x8x8x32xf32, #tpu.memory_space<vmem>>, vector<2x4x4x32xf32>
    %345 = vector.shape_cast %344 : vector<2x4x4x32xf32> to vector<32x32xf32>
    %346 = arith.truncf %345 : vector<32x32xf32> to vector<32x32xbf16>
    %c16_382 = arith.constant 16 : index
    %c0_383 = arith.constant 0 : index
    %c0_384 = arith.constant 0 : index
    %347 = vector.load %arg6[%c16_382, %c0_383, %c0_384] : memref<25x32x128xbf16, #tpu.memory_space<vmem>>, vector<1x32x128xbf16>
    %348 = vector.shape_cast %347 : vector<1x32x128xbf16> to vector<32x128xbf16>
    %cst_385 = arith.constant dense<0.000000e+00> : vector<32x128xf32>
    %349 = tpu.matmul %346, %348, %cst_385 {dimension_numbers = #tpu.dot_dimension_numbers<[1], [0], [0], [1], [0, 0, 1, 1], [], []>} : vector<32x32xbf16>, vector<32x128xbf16>, vector<32x128xf32> -> vector<32x128xf32>
    %350 = arith.addf %343, %349 : vector<32x128xf32>
    %c0_386 = arith.constant 0 : index
    %c3_387 = arith.constant 3 : index
    %c2_388 = arith.constant 2 : index
    %c0_389 = arith.constant 0 : index
    %351 = vector.load %arg16[%c0_386, %c3_387, %c2_388, %c0_389] : memref<2x8x8x32xf32, #tpu.memory_space<vmem>>, vector<2x4x4x32xf32>
    %352 = vector.shape_cast %351 : vector<2x4x4x32xf32> to vector<32x32xf32>
    %353 = arith.truncf %352 : vector<32x32xf32> to vector<32x32xbf16>
    %c17_390 = arith.constant 17 : index
    %c0_391 = arith.constant 0 : index
    %c0_392 = arith.constant 0 : index
    %354 = vector.load %arg6[%c17_390, %c0_391, %c0_392] : memref<25x32x128xbf16, #tpu.memory_space<vmem>>, vector<1x32x128xbf16>
    %355 = vector.shape_cast %354 : vector<1x32x128xbf16> to vector<32x128xbf16>
    %cst_393 = arith.constant dense<0.000000e+00> : vector<32x128xf32>
    %356 = tpu.matmul %353, %355, %cst_393 {dimension_numbers = #tpu.dot_dimension_numbers<[1], [0], [0], [1], [0, 0, 1, 1], [], []>} : vector<32x32xbf16>, vector<32x128xbf16>, vector<32x128xf32> -> vector<32x128xf32>
    %357 = arith.addf %350, %356 : vector<32x128xf32>
    %c0_394 = arith.constant 0 : index
    %c3_395 = arith.constant 3 : index
    %c3_396 = arith.constant 3 : index
    %c0_397 = arith.constant 0 : index
    %358 = vector.load %arg16[%c0_394, %c3_395, %c3_396, %c0_397] : memref<2x8x8x32xf32, #tpu.memory_space<vmem>>, vector<2x4x4x32xf32>
    %359 = vector.shape_cast %358 : vector<2x4x4x32xf32> to vector<32x32xf32>
    %360 = arith.truncf %359 : vector<32x32xf32> to vector<32x32xbf16>
    %c18_398 = arith.constant 18 : index
    %c0_399 = arith.constant 0 : index
    %c0_400 = arith.constant 0 : index
    %361 = vector.load %arg6[%c18_398, %c0_399, %c0_400] : memref<25x32x128xbf16, #tpu.memory_space<vmem>>, vector<1x32x128xbf16>
    %362 = vector.shape_cast %361 : vector<1x32x128xbf16> to vector<32x128xbf16>
    %cst_401 = arith.constant dense<0.000000e+00> : vector<32x128xf32>
    %363 = tpu.matmul %360, %362, %cst_401 {dimension_numbers = #tpu.dot_dimension_numbers<[1], [0], [0], [1], [0, 0, 1, 1], [], []>} : vector<32x32xbf16>, vector<32x128xbf16>, vector<32x128xf32> -> vector<32x128xf32>
    %364 = arith.addf %357, %363 : vector<32x128xf32>
    %c0_402 = arith.constant 0 : index
    %c3_403 = arith.constant 3 : index
    %c4_404 = arith.constant 4 : index
    %c0_405 = arith.constant 0 : index
    %365 = vector.load %arg16[%c0_402, %c3_403, %c4_404, %c0_405] : memref<2x8x8x32xf32, #tpu.memory_space<vmem>>, vector<2x4x4x32xf32>
    %366 = vector.shape_cast %365 : vector<2x4x4x32xf32> to vector<32x32xf32>
    %367 = arith.truncf %366 : vector<32x32xf32> to vector<32x32xbf16>
    %c19_406 = arith.constant 19 : index
    %c0_407 = arith.constant 0 : index
    %c0_408 = arith.constant 0 : index
    %368 = vector.load %arg6[%c19_406, %c0_407, %c0_408] : memref<25x32x128xbf16, #tpu.memory_space<vmem>>, vector<1x32x128xbf16>
    %369 = vector.shape_cast %368 : vector<1x32x128xbf16> to vector<32x128xbf16>
    %cst_409 = arith.constant dense<0.000000e+00> : vector<32x128xf32>
    %370 = tpu.matmul %367, %369, %cst_409 {dimension_numbers = #tpu.dot_dimension_numbers<[1], [0], [0], [1], [0, 0, 1, 1], [], []>} : vector<32x32xbf16>, vector<32x128xbf16>, vector<32x128xf32> -> vector<32x128xf32>
    %371 = arith.addf %364, %370 : vector<32x128xf32>
    %c0_410 = arith.constant 0 : index
    %c4_411 = arith.constant 4 : index
    %c0_412 = arith.constant 0 : index
    %c0_413 = arith.constant 0 : index
    %372 = vector.load %arg16[%c0_410, %c4_411, %c0_412, %c0_413] : memref<2x8x8x32xf32, #tpu.memory_space<vmem>>, vector<2x4x4x32xf32>
    %373 = vector.shape_cast %372 : vector<2x4x4x32xf32> to vector<32x32xf32>
    %374 = arith.truncf %373 : vector<32x32xf32> to vector<32x32xbf16>
    %c20_414 = arith.constant 20 : index
    %c0_415 = arith.constant 0 : index
    %c0_416 = arith.constant 0 : index
    %375 = vector.load %arg6[%c20_414, %c0_415, %c0_416] : memref<25x32x128xbf16, #tpu.memory_space<vmem>>, vector<1x32x128xbf16>
    %376 = vector.shape_cast %375 : vector<1x32x128xbf16> to vector<32x128xbf16>
    %cst_417 = arith.constant dense<0.000000e+00> : vector<32x128xf32>
    %377 = tpu.matmul %374, %376, %cst_417 {dimension_numbers = #tpu.dot_dimension_numbers<[1], [0], [0], [1], [0, 0, 1, 1], [], []>} : vector<32x32xbf16>, vector<32x128xbf16>, vector<32x128xf32> -> vector<32x128xf32>
    %378 = arith.addf %371, %377 : vector<32x128xf32>
    %c0_418 = arith.constant 0 : index
    %c4_419 = arith.constant 4 : index
    %c1_420 = arith.constant 1 : index
    %c0_421 = arith.constant 0 : index
    %379 = vector.load %arg16[%c0_418, %c4_419, %c1_420, %c0_421] : memref<2x8x8x32xf32, #tpu.memory_space<vmem>>, vector<2x4x4x32xf32>
    %380 = vector.shape_cast %379 : vector<2x4x4x32xf32> to vector<32x32xf32>
    %381 = arith.truncf %380 : vector<32x32xf32> to vector<32x32xbf16>
    %c21_422 = arith.constant 21 : index
    %c0_423 = arith.constant 0 : index
    %c0_424 = arith.constant 0 : index
    %382 = vector.load %arg6[%c21_422, %c0_423, %c0_424] : memref<25x32x128xbf16, #tpu.memory_space<vmem>>, vector<1x32x128xbf16>
    %383 = vector.shape_cast %382 : vector<1x32x128xbf16> to vector<32x128xbf16>
    %cst_425 = arith.constant dense<0.000000e+00> : vector<32x128xf32>
    %384 = tpu.matmul %381, %383, %cst_425 {dimension_numbers = #tpu.dot_dimension_numbers<[1], [0], [0], [1], [0, 0, 1, 1], [], []>} : vector<32x32xbf16>, vector<32x128xbf16>, vector<32x128xf32> -> vector<32x128xf32>
    %385 = arith.addf %378, %384 : vector<32x128xf32>
    %c0_426 = arith.constant 0 : index
    %c4_427 = arith.constant 4 : index
    %c2_428 = arith.constant 2 : index
    %c0_429 = arith.constant 0 : index
    %386 = vector.load %arg16[%c0_426, %c4_427, %c2_428, %c0_429] : memref<2x8x8x32xf32, #tpu.memory_space<vmem>>, vector<2x4x4x32xf32>
    %387 = vector.shape_cast %386 : vector<2x4x4x32xf32> to vector<32x32xf32>
    %388 = arith.truncf %387 : vector<32x32xf32> to vector<32x32xbf16>
    %c22_430 = arith.constant 22 : index
    %c0_431 = arith.constant 0 : index
    %c0_432 = arith.constant 0 : index
    %389 = vector.load %arg6[%c22_430, %c0_431, %c0_432] : memref<25x32x128xbf16, #tpu.memory_space<vmem>>, vector<1x32x128xbf16>
    %390 = vector.shape_cast %389 : vector<1x32x128xbf16> to vector<32x128xbf16>
    %cst_433 = arith.constant dense<0.000000e+00> : vector<32x128xf32>
    %391 = tpu.matmul %388, %390, %cst_433 {dimension_numbers = #tpu.dot_dimension_numbers<[1], [0], [0], [1], [0, 0, 1, 1], [], []>} : vector<32x32xbf16>, vector<32x128xbf16>, vector<32x128xf32> -> vector<32x128xf32>
    %392 = arith.addf %385, %391 : vector<32x128xf32>
    %c0_434 = arith.constant 0 : index
    %c4_435 = arith.constant 4 : index
    %c3_436 = arith.constant 3 : index
    %c0_437 = arith.constant 0 : index
    %393 = vector.load %arg16[%c0_434, %c4_435, %c3_436, %c0_437] : memref<2x8x8x32xf32, #tpu.memory_space<vmem>>, vector<2x4x4x32xf32>
    %394 = vector.shape_cast %393 : vector<2x4x4x32xf32> to vector<32x32xf32>
    %395 = arith.truncf %394 : vector<32x32xf32> to vector<32x32xbf16>
    %c23_438 = arith.constant 23 : index
    %c0_439 = arith.constant 0 : index
    %c0_440 = arith.constant 0 : index
    %396 = vector.load %arg6[%c23_438, %c0_439, %c0_440] : memref<25x32x128xbf16, #tpu.memory_space<vmem>>, vector<1x32x128xbf16>
    %397 = vector.shape_cast %396 : vector<1x32x128xbf16> to vector<32x128xbf16>
    %cst_441 = arith.constant dense<0.000000e+00> : vector<32x128xf32>
    %398 = tpu.matmul %395, %397, %cst_441 {dimension_numbers = #tpu.dot_dimension_numbers<[1], [0], [0], [1], [0, 0, 1, 1], [], []>} : vector<32x32xbf16>, vector<32x128xbf16>, vector<32x128xf32> -> vector<32x128xf32>
    %399 = arith.addf %392, %398 : vector<32x128xf32>
    %c0_442 = arith.constant 0 : index
    %c4_443 = arith.constant 4 : index
    %c4_444 = arith.constant 4 : index
    %c0_445 = arith.constant 0 : index
    %400 = vector.load %arg16[%c0_442, %c4_443, %c4_444, %c0_445] : memref<2x8x8x32xf32, #tpu.memory_space<vmem>>, vector<2x4x4x32xf32>
    %401 = vector.shape_cast %400 : vector<2x4x4x32xf32> to vector<32x32xf32>
    %402 = arith.truncf %401 : vector<32x32xf32> to vector<32x32xbf16>
    %c24_446 = arith.constant 24 : index
    %c0_447 = arith.constant 0 : index
    %c0_448 = arith.constant 0 : index
    %403 = vector.load %arg6[%c24_446, %c0_447, %c0_448] : memref<25x32x128xbf16, #tpu.memory_space<vmem>>, vector<1x32x128xbf16>
    %404 = vector.shape_cast %403 : vector<1x32x128xbf16> to vector<32x128xbf16>
    %cst_449 = arith.constant dense<0.000000e+00> : vector<32x128xf32>
    %405 = tpu.matmul %402, %404, %cst_449 {dimension_numbers = #tpu.dot_dimension_numbers<[1], [0], [0], [1], [0, 0, 1, 1], [], []>} : vector<32x32xbf16>, vector<32x128xbf16>, vector<32x128xf32> -> vector<32x128xf32>
    %406 = arith.addf %399, %405 : vector<32x128xf32>
    %407 = vector.extract_strided_slice %406 {offsets = [0, 0], sizes = [32, 64], strides = [1, 1]} : vector<32x128xf32> to vector<32x64xf32>
    %cst_450 = arith.constant 0.000000e+00 : f32
    %408 = vector.broadcast %cst_450 : f32 to vector<32x64xf32>
    %409 = arith.maximumf %407, %408 : vector<32x64xf32>
    %410 = vector.shape_cast %409 : vector<32x64xf32> to vector<8x4x64xf32>
    %c0_451 = arith.constant 0 : index
    %c0_452 = arith.constant 0 : index
    %c0_453 = arith.constant 0 : index
    %411 = vector.load %arg17[%c0_451, %c0_452, %c0_453] : memref<8x4x64xf32, #tpu.memory_space<vmem>>, vector<8x4x64xf32>
    tpu.vector_store %arg17[%c0_451, %c0_452, %c0_453], %410 {strides = array<i32>} : memref<8x4x64xf32, #tpu.memory_space<vmem>>, vector<8x4x64xf32>,
    %c0_454 = arith.constant 0 : index
    %c0_455 = arith.constant 0 : index
    %c0_456 = arith.constant 0 : index
    %412 = tpu.strided_load %arg17[%c0_454, %c0_455, %c0_456] {strides = array<i32: 1, 2, 1>} : memref<8x4x64xf32, #tpu.memory_space<vmem>>, vector<8x2x64xf32>
    %c0_457 = arith.constant 0 : index
    %c1_458 = arith.constant 1 : index
    %c0_459 = arith.constant 0 : index
    %413 = tpu.strided_load %arg17[%c0_457, %c1_458, %c0_459] {strides = array<i32: 1, 2, 1>} : memref<8x4x64xf32, #tpu.memory_space<vmem>>, vector<8x2x64xf32>
    %414 = arith.maximumf %412, %413 : vector<8x2x64xf32>
    %415 = vector.shape_cast %414 : vector<8x2x64xf32> to vector<4x2x2x64xf32>
    %416 = vector.extract_strided_slice %415 {offsets = [0, 0, 0, 0], sizes = [4, 1, 2, 64], strides = [1, 1, 1, 1]} : vector<4x2x2x64xf32> to vector<4x1x2x64xf32>
    %417 = vector.shape_cast %416 : vector<4x1x2x64xf32> to vector<4x2x64xf32>
    %418 = vector.extract_strided_slice %415 {offsets = [0, 1, 0, 0], sizes = [4, 1, 2, 64], strides = [1, 1, 1, 1]} : vector<4x2x2x64xf32> to vector<4x1x2x64xf32>
    %419 = vector.shape_cast %418 : vector<4x1x2x64xf32> to vector<4x2x64xf32>
    %420 = arith.maximumf %417, %419 : vector<4x2x64xf32>
    %421 = vector.shape_cast %420 : vector<4x2x64xf32> to vector<2x2x2x64xf32>
    %cst_460 = arith.constant 0.000000e+00 : f32
    %422 = vector.broadcast %cst_460 : f32 to vector<2x2x6x64xf32>
    %c0_461 = arith.constant 0 : index
    %c0_462 = arith.constant 0 : index
    %c0_463 = arith.constant 0 : index
    %c0_464 = arith.constant 0 : index
    %423 = vector.load %arg18[%c0_461, %c0_462, %c0_463, %c0_464] : memref<2x6x6x64xf32, #tpu.memory_space<vmem>>, vector<2x2x6x64xf32>
    tpu.vector_store %arg18[%c0_461, %c0_462, %c0_463, %c0_464], %422 {strides = array<i32>} : memref<2x6x6x64xf32, #tpu.memory_space<vmem>>, vector<2x2x6x64xf32>,
    %c0_465 = arith.constant 0 : index
    %c4_466 = arith.constant 4 : index
    %c0_467 = arith.constant 0 : index
    %c0_468 = arith.constant 0 : index
    %424 = vector.load %arg18[%c0_465, %c4_466, %c0_467, %c0_468] : memref<2x6x6x64xf32, #tpu.memory_space<vmem>>, vector<2x2x6x64xf32>
    tpu.vector_store %arg18[%c0_465, %c4_466, %c0_467, %c0_468], %422 {strides = array<i32>} : memref<2x6x6x64xf32, #tpu.memory_space<vmem>>, vector<2x2x6x64xf32>,
    %cst_469 = arith.constant 0.000000e+00 : f32
    %425 = vector.broadcast %cst_469 : f32 to vector<2x2x2x64xf32>
    %c0_470 = arith.constant 0 : index
    %c2_471 = arith.constant 2 : index
    %c0_472 = arith.constant 0 : index
    %c0_473 = arith.constant 0 : index
    %426 = vector.load %arg18[%c0_470, %c2_471, %c0_472, %c0_473] : memref<2x6x6x64xf32, #tpu.memory_space<vmem>>, vector<2x2x2x64xf32>
    tpu.vector_store %arg18[%c0_470, %c2_471, %c0_472, %c0_473], %425 {strides = array<i32>} : memref<2x6x6x64xf32, #tpu.memory_space<vmem>>, vector<2x2x2x64xf32>,
    %c0_474 = arith.constant 0 : index
    %c2_475 = arith.constant 2 : index
    %c4_476 = arith.constant 4 : index
    %c0_477 = arith.constant 0 : index
    %427 = vector.load %arg18[%c0_474, %c2_475, %c4_476, %c0_477] : memref<2x6x6x64xf32, #tpu.memory_space<vmem>>, vector<2x2x2x64xf32>
    tpu.vector_store %arg18[%c0_474, %c2_475, %c4_476, %c0_477], %425 {strides = array<i32>} : memref<2x6x6x64xf32, #tpu.memory_space<vmem>>, vector<2x2x2x64xf32>,
    %c0_478 = arith.constant 0 : index
    %c2_479 = arith.constant 2 : index
    %c2_480 = arith.constant 2 : index
    %c0_481 = arith.constant 0 : index
    %428 = vector.load %arg18[%c0_478, %c2_479, %c2_480, %c0_481] : memref<2x6x6x64xf32, #tpu.memory_space<vmem>>, vector<2x2x2x64xf32>
    tpu.vector_store %arg18[%c0_478, %c2_479, %c2_480, %c0_481], %421 {strides = array<i32>} : memref<2x6x6x64xf32, #tpu.memory_space<vmem>>, vector<2x2x2x64xf32>,
    %c0_482 = arith.constant 0 : index
    %c0_483 = arith.constant 0 : index
    %429 = vector.load %arg9[%c0_482, %c0_483] : memref<1x128xf32, #tpu.memory_space<vmem>>, vector<1x128xf32>
    %430 = vector.shape_cast %429 : vector<1x128xf32> to vector<1x128xf32>
    %431 = vector.broadcast %430 : vector<1x128xf32> to vector<8x128xf32>
    %c0_484 = arith.constant 0 : index
    %c0_485 = arith.constant 0 : index
    %c0_486 = arith.constant 0 : index
    %c0_487 = arith.constant 0 : index
    %432 = vector.load %arg18[%c0_484, %c0_485, %c0_486, %c0_487] : memref<2x6x6x64xf32, #tpu.memory_space<vmem>>, vector<2x2x2x64xf32>
    %433 = vector.shape_cast %432 : vector<2x2x2x64xf32> to vector<8x64xf32>
    %434 = arith.truncf %433 : vector<8x64xf32> to vector<8x64xbf16>
    %c0_488 = arith.constant 0 : index
    %c0_489 = arith.constant 0 : index
    %c0_490 = arith.constant 0 : index
    %435 = vector.load %arg8[%c0_488, %c0_489, %c0_490] : memref<25x64x128xbf16, #tpu.memory_space<vmem>>, vector<1x64x128xbf16>
    %436 = vector.shape_cast %435 : vector<1x64x128xbf16> to vector<64x128xbf16>
    %cst_491 = arith.constant dense<0.000000e+00> : vector<8x128xf32>
    %437 = tpu.matmul %434, %436, %cst_491 {dimension_numbers = #tpu.dot_dimension_numbers<[1], [0], [0], [1], [0, 0, 1, 1], [], []>} : vector<8x64xbf16>, vector<64x128xbf16>, vector<8x128xf32> -> vector<8x128xf32>
    %438 = arith.addf %431, %437 : vector<8x128xf32>
    %c0_492 = arith.constant 0 : index
    %c0_493 = arith.constant 0 : index
    %c1_494 = arith.constant 1 : index
    %c0_495 = arith.constant 0 : index
    %439 = vector.load %arg18[%c0_492, %c0_493, %c1_494, %c0_495] : memref<2x6x6x64xf32, #tpu.memory_space<vmem>>, vector<2x2x2x64xf32>
    %440 = vector.shape_cast %439 : vector<2x2x2x64xf32> to vector<8x64xf32>
    %441 = arith.truncf %440 : vector<8x64xf32> to vector<8x64xbf16>
    %c1_496 = arith.constant 1 : index
    %c0_497 = arith.constant 0 : index
    %c0_498 = arith.constant 0 : index
    %442 = vector.load %arg8[%c1_496, %c0_497, %c0_498] : memref<25x64x128xbf16, #tpu.memory_space<vmem>>, vector<1x64x128xbf16>
    %443 = vector.shape_cast %442 : vector<1x64x128xbf16> to vector<64x128xbf16>
    %cst_499 = arith.constant dense<0.000000e+00> : vector<8x128xf32>
    %444 = tpu.matmul %441, %443, %cst_499 {dimension_numbers = #tpu.dot_dimension_numbers<[1], [0], [0], [1], [0, 0, 1, 1], [], []>} : vector<8x64xbf16>, vector<64x128xbf16>, vector<8x128xf32> -> vector<8x128xf32>
    %445 = arith.addf %438, %444 : vector<8x128xf32>
    %c0_500 = arith.constant 0 : index
    %c0_501 = arith.constant 0 : index
    %c2_502 = arith.constant 2 : index
    %c0_503 = arith.constant 0 : index
    %446 = vector.load %arg18[%c0_500, %c0_501, %c2_502, %c0_503] : memref<2x6x6x64xf32, #tpu.memory_space<vmem>>, vector<2x2x2x64xf32>
    %447 = vector.shape_cast %446 : vector<2x2x2x64xf32> to vector<8x64xf32>
    %448 = arith.truncf %447 : vector<8x64xf32> to vector<8x64xbf16>
    %c2_504 = arith.constant 2 : index
    %c0_505 = arith.constant 0 : index
    %c0_506 = arith.constant 0 : index
    %449 = vector.load %arg8[%c2_504, %c0_505, %c0_506] : memref<25x64x128xbf16, #tpu.memory_space<vmem>>, vector<1x64x128xbf16>
    %450 = vector.shape_cast %449 : vector<1x64x128xbf16> to vector<64x128xbf16>
    %cst_507 = arith.constant dense<0.000000e+00> : vector<8x128xf32>
    %451 = tpu.matmul %448, %450, %cst_507 {dimension_numbers = #tpu.dot_dimension_numbers<[1], [0], [0], [1], [0, 0, 1, 1], [], []>} : vector<8x64xbf16>, vector<64x128xbf16>, vector<8x128xf32> -> vector<8x128xf32>
    %452 = arith.addf %445, %451 : vector<8x128xf32>
    %c0_508 = arith.constant 0 : index
    %c0_509 = arith.constant 0 : index
    %c3_510 = arith.constant 3 : index
    %c0_511 = arith.constant 0 : index
    %453 = vector.load %arg18[%c0_508, %c0_509, %c3_510, %c0_511] : memref<2x6x6x64xf32, #tpu.memory_space<vmem>>, vector<2x2x2x64xf32>
    %454 = vector.shape_cast %453 : vector<2x2x2x64xf32> to vector<8x64xf32>
    %455 = arith.truncf %454 : vector<8x64xf32> to vector<8x64xbf16>
    %c3_512 = arith.constant 3 : index
    %c0_513 = arith.constant 0 : index
    %c0_514 = arith.constant 0 : index
    %456 = vector.load %arg8[%c3_512, %c0_513, %c0_514] : memref<25x64x128xbf16, #tpu.memory_space<vmem>>, vector<1x64x128xbf16>
    %457 = vector.shape_cast %456 : vector<1x64x128xbf16> to vector<64x128xbf16>
    %cst_515 = arith.constant dense<0.000000e+00> : vector<8x128xf32>
    %458 = tpu.matmul %455, %457, %cst_515 {dimension_numbers = #tpu.dot_dimension_numbers<[1], [0], [0], [1], [0, 0, 1, 1], [], []>} : vector<8x64xbf16>, vector<64x128xbf16>, vector<8x128xf32> -> vector<8x128xf32>
    %459 = arith.addf %452, %458 : vector<8x128xf32>
    %c0_516 = arith.constant 0 : index
    %c0_517 = arith.constant 0 : index
    %c4_518 = arith.constant 4 : index
    %c0_519 = arith.constant 0 : index
    %460 = vector.load %arg18[%c0_516, %c0_517, %c4_518, %c0_519] : memref<2x6x6x64xf32, #tpu.memory_space<vmem>>, vector<2x2x2x64xf32>
    %461 = vector.shape_cast %460 : vector<2x2x2x64xf32> to vector<8x64xf32>
    %462 = arith.truncf %461 : vector<8x64xf32> to vector<8x64xbf16>
    %c4_520 = arith.constant 4 : index
    %c0_521 = arith.constant 0 : index
    %c0_522 = arith.constant 0 : index
    %463 = vector.load %arg8[%c4_520, %c0_521, %c0_522] : memref<25x64x128xbf16, #tpu.memory_space<vmem>>, vector<1x64x128xbf16>
    %464 = vector.shape_cast %463 : vector<1x64x128xbf16> to vector<64x128xbf16>
    %cst_523 = arith.constant dense<0.000000e+00> : vector<8x128xf32>
    %465 = tpu.matmul %462, %464, %cst_523 {dimension_numbers = #tpu.dot_dimension_numbers<[1], [0], [0], [1], [0, 0, 1, 1], [], []>} : vector<8x64xbf16>, vector<64x128xbf16>, vector<8x128xf32> -> vector<8x128xf32>
    %466 = arith.addf %459, %465 : vector<8x128xf32>
    %c0_524 = arith.constant 0 : index
    %c1_525 = arith.constant 1 : index
    %c0_526 = arith.constant 0 : index
    %c0_527 = arith.constant 0 : index
    %467 = vector.load %arg18[%c0_524, %c1_525, %c0_526, %c0_527] : memref<2x6x6x64xf32, #tpu.memory_space<vmem>>, vector<2x2x2x64xf32>
    %468 = vector.shape_cast %467 : vector<2x2x2x64xf32> to vector<8x64xf32>
    %469 = arith.truncf %468 : vector<8x64xf32> to vector<8x64xbf16>
    %c5_528 = arith.constant 5 : index
    %c0_529 = arith.constant 0 : index
    %c0_530 = arith.constant 0 : index
    %470 = vector.load %arg8[%c5_528, %c0_529, %c0_530] : memref<25x64x128xbf16, #tpu.memory_space<vmem>>, vector<1x64x128xbf16>
    %471 = vector.shape_cast %470 : vector<1x64x128xbf16> to vector<64x128xbf16>
    %cst_531 = arith.constant dense<0.000000e+00> : vector<8x128xf32>
    %472 = tpu.matmul %469, %471, %cst_531 {dimension_numbers = #tpu.dot_dimension_numbers<[1], [0], [0], [1], [0, 0, 1, 1], [], []>} : vector<8x64xbf16>, vector<64x128xbf16>, vector<8x128xf32> -> vector<8x128xf32>
    %473 = arith.addf %466, %472 : vector<8x128xf32>
    %c0_532 = arith.constant 0 : index
    %c1_533 = arith.constant 1 : index
    %c1_534 = arith.constant 1 : index
    %c0_535 = arith.constant 0 : index
    %474 = vector.load %arg18[%c0_532, %c1_533, %c1_534, %c0_535] : memref<2x6x6x64xf32, #tpu.memory_space<vmem>>, vector<2x2x2x64xf32>
    %475 = vector.shape_cast %474 : vector<2x2x2x64xf32> to vector<8x64xf32>
    %476 = arith.truncf %475 : vector<8x64xf32> to vector<8x64xbf16>
    %c6_536 = arith.constant 6 : index
    %c0_537 = arith.constant 0 : index
    %c0_538 = arith.constant 0 : index
    %477 = vector.load %arg8[%c6_536, %c0_537, %c0_538] : memref<25x64x128xbf16, #tpu.memory_space<vmem>>, vector<1x64x128xbf16>
    %478 = vector.shape_cast %477 : vector<1x64x128xbf16> to vector<64x128xbf16>
    %cst_539 = arith.constant dense<0.000000e+00> : vector<8x128xf32>
    %479 = tpu.matmul %476, %478, %cst_539 {dimension_numbers = #tpu.dot_dimension_numbers<[1], [0], [0], [1], [0, 0, 1, 1], [], []>} : vector<8x64xbf16>, vector<64x128xbf16>, vector<8x128xf32> -> vector<8x128xf32>
    %480 = arith.addf %473, %479 : vector<8x128xf32>
    %c0_540 = arith.constant 0 : index
    %c1_541 = arith.constant 1 : index
    %c2_542 = arith.constant 2 : index
    %c0_543 = arith.constant 0 : index
    %481 = vector.load %arg18[%c0_540, %c1_541, %c2_542, %c0_543] : memref<2x6x6x64xf32, #tpu.memory_space<vmem>>, vector<2x2x2x64xf32>
    %482 = vector.shape_cast %481 : vector<2x2x2x64xf32> to vector<8x64xf32>
    %483 = arith.truncf %482 : vector<8x64xf32> to vector<8x64xbf16>
    %c7_544 = arith.constant 7 : index
    %c0_545 = arith.constant 0 : index
    %c0_546 = arith.constant 0 : index
    %484 = vector.load %arg8[%c7_544, %c0_545, %c0_546] : memref<25x64x128xbf16, #tpu.memory_space<vmem>>, vector<1x64x128xbf16>
    %485 = vector.shape_cast %484 : vector<1x64x128xbf16> to vector<64x128xbf16>
    %cst_547 = arith.constant dense<0.000000e+00> : vector<8x128xf32>
    %486 = tpu.matmul %483, %485, %cst_547 {dimension_numbers = #tpu.dot_dimension_numbers<[1], [0], [0], [1], [0, 0, 1, 1], [], []>} : vector<8x64xbf16>, vector<64x128xbf16>, vector<8x128xf32> -> vector<8x128xf32>
    %487 = arith.addf %480, %486 : vector<8x128xf32>
    %c0_548 = arith.constant 0 : index
    %c1_549 = arith.constant 1 : index
    %c3_550 = arith.constant 3 : index
    %c0_551 = arith.constant 0 : index
    %488 = vector.load %arg18[%c0_548, %c1_549, %c3_550, %c0_551] : memref<2x6x6x64xf32, #tpu.memory_space<vmem>>, vector<2x2x2x64xf32>
    %489 = vector.shape_cast %488 : vector<2x2x2x64xf32> to vector<8x64xf32>
    %490 = arith.truncf %489 : vector<8x64xf32> to vector<8x64xbf16>
    %c8_552 = arith.constant 8 : index
    %c0_553 = arith.constant 0 : index
    %c0_554 = arith.constant 0 : index
    %491 = vector.load %arg8[%c8_552, %c0_553, %c0_554] : memref<25x64x128xbf16, #tpu.memory_space<vmem>>, vector<1x64x128xbf16>
    %492 = vector.shape_cast %491 : vector<1x64x128xbf16> to vector<64x128xbf16>
    %cst_555 = arith.constant dense<0.000000e+00> : vector<8x128xf32>
    %493 = tpu.matmul %490, %492, %cst_555 {dimension_numbers = #tpu.dot_dimension_numbers<[1], [0], [0], [1], [0, 0, 1, 1], [], []>} : vector<8x64xbf16>, vector<64x128xbf16>, vector<8x128xf32> -> vector<8x128xf32>
    %494 = arith.addf %487, %493 : vector<8x128xf32>
    %c0_556 = arith.constant 0 : index
    %c1_557 = arith.constant 1 : index
    %c4_558 = arith.constant 4 : index
    %c0_559 = arith.constant 0 : index
    %495 = vector.load %arg18[%c0_556, %c1_557, %c4_558, %c0_559] : memref<2x6x6x64xf32, #tpu.memory_space<vmem>>, vector<2x2x2x64xf32>
    %496 = vector.shape_cast %495 : vector<2x2x2x64xf32> to vector<8x64xf32>
    %497 = arith.truncf %496 : vector<8x64xf32> to vector<8x64xbf16>
    %c9_560 = arith.constant 9 : index
    %c0_561 = arith.constant 0 : index
    %c0_562 = arith.constant 0 : index
    %498 = vector.load %arg8[%c9_560, %c0_561, %c0_562] : memref<25x64x128xbf16, #tpu.memory_space<vmem>>, vector<1x64x128xbf16>
    %499 = vector.shape_cast %498 : vector<1x64x128xbf16> to vector<64x128xbf16>
    %cst_563 = arith.constant dense<0.000000e+00> : vector<8x128xf32>
    %500 = tpu.matmul %497, %499, %cst_563 {dimension_numbers = #tpu.dot_dimension_numbers<[1], [0], [0], [1], [0, 0, 1, 1], [], []>} : vector<8x64xbf16>, vector<64x128xbf16>, vector<8x128xf32> -> vector<8x128xf32>
    %501 = arith.addf %494, %500 : vector<8x128xf32>
    %c0_564 = arith.constant 0 : index
    %c2_565 = arith.constant 2 : index
    %c0_566 = arith.constant 0 : index
    %c0_567 = arith.constant 0 : index
    %502 = vector.load %arg18[%c0_564, %c2_565, %c0_566, %c0_567] : memref<2x6x6x64xf32, #tpu.memory_space<vmem>>, vector<2x2x2x64xf32>
    %503 = vector.shape_cast %502 : vector<2x2x2x64xf32> to vector<8x64xf32>
    %504 = arith.truncf %503 : vector<8x64xf32> to vector<8x64xbf16>
    %c10_568 = arith.constant 10 : index
    %c0_569 = arith.constant 0 : index
    %c0_570 = arith.constant 0 : index
    %505 = vector.load %arg8[%c10_568, %c0_569, %c0_570] : memref<25x64x128xbf16, #tpu.memory_space<vmem>>, vector<1x64x128xbf16>
    %506 = vector.shape_cast %505 : vector<1x64x128xbf16> to vector<64x128xbf16>
    %cst_571 = arith.constant dense<0.000000e+00> : vector<8x128xf32>
    %507 = tpu.matmul %504, %506, %cst_571 {dimension_numbers = #tpu.dot_dimension_numbers<[1], [0], [0], [1], [0, 0, 1, 1], [], []>} : vector<8x64xbf16>, vector<64x128xbf16>, vector<8x128xf32> -> vector<8x128xf32>
    %508 = arith.addf %501, %507 : vector<8x128xf32>
    %c0_572 = arith.constant 0 : index
    %c2_573 = arith.constant 2 : index
    %c1_574 = arith.constant 1 : index
    %c0_575 = arith.constant 0 : index
    %509 = vector.load %arg18[%c0_572, %c2_573, %c1_574, %c0_575] : memref<2x6x6x64xf32, #tpu.memory_space<vmem>>, vector<2x2x2x64xf32>
    %510 = vector.shape_cast %509 : vector<2x2x2x64xf32> to vector<8x64xf32>
    %511 = arith.truncf %510 : vector<8x64xf32> to vector<8x64xbf16>
    %c11_576 = arith.constant 11 : index
    %c0_577 = arith.constant 0 : index
    %c0_578 = arith.constant 0 : index
    %512 = vector.load %arg8[%c11_576, %c0_577, %c0_578] : memref<25x64x128xbf16, #tpu.memory_space<vmem>>, vector<1x64x128xbf16>
    %513 = vector.shape_cast %512 : vector<1x64x128xbf16> to vector<64x128xbf16>
    %cst_579 = arith.constant dense<0.000000e+00> : vector<8x128xf32>
    %514 = tpu.matmul %511, %513, %cst_579 {dimension_numbers = #tpu.dot_dimension_numbers<[1], [0], [0], [1], [0, 0, 1, 1], [], []>} : vector<8x64xbf16>, vector<64x128xbf16>, vector<8x128xf32> -> vector<8x128xf32>
    %515 = arith.addf %508, %514 : vector<8x128xf32>
    %c0_580 = arith.constant 0 : index
    %c2_581 = arith.constant 2 : index
    %c2_582 = arith.constant 2 : index
    %c0_583 = arith.constant 0 : index
    %516 = vector.load %arg18[%c0_580, %c2_581, %c2_582, %c0_583] : memref<2x6x6x64xf32, #tpu.memory_space<vmem>>, vector<2x2x2x64xf32>
    %517 = vector.shape_cast %516 : vector<2x2x2x64xf32> to vector<8x64xf32>
    %518 = arith.truncf %517 : vector<8x64xf32> to vector<8x64xbf16>
    %c12_584 = arith.constant 12 : index
    %c0_585 = arith.constant 0 : index
    %c0_586 = arith.constant 0 : index
    %519 = vector.load %arg8[%c12_584, %c0_585, %c0_586] : memref<25x64x128xbf16, #tpu.memory_space<vmem>>, vector<1x64x128xbf16>
    %520 = vector.shape_cast %519 : vector<1x64x128xbf16> to vector<64x128xbf16>
    %cst_587 = arith.constant dense<0.000000e+00> : vector<8x128xf32>
    %521 = tpu.matmul %518, %520, %cst_587 {dimension_numbers = #tpu.dot_dimension_numbers<[1], [0], [0], [1], [0, 0, 1, 1], [], []>} : vector<8x64xbf16>, vector<64x128xbf16>, vector<8x128xf32> -> vector<8x128xf32>
    %522 = arith.addf %515, %521 : vector<8x128xf32>
    %c0_588 = arith.constant 0 : index
    %c2_589 = arith.constant 2 : index
    %c3_590 = arith.constant 3 : index
    %c0_591 = arith.constant 0 : index
    %523 = vector.load %arg18[%c0_588, %c2_589, %c3_590, %c0_591] : memref<2x6x6x64xf32, #tpu.memory_space<vmem>>, vector<2x2x2x64xf32>
    %524 = vector.shape_cast %523 : vector<2x2x2x64xf32> to vector<8x64xf32>
    %525 = arith.truncf %524 : vector<8x64xf32> to vector<8x64xbf16>
    %c13_592 = arith.constant 13 : index
    %c0_593 = arith.constant 0 : index
    %c0_594 = arith.constant 0 : index
    %526 = vector.load %arg8[%c13_592, %c0_593, %c0_594] : memref<25x64x128xbf16, #tpu.memory_space<vmem>>, vector<1x64x128xbf16>
    %527 = vector.shape_cast %526 : vector<1x64x128xbf16> to vector<64x128xbf16>
    %cst_595 = arith.constant dense<0.000000e+00> : vector<8x128xf32>
    %528 = tpu.matmul %525, %527, %cst_595 {dimension_numbers = #tpu.dot_dimension_numbers<[1], [0], [0], [1], [0, 0, 1, 1], [], []>} : vector<8x64xbf16>, vector<64x128xbf16>, vector<8x128xf32> -> vector<8x128xf32>
    %529 = arith.addf %522, %528 : vector<8x128xf32>
    %c0_596 = arith.constant 0 : index
    %c2_597 = arith.constant 2 : index
    %c4_598 = arith.constant 4 : index
    %c0_599 = arith.constant 0 : index
    %530 = vector.load %arg18[%c0_596, %c2_597, %c4_598, %c0_599] : memref<2x6x6x64xf32, #tpu.memory_space<vmem>>, vector<2x2x2x64xf32>
    %531 = vector.shape_cast %530 : vector<2x2x2x64xf32> to vector<8x64xf32>
    %532 = arith.truncf %531 : vector<8x64xf32> to vector<8x64xbf16>
    %c14_600 = arith.constant 14 : index
    %c0_601 = arith.constant 0 : index
    %c0_602 = arith.constant 0 : index
    %533 = vector.load %arg8[%c14_600, %c0_601, %c0_602] : memref<25x64x128xbf16, #tpu.memory_space<vmem>>, vector<1x64x128xbf16>
    %534 = vector.shape_cast %533 : vector<1x64x128xbf16> to vector<64x128xbf16>
    %cst_603 = arith.constant dense<0.000000e+00> : vector<8x128xf32>
    %535 = tpu.matmul %532, %534, %cst_603 {dimension_numbers = #tpu.dot_dimension_numbers<[1], [0], [0], [1], [0, 0, 1, 1], [], []>} : vector<8x64xbf16>, vector<64x128xbf16>, vector<8x128xf32> -> vector<8x128xf32>
    %536 = arith.addf %529, %535 : vector<8x128xf32>
    %c0_604 = arith.constant 0 : index
    %c3_605 = arith.constant 3 : index
    %c0_606 = arith.constant 0 : index
    %c0_607 = arith.constant 0 : index
    %537 = vector.load %arg18[%c0_604, %c3_605, %c0_606, %c0_607] : memref<2x6x6x64xf32, #tpu.memory_space<vmem>>, vector<2x2x2x64xf32>
    %538 = vector.shape_cast %537 : vector<2x2x2x64xf32> to vector<8x64xf32>
    %539 = arith.truncf %538 : vector<8x64xf32> to vector<8x64xbf16>
    %c15_608 = arith.constant 15 : index
    %c0_609 = arith.constant 0 : index
    %c0_610 = arith.constant 0 : index
    %540 = vector.load %arg8[%c15_608, %c0_609, %c0_610] : memref<25x64x128xbf16, #tpu.memory_space<vmem>>, vector<1x64x128xbf16>
    %541 = vector.shape_cast %540 : vector<1x64x128xbf16> to vector<64x128xbf16>
    %cst_611 = arith.constant dense<0.000000e+00> : vector<8x128xf32>
    %542 = tpu.matmul %539, %541, %cst_611 {dimension_numbers = #tpu.dot_dimension_numbers<[1], [0], [0], [1], [0, 0, 1, 1], [], []>} : vector<8x64xbf16>, vector<64x128xbf16>, vector<8x128xf32> -> vector<8x128xf32>
    %543 = arith.addf %536, %542 : vector<8x128xf32>
    %c0_612 = arith.constant 0 : index
    %c3_613 = arith.constant 3 : index
    %c1_614 = arith.constant 1 : index
    %c0_615 = arith.constant 0 : index
    %544 = vector.load %arg18[%c0_612, %c3_613, %c1_614, %c0_615] : memref<2x6x6x64xf32, #tpu.memory_space<vmem>>, vector<2x2x2x64xf32>
    %545 = vector.shape_cast %544 : vector<2x2x2x64xf32> to vector<8x64xf32>
    %546 = arith.truncf %545 : vector<8x64xf32> to vector<8x64xbf16>
    %c16_616 = arith.constant 16 : index
    %c0_617 = arith.constant 0 : index
    %c0_618 = arith.constant 0 : index
    %547 = vector.load %arg8[%c16_616, %c0_617, %c0_618] : memref<25x64x128xbf16, #tpu.memory_space<vmem>>, vector<1x64x128xbf16>
    %548 = vector.shape_cast %547 : vector<1x64x128xbf16> to vector<64x128xbf16>
    %cst_619 = arith.constant dense<0.000000e+00> : vector<8x128xf32>
    %549 = tpu.matmul %546, %548, %cst_619 {dimension_numbers = #tpu.dot_dimension_numbers<[1], [0], [0], [1], [0, 0, 1, 1], [], []>} : vector<8x64xbf16>, vector<64x128xbf16>, vector<8x128xf32> -> vector<8x128xf32>
    %550 = arith.addf %543, %549 : vector<8x128xf32>
    %c0_620 = arith.constant 0 : index
    %c3_621 = arith.constant 3 : index
    %c2_622 = arith.constant 2 : index
    %c0_623 = arith.constant 0 : index
    %551 = vector.load %arg18[%c0_620, %c3_621, %c2_622, %c0_623] : memref<2x6x6x64xf32, #tpu.memory_space<vmem>>, vector<2x2x2x64xf32>
    %552 = vector.shape_cast %551 : vector<2x2x2x64xf32> to vector<8x64xf32>
    %553 = arith.truncf %552 : vector<8x64xf32> to vector<8x64xbf16>
    %c17_624 = arith.constant 17 : index
    %c0_625 = arith.constant 0 : index
    %c0_626 = arith.constant 0 : index
    %554 = vector.load %arg8[%c17_624, %c0_625, %c0_626] : memref<25x64x128xbf16, #tpu.memory_space<vmem>>, vector<1x64x128xbf16>
    %555 = vector.shape_cast %554 : vector<1x64x128xbf16> to vector<64x128xbf16>
    %cst_627 = arith.constant dense<0.000000e+00> : vector<8x128xf32>
    %556 = tpu.matmul %553, %555, %cst_627 {dimension_numbers = #tpu.dot_dimension_numbers<[1], [0], [0], [1], [0, 0, 1, 1], [], []>} : vector<8x64xbf16>, vector<64x128xbf16>, vector<8x128xf32> -> vector<8x128xf32>
    %557 = arith.addf %550, %556 : vector<8x128xf32>
    %c0_628 = arith.constant 0 : index
    %c3_629 = arith.constant 3 : index
    %c3_630 = arith.constant 3 : index
    %c0_631 = arith.constant 0 : index
    %558 = vector.load %arg18[%c0_628, %c3_629, %c3_630, %c0_631] : memref<2x6x6x64xf32, #tpu.memory_space<vmem>>, vector<2x2x2x64xf32>
    %559 = vector.shape_cast %558 : vector<2x2x2x64xf32> to vector<8x64xf32>
    %560 = arith.truncf %559 : vector<8x64xf32> to vector<8x64xbf16>
    %c18_632 = arith.constant 18 : index
    %c0_633 = arith.constant 0 : index
    %c0_634 = arith.constant 0 : index
    %561 = vector.load %arg8[%c18_632, %c0_633, %c0_634] : memref<25x64x128xbf16, #tpu.memory_space<vmem>>, vector<1x64x128xbf16>
    %562 = vector.shape_cast %561 : vector<1x64x128xbf16> to vector<64x128xbf16>
    %cst_635 = arith.constant dense<0.000000e+00> : vector<8x128xf32>
    %563 = tpu.matmul %560, %562, %cst_635 {dimension_numbers = #tpu.dot_dimension_numbers<[1], [0], [0], [1], [0, 0, 1, 1], [], []>} : vector<8x64xbf16>, vector<64x128xbf16>, vector<8x128xf32> -> vector<8x128xf32>
    %564 = arith.addf %557, %563 : vector<8x128xf32>
    %c0_636 = arith.constant 0 : index
    %c3_637 = arith.constant 3 : index
    %c4_638 = arith.constant 4 : index
    %c0_639 = arith.constant 0 : index
    %565 = vector.load %arg18[%c0_636, %c3_637, %c4_638, %c0_639] : memref<2x6x6x64xf32, #tpu.memory_space<vmem>>, vector<2x2x2x64xf32>
    %566 = vector.shape_cast %565 : vector<2x2x2x64xf32> to vector<8x64xf32>
    %567 = arith.truncf %566 : vector<8x64xf32> to vector<8x64xbf16>
    %c19_640 = arith.constant 19 : index
    %c0_641 = arith.constant 0 : index
    %c0_642 = arith.constant 0 : index
    %568 = vector.load %arg8[%c19_640, %c0_641, %c0_642] : memref<25x64x128xbf16, #tpu.memory_space<vmem>>, vector<1x64x128xbf16>
    %569 = vector.shape_cast %568 : vector<1x64x128xbf16> to vector<64x128xbf16>
    %cst_643 = arith.constant dense<0.000000e+00> : vector<8x128xf32>
    %570 = tpu.matmul %567, %569, %cst_643 {dimension_numbers = #tpu.dot_dimension_numbers<[1], [0], [0], [1], [0, 0, 1, 1], [], []>} : vector<8x64xbf16>, vector<64x128xbf16>, vector<8x128xf32> -> vector<8x128xf32>
    %571 = arith.addf %564, %570 : vector<8x128xf32>
    %c0_644 = arith.constant 0 : index
    %c4_645 = arith.constant 4 : index
    %c0_646 = arith.constant 0 : index
    %c0_647 = arith.constant 0 : index
    %572 = vector.load %arg18[%c0_644, %c4_645, %c0_646, %c0_647] : memref<2x6x6x64xf32, #tpu.memory_space<vmem>>, vector<2x2x2x64xf32>
    %573 = vector.shape_cast %572 : vector<2x2x2x64xf32> to vector<8x64xf32>
    %574 = arith.truncf %573 : vector<8x64xf32> to vector<8x64xbf16>
    %c20_648 = arith.constant 20 : index
    %c0_649 = arith.constant 0 : index
    %c0_650 = arith.constant 0 : index
    %575 = vector.load %arg8[%c20_648, %c0_649, %c0_650] : memref<25x64x128xbf16, #tpu.memory_space<vmem>>, vector<1x64x128xbf16>
    %576 = vector.shape_cast %575 : vector<1x64x128xbf16> to vector<64x128xbf16>
    %cst_651 = arith.constant dense<0.000000e+00> : vector<8x128xf32>
    %577 = tpu.matmul %574, %576, %cst_651 {dimension_numbers = #tpu.dot_dimension_numbers<[1], [0], [0], [1], [0, 0, 1, 1], [], []>} : vector<8x64xbf16>, vector<64x128xbf16>, vector<8x128xf32> -> vector<8x128xf32>
    %578 = arith.addf %571, %577 : vector<8x128xf32>
    %c0_652 = arith.constant 0 : index
    %c4_653 = arith.constant 4 : index
    %c1_654 = arith.constant 1 : index
    %c0_655 = arith.constant 0 : index
    %579 = vector.load %arg18[%c0_652, %c4_653, %c1_654, %c0_655] : memref<2x6x6x64xf32, #tpu.memory_space<vmem>>, vector<2x2x2x64xf32>
    %580 = vector.shape_cast %579 : vector<2x2x2x64xf32> to vector<8x64xf32>
    %581 = arith.truncf %580 : vector<8x64xf32> to vector<8x64xbf16>
    %c21_656 = arith.constant 21 : index
    %c0_657 = arith.constant 0 : index
    %c0_658 = arith.constant 0 : index
    %582 = vector.load %arg8[%c21_656, %c0_657, %c0_658] : memref<25x64x128xbf16, #tpu.memory_space<vmem>>, vector<1x64x128xbf16>
    %583 = vector.shape_cast %582 : vector<1x64x128xbf16> to vector<64x128xbf16>
    %cst_659 = arith.constant dense<0.000000e+00> : vector<8x128xf32>
    %584 = tpu.matmul %581, %583, %cst_659 {dimension_numbers = #tpu.dot_dimension_numbers<[1], [0], [0], [1], [0, 0, 1, 1], [], []>} : vector<8x64xbf16>, vector<64x128xbf16>, vector<8x128xf32> -> vector<8x128xf32>
    %585 = arith.addf %578, %584 : vector<8x128xf32>
    %c0_660 = arith.constant 0 : index
    %c4_661 = arith.constant 4 : index
    %c2_662 = arith.constant 2 : index
    %c0_663 = arith.constant 0 : index
    %586 = vector.load %arg18[%c0_660, %c4_661, %c2_662, %c0_663] : memref<2x6x6x64xf32, #tpu.memory_space<vmem>>, vector<2x2x2x64xf32>
    %587 = vector.shape_cast %586 : vector<2x2x2x64xf32> to vector<8x64xf32>
    %588 = arith.truncf %587 : vector<8x64xf32> to vector<8x64xbf16>
    %c22_664 = arith.constant 22 : index
    %c0_665 = arith.constant 0 : index
    %c0_666 = arith.constant 0 : index
    %589 = vector.load %arg8[%c22_664, %c0_665, %c0_666] : memref<25x64x128xbf16, #tpu.memory_space<vmem>>, vector<1x64x128xbf16>
    %590 = vector.shape_cast %589 : vector<1x64x128xbf16> to vector<64x128xbf16>
    %cst_667 = arith.constant dense<0.000000e+00> : vector<8x128xf32>
    %591 = tpu.matmul %588, %590, %cst_667 {dimension_numbers = #tpu.dot_dimension_numbers<[1], [0], [0], [1], [0, 0, 1, 1], [], []>} : vector<8x64xbf16>, vector<64x128xbf16>, vector<8x128xf32> -> vector<8x128xf32>
    %592 = arith.addf %585, %591 : vector<8x128xf32>
    %c0_668 = arith.constant 0 : index
    %c4_669 = arith.constant 4 : index
    %c3_670 = arith.constant 3 : index
    %c0_671 = arith.constant 0 : index
    %593 = vector.load %arg18[%c0_668, %c4_669, %c3_670, %c0_671] : memref<2x6x6x64xf32, #tpu.memory_space<vmem>>, vector<2x2x2x64xf32>
    %594 = vector.shape_cast %593 : vector<2x2x2x64xf32> to vector<8x64xf32>
    %595 = arith.truncf %594 : vector<8x64xf32> to vector<8x64xbf16>
    %c23_672 = arith.constant 23 : index
    %c0_673 = arith.constant 0 : index
    %c0_674 = arith.constant 0 : index
    %596 = vector.load %arg8[%c23_672, %c0_673, %c0_674] : memref<25x64x128xbf16, #tpu.memory_space<vmem>>, vector<1x64x128xbf16>
    %597 = vector.shape_cast %596 : vector<1x64x128xbf16> to vector<64x128xbf16>
    %cst_675 = arith.constant dense<0.000000e+00> : vector<8x128xf32>
    %598 = tpu.matmul %595, %597, %cst_675 {dimension_numbers = #tpu.dot_dimension_numbers<[1], [0], [0], [1], [0, 0, 1, 1], [], []>} : vector<8x64xbf16>, vector<64x128xbf16>, vector<8x128xf32> -> vector<8x128xf32>
    %599 = arith.addf %592, %598 : vector<8x128xf32>
    %c0_676 = arith.constant 0 : index
    %c4_677 = arith.constant 4 : index
    %c4_678 = arith.constant 4 : index
    %c0_679 = arith.constant 0 : index
    %600 = vector.load %arg18[%c0_676, %c4_677, %c4_678, %c0_679] : memref<2x6x6x64xf32, #tpu.memory_space<vmem>>, vector<2x2x2x64xf32>
    %601 = vector.shape_cast %600 : vector<2x2x2x64xf32> to vector<8x64xf32>
    %602 = arith.truncf %601 : vector<8x64xf32> to vector<8x64xbf16>
    %c24_680 = arith.constant 24 : index
    %c0_681 = arith.constant 0 : index
    %c0_682 = arith.constant 0 : index
    %603 = vector.load %arg8[%c24_680, %c0_681, %c0_682] : memref<25x64x128xbf16, #tpu.memory_space<vmem>>, vector<1x64x128xbf16>
    %604 = vector.shape_cast %603 : vector<1x64x128xbf16> to vector<64x128xbf16>
    %cst_683 = arith.constant dense<0.000000e+00> : vector<8x128xf32>
    %605 = tpu.matmul %602, %604, %cst_683 {dimension_numbers = #tpu.dot_dimension_numbers<[1], [0], [0], [1], [0, 0, 1, 1], [], []>} : vector<8x64xbf16>, vector<64x128xbf16>, vector<8x128xf32> -> vector<8x128xf32>
    %606 = arith.addf %599, %605 : vector<8x128xf32>
    %cst_684 = arith.constant 0.000000e+00 : f32
    %607 = vector.broadcast %cst_684 : f32 to vector<8x128xf32>
    %608 = arith.maximumf %606, %607 : vector<8x128xf32>
    %609 = vector.shape_cast %608 : vector<8x128xf32> to vector<4x2x128xf32>
    %c0_685 = arith.constant 0 : index
    %c0_686 = arith.constant 0 : index
    %c0_687 = arith.constant 0 : index
    %610 = vector.load %arg19[%c0_685, %c0_686, %c0_687] : memref<4x2x128xf32, #tpu.memory_space<vmem>>, vector<4x2x128xf32>
    tpu.vector_store %arg19[%c0_685, %c0_686, %c0_687], %609 {strides = array<i32>} : memref<4x2x128xf32, #tpu.memory_space<vmem>>, vector<4x2x128xf32>,
    %c0_688 = arith.constant 0 : index
    %c0_689 = arith.constant 0 : index
    %c0_690 = arith.constant 0 : index
    %611 = tpu.strided_load %arg19[%c0_688, %c0_689, %c0_690] {strides = array<i32: 1, 2, 1>} : memref<4x2x128xf32, #tpu.memory_space<vmem>>, vector<4x1x128xf32>
    %c0_691 = arith.constant 0 : index
    %c1_692 = arith.constant 1 : index
    %c0_693 = arith.constant 0 : index
    %612 = tpu.strided_load %arg19[%c0_691, %c1_692, %c0_693] {strides = array<i32: 1, 2, 1>} : memref<4x2x128xf32, #tpu.memory_space<vmem>>, vector<4x1x128xf32>
    %613 = arith.maximumf %611, %612 : vector<4x1x128xf32>
    %614 = vector.shape_cast %613 : vector<4x1x128xf32> to vector<2x2x1x128xf32>
    %615 = vector.extract_strided_slice %614 {offsets = [0, 0, 0, 0], sizes = [2, 1, 1, 128], strides = [1, 1, 1, 1]} : vector<2x2x1x128xf32> to vector<2x1x1x128xf32>
    %616 = vector.shape_cast %615 : vector<2x1x1x128xf32> to vector<2x1x128xf32>
    %617 = vector.extract_strided_slice %614 {offsets = [0, 1, 0, 0], sizes = [2, 1, 1, 128], strides = [1, 1, 1, 1]} : vector<2x2x1x128xf32> to vector<2x1x1x128xf32>
    %618 = vector.shape_cast %617 : vector<2x1x1x128xf32> to vector<2x1x128xf32>
    %619 = arith.maximumf %616, %618 : vector<2x1x128xf32>
    %620 = vector.shape_cast %619 : vector<2x1x128xf32> to vector<2x1x1x128xf32>
    %621 = vector.shape_cast %620 : vector<2x1x1x128xf32> to vector<2x1x128xf32>
    %cst_694 = arith.constant dense<0.000000e+00> : vector<2x128xf32>
    %622 = vector.multi_reduction <add>, %621, %cst_694 [1] : vector<2x1x128xf32> to vector<2x128xf32>
    %cst_695 = arith.constant 1.000000e+00 : f32
    %623 = vector.broadcast %cst_695 : f32 to vector<2x128xf32>
    %624 = arith.divf %622, %623 : vector<2x128xf32>
    %c0_696 = arith.constant 0 : index
    %c0_697 = arith.constant 0 : index
    %625 = vector.load %arg10[%c0_696, %c0_697] : memref<128x128xf32, #tpu.memory_space<vmem>>, vector<128x128xf32>
    %cst_698 = arith.constant dense<0.000000e+00> : vector<2x128xf32>
    %626 = tpu.matmul %624, %625, %cst_698 {dimension_numbers = #tpu.dot_dimension_numbers<[1], [0], [0], [1], [0, 0, 1, 1], [], []>} : vector<2x128xf32>, vector<128x128xf32>, vector<2x128xf32> -> vector<2x128xf32>
    %c0_699 = arith.constant 0 : index
    %c0_700 = arith.constant 0 : index
    %627 = vector.load %arg11[%c0_699, %c0_700] : memref<1x128xf32, #tpu.memory_space<vmem>>, vector<1x128xf32>
    %628 = vector.broadcast %627 : vector<1x128xf32> to vector<2x128xf32>
    %629 = arith.addf %626, %628 : vector<2x128xf32>
    %630 = vector.shape_cast %629 : vector<2x128xf32> to vector<1x2x128xf32>
    %c0_701 = arith.constant 0 : index
    %c0_702 = arith.constant 0 : index
    %c0_703 = arith.constant 0 : index
    %631 = vector.load %arg12[%c0_701, %c0_702, %c0_703] : memref<1x2x128xf32, #tpu.memory_space<vmem>>, vector<1x2x128xf32>
    tpu.vector_store %arg12[%c0_701, %c0_702, %c0_703], %630 {strides = array<i32>} : memref<1x2x128xf32, #tpu.memory_space<vmem>>, vector<1x2x128xf32>,
    return
  }
  func.func @transform_0(%arg0: i32) -> (i32, i32, i32) {
    %c0_i32 = arith.constant 0 : i32
    %c0_i32_0 = arith.constant 0 : i32
    %c0_i32_1 = arith.constant 0 : i32
    return %arg0, %c0_i32, %c0_i32_0 : i32, i32, i32
  }
  func.func @transform_1(%arg0: i32) -> (i32, i32) {
    %c0_i32 = arith.constant 0 : i32
    %c0_i32_0 = arith.constant 0 : i32
    %c0_i32_1 = arith.constant 0 : i32
    return %c0_i32, %c0_i32_0 : i32, i32
  }
  func.func @transform_2(%arg0: i32) -> (i32, i32) {
    %c0_i32 = arith.constant 0 : i32
    %c0_i32_0 = arith.constant 0 : i32
    %c0_i32_1 = arith.constant 0 : i32
    return %c0_i32, %c0_i32_0 : i32, i32
  }
  func.func @transform_3(%arg0: i32) -> (i32, i32, i32) {
    %c0_i32 = arith.constant 0 : i32
    %c0_i32_0 = arith.constant 0 : i32
    %c0_i32_1 = arith.constant 0 : i32
    %c0_i32_2 = arith.constant 0 : i32
    return %c0_i32, %c0_i32_0, %c0_i32_1 : i32, i32, i32
  }
  func.func @transform_4(%arg0: i32) -> (i32, i32) {
    %c0_i32 = arith.constant 0 : i32
    %c0_i32_0 = arith.constant 0 : i32
    %c0_i32_1 = arith.constant 0 : i32
    return %c0_i32, %c0_i32_0 : i32, i32
  }
  func.func @transform_5(%arg0: i32) -> (i32, i32, i32) {
    %c0_i32 = arith.constant 0 : i32
    %c0_i32_0 = arith.constant 0 : i32
    %c0_i32_1 = arith.constant 0 : i32
    %c0_i32_2 = arith.constant 0 : i32
    return %c0_i32, %c0_i32_0, %c0_i32_1 : i32, i32, i32
  }
  func.func @transform_6(%arg0: i32) -> (i32, i32) {
    %c0_i32 = arith.constant 0 : i32
    %c0_i32_0 = arith.constant 0 : i32
    %c0_i32_1 = arith.constant 0 : i32
    return %c0_i32, %c0_i32_0 : i32, i32
  }
  func.func @transform_7(%arg0: i32) -> (i32, i32, i32) {
    %c0_i32 = arith.constant 0 : i32
    %c0_i32_0 = arith.constant 0 : i32
    %c0_i32_1 = arith.constant 0 : i32
    %c0_i32_2 = arith.constant 0 : i32
    return %c0_i32, %c0_i32_0, %c0_i32_1 : i32, i32, i32
  }
  func.func @transform_8(%arg0: i32) -> (i32, i32) {
    %c0_i32 = arith.constant 0 : i32
    %c0_i32_0 = arith.constant 0 : i32
    %c0_i32_1 = arith.constant 0 : i32
    return %c0_i32, %c0_i32_0 : i32, i32
  }
  func.func @transform_9(%arg0: i32) -> (i32, i32) {
    %c0_i32 = arith.constant 0 : i32
    %c0_i32_0 = arith.constant 0 : i32
    %c0_i32_1 = arith.constant 0 : i32
    return %c0_i32, %c0_i32_0 : i32, i32
  }
  func.func @transform_10(%arg0: i32) -> (i32, i32) {
    %c0_i32 = arith.constant 0 : i32
    %c0_i32_0 = arith.constant 0 : i32
    %c0_i32_1 = arith.constant 0 : i32
    return %c0_i32, %c0_i32_0 : i32, i32
  }
  func.func @transform_11(%arg0: i32) -> (i32, i32, i32) {
    %c0_i32 = arith.constant 0 : i32
    %c0_i32_0 = arith.constant 0 : i32
    %c0_i32_1 = arith.constant 0 : i32
    return %arg0, %c0_i32, %c0_i32_0 : i32, i32, i32
  }
}

</mosaic_0001>

<bundles_post_ra>
// kernel: encoder_forward.1
= control target key start
LH: loop header
LB: loop body
LE: loop exit
PB: predicated region body
PF: predicated region fallthrough
CT: control target
= control target key end

     0   :  { %s12830_s0 = inlined_call_operand.vmem [shape: bf16[2,256,128], index: 0, kind: input, shape index: {}]   ;;  %s12831_s1 = inlined_call_operand.vmem [shape: bf16[128,128], index: 1, kind: input, shape index: {}]   ;;  %s12832_s2 = inlined_call_operand.vmem [shape: f32[1,128], index: 2, kind: input, shape index: {}]   ;;  %s12833_s3 = inlined_call_operand.vmem [shape: bf16[25,16,128], index: 3, kind: input, shape index: {}]   ;;  %s12834_s4 = inlined_call_operand.vmem [shape: f32[1,128], index: 4, kind: input, shape index: {}]   ;;  %s12835_s5 = inlined_call_operand.vmem [shape: bf16[25,32,128], index: 5, kind: input, shape index: {}]   ;;  %s12836_s6 = inlined_call_operand.vmem [shape: f32[1,128], index: 6, kind: input, shape index: {}]   ;;  %s12837_s7 = inlined_call_operand.vmem [shape: bf16[25,64,128], index: 7, kind: input, shape index: {}]   ;;  %s12838_s8 = inlined_call_operand.vmem [shape: f32[1,128], index: 8, kind: input, shape index: {}]   ;;  %s12839_s9 = inlined_call_operand.vmem [shape: f32[128,128], index: 9, kind: input, shape index: {}]   ;;  %s12840_s10 = inlined_call_operand.vmem [shape: f32[1,128], index: 10, kind: input, shape index: {}]   ;;  %s12841_s11 = inlined_call_operand.hbm [shape: f32[1,2,128], index: 11, kind: output, shape index: {}]  }
   0x1   :  { %v9704_v0 = vld [vmem:[%s12831_s1 + $0x38] sm:$0xff]  ;;  %v9703_v1 = vld [vmem:[%s12831_s1 + $0x30] sm:$0xff] }
   0x2   :  { %364 = vmatpush.bf16.msra.mxu0 %v9704_v0 }
   0x3   :  { %16 = vsyncpa [#allocation10], 0  ;;  %v9702_v2 = vld [vmem:[%s12831_s1 + $0x28] sm:$0xff]  ;;  %v9701_v3 = vld [vmem:[%s12831_s1 + $0x20] sm:$0xff]  ;;  %vm597_vm0 = vcmask 130048   ;;  %v12842_v23 = vmov 0.0  }
   0x4   :  { %v9700_v4 = vld [vmem:[%s12831_s1 + $0x18] sm:$0xff]  ;;  %v9699_v5 = vld [vmem:[%s12831_s1 + $0x10] sm:$0xff]  ;;  %v9698_v6 = vld [vmem:[%s12831_s1 + $0x8] sm:$0xff]  ;;  %837 = vst.msk [vmem:[#allocation3] sm:$0xff] %vm597_vm0, %v12842_v23  ;;  %vm838_vm1 = vcmask 125952   ;;  %vm856_vm2 = vcmask 123904  }
   0x5   :  { %v9697_v7 = vld [vmem:[%s12831_s1] sm:$0xff]  ;;  %v9666_v9 = vld [vmem:[%s12830_s0 + $0x8] sm:$0xff]  ;;  %v9667_v10 = vld [vmem:[%s12830_s0 + $0x10] sm:$0xff]  ;;  %840 = vst.msk [vmem:[#allocation3 + $0x10] sm:$0xff] %vm597_vm0, %v12842_v23  ;;  %vm3977_vm3 = vcmask 261120   ;;  %vm4091_vm4 = vcmask 254976  }
   0x6   :  { %365 = vmatpush.bf16.msra.mxu0 %v9703_v1  ;;  %v9665_v8 = vld [vmem:[%s12830_s0] sm:$0xff]  ;;  %v9668_v11 = vld [vmem:[%s12830_s0 + $0x18] sm:$0xff]  ;;  %v9670_v13 = vld [vmem:[%s12830_s0 + $0x28] sm:$0xff]  ;;  %842 = vst.msk [vmem:[#allocation3 + $0xc0] sm:$0xff] %vm597_vm0, %v12842_v23  ;;  %vm4108_vm5 = vcmask 257024   ;;  %vm6366_vm6 = vcmask 521216  }
   0x7   :  { %v9669_v12 = vld [vmem:[%s12830_s0 + $0x20] sm:$0xff]  ;;  %v9671_v14 = vld [vmem:[%s12830_s0 + $0x30] sm:$0xff]  ;;  %v9672_v15 = vld [vmem:[%s12830_s0 + $0x38] sm:$0xff]  ;;  %844 = vst.msk [vmem:[#allocation3 + $0xd0] sm:$0xff] %vm597_vm0, %v12842_v23  ;;  %vm6377_vm7 = vcmask 517120   ;;  %vm6314_vm8 = vcmask 519168  }
   0x8   :  { %v10070_v16 = vld [vmem:[%s12832_s2] ss:$0 sm:$0xff]  ;;  %847 = vst.msk [vmem:[#allocation3 + $0xa0] sm:$0xff] %vm597_vm0, %v12842_v23  ;;  %v9674_v25 = vld [vmem:[%s12830_s0 + $0x48] sm:$0xff]  ;;  %v9707_v34 = vld [vmem:[%s12833_s3 + $0x10] sm:$0xff]  ;;  %vm6444_vm9 = vcmask 523264  }
   0x9   :  { %v9673_v17 = vld [vmem:[%s12830_s0 + $0x40] sm:$0xff]  ;;  %849 = vst.msk [vmem:[#allocation3 + $0xb0] sm:$0xff] %vm597_vm0, %v12842_v23  ;;  %v9706_v33 = vld [vmem:[%s12833_s3 + $0x8] sm:$0xff]  ;;  %v9675_v35 = vld [vmem:[%s12830_s0 + $0x50] sm:$0xff]  ;;  %1216 = vmatpush.bf16.msra.mxu3 %v9707_v34  ;;  %vm8154_vm10 = vcmask 1041409  }
   0xa   :  { %366 = vmatpush.bf16.msra.mxu0 %v9702_v2  ;;  %851 = vst.msk [vmem:[#allocation3 + $0x160] sm:$0xff] %vm597_vm0, %v12842_v23  ;;  %v9705_v32 = vld [vmem:[%s12833_s3] sm:$0xff]  ;;  %1094 = vmatpush.bf16.msra.mxu2 %v9706_v33  ;;  %v9676_v58 = vld [vmem:[%s12830_s0 + $0x58] sm:$0xff] }
   0xb   :  { %853 = vst.msk [vmem:[#allocation3 + $0x170] sm:$0xff] %vm597_vm0, %v12842_v23  ;;  %972 = vmatpush.bf16.msra.mxu1 %v9705_v32  ;;  %v909_v37 = vld [vmem:[#allocation3] sm:$0xff]  ;;  %v9677_v1 = vld [vmem:[%s12830_s0 + $0x60] sm:$0xff] }
   0xc   :  { %839 = vst.msk [vmem:[#allocation3 + $0x8] sm:$0xf] %vm838_vm1, %v12842_v23  ;;  %v910_v38 = vld [vmem:[#allocation3 + $0x10] sm:$0xff] }
   0xd   :  { %841 = vst.msk [vmem:[#allocation3 + $0x18] sm:$0xf] %vm838_vm1, %v12842_v23  ;;  %v925_v42 = vpack.c.bf16 %v910_v38, %v909_v37 }
   0xe   :  { %367 = vmatpush.bf16.msra.mxu0 %v9701_v3  ;;  %843 = vst.msk [vmem:[#allocation3 + $0xc8] sm:$0xf] %vm838_vm1, %v12842_v23 }
   0xf   :  { %845 = vst.msk [vmem:[#allocation3 + $0xd8] sm:$0xf] %vm838_vm1, %v12842_v23  ;;  %8358 = vmatmul.msk.bf16.vlgmr.msra.gmra.mxu1 %vm597_vm0, %v925_v42  ;;  %v9679_v42 = vld [vmem:[%s12830_s0 + $0x70] sm:$0xff] }
  0x10   :  { %848 = vst.msk [vmem:[#allocation3 + $0xa8] sm:$0xf] %vm838_vm1, %v12842_v23 }
  0x11   :  { %850 = vst.msk [vmem:[#allocation3 + $0xb8] sm:$0xf] %vm838_vm1, %v12842_v23 }
  0x12   :  { %368 = vmatpush.bf16.msra.mxu0 %v9700_v4  ;;  %852 = vst.msk [vmem:[#allocation3 + $0x168] sm:$0xf] %vm838_vm1, %v12842_v23 }
  0x13   :  { %854 = vst.msk [vmem:[#allocation3 + $0x178] sm:$0xf] %vm838_vm1, %v12842_v23  ;;  %v1030_v39 = vld [vmem:[#allocation3 + $0x1] sm:$0xff] }
  0x14   :  { %857 = vst.msk [vmem:[#allocation3 + $0x20] sm:$0x3] %vm856_vm2, %v12842_v23  ;;  %v1031_v43 = vld [vmem:[#allocation3 + $0x11] sm:$0xff]  ;;  %v1152_v44 = vld [vmem:[#allocation3 + $0x2] sm:$0xff] }
  0x15   :  { %858 = vst.msk [vmem:[#allocation3 + $0x30] sm:$0x3] %vm856_vm2, %v12842_v23  ;;  %v1046_v46 = vpack.c.bf16 %v1031_v43, %v1030_v39  ;;  %v1153_v47 = vld [vmem:[#allocation3 + $0x12] sm:$0xff] }
  0x16   :  { %369 = vmatpush.bf16.msra.mxu0 %v9699_v5  ;;  %859 = vst.msk [vmem:[#allocation3 + $0x40] sm:$0x3] %vm856_vm2, %v12842_v23  ;;  %v1168_v49 = vpack.c.bf16 %v1153_v47, %v1152_v44 }
  0x17   :  { %860 = vst.msk [vmem:[#allocation3 + $0x50] sm:$0x3] %vm856_vm2, %v12842_v23  ;;  %8372 = vmatmul.msk.bf16.vlgmr.msra.gmra.mxu2 %vm597_vm0, %v1046_v46 }
  0x18   :  { %861 = vst.msk [vmem:[#allocation3 + $0x60] sm:$0x3] %vm856_vm2, %v12842_v23  ;;  %8386 = vmatmul.msk.bf16.vlgmr.msra.gmra.mxu3 %vm597_vm0, %v1168_v49 }
  0x19   :  { %862 = vst.msk [vmem:[#allocation3 + $0x70] sm:$0x3] %vm856_vm2, %v12842_v23 }
  0x1a   :  { %370 = vmatpush.bf16.msra.mxu0 %v9698_v6  ;;  %863 = vst.msk [vmem:[#allocation3 + $0x80] sm:$0x3] %vm856_vm2, %v12842_v23 }
  0x1b   :  { %864 = vst.msk [vmem:[#allocation3 + $0x90] sm:$0x3] %vm856_vm2, %v12842_v23 }
  0x1c   :  { %865 = vst.msk [vmem:[#allocation3 + $0xe0] sm:$0x3] %vm856_vm2, %v12842_v23 }
  0x1d   :  { %866 = vst.msk [vmem:[#allocation3 + $0xf0] sm:$0x3] %vm856_vm2, %v12842_v23 }
  0x1e   :  { %371 = vmatpush.bf16.msra.mxu0 %v9697_v7  ;;  %867 = vst.msk [vmem:[#allocation3 + $0x100] sm:$0x3] %vm856_vm2, %v12842_v23 }
  0x1f   :  { %868 = vst.msk [vmem:[#allocation3 + $0x110] sm:$0x3] %vm856_vm2, %v12842_v23 }
  0x20   :  { %869 = vst.msk [vmem:[#allocation3 + $0x120] sm:$0x3] %vm856_vm2, %v12842_v23 }
  0x21   :  { %372 = vmatmul.bf16.vlgmr.msra.gmra.mxu0 %v9665_v8  ;;  %870 = vst.msk [vmem:[#allocation3 + $0x130] sm:$0x3] %vm856_vm2, %v12842_v23 }
  0x22   :  { %871 = vst.msk [vmem:[#allocation3 + $0x140] sm:$0x3] %vm856_vm2, %v12842_v23 }
  0x23   :  { %872 = vst.msk [vmem:[#allocation3 + $0x150] sm:$0x3] %vm856_vm2, %v12842_v23 }
  0x24   :  { %873 = vst.msk [vmem:[#allocation3 + $0x2a] sm:$0x3] %vm856_vm2, %v12842_v23 }
  0x25   :  { %874 = vst.msk [vmem:[#allocation3 + $0x3a] sm:$0x3] %vm856_vm2, %v12842_v23 }
  0x26   :  { %875 = vst.msk [vmem:[#allocation3 + $0x4a] sm:$0x3] %vm856_vm2, %v12842_v23 }
  0x27   :  { %876 = vst.msk [vmem:[#allocation3 + $0x5a] sm:$0x3] %vm856_vm2, %v12842_v23 }
  0x28   :  { %877 = vst.msk [vmem:[#allocation3 + $0x6a] sm:$0x3] %vm856_vm2, %v12842_v23 }
  0x29   :  { %878 = vst.msk [vmem:[#allocation3 + $0x7a] sm:$0x3] %vm856_vm2, %v12842_v23 }
  0x2a   :  { %879 = vst.msk [vmem:[#allocation3 + $0x8a] sm:$0x3] %vm856_vm2, %v12842_v23 }
  0x2b   :  { %880 = vst.msk [vmem:[#allocation3 + $0x9a] sm:$0x3] %vm856_vm2, %v12842_v23 }
  0x2c   :  { %881 = vst.msk [vmem:[#allocation3 + $0xea] sm:$0x3] %vm856_vm2, %v12842_v23 }
  0x2d   :  { %882 = vst.msk [vmem:[#allocation3 + $0xfa] sm:$0x3] %vm856_vm2, %v12842_v23 }
  0x2e   :  { %883 = vst.msk [vmem:[#allocation3 + $0x10a] sm:$0x3] %vm856_vm2, %v12842_v23 }
  0x2f   :  { %884 = vst.msk [vmem:[#allocation3 + $0x11a] sm:$0x3] %vm856_vm2, %v12842_v23 }
  0x30   :  { %885 = vst.msk [vmem:[#allocation3 + $0x12a] sm:$0x3] %vm856_vm2, %v12842_v23 }
  0x31   :  { %377 = vmatmul.bf16.gmra.mxu0 %v9666_v9  ;;  %886 = vst.msk [vmem:[#allocation3 + $0x13a] sm:$0x3] %vm856_vm2, %v12842_v23 }
  0x32   :  { %887 = vst.msk [vmem:[#allocation3 + $0x14a] sm:$0x3] %vm856_vm2, %v12842_v23 }
  0x33   :  { %888 = vst.msk [vmem:[#allocation3 + $0x15a] sm:$0x3] %vm856_vm2, %v12842_v23 }
  0x41   :  { %382 = vmatmul.bf16.gmra.mxu0 %v9667_v10 }
  0x51   :  { %387 = vmatmul.bf16.gmra.mxu0 %v9668_v11 }
  0x61   :  { %392 = vmatmul.bf16.gmra.mxu0 %v9669_v12 }
  0x71   :  { %397 = vmatmul.bf16.gmra.mxu0 %v9670_v13 }
  0x81   :  { %402 = vmatmul.bf16.gmra.mxu0 %v9671_v14 }
  0x91   :  { %407 = vmatmul.bf16.gmra.mxu0 %v9672_v15 }
  0x9e   :  { %v373_v18 = vpop.f32.mrf.mxu0 }
  0x9f   :  { %v374_v19 = vadd.f32 %v10070_v16, %v373_v18 }
  0xa1   :  { %v533_v20 = vmax.f32 %v374_v19, 0.0  ;;  %412 = vmatmul.bf16.gmra.mxu0 %v9673_v17  ;;  %v9678_v17 = vld [vmem:[%s12830_s0 + $0x68] sm:$0xff] }
  0xa3   :  { %598 = vst.msk [vmem:[#allocation2] sm:$0xff] %vm597_vm0, %v533_v20 }
  0xa6   :  { %v375_v21 = vpop.f32.mrf.mxu0 }
  0xa7   :  { %v376_v22 = vadd.f32 %v10070_v16, %v375_v21 }
  0xa9   :  { %v534_v24 = vmax.f32 %v376_v22, 0.0 }
  0xab   :  { %599 = vst.msk [vmem:[#allocation2 + $0x8] sm:$0xff] %vm597_vm0, %v534_v24 }
  0xae   :  { %v378_v26 = vpop.f32.mrf.mxu0 }
  0xaf   :  { %v379_v27 = vadd.f32 %v10070_v16, %v378_v26 }
  0xb1   :  { %v535_v28 = vmax.f32 %v379_v27, 0.0  ;;  %417 = vmatmul.bf16.gmra.mxu0 %v9674_v25 }
  0xb2   :  { %v662_v40 = vld [vmem:[#allocation2] ss:$2 sm:$0xff]  ;;  %v726_v45 = vld [vmem:[#allocation2 + $0x1] ss:$2 sm:$0xff] }
  0xb3   :  { %600 = vst.msk [vmem:[#allocation2 + $0x10] sm:$0xff] %vm597_vm0, %v535_v28  ;;  %v789_v52 = vmax.f32 %v662_v40, %v726_v45 }
  0xb6   :  { %v380_v29 = vpop.f32.mrf.mxu0 }
  0xb7   :  { %v381_v30 = vadd.f32 %v10070_v16, %v380_v29 }
  0xb9   :  { %v536_v31 = vmax.f32 %v381_v30, 0.0 }
  0xbb   :  { %601 = vst.msk [vmem:[#allocation2 + $0x18] sm:$0xff] %vm597_vm0, %v536_v31 }
  0xbe   :  { %v383_v36 = vpop.f32.mrf.mxu0 }
  0xbf   :  { %v384_v41 = vadd.f32 %v10070_v16, %v383_v36 }
  0xc1   :  { %v537_v48 = vmax.f32 %v384_v41, 0.0  ;;  %422 = vmatmul.bf16.gmra.mxu0 %v9675_v35 }
  0xc2   :  { %v664_v50 = vld [vmem:[#allocation2 + $0x10] ss:$2 sm:$0xff]  ;;  %v728_v51 = vld [vmem:[#allocation2 + $0x11] ss:$2 sm:$0xff] }
  0xc3   :  { %v790_v53 = vmax.f32 %v664_v50, %v728_v51  ;;  %602 = vst.msk [vmem:[#allocation2 + $0x20] sm:$0xff] %vm597_vm0, %v537_v48 }
  0xc5   :  { %v821_v54 = vmax.f32 %v789_v52, %v790_v53 }
  0xc6   :  { %v385_v55 = vpop.f32.mrf.mxu0 }
  0xc7   :  { %v386_v56 = vadd.f32 %v10070_v16, %v385_v55  ;;  %889 = vst.msk [vmem:[#allocation3 + $0x22] sm:$0xff] %vm597_vm0, %v821_v54 }
  0xc9   :  { %v538_v57 = vmax.f32 %v386_v56, 0.0  ;;  %v9680_v56 = vld [vmem:[%s12830_s0 + $0x78] sm:$0xff] }
  0xcb   :  { %603 = vst.msk [vmem:[#allocation2 + $0x28] sm:$0xff] %vm597_vm0, %v538_v57 }
  0xce   :  { %v388_v59 = vpop.f32.mrf.mxu0  ;;  %v911_v15 = vld [vmem:[#allocation3 + $0x20] sm:$0xff] }
  0xcf   :  { %v389_v60 = vadd.f32 %v10070_v16, %v388_v59  ;;  %v1032_v18 = vld [vmem:[#allocation3 + $0x21] sm:$0xff] }
  0xd0   :  { %v1154_v19 = vld [vmem:[#allocation3 + $0x22] sm:$0xff] }
  0xd1   :  { %v539_v61 = vmax.f32 %v389_v60, 0.0  ;;  %427 = vmatmul.bf16.gmra.mxu0 %v9676_v58  ;;  %v10224_v29 = vld [vmem:[#allocation3 + $0x20] sm:$0xff] }
  0xd2   :  { %v666_v4 = vld [vmem:[#allocation2 + $0x20] ss:$2 sm:$0xff]  ;;  %v730_v5 = vld [vmem:[#allocation2 + $0x21] ss:$2 sm:$0xff]  ;;  %12900 = vst [vmem:[#allocation12_spill] sm:$0xff] %v10224_v29  ;;  %v10721_v29 = vld [vmem:[#allocation3 + $0x14] sm:$0xff] }
  0xd3   :  { %604 = vst.msk [vmem:[#allocation2 + $0x30] sm:$0xff] %vm597_vm0, %v539_v61  ;;  %v791_v9 = vmax.f32 %v666_v4, %v730_v5  ;;  %v10228_v31 = vld [vmem:[#allocation3 + $0x21] sm:$0xff] }
  0xd4   :  { %12902 = vst [vmem:[#allocation14_spill] sm:$0xff] %v10228_v31  ;;  %v10230_v32 = vld [vmem:[#allocation3 + $0x22] sm:$0xff] }
  0xd5   :  { %12903 = vst [vmem:[#allocation15_spill] sm:$0xff] %v10230_v32 }
  0xd6   :  { %v390_v62 = vpop.f32.mrf.mxu0  ;;  %12948 = vst [vmem:[#allocation58_spill] sm:$0xff] %v10721_v29 }
  0xd7   :  { %v391_v63 = vadd.f32 %v10070_v16, %v390_v62 }
  0xd9   :  { %v540_v0 = vmax.f32 %v391_v63, 0.0 }
  0xdb   :  { %605 = vst.msk [vmem:[#allocation2 + $0x38] sm:$0xff] %vm597_vm0, %v540_v0 }
  0xde   :  { %v393_v2 = vpop.f32.mrf.mxu0 }
  0xdf   :  { %v394_v3 = vadd.f32 %v10070_v16, %v393_v2 }
  0xe1   :  { %v541_v6 = vmax.f32 %v394_v3, 0.0  ;;  %432 = vmatmul.bf16.gmra.mxu0 %v9677_v1 }
  0xe2   :  { %v668_v7 = vld [vmem:[#allocation2 + $0x30] ss:$2 sm:$0xff]  ;;  %v732_v8 = vld [vmem:[#allocation2 + $0x31] ss:$2 sm:$0xff] }
  0xe3   :  { %v792_v10 = vmax.f32 %v668_v7, %v732_v8  ;;  %606 = vst.msk [vmem:[#allocation2 + $0x40] sm:$0xff] %vm597_vm0, %v541_v6  ;;  %v9681_v7 = vld [vmem:[%s12830_s0 + $0x80] sm:$0xff] }
  0xe5   :  { %v822_v11 = vmax.f32 %v791_v9, %v792_v10 }
  0xe6   :  { %v395_v12 = vpop.f32.mrf.mxu0 }
  0xe7   :  { %v396_v13 = vadd.f32 %v10070_v16, %v395_v12  ;;  %890 = vst.msk [vmem:[#allocation3 + $0x32] sm:$0xff] %vm597_vm0, %v822_v11 }
  0xe9   :  { %v542_v14 = vmax.f32 %v396_v13, 0.0 }
  0xeb   :  { %607 = vst.msk [vmem:[#allocation2 + $0x48] sm:$0xff] %vm597_vm0, %v542_v14 }
  0xee   :  { %v398_v20 = vpop.f32.mrf.mxu0  ;;  %v10220_v21 = vld [vmem:[#allocation3 + $0x30] sm:$0xff] }
  0xef   :  { %v1033_v22 = vld [vmem:[#allocation3 + $0x31] sm:$0xff]  ;;  %v399_v25 = vadd.f32 %v10070_v16, %v398_v20  ;;  %v926_v26 = vpack.c.bf16 %v10220_v21, %v911_v15 }
  0xf0   :  { %v1155_v24 = vld [vmem:[#allocation3 + $0x32] sm:$0xff]  ;;  %v1047_v27 = vpack.c.bf16 %v1033_v22, %v1032_v18 }
  0xf1   :  { %v1169_v28 = vpack.c.bf16 %v1155_v24, %v1154_v19  ;;  %v10226_v30 = vld [vmem:[#allocation3 + $0x30] sm:$0xff]  ;;  %v543_v36 = vmax.f32 %v399_v25, 0.0  ;;  %437 = vmatmul.bf16.gmra.mxu0 %v9678_v17  ;;  %8359 = vmatmul.msk.bf16.gmra.mxu1 %vm597_vm0, %v926_v26  ;;  %v9682_v25 = vld [vmem:[%s12830_s0 + $0x88] sm:$0xff] }
  0xf2   :  { %12901 = vst [vmem:[#allocation13_spill] sm:$0xff] %v10226_v30  ;;  %v10232_v33 = vld [vmem:[#allocation3 + $0x31] sm:$0xff]  ;;  %8373 = vmatmul.msk.bf16.gmra.mxu2 %vm597_vm0, %v1047_v27  ;;  %v670_v45 = vld [vmem:[#allocation2 + $0x40] ss:$2 sm:$0xff]  ;;  %v734_v46 = vld [vmem:[#allocation2 + $0x41] ss:$2 sm:$0xff] }
  0xf3   :  { %12904 = vst [vmem:[#allocation16_spill] sm:$0xff] %v10232_v33  ;;  %v10234_v34 = vld [vmem:[#allocation3 + $0x32] sm:$0xff]  ;;  %8387 = vmatmul.msk.bf16.gmra.mxu3 %vm597_vm0, %v1169_v28  ;;  %v793_v50 = vmax.f32 %v670_v45, %v734_v46  ;;  %v1274_v33 = vld [vmem:[#allocation3 + $0x3] sm:$0xff] }
  0xf4   :  { %12905 = vst [vmem:[#allocation17_spill] sm:$0xff] %v10234_v34  ;;  %v10264_v61 = vld [vmem:[#allocation3 + $0x33] sm:$0xff] }
  0xf5   :  { %608 = vst.msk [vmem:[#allocation2 + $0x50] sm:$0xff] %vm597_vm0, %v543_v36  ;;  %v10270_v0 = vld [vmem:[#allocation3 + $0x33] sm:$0xff] }
  0xf6   :  { %v400_v39 = vpop.f32.mrf.mxu0  ;;  %12906 = vst [vmem:[#allocation18_spill] sm:$0xff] %v10270_v0 }
  0xf7   :  { %v401_v40 = vadd.f32 %v10070_v16, %v400_v39 }
  0xf9   :  { %v544_v41 = vmax.f32 %v401_v40, 0.0 }
  0xfb   :  { %609 = vst.msk [vmem:[#allocation2 + $0x58] sm:$0xff] %vm597_vm0, %v544_v41 }
  0xfe   :  { %v403_v43 = vpop.f32.mrf.mxu0 }
  0xff   :  { %v404_v44 = vadd.f32 %v10070_v16, %v403_v43 }
 0x101   :  { %v545_v47 = vmax.f32 %v404_v44, 0.0  ;;  %442 = vmatmul.bf16.gmra.mxu0 %v9679_v42 }
 0x102   :  { %v672_v48 = vld [vmem:[#allocation2 + $0x50] ss:$2 sm:$0xff]  ;;  %v736_v49 = vld [vmem:[#allocation2 + $0x51] ss:$2 sm:$0xff] }
 0x103   :  { %v794_v51 = vmax.f32 %v672_v48, %v736_v49  ;;  %610 = vst.msk [vmem:[#allocation2 + $0x60] sm:$0xff] %vm597_vm0, %v545_v47 }
 0x105   :  { %v823_v52 = vmax.f32 %v793_v50, %v794_v51 }
 0x106   :  { %v405_v53 = vpop.f32.mrf.mxu0 }
 0x107   :  { %v406_v54 = vadd.f32 %v10070_v16, %v405_v53  ;;  %891 = vst.msk [vmem:[#allocation3 + $0x42] sm:$0xff] %vm597_vm0, %v823_v52 }
 0x109   :  { %v546_v55 = vmax.f32 %v406_v54, 0.0 }
 0x10b   :  { %611 = vst.msk [vmem:[#allocation2 + $0x68] sm:$0xff] %vm597_vm0, %v546_v55 }
 0x10e   :  { %v408_v57 = vpop.f32.mrf.mxu0  ;;  %v10259_v58 = vld [vmem:[#allocation3 + $0x40] sm:$0xff] }
 0x10f   :  { %v409_v59 = vadd.f32 %v10070_v16, %v408_v57  ;;  %v10266_v62 = vld [vmem:[#allocation3 + $0x43] sm:$0xff] }
 0x110   :  { %v10272_v1 = vld [vmem:[#allocation3 + $0x43] sm:$0xff] }
 0x111   :  { %12907 = vst [vmem:[#allocation19_spill] sm:$0xff] %v10272_v1  ;;  %v547_v2 = vmax.f32 %v409_v59, 0.0  ;;  %447 = vmatmul.bf16.gmra.mxu0 %v9680_v56  ;;  %v1034_v24 = vld [vmem:[#allocation3 + $0x41] sm:$0xff] }
 0x112   :  { %v674_v10 = vld [vmem:[#allocation2 + $0x60] ss:$2 sm:$0xff]  ;;  %v738_v11 = vld [vmem:[#allocation2 + $0x61] ss:$2 sm:$0xff] }
 0x113   :  { %612 = vst.msk [vmem:[#allocation2 + $0x70] sm:$0xff] %vm597_vm0, %v547_v2  ;;  %v795_v15 = vmax.f32 %v674_v10, %v738_v11  ;;  %v1156_v26 = vld [vmem:[#allocation3 + $0x42] sm:$0xff] }
 0x114   :  { %v10290_v27 = vld [vmem:[#allocation3 + $0x40] sm:$0xff] }
 0x115   :  { %12908 = vst [vmem:[#allocation20_spill] sm:$0xff] %v10290_v27  ;;  %v10299_v46 = vld [vmem:[#allocation3 + $0x41] sm:$0xff] }
 0x116   :  { %v410_v4 = vpop.f32.mrf.mxu0  ;;  %12910 = vst [vmem:[#allocation22_spill] sm:$0xff] %v10299_v46  ;;  %v10301_v47 = vld [vmem:[#allocation3 + $0x42] sm:$0xff] }
 0x117   :  { %v411_v5 = vadd.f32 %v10070_v16, %v410_v4  ;;  %12911 = vst [vmem:[#allocation23_spill] sm:$0xff] %v10301_v47  ;;  %v10309_v51 = vld [vmem:[#allocation3 + $0x41] sm:$0xff] }
 0x118   :  { %12914 = vst [vmem:[#allocation26_spill] sm:$0xff] %v10309_v51  ;;  %v10316_v55 = vld [vmem:[#allocation3 + $0x42] sm:$0xff] }
 0x119   :  { %v548_v6 = vmax.f32 %v411_v5, 0.0  ;;  %12915 = vst [vmem:[#allocation27_spill] sm:$0xff] %v10316_v55 }
 0x11b   :  { %613 = vst.msk [vmem:[#allocation2 + $0x78] sm:$0xff] %vm597_vm0, %v548_v6 }
 0x11e   :  { %v413_v8 = vpop.f32.mrf.mxu0 }
 0x11f   :  { %v414_v9 = vadd.f32 %v10070_v16, %v413_v8 }
 0x121   :  { %v549_v12 = vmax.f32 %v414_v9, 0.0  ;;  %452 = vmatmul.bf16.gmra.mxu0 %v9681_v7  ;;  %v9683_v7 = vld [vmem:[%s12830_s0 + $0x90] sm:$0xff] }
 0x122   :  { %v676_v13 = vld [vmem:[#allocation2 + $0x70] ss:$2 sm:$0xff]  ;;  %v740_v14 = vld [vmem:[#allocation2 + $0x71] ss:$2 sm:$0xff] }
 0x123   :  { %v796_v17 = vmax.f32 %v676_v13, %v740_v14  ;;  %614 = vst.msk [vmem:[#allocation2 + $0x80] sm:$0xff] %vm597_vm0, %v549_v12 }
 0x125   :  { %v824_v18 = vmax.f32 %v795_v15, %v796_v17 }
 0x126   :  { %v415_v19 = vpop.f32.mrf.mxu0 }
 0x127   :  { %v416_v20 = vadd.f32 %v10070_v16, %v415_v19  ;;  %892 = vst.msk [vmem:[#allocation3 + $0x52] sm:$0xff] %vm597_vm0, %v824_v18  ;;  %v10339_v18 = vld [vmem:[%s12834_s4] ss:$0 sm:$0xff]  ;;  %v974_v19 = vpop.f32.mrf.mxu1 }
 0x129   :  { %v550_v22 = vmax.f32 %v416_v20, 0.0  ;;  %v1014_v20 = vadd.f32 %v10339_v18, %v974_v19 }
 0x12b   :  { %615 = vst.msk [vmem:[#allocation2 + $0x88] sm:$0xff] %vm597_vm0, %v550_v22 }
 0x12e   :  { %v418_v28 = vpop.f32.mrf.mxu0  ;;  %v10292_v36 = vld [vmem:[#allocation3 + $0x50] sm:$0xff] }
 0x12f   :  { %v1035_v39 = vld [vmem:[#allocation3 + $0x51] sm:$0xff]  ;;  %v419_v41 = vadd.f32 %v10070_v16, %v418_v28  ;;  %v927_v42 = vpack.c.bf16 %v10292_v36, %v10259_v58 }
 0x130   :  { %v1157_v40 = vld [vmem:[#allocation3 + $0x52] sm:$0xff]  ;;  %v1048_v43 = vpack.c.bf16 %v1035_v39, %v1034_v24  ;;  %v1218_v39 = vpop.f32.mrf.mxu3 }
 0x131   :  { %v1170_v44 = vpack.c.bf16 %v1157_v40, %v1156_v26  ;;  %v10297_v45 = vld [vmem:[#allocation3 + $0x50] sm:$0xff]  ;;  %v551_v52 = vmax.f32 %v419_v41, 0.0  ;;  %457 = vmatmul.bf16.gmra.mxu0 %v9682_v25  ;;  %8360 = vmatmul.msk.bf16.gmra.mxu1 %vm597_vm0, %v927_v42  ;;  %v1096_v25 = vpop.f32.mrf.mxu2 }
 0x132   :  { %12909 = vst [vmem:[#allocation21_spill] sm:$0xff] %v10297_v45  ;;  %v10303_v48 = vld [vmem:[#allocation3 + $0x51] sm:$0xff]  ;;  %8374 = vmatmul.msk.bf16.gmra.mxu2 %vm597_vm0, %v1048_v43  ;;  %v678_v10 = vld [vmem:[#allocation2 + $0x80] ss:$2 sm:$0xff]  ;;  %v742_v11 = vld [vmem:[#allocation2 + $0x81] ss:$2 sm:$0xff]  ;;  %v1136_v28 = vadd.f32 %v1096_v25, %v1014_v20 }
 0x133   :  { %12912 = vst [vmem:[#allocation24_spill] sm:$0xff] %v10303_v48  ;;  %v10305_v49 = vld [vmem:[#allocation3 + $0x52] sm:$0xff]  ;;  %8388 = vmatmul.msk.bf16.gmra.mxu3 %vm597_vm0, %v1170_v44  ;;  %v797_v15 = vmax.f32 %v678_v10, %v742_v11 }
 0x134   :  { %12913 = vst [vmem:[#allocation25_spill] sm:$0xff] %v10305_v49  ;;  %v10318_v56 = vld [vmem:[#allocation3 + $0x51] sm:$0xff]  ;;  %v10344_v41 = vadd.f32 %v1218_v39, %v1136_v28 }
 0x135   :  { %12916 = vst [vmem:[#allocation28_spill] sm:$0xff] %v10318_v56  ;;  %v10320_v57 = vld [vmem:[#allocation3 + $0x52] sm:$0xff] }
 0x136   :  { %12917 = vst [vmem:[#allocation29_spill] sm:$0xff] %v10320_v57  ;;  %v420_v4 = vpop.f32.mrf.mxu0  ;;  %v9684_v42 = vld [vmem:[%s12830_s0 + $0x98] sm:$0xff] }
 0x137   :  { %616 = vst.msk [vmem:[#allocation2 + $0x90] sm:$0xff] %vm597_vm0, %v551_v52  ;;  %v421_v5 = vadd.f32 %v10070_v16, %v420_v4 }
 0x139   :  { %v552_v6 = vmax.f32 %v421_v5, 0.0  ;;  %v10355_v5 = vld [vmem:[#allocation3 + $0x53] sm:$0xff] }
 0x13b   :  { %617 = vst.msk [vmem:[#allocation2 + $0x98] sm:$0xff] %vm597_vm0, %v552_v6 }
 0x13e   :  { %v423_v8 = vpop.f32.mrf.mxu0 }
 0x13f   :  { %v424_v9 = vadd.f32 %v10070_v16, %v423_v8  ;;  %v10361_v8 = vld [vmem:[#allocation3 + $0x53] sm:$0xff] }
 0x140   :  { %12918 = vst [vmem:[#allocation30_spill] sm:$0xff] %v10361_v8 }
 0x141   :  { %v553_v12 = vmax.f32 %v424_v9, 0.0  ;;  %462 = vmatmul.bf16.gmra.mxu0 %v9683_v7 }
 0x142   :  { %v680_v13 = vld [vmem:[#allocation2 + $0x90] ss:$2 sm:$0xff]  ;;  %v744_v14 = vld [vmem:[#allocation2 + $0x91] ss:$2 sm:$0xff] }
 0x143   :  { %v798_v17 = vmax.f32 %v680_v13, %v744_v14  ;;  %618 = vst.msk [vmem:[#allocation2 + $0xa0] sm:$0xff] %vm597_vm0, %v553_v12 }
 0x145   :  { %v825_v22 = vmax.f32 %v797_v15, %v798_v17  ;;  %v9685_v15 = vld [vmem:[%s12830_s0 + $0xa0] sm:$0xff] }
 0x146   :  { %v425_v24 = vpop.f32.mrf.mxu0 }
 0x147   :  { %v426_v26 = vadd.f32 %v10070_v16, %v425_v24  ;;  %893 = vst.msk [vmem:[#allocation3 + $0x62] sm:$0xff] %vm597_vm0, %v825_v22 }
 0x149   :  { %v554_v40 = vmax.f32 %v426_v26, 0.0 }
 0x14b   :  { %619 = vst.msk [vmem:[#allocation2 + $0xa8] sm:$0xff] %vm597_vm0, %v554_v40 }
 0x14e   :  { %v428_v43 = vpop.f32.mrf.mxu0  ;;  %v10350_v44 = vld [vmem:[#allocation3 + $0x60] sm:$0xff] }
 0x14f   :  { %v429_v52 = vadd.f32 %v10070_v16, %v428_v43  ;;  %v10357_v6 = vld [vmem:[#allocation3 + $0x63] sm:$0xff] }
 0x150   :  { %v10363_v9 = vld [vmem:[#allocation3 + $0x63] sm:$0xff] }
 0x151   :  { %12919 = vst [vmem:[#allocation31_spill] sm:$0xff] %v10363_v9  ;;  %v555_v10 = vmax.f32 %v429_v52, 0.0  ;;  %467 = vmatmul.bf16.gmra.mxu0 %v9684_v42  ;;  %v10376_v52 = vpop.f32.mrf.mxu1  ;;  %v10402_v2 = vld [vmem:[#allocation3 + $0x61] sm:$0xff] }
 0x152   :  { %v682_v20 = vld [vmem:[#allocation2 + $0xa0] ss:$2 sm:$0xff]  ;;  %v746_v22 = vld [vmem:[#allocation2 + $0xa1] ss:$2 sm:$0xff]  ;;  %12924 = vst [vmem:[#allocation36_spill] sm:$0xff] %v10402_v2 }
 0x153   :  { %620 = vst.msk [vmem:[#allocation2 + $0xb0] sm:$0xff] %vm597_vm0, %v555_v10  ;;  %v799_v28 = vmax.f32 %v682_v20, %v746_v22 }
 0x156   :  { %v430_v12 = vpop.f32.mrf.mxu0 }
 0x157   :  { %v431_v13 = vadd.f32 %v10070_v16, %v430_v12  ;;  %v10380_v12 = vpop.f32.mrf.mxu2 }
 0x159   :  { %v556_v14 = vmax.f32 %v431_v13, 0.0  ;;  %v10382_v13 = vpop.f32.mrf.mxu3 }
 0x15b   :  { %621 = vst.msk [vmem:[#allocation2 + $0xb8] sm:$0xff] %vm597_vm0, %v556_v14  ;;  %v9686_v14 = vld [vmem:[%s12830_s0 + $0xa8] sm:$0xff] }
 0x15e   :  { %v433_v17 = vpop.f32.mrf.mxu0 }
 0x15f   :  { %v434_v19 = vadd.f32 %v10070_v16, %v433_v17 }
 0x161   :  { %v557_v24 = vmax.f32 %v434_v19, 0.0  ;;  %472 = vmatmul.bf16.gmra.mxu0 %v9685_v15  ;;  %v1036_v15 = vld [vmem:[#allocation3 + $0x61] sm:$0xff] }
 0x162   :  { %v684_v25 = vld [vmem:[#allocation2 + $0xb0] ss:$2 sm:$0xff]  ;;  %v748_v26 = vld [vmem:[#allocation2 + $0xb1] ss:$2 sm:$0xff] }
 0x163   :  { %v800_v39 = vmax.f32 %v684_v25, %v748_v26  ;;  %622 = vst.msk [vmem:[#allocation2 + $0xc0] sm:$0xff] %vm597_vm0, %v557_v24 }
 0x165   :  { %v826_v40 = vmax.f32 %v799_v28, %v800_v39  ;;  %v1158_v28 = vld [vmem:[#allocation3 + $0x62] sm:$0xff] }
 0x166   :  { %v435_v42 = vpop.f32.mrf.mxu0  ;;  %v10392_v39 = vld [vmem:[#allocation3 + $0x61] sm:$0xff] }
 0x167   :  { %v436_v43 = vadd.f32 %v10070_v16, %v435_v42  ;;  %894 = vst.msk [vmem:[#allocation3 + $0x72] sm:$0xff] %vm597_vm0, %v826_v40 }
 0x168   :  { %12920 = vst [vmem:[#allocation32_spill] sm:$0xff] %v10392_v39 }
 0x169   :  { %v558_v10 = vmax.f32 %v436_v43, 0.0  ;;  %v10396_v43 = vld [vmem:[#allocation3 + $0x62] sm:$0xff] }
 0x16a   :  { %12922 = vst [vmem:[#allocation34_spill] sm:$0xff] %v10396_v43 }
 0x16b   :  { %623 = vst.msk [vmem:[#allocation2 + $0xc8] sm:$0xff] %vm597_vm0, %v558_v10 }
 0x16e   :  { %v438_v17 = vpop.f32.mrf.mxu0  ;;  %v10387_v19 = vld [vmem:[#allocation3 + $0x70] sm:$0xff]  ;;  %v979_v59 = vpop.f32.mrf.mxu1 }
 0x16f   :  { %v1037_v20 = vld [vmem:[#allocation3 + $0x71] sm:$0xff]  ;;  %v439_v24 = vadd.f32 %v10070_v16, %v438_v17  ;;  %v928_v25 = vpack.c.bf16 %v10387_v19, %v10350_v44 }
 0x170   :  { %v1159_v22 = vld [vmem:[#allocation3 + $0x72] sm:$0xff]  ;;  %v1049_v26 = vpack.c.bf16 %v1037_v20, %v1036_v15  ;;  %v10407_v20 = vld [vmem:[#allocation3 + $0x62] sm:$0xff] }
 0x171   :  { %v10394_v40 = vld [vmem:[#allocation3 + $0x71] sm:$0xff]  ;;  %v1171_v42 = vpack.c.bf16 %v1159_v22, %v1158_v28  ;;  %v559_v17 = vmax.f32 %v439_v24, 0.0  ;;  %477 = vmatmul.bf16.gmra.mxu0 %v9686_v14  ;;  %8361 = vmatmul.msk.bf16.gmra.mxu1 %vm597_vm0, %v928_v25  ;;  %12925 = vst [vmem:[#allocation37_spill] sm:$0xff] %v10407_v20  ;;  %v1016_v25 = vadd.f32 %v10339_v18, %v979_v59 }
 0x172   :  { %12921 = vst [vmem:[#allocation33_spill] sm:$0xff] %v10394_v40  ;;  %v10398_v10 = vld [vmem:[#allocation3 + $0x72] sm:$0xff]  ;;  %8375 = vmatmul.msk.bf16.gmra.mxu2 %vm597_vm0, %v1049_v26  ;;  %v686_v24 = vld [vmem:[#allocation2 + $0xc0] ss:$2 sm:$0xff]  ;;  %v750_v59 = vld [vmem:[#allocation2 + $0xc1] ss:$2 sm:$0xff] }
 0x173   :  { %12923 = vst [vmem:[#allocation35_spill] sm:$0xff] %v10398_v10  ;;  %v10409_v22 = vld [vmem:[#allocation3 + $0x71] sm:$0xff]  ;;  %8389 = vmatmul.msk.bf16.gmra.mxu3 %vm597_vm0, %v1171_v42  ;;  %v9687_v42 = vld [vmem:[%s12830_s0 + $0xb0] sm:$0xff]  ;;  %v801_v50 = vmax.f32 %v686_v24, %v750_v59 }
 0x174   :  { %12926 = vst [vmem:[#allocation38_spill] sm:$0xff] %v10409_v22  ;;  %v10411_v28 = vld [vmem:[#allocation3 + $0x72] sm:$0xff] }
 0x175   :  { %12927 = vst [vmem:[#allocation39_spill] sm:$0xff] %v10411_v28  ;;  %v1101_v11 = vpop.f32.mrf.mxu2  ;;  %v1161_v20 = vld [vmem:[#allocation3 + $0xd2] sm:$0xff] }
 0x176   :  { %624 = vst.msk [vmem:[#allocation2 + $0xd0] sm:$0xff] %vm597_vm0, %v559_v17  ;;  %v1138_v3 = vadd.f32 %v1101_v11, %v1016_v25  ;;  %v440_v15 = vpop.f32.mrf.mxu0  ;;  %v1223_v54 = vpop.f32.mrf.mxu3 }
 0x177   :  { %v441_v38 = vadd.f32 %v10070_v16, %v440_v15 }
 0x178   :  { %v10422_v23 = vadd.f32 %v1223_v54, %v1138_v3 }
 0x179   :  { %v560_v26 = vmax.f32 %v441_v38, 0.0 }
 0x17b   :  { %625 = vst.msk [vmem:[#allocation2 + $0xd8] sm:$0xff] %vm597_vm0, %v560_v26 }
 0x17e   :  { %v443_v14 = vpop.f32.mrf.mxu0 }
 0x17f   :  { %v444_v17 = vadd.f32 %v10070_v16, %v443_v14  ;;  %v9688_v14 = vld [vmem:[%s12830_s0 + $0xb8] sm:$0xff] }
 0x181   :  { %v561_v53 = vmax.f32 %v444_v17, 0.0  ;;  %482 = vmatmul.bf16.gmra.mxu0 %v9687_v42 }
 0x182   :  { %v688_v11 = vld [vmem:[#allocation2 + $0xd0] ss:$2 sm:$0xff]  ;;  %v752_v25 = vld [vmem:[#allocation2 + $0xd1] ss:$2 sm:$0xff] }
 0x183   :  { %v802_v15 = vmax.f32 %v688_v11, %v752_v25  ;;  %626 = vst.msk [vmem:[#allocation2 + $0xe0] sm:$0xff] %vm597_vm0, %v561_v53  ;;  %v9689_v11 = vld [vmem:[%s12830_s0 + $0xc0] sm:$0xff] }
 0x185   :  { %v827_v38 = vmax.f32 %v801_v50, %v802_v15 }
 0x186   :  { %v445_v3 = vpop.f32.mrf.mxu0 }
 0x187   :  { %895 = vst.msk [vmem:[#allocation3 + $0x82] sm:$0xff] %vm597_vm0, %v827_v38  ;;  %v446_v54 = vadd.f32 %v10070_v16, %v445_v3 }
 0x189   :  { %v562_v26 = vmax.f32 %v446_v54, 0.0 }
 0x18b   :  { %627 = vst.msk [vmem:[#allocation2 + $0xe8] sm:$0xff] %vm597_vm0, %v562_v26 }
 0x18e   :  { %v448_v42 = vpop.f32.mrf.mxu0 }
 0x18f   :  { %v449_v17 = vadd.f32 %v10070_v16, %v448_v42 }
 0x191   :  { %v563_v24 = vmax.f32 %v449_v17, 0.0  ;;  %487 = vmatmul.bf16.gmra.mxu0 %v9688_v14 }
 0x192   :  { %v690_v38 = vld [vmem:[#allocation2 + $0xe0] ss:$2 sm:$0xff]  ;;  %v754_v3 = vld [vmem:[#allocation2 + $0xe1] ss:$2 sm:$0xff] }
 0x193   :  { %628 = vst.msk [vmem:[#allocation2 + $0xf0] sm:$0xff] %vm597_vm0, %v563_v24  ;;  %v803_v42 = vmax.f32 %v690_v38, %v754_v3  ;;  %v10455_v38 = vpop.f32.mrf.mxu3 }
 0x196   :  { %v450_v50 = vpop.f32.mrf.mxu0 }
 0x197   :  { %v451_v53 = vadd.f32 %v10070_v16, %v450_v50 }
 0x199   :  { %v564_v59 = vmax.f32 %v451_v53, 0.0 }
 0x19b   :  { %629 = vst.msk [vmem:[#allocation2 + $0xf8] sm:$0xff] %vm597_vm0, %v564_v59  ;;  %v10447_v59 = vpop.f32.mrf.mxu1 }
 0x19e   :  { %v453_v25 = vpop.f32.mrf.mxu0 }
 0x19f   :  { %v454_v15 = vadd.f32 %v10070_v16, %v453_v25  ;;  %v10450_v25 = vpop.f32.mrf.mxu2 }
 0x1a1   :  { %v565_v54 = vmax.f32 %v454_v15, 0.0  ;;  %492 = vmatmul.bf16.gmra.mxu0 %v9689_v11  ;;  %v9690_v11 = vld [vmem:[%s12830_s0 + $0xc8] sm:$0xff] }
 0x1a2   :  { %v692_v26 = vld [vmem:[#allocation2 + $0xf0] ss:$2 sm:$0xff]  ;;  %v756_v14 = vld [vmem:[#allocation2 + $0xf1] ss:$2 sm:$0xff] }
 0x1a3   :  { %v804_v17 = vmax.f32 %v692_v26, %v756_v14  ;;  %630 = vst.msk [vmem:[#allocation2 + $0x100] sm:$0xff] %vm597_vm0, %v565_v54 }
 0x1a5   :  { %v828_v24 = vmax.f32 %v803_v42, %v804_v17  ;;  %v10460_v42 = vld [vmem:[#allocation3 + $0x82] sm:$0xff] }
 0x1a6   :  { %v455_v50 = vpop.f32.mrf.mxu0  ;;  %12929 = vst [vmem:[#allocation41_spill] sm:$0xff] %v10460_v42  ;;  %v1039_v42 = vld [vmem:[#allocation3 + $0xd1] sm:$0xff] }
 0x1a7   :  { %896 = vst.msk [vmem:[#allocation3 + $0x92] sm:$0xff] %vm597_vm0, %v828_v24  ;;  %v456_v53 = vadd.f32 %v10070_v16, %v455_v50 }
 0x1a9   :  { %v566_v37 = vmax.f32 %v456_v53, 0.0 }
 0x1ab   :  { %631 = vst.msk [vmem:[#allocation2 + $0x108] sm:$0xff] %vm597_vm0, %v566_v37 }
 0x1ae   :  { %v458_v15 = vpop.f32.mrf.mxu0  ;;  %v10458_v54 = vld [vmem:[#allocation3 + $0x92] sm:$0xff]  ;;  %v984_v14 = vpop.f32.mrf.mxu1 }
 0x1af   :  { %v459_v3 = vadd.f32 %v10070_v16, %v458_v15  ;;  %12928 = vst [vmem:[#allocation40_spill] sm:$0xff] %v10458_v54  ;;  %v1018_v17 = vadd.f32 %v10339_v18, %v984_v14  ;;  %v1160_v54 = vld [vmem:[#allocation3 + $0xc2] sm:$0xff] }
 0x1b0   :  { %v1172_v28 = vpack.c.bf16 %v1161_v20, %v1160_v54 }
 0x1b1   :  { %v567_v26 = vmax.f32 %v459_v3, 0.0  ;;  %497 = vmatmul.bf16.gmra.mxu0 %v9690_v11  ;;  %v9691_v11 = vld [vmem:[%s12830_s0 + $0xd0] sm:$0xff] }
 0x1b2   :  { %v694_v63 = vld [vmem:[#allocation2 + $0x100] ss:$2 sm:$0xff]  ;;  %v758_v14 = vld [vmem:[#allocation2 + $0x101] ss:$2 sm:$0xff]  ;;  %8390 = vmatmul.msk.bf16.gmra.mxu3 %vm597_vm0, %v1172_v28 }
 0x1b3   :  { %632 = vst.msk [vmem:[#allocation2 + $0x110] sm:$0xff] %vm597_vm0, %v567_v26  ;;  %v805_v60 = vmax.f32 %v694_v63, %v758_v14 }
 0x1b5   :  { %v1106_v24 = vpop.f32.mrf.mxu2 }
 0x1b6   :  { %v1140_v50 = vadd.f32 %v1106_v24, %v1018_v17  ;;  %v460_v53 = vpop.f32.mrf.mxu0  ;;  %v1228_v35 = vpop.f32.mrf.mxu3 }
 0x1b7   :  { %v461_v15 = vadd.f32 %v10070_v16, %v460_v53 }
 0x1b8   :  { %v10467_v7 = vadd.f32 %v1228_v35, %v1140_v50  ;;  %v917_v35 = vld [vmem:[#allocation3 + $0xc0] sm:$0xff]  ;;  %v10475_v50 = vld [vmem:[#allocation3 + $0xd0] sm:$0xff] }
 0x1b9   :  { %v568_v3 = vmax.f32 %v461_v15, 0.0  ;;  %v1038_v15 = vld [vmem:[#allocation3 + $0xc1] sm:$0xff] }
 0x1bb   :  { %633 = vst.msk [vmem:[#allocation2 + $0x118] sm:$0xff] %vm597_vm0, %v568_v3  ;;  %v929_v3 = vpack.c.bf16 %v10475_v50, %v917_v35 }
 0x1bd   :  { %8362 = vmatmul.msk.bf16.gmra.mxu1 %vm597_vm0, %v929_v3 }
 0x1be   :  { %v463_v37 = vpop.f32.mrf.mxu0 }
 0x1bf   :  { %v464_v26 = vadd.f32 %v10070_v16, %v463_v37  ;;  %v1050_v37 = vpack.c.bf16 %v1039_v42, %v1038_v15  ;;  %v9692_v42 = vld [vmem:[%s12830_s0 + $0xd8] sm:$0xff] }
 0x1c1   :  { %v569_v4 = vmax.f32 %v464_v26, 0.0  ;;  %502 = vmatmul.bf16.gmra.mxu0 %v9691_v11  ;;  %8376 = vmatmul.msk.bf16.gmra.mxu2 %vm597_vm0, %v1050_v37 }
 0x1c2   :  { %v696_v17 = vld [vmem:[#allocation2 + $0x110] ss:$2 sm:$0xff]  ;;  %v760_v24 = vld [vmem:[#allocation2 + $0x111] ss:$2 sm:$0xff] }
 0x1c3   :  { %v806_v53 = vmax.f32 %v696_v17, %v760_v24  ;;  %634 = vst.msk [vmem:[#allocation2 + $0x120] sm:$0xff] %vm597_vm0, %v569_v4  ;;  %v9693_v24 = vld [vmem:[%s12830_s0 + $0xe0] sm:$0xff] }
 0x1c5   :  { %v829_v2 = vmax.f32 %v805_v60, %v806_v53 }
 0x1c6   :  { %v465_v26 = vpop.f32.mrf.mxu0 }
 0x1c7   :  { %v466_v63 = vadd.f32 %v10070_v16, %v465_v26  ;;  %897 = vst.msk [vmem:[#allocation3 + $0xe2] sm:$0xff] %vm597_vm0, %v829_v2 }
 0x1c9   :  { %v570_v4 = vmax.f32 %v466_v63, 0.0 }
 0x1cb   :  { %635 = vst.msk [vmem:[#allocation2 + $0x128] sm:$0xff] %vm597_vm0, %v570_v4 }
 0x1ce   :  { %v468_v20 = vpop.f32.mrf.mxu0  ;;  %v10487_v60 = vld [vmem:[#allocation3 + $0xe0] sm:$0xff] }
 0x1cf   :  { %v469_v54 = vadd.f32 %v10070_v16, %v468_v20  ;;  %v9708_v20 = vld [vmem:[%s12833_s3 + $0x18] sm:$0xff]  ;;  %v10524_v11 = vld [vmem:[#allocation3 + $0xe2] sm:$0xff] }
 0x1d0   :  { %1338 = vmatpush.bf16.msrb.mxu1 %v9708_v20 }
 0x1d1   :  { %v571_v14 = vmax.f32 %v469_v54, 0.0  ;;  %507 = vmatmul.bf16.gmra.mxu0 %v9692_v42 }
 0x1d2   :  { %v698_v15 = vld [vmem:[#allocation2 + $0x120] ss:$2 sm:$0xff]  ;;  %v762_v3 = vld [vmem:[#allocation2 + $0x121] ss:$2 sm:$0xff] }
 0x1d3   :  { %636 = vst.msk [vmem:[#allocation2 + $0x130] sm:$0xff] %vm597_vm0, %v571_v14  ;;  %v807_v4 = vmax.f32 %v698_v15, %v762_v3 }
 0x1d6   :  { %v470_v2 = vpop.f32.mrf.mxu0 }
 0x1d7   :  { %v471_v28 = vadd.f32 %v10070_v16, %v470_v2 }
 0x1d9   :  { %v572_v17 = vmax.f32 %v471_v28, 0.0  ;;  %v10505_v28 = vpop.f32.mrf.mxu1 }
 0x1db   :  { %637 = vst.msk [vmem:[#allocation2 + $0x138] sm:$0xff] %vm597_vm0, %v572_v17 }
 0x1de   :  { %v473_v53 = vpop.f32.mrf.mxu0 }
 0x1df   :  { %v474_v35 = vadd.f32 %v10070_v16, %v473_v53  ;;  %v9694_v53 = vld [vmem:[%s12830_s0 + $0xe8] sm:$0xff] }
 0x1e1   :  { %v573_v37 = vmax.f32 %v474_v35, 0.0  ;;  %512 = vmatmul.bf16.gmra.mxu0 %v9693_v24  ;;  %v10508_v24 = vpop.f32.mrf.mxu2  ;;  %v1040_v35 = vld [vmem:[#allocation3 + $0xe1] sm:$0xff] }
 0x1e2   :  { %v700_v26 = vld [vmem:[#allocation2 + $0x130] ss:$2 sm:$0xff]  ;;  %v764_v63 = vld [vmem:[#allocation2 + $0x131] ss:$2 sm:$0xff] }
 0x1e3   :  { %v808_v42 = vmax.f32 %v700_v26, %v764_v63  ;;  %638 = vst.msk [vmem:[#allocation2 + $0x140] sm:$0xff] %vm597_vm0, %v573_v37  ;;  %v10515_v63 = vpop.f32.mrf.mxu3 }
 0x1e5   :  { %v830_v54 = vmax.f32 %v807_v4, %v808_v42 }
 0x1e6   :  { %v475_v14 = vpop.f32.mrf.mxu0 }
 0x1e7   :  { %v476_v2 = vadd.f32 %v10070_v16, %v475_v14  ;;  %898 = vst.msk [vmem:[#allocation3 + $0xf2] sm:$0xff] %vm597_vm0, %v830_v54  ;;  %v1162_v54 = vld [vmem:[#allocation3 + $0xe2] sm:$0xff] }
 0x1e8   :  { %v10520_v14 = vld [vmem:[#allocation3 + $0xe1] sm:$0xff] }
 0x1e9   :  { %v574_v17 = vmax.f32 %v476_v2, 0.0 }
 0x1eb   :  { %639 = vst.msk [vmem:[#allocation2 + $0x148] sm:$0xff] %vm597_vm0, %v574_v17 }
 0x1ee   :  { %v478_v15 = vpop.f32.mrf.mxu0  ;;  %v10513_v3 = vld [vmem:[#allocation3 + $0xf0] sm:$0xff]  ;;  %v989_v51 = vpop.f32.mrf.mxu1 }
 0x1ef   :  { %v1041_v37 = vld [vmem:[#allocation3 + $0xf1] sm:$0xff]  ;;  %v479_v4 = vadd.f32 %v10070_v16, %v478_v15  ;;  %v930_v42 = vpack.c.bf16 %v10513_v3, %v10487_v60 }
 0x1f0   :  { %v1163_v26 = vld [vmem:[#allocation3 + $0xf2] sm:$0xff]  ;;  %v1051_v20 = vpack.c.bf16 %v1041_v37, %v1040_v35  ;;  %v1020_v35 = vadd.f32 %v10339_v18, %v989_v51  ;;  %v9695_v51 = vld [vmem:[%s12830_s0 + $0xf0] sm:$0xff] }
 0x1f1   :  { %v10522_v2 = vld [vmem:[#allocation3 + $0xf1] sm:$0xff]  ;;  %v1173_v17 = vpack.c.bf16 %v1163_v26, %v1162_v54  ;;  %v575_v57 = vmax.f32 %v479_v4, 0.0  ;;  %517 = vmatmul.bf16.gmra.mxu0 %v9694_v53  ;;  %8363 = vmatmul.msk.bf16.gmra.mxu1 %vm597_vm0, %v930_v42 }
 0x1f2   :  { %v10526_v22 = vld [vmem:[#allocation3 + $0xf2] sm:$0xff]  ;;  %8377 = vmatmul.msk.bf16.gmra.mxu2 %vm597_vm0, %v1051_v20 }
 0x1f3   :  { %8391 = vmatmul.msk.bf16.gmra.mxu3 %vm597_vm0, %v1173_v17  ;;  %640 = vst.msk [vmem:[#allocation2 + $0x150] sm:$0xff] %vm597_vm0, %v575_v57  ;;  %v10540_v53 = vld [vmem:[%s12832_s2] ss:$0 sm:$0xff] }
 0x1f5   :  { %v1111_v15 = vpop.f32.mrf.mxu2 }
 0x1f6   :  { %v1142_v37 = vadd.f32 %v1111_v15, %v1020_v35  ;;  %v480_v26 = vpop.f32.mrf.mxu0  ;;  %v1233_v54 = vpop.f32.mrf.mxu3  ;;  %v702_v35 = vld [vmem:[#allocation2 + $0x140] ss:$2 sm:$0xff]  ;;  %v766_v15 = vld [vmem:[#allocation2 + $0x141] ss:$2 sm:$0xff] }
 0x1f7   :  { %v481_v4 = vadd.f32 %v10540_v53, %v480_v26  ;;  %v809_v26 = vmax.f32 %v702_v35, %v766_v15  ;;  %v10567_v15 = vld [vmem:[#allocation3 + $0xf3] sm:$0xff] }
 0x1f8   :  { %v10543_v42 = vadd.f32 %v1233_v54, %v1142_v37  ;;  %v9720_v37 = vld [vmem:[%s12833_s3 + $0x78] sm:$0xff]  ;;  %12930 = vst [vmem:[#allocation42_spill] sm:$0xff] %v10567_v15 }
 0x1f9   :  { %v576_v20 = vmax.f32 %v481_v4, 0.0  ;;  %2804 = vmatpush.bf16.msrb.mxu0 %v9720_v37 }
 0x1fb   :  { %641 = vst.msk [vmem:[#allocation2 + $0x158] sm:$0xff] %vm597_vm0, %v576_v20 }
 0x1fd   :  { %v10620_v43 = vpop.f32.mrf.mxu2 }
 0x1fe   :  { %v483_v57 = vpop.f32.mrf.mxu0 }
 0x1ff   :  { %v484_v17 = vadd.f32 %v10540_v53, %v483_v57 }
 0x201   :  { %v577_v16 = vmax.f32 %v484_v17, 0.0  ;;  %522 = vmatmul.bf16.gmra.mxu0 %v9695_v51  ;;  %v9696_v51 = vld [vmem:[%s12830_s0 + $0xf8] sm:$0xff] }
 0x202   :  { %v704_v55 = vld [vmem:[#allocation2 + $0x150] ss:$2 sm:$0xff]  ;;  %v768_v56 = vld [vmem:[#allocation2 + $0x151] ss:$2 sm:$0xff] }
 0x203   :  { %v810_v54 = vmax.f32 %v704_v55, %v768_v56  ;;  %642 = vst.msk [vmem:[#allocation2 + $0x160] sm:$0xff] %vm597_vm0, %v577_v16  ;;  %v10561_v55 = vld [vmem:[#allocation3 + $0xf3] sm:$0xff] }
 0x205   :  { %v831_v4 = vmax.f32 %v809_v26, %v810_v54 }
 0x206   :  { %v485_v20 = vpop.f32.mrf.mxu0 }
 0x207   :  { %v486_v8 = vadd.f32 %v10540_v53, %v485_v20  ;;  %899 = vst.msk [vmem:[#allocation3 + $0x102] sm:$0xff] %vm597_vm0, %v831_v4 }
 0x209   :  { %v578_v57 = vmax.f32 %v486_v8, 0.0 }
 0x20b   :  { %643 = vst.msk [vmem:[#allocation2 + $0x168] sm:$0xff] %vm597_vm0, %v578_v57 }
 0x20e   :  { %v488_v17 = vpop.f32.mrf.mxu0  ;;  %v10563_v56 = vld [vmem:[#allocation3 + $0x103] sm:$0xff] }
 0x20f   :  { %v489_v35 = vadd.f32 %v10540_v53, %v488_v17  ;;  %v10569_v37 = vld [vmem:[#allocation3 + $0x103] sm:$0xff] }
 0x210   :  { %12931 = vst [vmem:[#allocation43_spill] sm:$0xff] %v10569_v37  ;;  %v10614_v37 = vpop.f32.mrf.mxu1 }
 0x211   :  { %v579_v8 = vmax.f32 %v489_v35, 0.0  ;;  %527 = vmatmul.bf16.gmra.mxu0 %v9696_v51  ;;  %v12932_v51 = vpack.c.bf16 %v10259_v58, %v10220_v21  ;;  %v10587_v21 = vld [vmem:[#allocation3 + $0x101] sm:$0xff] }
 0x212   :  { %v706_v16 = vld [vmem:[#allocation2 + $0x160] ss:$2 sm:$0xff]  ;;  %v770_v9 = vld [vmem:[#allocation2 + $0x161] ss:$2 sm:$0xff] }
 0x213   :  { %644 = vst.msk [vmem:[#allocation2 + $0x170] sm:$0xff] %vm597_vm0, %v579_v8  ;;  %v811_v8 = vmax.f32 %v706_v16, %v770_v9  ;;  %v10589_v58 = vld [vmem:[#allocation3 + $0x102] sm:$0xff] }
 0x216   :  { %v490_v54 = vpop.f32.mrf.mxu0 }
 0x217   :  { %v491_v4 = vadd.f32 %v10540_v53, %v490_v54 }
 0x219   :  { %v580_v20 = vmax.f32 %v491_v4, 0.0 }
 0x21b   :  { %645 = vst.msk [vmem:[#allocation2 + $0x178] sm:$0xff] %vm597_vm0, %v580_v20 }
 0x21e   :  { %v493_v57 = vpop.f32.mrf.mxu0 }
 0x21f   :  { %v494_v17 = vadd.f32 %v10540_v53, %v493_v57 }
 0x221   :  { %v581_v0 = vmax.f32 %v494_v17, 0.0  ;;  %8568 = vmatmul.msk.bf16.vlgmr.msrb.gmra.mxu0 %vm597_vm0, %v12932_v51  ;;  %v10585_v17 = vld [vmem:[#allocation3 + $0x100] sm:$0xff] }
 0x222   :  { %v708_v35 = vld [vmem:[#allocation2 + $0x170] ss:$2 sm:$0xff]  ;;  %v772_v26 = vld [vmem:[#allocation2 + $0x171] ss:$2 sm:$0xff] }
 0x223   :  { %v812_v15 = vmax.f32 %v708_v35, %v772_v26  ;;  %646 = vst.msk [vmem:[#allocation2 + $0x180] sm:$0xff] %vm597_vm0, %v581_v0 }
 0x225   :  { %v832_v54 = vmax.f32 %v811_v8, %v812_v15 }
 0x226   :  { %v495_v4 = vpop.f32.mrf.mxu0 }
 0x227   :  { %v496_v20 = vadd.f32 %v10540_v53, %v495_v4  ;;  %900 = vst.msk [vmem:[#allocation3 + $0x112] sm:$0xff] %vm597_vm0, %v832_v54  ;;  %v12935_v4 = vpack.c.bf16 %v10350_v44, %v10292_v36 }
 0x229   :  { %v582_v57 = vmax.f32 %v496_v20, 0.0 }
 0x22b   :  { %647 = vst.msk [vmem:[#allocation2 + $0x188] sm:$0xff] %vm597_vm0, %v582_v57 }
 0x22e   :  { %v498_v51 = vpop.f32.mrf.mxu0  ;;  %v10591_v9 = vld [vmem:[#allocation3 + $0x110] sm:$0xff] }
 0x22f   :  { %v10593_v16 = vld [vmem:[#allocation3 + $0x111] sm:$0xff]  ;;  %v499_v15 = vadd.f32 %v10540_v53, %v498_v51  ;;  %v931_v26 = vpack.c.bf16 %v10591_v9, %v10585_v17 }
 0x230   :  { %12933 = vst [vmem:[#allocation44_spill] sm:$0xff] %v10593_v16  ;;  %v10595_v0 = vld [vmem:[#allocation3 + $0x112] sm:$0xff]  ;;  %v1052_v35 = vpack.c.bf16 %v10593_v16, %v10587_v21 }
 0x231   :  { %12934 = vst [vmem:[#allocation45_spill] sm:$0xff] %v10595_v0  ;;  %v1174_v8 = vpack.c.bf16 %v10595_v0, %v10589_v58  ;;  %v583_v54 = vmax.f32 %v499_v15, 0.0  ;;  %8364 = vmatmul.msk.bf16.gmra.mxu1 %vm597_vm0, %v931_v26  ;;  %8569 = vmatmul.msk.bf16.gmra.mxu0 %vm597_vm0, %v12935_v4  ;;  %v2745_v15 = vld [vmem:[#allocation3 + $0x80] sm:$0xff] }
 0x232   :  { %8378 = vmatmul.msk.bf16.gmra.mxu2 %vm597_vm0, %v1052_v35  ;;  %v774_v1 = vld [vmem:[#allocation2 + $0x181] ss:$2 sm:$0xff]  ;;  %v10618_v36 = vpack.c.bf16 %v2745_v15, %v10387_v19 }
 0x233   :  { %8392 = vmatmul.msk.bf16.gmra.mxu3 %vm597_vm0, %v1174_v8  ;;  %648 = vst.msk [vmem:[#allocation2 + $0x190] sm:$0xff] %vm597_vm0, %v583_v54  ;;  %v710_v8 = vld [vmem:[#allocation2 + $0x180] ss:$2 sm:$0xff] }
 0x236   :  { %v500_v20 = vpop.f32.mrf.mxu0 }
 0x237   :  { %v501_v57 = vadd.f32 %v10540_v53, %v500_v20  ;;  %v813_v20 = vmax.f32 %v710_v8, %v774_v1  ;;  %v2747_v8 = vld [vmem:[#allocation3 + $0xa0] sm:$0xff] }
 0x239   :  { %v584_v51 = vmax.f32 %v501_v57, 0.0 }
 0x23a   :  { %v994_v49 = vpop.f32.mrf.mxu1 }
 0x23b   :  { %649 = vst.msk [vmem:[#allocation2 + $0x198] sm:$0xff] %vm597_vm0, %v584_v51  ;;  %v10625_v51 = vpop.f32.mrf.mxu3  ;;  %v1022_v15 = vadd.f32 %v10339_v18, %v994_v49  ;;  %v10639_v49 = vld [vmem:[#allocation3 + $0x111] sm:$0xff] }
 0x23c   :  { %12939 = vst [vmem:[#allocation49_spill] sm:$0xff] %v10639_v49 }
 0x23e   :  { %v503_v26 = vpop.f32.mrf.mxu0 }
 0x23f   :  { %v504_v35 = vadd.f32 %v10540_v53, %v503_v26 }
 0x241   :  { %v585_v4 = vmax.f32 %v504_v35, 0.0  ;;  %8570 = vmatmul.msk.bf16.gmra.mxu0 %vm597_vm0, %v10618_v36 }
 0x242   :  { %v712_v54 = vld [vmem:[#allocation2 + $0x190] ss:$2 sm:$0xff]  ;;  %v776_v10 = vld [vmem:[#allocation2 + $0x191] ss:$2 sm:$0xff] }
 0x243   :  { %v814_v57 = vmax.f32 %v712_v54, %v776_v10  ;;  %650 = vst.msk [vmem:[#allocation2 + $0x1a0] sm:$0xff] %vm597_vm0, %v585_v4  ;;  %v1238_v1 = vpop.f32.mrf.mxu3  ;;  %v2746_v10 = vld [vmem:[#allocation3 + $0x90] sm:$0xff] }
 0x244   :  { %v1116_v32 = vpop.f32.mrf.mxu2  ;;  %v10633_v54 = vld [vmem:[#allocation3 + $0x113] sm:$0xff] }
 0x245   :  { %v833_v26 = vmax.f32 %v813_v20, %v814_v57  ;;  %v1144_v34 = vadd.f32 %v1116_v32, %v1022_v15  ;;  %12936 = vst [vmem:[#allocation46_spill] sm:$0xff] %v10633_v54  ;;  %v10648_v15 = vld [vmem:[#allocation3 + $0x112] sm:$0xff] }
 0x246   :  { %v505_v47 = vpop.f32.mrf.mxu0  ;;  %12941 = vst [vmem:[#allocation51_spill] sm:$0xff] %v10648_v15 }
 0x247   :  { %v506_v19 = vadd.f32 %v10540_v53, %v505_v47  ;;  %901 = vst.msk [vmem:[#allocation3 + $0x122] sm:$0xff] %vm597_vm0, %v833_v26  ;;  %v10631_v4 = vadd.f32 %v1238_v1, %v1144_v34  ;;  %v2759_v1 = vpack.c.bf16 %v2747_v8, %v2746_v10 }
 0x249   :  { %v586_v35 = vmax.f32 %v506_v19, 0.0 }
 0x24b   :  { %651 = vst.msk [vmem:[#allocation2 + $0x1a8] sm:$0xff] %vm597_vm0, %v586_v35  ;;  %v10650_v35 = vld [vmem:[#allocation3 + $0x113] sm:$0xff] }
 0x24c   :  { %12942 = vst [vmem:[#allocation52_spill] sm:$0xff] %v10650_v35 }
 0x24e   :  { %v508_v20 = vpop.f32.mrf.mxu0  ;;  %v10635_v57 = vld [vmem:[#allocation3 + $0x121] sm:$0xff] }
 0x24f   :  { %12937 = vst [vmem:[#allocation47_spill] sm:$0xff] %v10635_v57  ;;  %v10637_v47 = vld [vmem:[#allocation3 + $0x122] sm:$0xff]  ;;  %v509_v26 = vadd.f32 %v10540_v53, %v508_v20 }
 0x250   :  { %12938 = vst [vmem:[#allocation48_spill] sm:$0xff] %v10637_v47  ;;  %v10642_v19 = vld [vmem:[#allocation3 + $0x123] sm:$0xff] }
 0x251   :  { %12940 = vst [vmem:[#allocation50_spill] sm:$0xff] %v10642_v19  ;;  %v10654_v40 = vld [vmem:[#allocation3 + $0x121] sm:$0xff]  ;;  %v587_v48 = vmax.f32 %v509_v26, 0.0  ;;  %8571 = vmatmul.msk.bf16.gmra.mxu0 %vm597_vm0, %v2759_v1  ;;  %v9709_v26 = vld [vmem:[%s12833_s3 + $0x20] sm:$0xff]  ;;  %v10676_v1 = vpack.c.bf16 %v10585_v17, %v10513_v3  ;;  %v10685_v17 = vpop.f32.mrf.mxu1 }
 0x252   :  { %12943 = vst [vmem:[#allocation53_spill] sm:$0xff] %v10654_v40  ;;  %v10656_v46 = vld [vmem:[#allocation3 + $0x122] sm:$0xff]  ;;  %1460 = vmatpush.bf16.msrb.mxu2 %v9709_v26 }
 0x253   :  { %12944 = vst [vmem:[#allocation54_spill] sm:$0xff] %v10656_v46  ;;  %v10658_v20 = vld [vmem:[#allocation3 + $0x123] sm:$0xff] }
 0x254   :  { %12945 = vst [vmem:[#allocation55_spill] sm:$0xff] %v10658_v20  ;;  %v714_v15 = vld [vmem:[#allocation2 + $0x1a0] ss:$2 sm:$0xff]  ;;  %v778_v27 = vld [vmem:[#allocation2 + $0x1a1] ss:$2 sm:$0xff] }
 0x255   :  { %652 = vst.msk [vmem:[#allocation2 + $0x1b0] sm:$0xff] %vm597_vm0, %v587_v48 }
 0x256   :  { %v510_v10 = vpop.f32.mrf.mxu0 }
 0x257   :  { %v511_v8 = vadd.f32 %v10540_v53, %v510_v10 }
 0x259   :  { %v588_v39 = vmax.f32 %v511_v8, 0.0  ;;  %v9710_v8 = vld [vmem:[%s12833_s3 + $0x28] sm:$0xff] }
 0x25a   :  { %1583 = vmatpush.bf16.msrb.mxu3 %v9710_v8 }
 0x25b   :  { %653 = vst.msk [vmem:[#allocation2 + $0x1b8] sm:$0xff] %vm597_vm0, %v588_v39  ;;  %v815_v39 = vmax.f32 %v714_v15, %v778_v27  ;;  %v10692_v27 = vpop.f32.mrf.mxu2  ;;  %v10694_v15 = vpop.f32.mrf.mxu3 }
 0x25e   :  { %v513_v32 = vpop.f32.mrf.mxu0 }
 0x25f   :  { %v514_v34 = vadd.f32 %v10540_v53, %v513_v32 }
 0x261   :  { %v589_v48 = vmax.f32 %v514_v34, 0.0  ;;  %8572 = vmatmul.msk.bf16.gmra.mxu0 %vm597_vm0, %v10676_v1  ;;  %v9711_v34 = vld [vmem:[%s12833_s3 + $0x30] sm:$0xff] }
 0x262   :  { %v716_v35 = vld [vmem:[#allocation2 + $0x1b0] ss:$2 sm:$0xff]  ;;  %v780_v10 = vld [vmem:[#allocation2 + $0x1b1] ss:$2 sm:$0xff]  ;;  %1705 = vmatpush.bf16.msra.mxu1 %v9711_v34 }
 0x263   :  { %v816_v26 = vmax.f32 %v716_v35, %v780_v10  ;;  %654 = vst.msk [vmem:[#allocation2 + $0x1c0] sm:$0xff] %vm597_vm0, %v589_v48  ;;  %v923_v35 = vld [vmem:[#allocation3 + $0x120] sm:$0xff] }
 0x265   :  { %v834_v32 = vmax.f32 %v815_v39, %v816_v26 }
 0x266   :  { %v515_v20 = vpop.f32.mrf.mxu0 }
 0x267   :  { %v516_v3 = vadd.f32 %v10540_v53, %v515_v20  ;;  %902 = vst.msk [vmem:[#allocation3 + $0x132] sm:$0xff] %vm597_vm0, %v834_v32 }
 0x269   :  { %v590_v46 = vmax.f32 %v516_v3, 0.0  ;;  %v10706_v3 = vpack.c.bf16 %v923_v35, %v10591_v9 }
 0x26b   :  { %655 = vst.msk [vmem:[#allocation2 + $0x1c8] sm:$0xff] %vm597_vm0, %v590_v46 }
 0x26e   :  { %v518_v48 = vpop.f32.mrf.mxu0  ;;  %v924_v10 = vld [vmem:[#allocation3 + $0x130] sm:$0xff]  ;;  %v999_v49 = vpop.f32.mrf.mxu1 }
 0x26f   :  { %v10696_v20 = vld [vmem:[#allocation3 + $0x131] sm:$0xff]  ;;  %v519_v39 = vadd.f32 %v10540_v53, %v518_v48  ;;  %v932_v26 = vpack.c.bf16 %v924_v10, %v923_v35  ;;  %v1024_v48 = vadd.f32 %v10339_v18, %v999_v49 }
 0x270   :  { %12946 = vst [vmem:[#allocation56_spill] sm:$0xff] %v10696_v20  ;;  %v10698_v8 = vld [vmem:[#allocation3 + $0x132] sm:$0xff]  ;;  %v1053_v32 = vpack.c.bf16 %v10696_v20, %v10635_v57  ;;  %v1282_v57 = vld [vmem:[#allocation3 + $0xc3] sm:$0xff] }
 0x271   :  { %12947 = vst [vmem:[#allocation57_spill] sm:$0xff] %v10698_v8  ;;  %v1175_v46 = vpack.c.bf16 %v10698_v8, %v10637_v47  ;;  %v591_v34 = vmax.f32 %v519_v39, 0.0  ;;  %8365 = vmatmul.msk.bf16.gmra.mxu1 %vm597_vm0, %v932_v26  ;;  %8573 = vmatmul.msk.bf16.gmra.mxu0 %vm597_vm0, %v10706_v3 }
 0x272   :  { %8379 = vmatmul.msk.bf16.gmra.mxu2 %vm597_vm0, %v1053_v32  ;;  %v1396_v32 = vld [vmem:[#allocation3 + $0x4] sm:$0xff] }
 0x273   :  { %8393 = vmatmul.msk.bf16.gmra.mxu3 %vm597_vm0, %v1175_v46  ;;  %656 = vst.msk [vmem:[#allocation2 + $0x1d0] sm:$0xff] %vm597_vm0, %v591_v34  ;;  %v10719_v46 = vld [vmem:[#allocation3 + $0x13] sm:$0xff]  ;;  %v1412_v18 = vpack.c.bf16 %v10721_v29, %v1396_v32  ;;  %v718_v49 = vld [vmem:[#allocation2 + $0x1c0] ss:$2 sm:$0xff] }
 0x274   :  { %v1290_v34 = vpack.c.bf16 %v10719_v46, %v1274_v33 }
 0x275   :  { %v1121_v40 = vpop.f32.mrf.mxu2 }
 0x276   :  { %v1146_v45 = vadd.f32 %v1121_v40, %v1024_v48  ;;  %v520_v31 = vpop.f32.mrf.mxu0  ;;  %v1243_v9 = vpop.f32.mrf.mxu3  ;;  %v1519_v40 = vld [vmem:[#allocation3 + $0x10] sm:$0xff]  ;;  %v782_v48 = vld [vmem:[#allocation2 + $0x1c1] ss:$2 sm:$0xff] }
 0x277   :  { %v521_v35 = vadd.f32 %v10540_v53, %v520_v31 }
 0x278   :  { %v10716_v39 = vadd.f32 %v1243_v9, %v1146_v45  ;;  %v9890_v45 = vld [vmem:[#allocation3 + $0x20] sm:$0xff] }
 0x279   :  { %v592_v26 = vmax.f32 %v521_v35, 0.0  ;;  %v1535_v9 = vpack.c.bf16 %v9890_v45, %v1519_v40  ;;  %v817_v35 = vmax.f32 %v718_v49, %v782_v48  ;;  %v10733_v49 = vld [vmem:[#allocation3 + $0x34] sm:$0xff]  ;;  %v10737_v48 = vld [vmem:[#allocation3 + $0x24] sm:$0xff] }
 0x27a   :  { %12949 = vst [vmem:[#allocation59_spill] sm:$0xff] %v10737_v48 }
 0x27b   :  { %657 = vst.msk [vmem:[#allocation2 + $0x1d8] sm:$0xff] %vm597_vm0, %v592_v26 }
 0x27d   :  { %v10767_v0 = vpop.f32.mrf.mxu2 }
 0x27e   :  { %v523_v30 = vpop.f32.mrf.mxu0  ;;  %12951 = vst [vmem:[#allocation61_spill] sm:$0xff] %v10767_v0  ;;  %v10793_v0 = vld [vmem:[#allocation3 + $0xd4] sm:$0xff] }
 0x27f   :  { %v524_v31 = vadd.f32 %v10540_v53, %v523_v30  ;;  %12954 = vst [vmem:[#allocation64_spill] sm:$0xff] %v10793_v0 }
 0x281   :  { %v593_v8 = vmax.f32 %v524_v31, 0.0  ;;  %8400 = vmatmul.msk.bf16.vlgmr.msrb.gmra.mxu1 %vm597_vm0, %v1290_v34 }
 0x282   :  { %8414 = vmatmul.msk.bf16.vlgmr.msrb.gmra.mxu2 %vm597_vm0, %v1412_v18  ;;  %v720_v26 = vld [vmem:[#allocation2 + $0x1d0] ss:$2 sm:$0xff]  ;;  %v784_v20 = vld [vmem:[#allocation2 + $0x1d1] ss:$2 sm:$0xff]  ;;  %v10735_v18 = vld [vmem:[#allocation3 + $0x23] sm:$0xff] }
 0x283   :  { %8428 = vmatmul.msk.bf16.vlgmr.msrb.gmra.mxu3 %vm597_vm0, %v1535_v9  ;;  %v818_v33 = vmax.f32 %v720_v26, %v784_v20  ;;  %658 = vst.msk [vmem:[#allocation2 + $0x1e0] sm:$0xff] %vm597_vm0, %v593_v8  ;;  %v9891_v8 = vld [vmem:[#allocation3 + $0x33] sm:$0xff]  ;;  %v1413_v9 = vpack.c.bf16 %v10733_v49, %v10737_v48  ;;  %v9893_v26 = vld [vmem:[#allocation3 + $0x40] sm:$0xff]  ;;  %v10765_v48 = vpop.f32.mrf.mxu1 }
 0x284   :  { %v1291_v45 = vpack.c.bf16 %v9891_v8, %v10735_v18  ;;  %v1400_v8 = vld [vmem:[#allocation3 + $0x44] sm:$0xff]  ;;  %12950 = vst [vmem:[#allocation60_spill] sm:$0xff] %v10765_v48 }
 0x285   :  { %v835_v32 = vmax.f32 %v817_v35, %v818_v33  ;;  %v9892_v35 = vld [vmem:[#allocation3 + $0x30] sm:$0xff]  ;;  %v10798_v48 = vpack.c.bf16 %v1400_v8, %v10733_v49 }
 0x286   :  { %v525_v29 = vpop.f32.mrf.mxu0  ;;  %v1536_v33 = vpack.c.bf16 %v9893_v26, %v9892_v35  ;;  %v9724_v26 = vld [vmem:[%s12833_s3 + $0x98] sm:$0xff] }
 0x287   :  { %903 = vst.msk [vmem:[#allocation3 + $0x142] sm:$0xff] %vm597_vm0, %v835_v32  ;;  %v526_v30 = vadd.f32 %v10540_v53, %v525_v29  ;;  %3292 = vmatpush.bf16.msra.mxu0 %v9724_v26 }
 0x288   :  { %12955 = vst [vmem:[#allocation65_spill] sm:$0xff] %v10798_v48 }
 0x289   :  { %v594_v40 = vmax.f32 %v526_v30, 0.0 }
 0x28b   :  { %659 = vst.msk [vmem:[#allocation2 + $0x1e8] sm:$0xff] %vm597_vm0, %v594_v40 }
 0x28e   :  { %v528_v34 = vpop.f32.mrf.mxu0  ;;  %v2753_v31 = vld [vmem:[#allocation3 + $0x140] sm:$0xff] }
 0x28f   :  { %v529_v20 = vadd.f32 %v10540_v53, %v528_v34  ;;  %v10743_v29 = vpack.c.bf16 %v2753_v31, %v924_v10  ;;  %v1401_v34 = vld [vmem:[#allocation3 + $0x54] sm:$0xff] }
 0x290   :  { %v1414_v35 = vpack.c.bf16 %v1401_v34, %v1400_v8 }
 0x291   :  { %v595_v32 = vmax.f32 %v529_v20, 0.0  ;;  %8401 = vmatmul.msk.bf16.gmra.mxu1 %vm597_vm0, %v1291_v45  ;;  %8574 = vmatmul.msk.bf16.gmra.mxu0 %vm597_vm0, %v10743_v29  ;;  %v9894_v45 = vld [vmem:[#allocation3 + $0x43] sm:$0xff] }
 0x292   :  { %8415 = vmatmul.msk.bf16.gmra.mxu2 %vm597_vm0, %v1413_v9  ;;  %v722_v31 = vld [vmem:[#allocation2 + $0x1e0] ss:$2 sm:$0xff]  ;;  %v786_v20 = vld [vmem:[#allocation2 + $0x1e1] ss:$2 sm:$0xff]  ;;  %v10754_v9 = vpack.c.bf16 %v10355_v5, %v9894_v45 }
 0x293   :  { %8429 = vmatmul.msk.bf16.gmra.mxu3 %vm597_vm0, %v1536_v33  ;;  %660 = vst.msk [vmem:[#allocation2 + $0x1f0] sm:$0xff] %vm597_vm0, %v595_v32  ;;  %v9895_v33 = vld [vmem:[#allocation3 + $0x50] sm:$0xff] }
 0x294   :  { %v1537_v32 = vpack.c.bf16 %v10350_v44, %v9895_v33  ;;  %v10769_v44 = vld [vmem:[#allocation3 + $0x73] sm:$0xff]  ;;  %v10771_v33 = vpop.f32.mrf.mxu3 }
 0x295   :  { %12952 = vst [vmem:[#allocation62_spill] sm:$0xff] %v10771_v33  ;;  %v1404_v33 = vld [vmem:[#allocation3 + $0xc4] sm:$0xff] }
 0x296   :  { %v530_v30 = vpop.f32.mrf.mxu0 }
 0x297   :  { %v531_v40 = vadd.f32 %v10540_v53, %v530_v30  ;;  %v819_v53 = vmax.f32 %v722_v31, %v786_v20  ;;  %v1403_v31 = vld [vmem:[#allocation3 + $0x74] sm:$0xff]  ;;  %v2755_v20 = vld [vmem:[#allocation3 + $0x160] sm:$0xff] }
 0x299   :  { %v596_v10 = vmax.f32 %v531_v40, 0.0 }
 0x29b   :  { %661 = vst.msk [vmem:[#allocation2 + $0x1f8] sm:$0xff] %vm597_vm0, %v596_v10 }
 0x2a1   :  { %8402 = vmatmul.msk.bf16.gmra.mxu1 %vm597_vm0, %v10754_v9 }
 0x2a2   :  { %8416 = vmatmul.msk.bf16.gmra.mxu2 %vm597_vm0, %v1414_v35  ;;  %v724_v30 = vld [vmem:[#allocation2 + $0x1f0] ss:$2 sm:$0xff]  ;;  %v788_v40 = vld [vmem:[#allocation2 + $0x1f1] ss:$2 sm:$0xff]  ;;  %v1402_v35 = vld [vmem:[#allocation3 + $0x64] sm:$0xff] }
 0x2a3   :  { %8430 = vmatmul.msk.bf16.gmra.mxu3 %vm597_vm0, %v1537_v32  ;;  %v820_v10 = vmax.f32 %v724_v30, %v788_v40  ;;  %v10775_v32 = vpack.c.bf16 %v10769_v44, %v10357_v6  ;;  %v1415_v26 = vpack.c.bf16 %v1403_v31, %v1402_v35  ;;  %v10786_v40 = vld [vmem:[%s12834_s4] ss:$0 sm:$0xff] }
 0x2a5   :  { %v836_v45 = vmax.f32 %v819_v53, %v820_v10 }
 0x2a7   :  { %904 = vst.msk [vmem:[#allocation3 + $0x152] sm:$0xff] %vm597_vm0, %v836_v45 }
 0x2ae   :  { %v2754_v47 = vld [vmem:[#allocation3 + $0x150] sm:$0xff]  ;;  %v1004_v30 = vpop.f32.mrf.mxu1 }
 0x2af   :  { %v2763_v53 = vpack.c.bf16 %v2755_v20, %v2754_v47  ;;  %v1026_v10 = vadd.f32 %v10786_v40, %v1004_v30  ;;  %v12956_v30 = vpack.c.bf16 %v10487_v60, %v10475_v50  ;;  %v10826_v50 = vpop.f32.mrf.mxu0  ;;  %v9712_v60 = vld [vmem:[%s12833_s3 + $0x38] sm:$0xff] }
 0x2b0   :  { %12959 = vst [vmem:[#allocation68_spill] sm:$0xff] %v10826_v50  ;;  %1827 = vmatpush.bf16.msra.mxu2 %v9712_v60 }
 0x2b1   :  { %8403 = vmatmul.msk.bf16.gmra.mxu1 %vm597_vm0, %v10775_v32  ;;  %8575 = vmatmul.msk.bf16.gmra.mxu0 %vm597_vm0, %v2763_v53  ;;  %v1416_v53 = vpack.c.bf16 %v10793_v0, %v1404_v33  ;;  %v10812_v33 = vld [vmem:[#allocation3 + $0xe4] sm:$0xff] }
 0x2b2   :  { %8417 = vmatmul.msk.bf16.gmra.mxu2 %vm597_vm0, %v1415_v26  ;;  %v10791_v26 = vld [vmem:[#allocation3 + $0xd3] sm:$0xff]  ;;  %12957 = vst [vmem:[#allocation66_spill] sm:$0xff] %v10812_v33 }
 0x2b3   :  { %8431 = vmatmul.msk.bf16.gmra.mxu3 %vm597_vm0, %v10618_v36  ;;  %v1294_v36 = vpack.c.bf16 %v10791_v26, %v1282_v57  ;;  %v10810_v57 = vld [vmem:[#allocation3 + $0xe3] sm:$0xff] }
 0x2b4   :  { %v1295_v49 = vpack.c.bf16 %v10561_v55, %v10810_v57 }
 0x2b5   :  { %v1126_v45 = vpop.f32.mrf.mxu2 }
 0x2b6   :  { %v1148_v47 = vadd.f32 %v1126_v45, %v1026_v10  ;;  %v1248_v20 = vpop.f32.mrf.mxu3  ;;  %v10808_v10 = vld [vmem:[#allocation3 + $0xf4] sm:$0xff]  ;;  %v10818_v45 = vpack.c.bf16 %v1402_v35, %v1401_v34 }
 0x2b7   :  { %v1417_v8 = vpack.c.bf16 %v10808_v10, %v10812_v33  ;;  %v9713_v34 = vld [vmem:[%s12833_s3 + $0x40] sm:$0xff]  ;;  %v1410_v33 = vld [vmem:[#allocation3 + $0x124] sm:$0xff] }
 0x2b8   :  { %v10789_v16 = vadd.f32 %v1248_v20, %v1148_v47  ;;  %12958 = vst [vmem:[#allocation67_spill] sm:$0xff] %v10818_v45  ;;  %1949 = vmatpush.bf16.msra.mxu3 %v9713_v34  ;;  %v10834_v35 = vld [vmem:[#allocation3 + $0x114] sm:$0xff]  ;;  %v3233_v47 = vld [vmem:[#allocation3 + $0x84] sm:$0xff]  ;;  %v10836_v20 = vpop.f32.mrf.mxu0 }
 0x2b9   :  { %12960 = vst [vmem:[#allocation69_spill] sm:$0xff] %v10836_v20  ;;  %v10861_v34 = vld [vmem:[#allocation3 + $0x133] sm:$0xff]  ;;  %v3235_v20 = vld [vmem:[#allocation3 + $0xa4] sm:$0xff] }
 0x2ba   :  { %12953 = vst [vmem:[#allocation63_spill] sm:$0xff] %v10789_v16  ;;  %v10869_v0 = vpack.c.bf16 %v10861_v34, %v10642_v19 }
 0x2bb   :  { %12966 = vst [vmem:[#allocation75_spill] sm:$0xff] %v10861_v34 }
 0x2bc   :  { %12968 = vst [vmem:[#allocation77_spill] sm:$0xff] %v10869_v0 }
 0x2bd   :  { %v10859_v60 = vpop.f32.mrf.mxu2 }
 0x2be   :  { %12965 = vst [vmem:[#allocation74_spill] sm:$0xff] %v10859_v60 }
 0x2c1   :  { %8404 = vmatmul.msk.bf16.gmra.mxu1 %vm597_vm0, %v1294_v36  ;;  %8624 = vmatmul.msk.bf16.vlgmr.msra.gmra.mxu0 %vm597_vm0, %v10798_v48  ;;  %v10840_v36 = vpack.c.bf16 %v10633_v54, %v10563_v56 }
 0x2c2   :  { %8418 = vmatmul.msk.bf16.gmra.mxu2 %vm597_vm0, %v1416_v53 }
 0x2c3   :  { %8432 = vmatmul.msk.bf16.gmra.mxu3 %vm597_vm0, %v12956_v30  ;;  %12961 = vst [vmem:[#allocation70_spill] sm:$0xff] %v10840_v36  ;;  %v10843_v30 = vpack.c.bf16 %v3233_v47, %v1403_v31  ;;  %v10857_v31 = vpop.f32.mrf.mxu0  ;;  %v10863_v47 = vld [vmem:[#allocation3 + $0x134] sm:$0xff] }
 0x2c4   :  { %12964 = vst [vmem:[#allocation73_spill] sm:$0xff] %v10857_v31 }
 0x2c5   :  { %12962 = vst [vmem:[#allocation71_spill] sm:$0xff] %v10843_v30 }
 0x2cb   :  { %v10875_v31 = vpop.f32.mrf.mxu0 }
 0x2cc   :  { %12969 = vst [vmem:[#allocation78_spill] sm:$0xff] %v10875_v31  ;;  %v1763_v31 = vld [vmem:[#allocation3 + $0x12] sm:$0xff] }
 0x2d1   :  { %8405 = vmatmul.msk.bf16.gmra.mxu1 %vm597_vm0, %v1295_v49  ;;  %8625 = vmatmul.msk.bf16.gmra.mxu0 %vm597_vm0, %v10818_v45  ;;  %v9714_v49 = vld [vmem:[%s12833_s3 + $0x48] sm:$0xff] }
 0x2d2   :  { %8419 = vmatmul.msk.bf16.gmra.mxu2 %vm597_vm0, %v1417_v8  ;;  %2071 = vmatpush.bf16.msrb.mxu1 %v9714_v49  ;;  %v10855_v8 = vpop.f32.mrf.mxu1  ;;  %v1419_v49 = vpack.c.bf16 %v10863_v47, %v1410_v33 }
 0x2d3   :  { %8433 = vmatmul.msk.bf16.gmra.mxu3 %vm597_vm0, %v10676_v1  ;;  %v1408_v1 = vld [vmem:[#allocation3 + $0x104] sm:$0xff]  ;;  %12963 = vst [vmem:[#allocation72_spill] sm:$0xff] %v10855_v8 }
 0x2d4   :  { %v1418_v53 = vpack.c.bf16 %v10834_v35, %v1408_v1 }
 0x2e1   :  { %8406 = vmatmul.msk.bf16.gmra.mxu1 %vm597_vm0, %v10840_v36  ;;  %8626 = vmatmul.msk.bf16.gmra.mxu0 %vm597_vm0, %v10843_v30 }
 0x2e2   :  { %8420 = vmatmul.msk.bf16.gmra.mxu2 %vm597_vm0, %v1418_v53  ;;  %v10865_v53 = vpop.f32.mrf.mxu3 }
 0x2e3   :  { %8434 = vmatmul.msk.bf16.gmra.mxu3 %vm597_vm0, %v10706_v3  ;;  %12967 = vst [vmem:[#allocation76_spill] sm:$0xff] %v10865_v53  ;;  %v3234_v3 = vld [vmem:[#allocation3 + $0x94] sm:$0xff] }
 0x2e4   :  { %v3247_v30 = vpack.c.bf16 %v3235_v20, %v3234_v3  ;;  %v10884_v3 = vpop.f32.mrf.mxu0 }
 0x2ee   :  { %v1009_v50 = vpop.f32.mrf.mxu1 }
 0x2ef   :  { %v1028_v45 = vadd.f32 %v10786_v40, %v1009_v50 }
 0x2f1   :  { %8407 = vmatmul.msk.bf16.gmra.mxu1 %vm597_vm0, %v10869_v0  ;;  %8627 = vmatmul.msk.bf16.gmra.mxu0 %vm597_vm0, %v3247_v30  ;;  %v1641_v0 = vld [vmem:[#allocation3 + $0x11] sm:$0xff]  ;;  %v9897_v30 = vld [vmem:[#allocation3 + $0x21] sm:$0xff] }
 0x2f2   :  { %8421 = vmatmul.msk.bf16.gmra.mxu2 %vm597_vm0, %v1419_v49 }
 0x2f3   :  { %8435 = vmatmul.msk.bf16.gmra.mxu3 %vm597_vm0, %v10743_v29 }
 0x2f5   :  { %v1131_v48 = vpop.f32.mrf.mxu2 }
 0x2f6   :  { %v1150_v36 = vadd.f32 %v1131_v48, %v1028_v45  ;;  %v1253_v34 = vpop.f32.mrf.mxu3  ;;  %v1011_v53 = vpop.f32.mrf.mxu1  ;;  %v1657_v48 = vpack.c.bf16 %v9897_v30, %v1641_v0  ;;  %v9898_v45 = vld [vmem:[#allocation3 + $0x22] sm:$0xff] }
 0x2f7   :  { %v1029_v20 = vadd.f32 %v10786_v40, %v1011_v53  ;;  %v1779_v16 = vpack.c.bf16 %v9898_v45, %v1763_v31  ;;  %v1015_v53 = vadd.f32 %v10786_v40, %v10376_v52  ;;  %v9901_v45 = vld [vmem:[#allocation3 + $0x32] sm:$0xff] }
 0x2f8   :  { %v10881_v60 = vadd.f32 %v1253_v34, %v1150_v36  ;;  %v1901_v36 = vpack.c.bf16 %v10735_v18, %v10719_v46  ;;  %v10892_v34 = vpack.c.bf16 %v1408_v1, %v10808_v10  ;;  %v10902_v18 = vpop.f32.mrf.mxu0 }
 0x2f9   :  { %v1137_v0 = vadd.f32 %v10380_v12, %v1015_v53  ;;  %v9900_v12 = vld [vmem:[#allocation3 + $0x41] sm:$0xff] }
 0x2fb   :  { %v1259_v52 = vadd.f32 %v10382_v13, %v1137_v0  ;;  %v12970_v13 = vpack.c.bf16 %v10266_v62, %v10264_v61 }
 0x2fd   :  { %v1133_v49 = vpop.f32.mrf.mxu2 }
 0x2fe   :  { %v1151_v8 = vadd.f32 %v1133_v49, %v1029_v20  ;;  %v1255_v54 = vpop.f32.mrf.mxu3  ;;  %v1340_v29 = vpop.f32.mrf.mxu1 }
 0x2ff   :  { %v1380_v50 = vadd.f32 %v1340_v29, %v10344_v41 }
 0x300   :  { %v10886_v19 = vadd.f32 %v1255_v54, %v1151_v8 }
 0x301   :  { %8442 = vmatmul.msk.bf16.vlgmr.msra.gmra.mxu1 %vm597_vm0, %v1657_v48  ;;  %8628 = vmatmul.msk.bf16.gmra.mxu0 %vm597_vm0, %v10892_v34  ;;  %v9899_v48 = vld [vmem:[#allocation3 + $0x31] sm:$0xff] }
 0x302   :  { %8456 = vmatmul.msk.bf16.vlgmr.msra.gmra.mxu2 %vm597_vm0, %v1779_v16 }
 0x303   :  { %8470 = vmatmul.msk.bf16.vlgmr.msra.gmra.mxu3 %vm597_vm0, %v1901_v36  ;;  %v9902_v36 = vld [vmem:[#allocation3 + $0x42] sm:$0xff] }
 0x304   :  { %v1780_v53 = vpack.c.bf16 %v9902_v36, %v9901_v45  ;;  %v9905_v45 = vld [vmem:[#allocation3 + $0x52] sm:$0xff]  ;;  %v9906_v36 = vld [vmem:[#allocation3 + $0x62] sm:$0xff] }
 0x305   :  { %v1462_v41 = vpop.f32.mrf.mxu2 }
 0x306   :  { %v1502_v54 = vadd.f32 %v1462_v41, %v1380_v50  ;;  %v1585_v46 = vpop.f32.mrf.mxu3  ;;  %v1342_v10 = vpop.f32.mrf.mxu1  ;;  %v1658_v50 = vpack.c.bf16 %v9900_v12, %v9899_v48 }
 0x307   :  { %v1381_v8 = vadd.f32 %v1342_v10, %v1259_v52  ;;  %v10910_v41 = vpop.f32.mrf.mxu0 }
 0x308   :  { %v10904_v1 = vadd.f32 %v1585_v46, %v1502_v54  ;;  %v10913_v54 = vpack.c.bf16 %v1410_v33, %v10834_v35 }
 0x30d   :  { %v1464_v31 = vpop.f32.mrf.mxu2 }
 0x30e   :  { %v1503_v16 = vadd.f32 %v1464_v31, %v1381_v8  ;;  %v1587_v20 = vpop.f32.mrf.mxu3  ;;  %v1345_v49 = vpop.f32.mrf.mxu1 }
 0x30f   :  { %v1382_v30 = vadd.f32 %v1345_v49, %v10422_v23  ;;  %v1017_v23 = vadd.f32 %v10786_v40, %v10447_v59  ;;  %v10929_v31 = vpop.f32.mrf.mxu0  ;;  %v3241_v49 = vld [vmem:[#allocation3 + $0x144] sm:$0xff] }
 0x310   :  { %v10907_v29 = vadd.f32 %v1587_v20, %v1503_v16 }
 0x311   :  { %8443 = vmatmul.msk.bf16.gmra.mxu1 %vm597_vm0, %v1658_v50  ;;  %8629 = vmatmul.msk.bf16.gmra.mxu0 %vm597_vm0, %v10913_v54  ;;  %v1139_v46 = vadd.f32 %v10450_v25, %v1017_v23  ;;  %v9903_v25 = vld [vmem:[#allocation3 + $0x51] sm:$0xff]  ;;  %v1019_v23 = vadd.f32 %v10786_v40, %v10505_v28  ;;  %v10958_v28 = vld [vmem:[#allocation3 + $0x82] sm:$0xff] }
 0x312   :  { %8457 = vmatmul.msk.bf16.gmra.mxu2 %vm597_vm0, %v1780_v53  ;;  %v1781_v53 = vpack.c.bf16 %v9906_v36, %v9905_v45  ;;  %v9907_v45 = vld [vmem:[#allocation3 + $0x71] sm:$0xff] }
 0x313   :  { %8471 = vmatmul.msk.bf16.gmra.mxu3 %vm597_vm0, %v12970_v13  ;;  %v1261_v8 = vadd.f32 %v10455_v38, %v1139_v46  ;;  %v9728_v38 = vld [vmem:[%s12833_s3 + $0xb8] sm:$0xff]  ;;  %v10938_v13 = vpack.c.bf16 %v3241_v49, %v10863_v47  ;;  %v1141_v46 = vadd.f32 %v10508_v24, %v1019_v23 }
 0x314   :  { %3781 = vmatpush.bf16.msrb.mxu0 %v9728_v38 }
 0x315   :  { %v1467_v0 = vpop.f32.mrf.mxu2 }
 0x316   :  { %v1504_v33 = vadd.f32 %v1467_v0, %v1382_v30  ;;  %v1590_v35 = vpop.f32.mrf.mxu3  ;;  %v1347_v10 = vpop.f32.mrf.mxu1  ;;  %v9904_v30 = vld [vmem:[#allocation3 + $0x61] sm:$0xff] }
 0x317   :  { %v1383_v61 = vadd.f32 %v1347_v10, %v1261_v8  ;;  %v1659_v50 = vpack.c.bf16 %v9904_v30, %v9903_v25  ;;  %v10950_v0 = vpop.f32.mrf.mxu0  ;;  %v10960_v25 = vld [vmem:[#allocation3 + $0x83] sm:$0xff] }
 0x318   :  { %v10926_v52 = vadd.f32 %v1590_v35, %v1504_v33 }
 0x31d   :  { %v1469_v62 = vpop.f32.mrf.mxu2 }
 0x31e   :  { %v1505_v16 = vadd.f32 %v1469_v62, %v1383_v61  ;;  %v1592_v20 = vpop.f32.mrf.mxu3  ;;  %v1350_v48 = vpop.f32.mrf.mxu1  ;;  %v3242_v61 = vld [vmem:[#allocation3 + $0x154] sm:$0xff]  ;;  %v3243_v62 = vld [vmem:[#allocation3 + $0x164] sm:$0xff] }
 0x31f   :  { %v1384_v59 = vadd.f32 %v1350_v48, %v10467_v7  ;;  %v12971_v7 = vpack.c.bf16 %v10357_v6, %v10355_v5  ;;  %v1263_v5 = vadd.f32 %v10515_v63, %v1141_v46  ;;  %v10962_v24 = vpop.f32.mrf.mxu0  ;;  %v3251_v30 = vpack.c.bf16 %v3243_v62, %v3242_v61  ;;  %v1649_v62 = vld [vmem:[#allocation3 + $0xd1] sm:$0xff] }
 0x320   :  { %v10931_v12 = vadd.f32 %v1592_v20, %v1505_v16  ;;  %v10956_v20 = vld [vmem:[#allocation3 + $0x81] sm:$0xff] }
 0x321   :  { %8444 = vmatmul.msk.bf16.gmra.mxu1 %vm597_vm0, %v1659_v50  ;;  %8630 = vmatmul.msk.bf16.gmra.mxu0 %vm597_vm0, %v10938_v13  ;;  %v1660_v36 = vpack.c.bf16 %v10956_v20, %v9907_v45  ;;  %v1905_v45 = vpack.c.bf16 %v10810_v57, %v10791_v26 }
 0x322   :  { %8458 = vmatmul.msk.bf16.gmra.mxu2 %vm597_vm0, %v1781_v53  ;;  %v9908_v53 = vld [vmem:[#allocation3 + $0x72] sm:$0xff] }
 0x323   :  { %8472 = vmatmul.msk.bf16.gmra.mxu3 %vm597_vm0, %v12971_v7  ;;  %v1782_v38 = vpack.c.bf16 %v10958_v28, %v9908_v53  ;;  %v1904_v7 = vpack.c.bf16 %v10960_v25, %v10769_v44 }
 0x325   :  { %v1472_v47 = vpop.f32.mrf.mxu2 }
 0x326   :  { %v1506_v33 = vadd.f32 %v1472_v47, %v1384_v59  ;;  %v1595_v35 = vpop.f32.mrf.mxu3  ;;  %v1352_v10 = vpop.f32.mrf.mxu1 }
 0x327   :  { %v1385_v6 = vadd.f32 %v1352_v10, %v1263_v5  ;;  %v10980_v44 = vpop.f32.mrf.mxu0 }
 0x328   :  { %v10953_v8 = vadd.f32 %v1595_v35, %v1506_v33 }
 0x32d   :  { %v1474_v16 = vpop.f32.mrf.mxu2 }
 0x32e   :  { %v1507_v49 = vadd.f32 %v1474_v16, %v1385_v6  ;;  %v1597_v48 = vpop.f32.mrf.mxu3  ;;  %v1355_v59 = vpop.f32.mrf.mxu1  ;;  %v1771_v16 = vld [vmem:[#allocation3 + $0xd2] sm:$0xff] }
 0x32f   :  { %v1386_v63 = vadd.f32 %v1355_v59, %v10543_v42  ;;  %v1021_v42 = vadd.f32 %v10786_v40, %v10614_v37 }
 0x330   :  { %v10964_v50 = vadd.f32 %v1597_v48, %v1507_v49 }
 0x331   :  { %8445 = vmatmul.msk.bf16.gmra.mxu1 %vm597_vm0, %v1660_v36  ;;  %8631 = vmatmul.msk.bf16.gmra.mxu0 %vm597_vm0, %v3251_v30  ;;  %v1143_v47 = vadd.f32 %v10620_v43, %v1021_v42  ;;  %v1661_v30 = vpack.c.bf16 %v10520_v14, %v1649_v62  ;;  %v10994_v36 = vpop.f32.mrf.mxu0 }
 0x332   :  { %8459 = vmatmul.msk.bf16.gmra.mxu2 %vm597_vm0, %v1782_v38 }
 0x333   :  { %8473 = vmatmul.msk.bf16.gmra.mxu3 %vm597_vm0, %v1904_v7  ;;  %v1265_v5 = vadd.f32 %v10625_v51, %v1143_v47  ;;  %v1023_v51 = vadd.f32 %v10786_v40, %v10685_v17 }
 0x335   :  { %v1477_v23 = vpop.f32.mrf.mxu2  ;;  %v1145_v53 = vadd.f32 %v10692_v27, %v1023_v51  ;;  %v1662_v27 = vpack.c.bf16 %v10587_v21, %v10522_v2 }
 0x336   :  { %v1508_v46 = vadd.f32 %v1477_v23, %v1386_v63  ;;  %v1600_v33 = vpop.f32.mrf.mxu3  ;;  %v1357_v35 = vpop.f32.mrf.mxu1  ;;  %v1783_v63 = vpack.c.bf16 %v10524_v11, %v1771_v16  ;;  %v12974_v16 = vld [vmem:[#allocation61_spill] sm:$0xff] }
 0x337   :  { %v1387_v6 = vadd.f32 %v1357_v35, %v1265_v5  ;;  %v1267_v17 = vadd.f32 %v10694_v15, %v1145_v53  ;;  %v12972_v15 = vpack.c.bf16 %v10563_v56, %v10561_v55  ;;  %v9715_v55 = vld [vmem:[%s12833_s3 + $0x50] sm:$0xff]  ;;  %v9716_v56 = vld [vmem:[%s12833_s3 + $0x58] sm:$0xff] }
 0x338   :  { %v10978_v10 = vadd.f32 %v1600_v33, %v1508_v46  ;;  %2193 = vmatpush.bf16.msrb.mxu2 %v9715_v55  ;;  %2315 = vmatpush.bf16.msrb.mxu3 %v9716_v56 }
 0x339   :  { %v11003_v42 = vpop.f32.mrf.mxu0 }
 0x33d   :  { %v1479_v61 = vpop.f32.mrf.mxu2 }
 0x33e   :  { %v1509_v49 = vadd.f32 %v1479_v61, %v1387_v6  ;;  %v1602_v48 = vpop.f32.mrf.mxu3  ;;  %v1360_v59 = vpop.f32.mrf.mxu1  ;;  %v1784_v6 = vpack.c.bf16 %v10589_v58, %v10526_v22  ;;  %v12973_v61 = vld [vmem:[#allocation60_spill] sm:$0xff] }
 0x33f   :  { %v1388_v43 = vadd.f32 %v1360_v59, %v10631_v4 }
 0x340   :  { %v10983_v37 = vadd.f32 %v1602_v48, %v1509_v49 }
 0x341   :  { %8446 = vmatmul.msk.bf16.gmra.mxu1 %vm597_vm0, %v1661_v30  ;;  %8680 = vmatmul.msk.bf16.vlgmr.msrb.gmra.mxu0 %vm597_vm0, %v10754_v9  ;;  %v11022_v62 = vpop.f32.mrf.mxu0 }
 0x342   :  { %8460 = vmatmul.msk.bf16.gmra.mxu2 %vm597_vm0, %v1783_v63 }
 0x343   :  { %8474 = vmatmul.msk.bf16.gmra.mxu3 %vm597_vm0, %v1905_v45 }
 0x345   :  { %v1482_v4 = vpop.f32.mrf.mxu2 }
 0x346   :  { %v1510_v38 = vadd.f32 %v1482_v4, %v1388_v43  ;;  %v1605_v7 = vpop.f32.mrf.mxu3  ;;  %v1362_v26 = vpop.f32.mrf.mxu1 }
 0x347   :  { %v1389_v23 = vadd.f32 %v1362_v26, %v1267_v17  ;;  %v12976_v17 = vld [vmem:[#allocation63_spill] sm:$0xff] }
 0x348   :  { %v11000_v57 = vadd.f32 %v1605_v7, %v1510_v38  ;;  %v3722_v38 = vld [vmem:[#allocation3 + $0x93] sm:$0xff] }
 0x349   :  { %v11034_v45 = vpop.f32.mrf.mxu0 }
 0x34d   :  { %v1484_v47 = vpop.f32.mrf.mxu2 }
 0x34e   :  { %v1511_v46 = vadd.f32 %v1484_v47, %v1389_v23  ;;  %v1607_v33 = vpop.f32.mrf.mxu3  ;;  %v1365_v35 = vpop.f32.mrf.mxu1  ;;  %v11040_v47 = vpack.c.bf16 %v3722_v38, %v10960_v25  ;;  %v9717_v25 = vld [vmem:[%s12833_s3 + $0x60] sm:$0xff] }
 0x34f   :  { %v1390_v9 = vadd.f32 %v1365_v35, %v10716_v39  ;;  %v1025_v39 = vadd.f32 %v10786_v40, %v12973_v61  ;;  %v12984_v61 = vld [vmem:[#allocation46_spill] sm:$0xff]  ;;  %2437 = vmatpush.bf16.msra.mxu1 %v9717_v25 }
 0x350   :  { %v11005_v5 = vadd.f32 %v1607_v33, %v1511_v46  ;;  %v12977_v46 = vld [vmem:[#allocation47_spill] sm:$0xff]  ;;  %v12978_v33 = vld [vmem:[#allocation44_spill] sm:$0xff]  ;;  %v3724_v38 = vld [vmem:[#allocation3 + $0xb3] sm:$0xff] }
 0x351   :  { %8447 = vmatmul.msk.bf16.gmra.mxu1 %vm597_vm0, %v1662_v27  ;;  %8681 = vmatmul.msk.bf16.gmra.mxu0 %vm597_vm0, %v10775_v32  ;;  %v1147_v58 = vadd.f32 %v12974_v16, %v1025_v39  ;;  %v12975_v32 = vld [vmem:[#allocation62_spill] sm:$0xff]  ;;  %v12979_v35 = vpack.c.bf16 %v12977_v46, %v12978_v33  ;;  %v12981_v27 = vld [vmem:[#allocation45_spill] sm:$0xff]  ;;  %v11062_v56 = vpop.f32.mrf.mxu0 }
 0x352   :  { %8461 = vmatmul.msk.bf16.gmra.mxu2 %vm597_vm0, %v1784_v6 }
 0x353   :  { %8475 = vmatmul.msk.bf16.gmra.mxu3 %vm597_vm0, %v12972_v15  ;;  %v1269_v30 = vadd.f32 %v12975_v32, %v1147_v58  ;;  %v12983_v15 = vld [vmem:[#allocation50_spill] sm:$0xff] }
 0x354   :  { %v12985_v39 = vpack.c.bf16 %v12983_v15, %v12984_v61  ;;  %v12989_v15 = vld [vmem:[#allocation56_spill] sm:$0xff] }
 0x355   :  { %v1487_v21 = vpop.f32.mrf.mxu2 }
 0x356   :  { %v1512_v49 = vadd.f32 %v1487_v21, %v1390_v9  ;;  %v1610_v48 = vpop.f32.mrf.mxu3  ;;  %v1367_v59 = vpop.f32.mrf.mxu1  ;;  %v12980_v9 = vld [vmem:[#allocation48_spill] sm:$0xff] }
 0x357   :  { %v1391_v63 = vadd.f32 %v1367_v59, %v1269_v30  ;;  %v12982_v6 = vpack.c.bf16 %v12980_v9, %v12981_v27  ;;  %v12986_v21 = vld [vmem:[#allocation72_spill] sm:$0xff] }
 0x358   :  { %v11025_v43 = vadd.f32 %v1610_v48, %v1512_v49  ;;  %v1027_v16 = vadd.f32 %v10786_v40, %v12986_v21  ;;  %v12987_v49 = vld [vmem:[#allocation74_spill] sm:$0xff]  ;;  %v11069_v40 = vld [vmem:[#allocation3 + $0x142] sm:$0xff] }
 0x359   :  { %v11080_v21 = vpop.f32.mrf.mxu0 }
 0x35a   :  { %v1149_v48 = vadd.f32 %v12987_v49, %v1027_v16  ;;  %v12991_v16 = vld [vmem:[#allocation75_spill] sm:$0xff] }
 0x35d   :  { %v1489_v51 = vpop.f32.mrf.mxu2 }
 0x35e   :  { %v1513_v4 = vadd.f32 %v1489_v51, %v1391_v63  ;;  %v1612_v53 = vpop.f32.mrf.mxu3  ;;  %v1370_v7 = vpop.f32.mrf.mxu1  ;;  %v12988_v63 = vld [vmem:[#allocation76_spill] sm:$0xff] }
 0x35f   :  { %v1392_v23 = vadd.f32 %v1370_v7, %v12976_v17  ;;  %v1271_v51 = vadd.f32 %v12988_v63, %v1149_v48  ;;  %v11067_v17 = vld [vmem:[#allocation3 + $0x141] sm:$0xff] }
 0x360   :  { %v11036_v26 = vadd.f32 %v1612_v53, %v1513_v4  ;;  %v3723_v53 = vld [vmem:[#allocation3 + $0xa3] sm:$0xff]  ;;  %v1664_v61 = vpack.c.bf16 %v11067_v17, %v12989_v15 }
 0x361   :  { %8448 = vmatmul.msk.bf16.gmra.mxu1 %vm597_vm0, %v12979_v35  ;;  %8682 = vmatmul.msk.bf16.gmra.mxu0 %vm597_vm0, %v11040_v47  ;;  %v11071_v35 = vld [vmem:[#allocation3 + $0x143] sm:$0xff]  ;;  %v3736_v9 = vpack.c.bf16 %v3724_v38, %v3723_v53  ;;  %v11091_v63 = vpop.f32.mrf.mxu0 }
 0x362   :  { %8462 = vmatmul.msk.bf16.gmra.mxu2 %vm597_vm0, %v12982_v6  ;;  %v12995_v15 = vld [vmem:[#allocation12_spill] sm:$0xff] }
 0x363   :  { %8476 = vmatmul.msk.bf16.gmra.mxu3 %vm597_vm0, %v12985_v39  ;;  %v12990_v39 = vld [vmem:[#allocation57_spill] sm:$0xff] }
 0x364   :  { %v1786_v25 = vpack.c.bf16 %v11069_v40, %v12990_v39  ;;  %v12998_v39 = vld [vmem:[#allocation14_spill] sm:$0xff] }
 0x365   :  { %v1492_v58 = vpop.f32.mrf.mxu2 }
 0x366   :  { %v1514_v59 = vadd.f32 %v1492_v58, %v1392_v23  ;;  %v1615_v55 = vpop.f32.mrf.mxu3  ;;  %v1372_v32 = vpop.f32.mrf.mxu1  ;;  %v1908_v58 = vpack.c.bf16 %v11071_v35, %v12991_v16  ;;  %v13000_v16 = vld [vmem:[#allocation70_spill] sm:$0xff] }
 0x367   :  { %v1393_v4 = vadd.f32 %v1372_v32, %v1271_v51 }
 0x368   :  { %v11064_v30 = vadd.f32 %v1615_v55, %v1514_v59 }
 0x36d   :  { %v1494_v7 = vpop.f32.mrf.mxu2 }
 0x36e   :  { %v1515_v46 = vadd.f32 %v1494_v7, %v1393_v4  ;;  %v1617_v33 = vpop.f32.mrf.mxu3  ;;  %v1375_v23 = vpop.f32.mrf.mxu1 }
 0x36f   :  { %v1394_v6 = vadd.f32 %v1375_v23, %v10881_v60  ;;  %v12993_v23 = vld [vmem:[#allocation59_spill] sm:$0xff] }
 0x370   :  { %v11073_v27 = vadd.f32 %v1617_v33, %v1515_v46  ;;  %v12992_v33 = vld [vmem:[#allocation58_spill] sm:$0xff] }
 0x371   :  { %8449 = vmatmul.msk.bf16.gmra.mxu1 %vm597_vm0, %v1664_v61  ;;  %8683 = vmatmul.msk.bf16.gmra.mxu0 %vm597_vm0, %v3736_v9  ;;  %v2023_v9 = vpack.c.bf16 %v12993_v23, %v12992_v33 }
 0x372   :  { %8463 = vmatmul.msk.bf16.gmra.mxu2 %vm597_vm0, %v1786_v25 }
 0x373   :  { %8477 = vmatmul.msk.bf16.gmra.mxu3 %vm597_vm0, %v1908_v58  ;;  %v11109_v58 = vpop.f32.mrf.mxu0 }
 0x375   :  { %v1497_v60 = vpop.f32.mrf.mxu2 }
 0x376   :  { %v1516_v49 = vadd.f32 %v1497_v60, %v1394_v6  ;;  %v1620_v48 = vpop.f32.mrf.mxu3  ;;  %v1377_v59 = vpop.f32.mrf.mxu1  ;;  %v12994_v6 = vld [vmem:[#allocation13_spill] sm:$0xff] }
 0x377   :  { %v1395_v32 = vadd.f32 %v1377_v59, %v10886_v19  ;;  %v12996_v61 = vpack.c.bf16 %v12994_v6, %v12995_v15  ;;  %v12997_v19 = vld [vmem:[#allocation16_spill] sm:$0xff]  ;;  %v13001_v6 = vld [vmem:[#allocation65_spill] sm:$0xff] }
 0x378   :  { %v11088_v55 = vadd.f32 %v1620_v48, %v1516_v49  ;;  %v12999_v25 = vpack.c.bf16 %v12997_v19, %v12998_v39  ;;  %v13003_v15 = vld [vmem:[#allocation20_spill] sm:$0xff] }
 0x379   :  { %v13005_v19 = vld [vmem:[#allocation24_spill] sm:$0xff] }
 0x37d   :  { %v1499_v51 = vpop.f32.mrf.mxu2 }
 0x37e   :  { %v1517_v4 = vadd.f32 %v1499_v51, %v1395_v32  ;;  %v1622_v53 = vpop.f32.mrf.mxu3  ;;  %v1707_v38 = vpop.f32.mrf.mxu1 }
 0x37f   :  { %v1747_v46 = vadd.f32 %v1707_v38, %v10904_v1  ;;  %v11114_v38 = vpop.f32.mrf.mxu0 }
 0x380   :  { %v11093_v7 = vadd.f32 %v1622_v53, %v1517_v4 }
 0x381   :  { %8484 = vmatmul.msk.bf16.vlgmr.msrb.gmra.mxu1 %vm597_vm0, %v2023_v9  ;;  %8684 = vmatmul.msk.bf16.gmra.mxu0 %vm597_vm0, %v13000_v16 }
 0x382   :  { %8498 = vmatmul.msk.bf16.vlgmr.msrb.gmra.mxu2 %vm597_vm0, %v12996_v61 }
 0x383   :  { %8512 = vmatmul.msk.bf16.vlgmr.msrb.gmra.mxu3 %vm597_vm0, %v12999_v25  ;;  %v13008_v25 = vld [vmem:[#allocation77_spill] sm:$0xff] }
 0x385   :  { %v1829_v1 = vpop.f32.mrf.mxu2 }
 0x386   :  { %v1869_v60 = vadd.f32 %v1829_v1, %v1747_v46  ;;  %v1951_v49 = vpop.f32.mrf.mxu3  ;;  %v1709_v48 = vpop.f32.mrf.mxu1  ;;  %v13002_v46 = vld [vmem:[#allocation21_spill] sm:$0xff] }
 0x387   :  { %v1748_v32 = vadd.f32 %v1709_v48, %v10907_v29  ;;  %v13004_v61 = vpack.c.bf16 %v13002_v46, %v13003_v15  ;;  %v13006_v29 = vld [vmem:[#allocation22_spill] sm:$0xff] }
 0x388   :  { %v11111_v59 = vadd.f32 %v1951_v49, %v1869_v60  ;;  %v13007_v39 = vpack.c.bf16 %v13005_v19, %v13006_v29  ;;  %v2133_v15 = vld [vmem:[#allocation3 + $0x60] sm:$0xff] }
 0x38d   :  { %v1831_v51 = vpop.f32.mrf.mxu2 }
 0x38e   :  { %v1870_v4 = vadd.f32 %v1831_v51, %v1748_v32  ;;  %v1953_v53 = vpop.f32.mrf.mxu3  ;;  %v1712_v33 = vpop.f32.mrf.mxu1 }
 0x38f   :  { %v1749_v9 = vadd.f32 %v1712_v33, %v10926_v52  ;;  %v11134_v32 = vpop.f32.mrf.mxu0 }
 0x390   :  { %v11116_v23 = vadd.f32 %v1953_v53, %v1870_v4  ;;  %v2134_v4 = vld [vmem:[#allocation3 + $0x70] sm:$0xff] }
 0x391   :  { %8485 = vmatmul.msk.bf16.gmra.mxu1 %vm597_vm0, %v13001_v6  ;;  %8685 = vmatmul.msk.bf16.gmra.mxu0 %vm597_vm0, %v13008_v25  ;;  %v3730_v6 = vld [vmem:[#allocation3 + $0x153] sm:$0xff] }
 0x392   :  { %8499 = vmatmul.msk.bf16.gmra.mxu2 %vm597_vm0, %v13004_v61  ;;  %v11140_v29 = vpack.c.bf16 %v3730_v6, %v11071_v35  ;;  %v13010_v25 = vld [vmem:[#allocation33_spill] sm:$0xff] }
 0x393   :  { %8513 = vmatmul.msk.bf16.gmra.mxu3 %vm597_vm0, %v13007_v39  ;;  %v13009_v39 = vld [vmem:[#allocation67_spill] sm:$0xff] }
 0x395   :  { %v1834_v16 = vpop.f32.mrf.mxu2 }
 0x396   :  { %v1871_v1 = vadd.f32 %v1834_v16, %v1749_v9  ;;  %v1956_v60 = vpop.f32.mrf.mxu3  ;;  %v1714_v52 = vpop.f32.mrf.mxu1  ;;  %v2147_v9 = vpack.c.bf16 %v2134_v4, %v2133_v15  ;;  %v13011_v16 = vld [vmem:[#allocation32_spill] sm:$0xff] }
 0x397   :  { %v1750_v48 = vadd.f32 %v1714_v52, %v10931_v12  ;;  %v11145_v12 = vpop.f32.mrf.mxu0 }
 0x398   :  { %v11131_v49 = vadd.f32 %v1956_v60, %v1871_v1  ;;  %v13012_v1 = vpack.c.bf16 %v13010_v25, %v13011_v16 }
 0x39d   :  { %v1836_v51 = vpop.f32.mrf.mxu2 }
 0x39e   :  { %v1872_v53 = vadd.f32 %v1836_v51, %v1750_v48  ;;  %v1958_v33 = vpop.f32.mrf.mxu3  ;;  %v1717_v46 = vpop.f32.mrf.mxu1 }
 0x39f   :  { %v1751_v19 = vadd.f32 %v1717_v46, %v10953_v8  ;;  %v11156_v46 = vld [vmem:[#allocation3 + $0x91] sm:$0xff] }
 0x3a0   :  { %v11136_v61 = vadd.f32 %v1958_v33, %v1872_v53  ;;  %v2136_v53 = vld [vmem:[#allocation3 + $0x90] sm:$0xff] }
 0x3a1   :  { %8486 = vmatmul.msk.bf16.gmra.mxu1 %vm597_vm0, %v13009_v39  ;;  %8686 = vmatmul.msk.bf16.gmra.mxu0 %vm597_vm0, %v11140_v29 }
 0x3a2   :  { %8500 = vmatmul.msk.bf16.gmra.mxu2 %vm597_vm0, %v2147_v9  ;;  %v2135_v9 = vld [vmem:[#allocation3 + $0x80] sm:$0xff] }
 0x3a3   :  { %8514 = vmatmul.msk.bf16.gmra.mxu3 %vm597_vm0, %v13012_v1  ;;  %v2148_v16 = vpack.c.bf16 %v2136_v53, %v2135_v9  ;;  %v13013_v1 = vld [vmem:[#allocation71_spill] sm:$0xff] }
 0x3a5   :  { %v1839_v8 = vpop.f32.mrf.mxu2 }
 0x3a6   :  { %v1873_v60 = vadd.f32 %v1839_v8, %v1751_v19  ;;  %v1961_v52 = vpop.f32.mrf.mxu3  ;;  %v1719_v35 = vpop.f32.mrf.mxu1  ;;  %v2270_v19 = vpack.c.bf16 %v11156_v46, %v10956_v20 }
 0x3a7   :  { %v1752_v51 = vadd.f32 %v1719_v35, %v10964_v50 }
 0x3a8   :  { %v11153_v48 = vadd.f32 %v1961_v52, %v1873_v60 }
 0x3ad   :  { %v1841_v4 = vpop.f32.mrf.mxu2 }
 0x3ae   :  { %v1874_v33 = vadd.f32 %v1841_v4, %v1752_v51  ;;  %v1963_v6 = vpop.f32.mrf.mxu3  ;;  %v1722_v15 = vpop.f32.mrf.mxu1  ;;  %v2138_v4 = vld [vmem:[#allocation3 + $0xf0] sm:$0xff] }
 0x3af   :  { %v1753_v25 = vadd.f32 %v1722_v15, %v10978_v10 }
 0x3b0   :  { %v11158_v39 = vadd.f32 %v1963_v6, %v1874_v33  ;;  %v2137_v6 = vld [vmem:[#allocation3 + $0xe0] sm:$0xff] }
 0x3b1   :  { %8487 = vmatmul.msk.bf16.gmra.mxu1 %vm597_vm0, %v13013_v1 }
 0x3b2   :  { %8501 = vmatmul.msk.bf16.gmra.mxu2 %vm597_vm0, %v2148_v16  ;;  %v13014_v16 = vld [vmem:[#allocation64_spill] sm:$0xff] }
 0x3b3   :  { %8515 = vmatmul.msk.bf16.gmra.mxu3 %vm597_vm0, %v2270_v19  ;;  %v13015_v19 = vld [vmem:[#allocation66_spill] sm:$0xff] }
 0x3b4   :  { %v2027_v1 = vpack.c.bf16 %v13015_v19, %v13014_v16  ;;  %v11187_v19 = vld [vmem:[#allocation3 + $0x101] sm:$0xff] }
 0x3b5   :  { %v1844_v50 = vpop.f32.mrf.mxu2 }
 0x3b6   :  { %v1875_v8 = vadd.f32 %v1844_v50, %v1753_v25  ;;  %v1966_v60 = vpop.f32.mrf.mxu3  ;;  %v1724_v52 = vpop.f32.mrf.mxu1  ;;  %v2149_v25 = vpack.c.bf16 %v2138_v4, %v2137_v6  ;;  %v2139_v6 = vld [vmem:[#allocation3 + $0x100] sm:$0xff] }
 0x3b7   :  { %v1754_v51 = vadd.f32 %v1724_v52, %v10983_v37  ;;  %v13016_v37 = vpack.c.bf16 %v10522_v2, %v10520_v14 }
 0x3b8   :  { %v11167_v35 = vadd.f32 %v1966_v60, %v1875_v8 }
 0x3bd   :  { %v1846_v10 = vpop.f32.mrf.mxu2 }
 0x3be   :  { %v1876_v53 = vadd.f32 %v1846_v10, %v1754_v51  ;;  %v1968_v33 = vpop.f32.mrf.mxu3  ;;  %v1727_v20 = vpop.f32.mrf.mxu1 }
 0x3bf   :  { %v1755_v9 = vadd.f32 %v1727_v20, %v11000_v57 }
 0x3c0   :  { %v11170_v15 = vadd.f32 %v1968_v33, %v1876_v53  ;;  %v2140_v53 = vld [vmem:[#allocation3 + $0x110] sm:$0xff] }
 0x3c1   :  { %8488 = vmatmul.msk.bf16.gmra.mxu1 %vm597_vm0, %v2027_v1  ;;  %v2150_v2 = vpack.c.bf16 %v2140_v53, %v2139_v6 }
 0x3c2   :  { %8502 = vmatmul.msk.bf16.gmra.mxu2 %vm597_vm0, %v2149_v25 }
 0x3c3   :  { %8516 = vmatmul.msk.bf16.gmra.mxu3 %vm597_vm0, %v13016_v37 }
 0x3c5   :  { %v1849_v50 = vpop.f32.mrf.mxu2 }
 0x3c6   :  { %v1877_v8 = vadd.f32 %v1849_v50, %v1755_v9  ;;  %v1971_v60 = vpop.f32.mrf.mxu3  ;;  %v1729_v52 = vpop.f32.mrf.mxu1  ;;  %v9909_v9 = vld [vmem:[#allocation3 + $0x111] sm:$0xff] }
 0x3c7   :  { %v1756_v57 = vadd.f32 %v1729_v52, %v11005_v5  ;;  %v2272_v1 = vpack.c.bf16 %v9909_v9, %v11187_v19 }
 0x3c8   :  { %v11181_v51 = vadd.f32 %v1971_v60, %v1877_v8  ;;  %v9718_v60 = vld [vmem:[%s12833_s3 + $0x68] sm:$0xff] }
 0x3c9   :  { %2559 = vmatpush.bf16.msra.mxu2 %v9718_v60 }
 0x3cd   :  { %v1851_v10 = vpop.f32.mrf.mxu2 }
 0x3ce   :  { %v1878_v4 = vadd.f32 %v1851_v10, %v1756_v57  ;;  %v1973_v33 = vpop.f32.mrf.mxu3  ;;  %v1732_v20 = vpop.f32.mrf.mxu1  ;;  %v2142_v57 = vld [vmem:[#allocation3 + $0x130] sm:$0xff] }
 0x3cf   :  { %v1757_v14 = vadd.f32 %v1732_v20, %v11025_v43  ;;  %v2141_v20 = vld [vmem:[#allocation3 + $0x120] sm:$0xff] }
 0x3d0   :  { %v11184_v16 = vadd.f32 %v1973_v33, %v1878_v4  ;;  %v11203_v4 = vld [vmem:[#allocation3 + $0x131] sm:$0xff] }
 0x3d1   :  { %8489 = vmatmul.msk.bf16.gmra.mxu1 %vm597_vm0, %v10892_v34  ;;  %v9719_v34 = vld [vmem:[%s12833_s3 + $0x70] sm:$0xff] }
 0x3d2   :  { %8503 = vmatmul.msk.bf16.gmra.mxu2 %vm597_vm0, %v2150_v2  ;;  %2681 = vmatpush.bf16.msra.mxu3 %v9719_v34  ;;  %v9910_v2 = vld [vmem:[#allocation3 + $0x121] sm:$0xff] }
 0x3d3   :  { %8517 = vmatmul.msk.bf16.gmra.mxu3 %vm597_vm0, %v2272_v1  ;;  %v2273_v9 = vpack.c.bf16 %v11203_v4, %v9910_v2  ;;  %v9721_v1 = vld [vmem:[%s12833_s3 + $0x80] sm:$0xff]  ;;  %v2143_v34 = vld [vmem:[#allocation3 + $0x140] sm:$0xff] }
 0x3d4   :  { %2926 = vmatpush.bf16.msrb.mxu1 %v9721_v1 }
 0x3d5   :  { %v1854_v5 = vpop.f32.mrf.mxu2 }
 0x3d6   :  { %v1879_v25 = vadd.f32 %v1854_v5, %v1757_v14  ;;  %v1976_v37 = vpop.f32.mrf.mxu3  ;;  %v1734_v50 = vpop.f32.mrf.mxu1  ;;  %v2151_v14 = vpack.c.bf16 %v2142_v57, %v2141_v20 }
 0x3d7   :  { %v1758_v43 = vadd.f32 %v1734_v50, %v11036_v26 }
 0x3d8   :  { %v11194_v8 = vadd.f32 %v1976_v37, %v1879_v25 }
 0x3dd   :  { %v1856_v52 = vpop.f32.mrf.mxu2 }
 0x3de   :  { %v1880_v10 = vadd.f32 %v1856_v52, %v1758_v43  ;;  %v1978_v53 = vpop.f32.mrf.mxu3  ;;  %v1737_v33 = vpop.f32.mrf.mxu1 }
 0x3df   :  { %v1759_v26 = vadd.f32 %v1737_v33, %v11064_v30 }
 0x3e0   :  { %v11205_v6 = vadd.f32 %v1978_v53, %v1880_v10  ;;  %v11219_v10 = vld [vmem:[#allocation3 + $0x151] sm:$0xff] }
 0x3e1   :  { %8490 = vmatmul.msk.bf16.gmra.mxu1 %vm597_vm0, %v10913_v54  ;;  %v2144_v54 = vld [vmem:[#allocation3 + $0x150] sm:$0xff] }
 0x3e2   :  { %8504 = vmatmul.msk.bf16.gmra.mxu2 %vm597_vm0, %v2151_v14  ;;  %v2152_v14 = vpack.c.bf16 %v2144_v54, %v2143_v34  ;;  %v9911_v54 = vld [vmem:[#allocation3 + $0x33] sm:$0xff] }
 0x3e3   :  { %8518 = vmatmul.msk.bf16.gmra.mxu3 %vm597_vm0, %v2273_v9 }
 0x3e5   :  { %v1859_v5 = vpop.f32.mrf.mxu2 }
 0x3e6   :  { %v1881_v25 = vadd.f32 %v1859_v5, %v1759_v26  ;;  %v1981_v37 = vpop.f32.mrf.mxu3  ;;  %v1739_v30 = vpop.f32.mrf.mxu1  ;;  %v2274_v26 = vpack.c.bf16 %v11219_v10, %v11067_v17 }
 0x3e7   :  { %v1760_v43 = vadd.f32 %v1739_v30, %v11073_v27 }
 0x3e8   :  { %v11216_v50 = vadd.f32 %v1981_v37, %v1881_v25 }
 0x3ed   :  { %v1861_v60 = vpop.f32.mrf.mxu2 }
 0x3ee   :  { %v1882_v52 = vadd.f32 %v1861_v60, %v1760_v43  ;;  %v1983_v57 = vpop.f32.mrf.mxu3  ;;  %v1742_v53 = vpop.f32.mrf.mxu1  ;;  %v2618_v43 = vld [vmem:[#allocation3 + $0x34] sm:$0xff]  ;;  %v2495_v60 = vld [vmem:[#allocation3 + $0x23] sm:$0xff] }
 0x3ef   :  { %v1761_v20 = vadd.f32 %v1742_v53, %v11088_v55 }
 0x3f0   :  { %v11221_v33 = vadd.f32 %v1983_v57, %v1882_v52  ;;  %v2511_v52 = vpack.c.bf16 %v9911_v54, %v2495_v60  ;;  %v2617_v57 = vld [vmem:[#allocation3 + $0x24] sm:$0xff] }
 0x3f1   :  { %8491 = vmatmul.msk.bf16.gmra.mxu1 %vm597_vm0, %v10938_v13  ;;  %v2633_v53 = vpack.c.bf16 %v2618_v43, %v2617_v57  ;;  %v9912_v54 = vld [vmem:[#allocation3 + $0x43] sm:$0xff] }
 0x3f2   :  { %8505 = vmatmul.msk.bf16.gmra.mxu2 %vm597_vm0, %v2152_v14  ;;  %v13018_v14 = vld [vmem:[#allocation15_spill] sm:$0xff] }
 0x3f3   :  { %8519 = vmatmul.msk.bf16.gmra.mxu3 %vm597_vm0, %v2274_v26 }
 0x3f5   :  { %v1864_v27 = vpop.f32.mrf.mxu2 }
 0x3f6   :  { %v1883_v2 = vadd.f32 %v1864_v27, %v1761_v20  ;;  %v1986_v9 = vpop.f32.mrf.mxu3  ;;  %v1744_v1 = vpop.f32.mrf.mxu1  ;;  %v13017_v20 = vld [vmem:[#allocation17_spill] sm:$0xff] }
 0x3f7   :  { %v1762_v25 = vadd.f32 %v1744_v1, %v11093_v7  ;;  %v13019_v26 = vpack.c.bf16 %v13017_v20, %v13018_v14  ;;  %v13020_v20 = vld [vmem:[#allocation25_spill] sm:$0xff]  ;;  %v13021_v14 = vld [vmem:[#allocation23_spill] sm:$0xff] }
 0x3f8   :  { %v11230_v5 = vadd.f32 %v1986_v9, %v1883_v2 }
 0x3fd   :  { %v1866_v55 = vpop.f32.mrf.mxu2 }
 0x3fe   :  { %v1884_v37 = vadd.f32 %v1866_v55, %v1762_v25  ;;  %v1988_v30 = vpop.f32.mrf.mxu3  ;;  %v2073_v17 = vpop.f32.mrf.mxu1 }
 0x3ff   :  { %v2113_v13 = vadd.f32 %v2073_v17, %v11111_v59 }
 0x400   :  { %v11233_v34 = vadd.f32 %v1988_v30, %v1884_v37  ;;  %v2620_v30 = vld [vmem:[#allocation3 + $0x54] sm:$0xff] }
 0x401   :  { %8526 = vmatmul.msk.bf16.vlgmr.msra.gmra.mxu1 %vm597_vm0, %v13019_v26  ;;  %v13022_v26 = vpack.c.bf16 %v13020_v20, %v13021_v14  ;;  %v13023_v20 = vld [vmem:[#allocation35_spill] sm:$0xff]  ;;  %v13024_v14 = vld [vmem:[#allocation34_spill] sm:$0xff] }
 0x402   :  { %8540 = vmatmul.msk.bf16.vlgmr.msra.gmra.mxu2 %vm597_vm0, %v2511_v52  ;;  %v9913_v52 = vld [vmem:[#allocation3 + $0x53] sm:$0xff] }
 0x403   :  { %8554 = vmatmul.msk.bf16.vlgmr.msra.gmra.mxu3 %vm597_vm0, %v2633_v53  ;;  %v2512_v57 = vpack.c.bf16 %v9913_v52, %v9912_v54  ;;  %v2619_v53 = vld [vmem:[#allocation3 + $0x44] sm:$0xff] }
 0x405   :  { %v2195_v7 = vpop.f32.mrf.mxu2 }
 0x406   :  { %v2235_v27 = vadd.f32 %v2195_v7, %v2113_v13  ;;  %v2317_v2 = vpop.f32.mrf.mxu3  ;;  %v2075_v9 = vpop.f32.mrf.mxu1  ;;  %v2634_v13 = vpack.c.bf16 %v2620_v30, %v2619_v53  ;;  %v2622_v30 = vld [vmem:[#allocation3 + $0x74] sm:$0xff]  ;;  %v2621_v53 = vld [vmem:[#allocation3 + $0x64] sm:$0xff] }
 0x407   :  { %v2114_v59 = vadd.f32 %v2075_v9, %v11116_v23 }
 0x408   :  { %v11242_v1 = vadd.f32 %v2317_v2, %v2235_v27 }
 0x40d   :  { %v2197_v25 = vpop.f32.mrf.mxu2 }
 0x40e   :  { %v2236_v55 = vadd.f32 %v2197_v25, %v2114_v59  ;;  %v2319_v37 = vpop.f32.mrf.mxu3  ;;  %v2078_v43 = vpop.f32.mrf.mxu1  ;;  %v11257_v25 = vld [vmem:[#allocation3 + $0x73] sm:$0xff] }
 0x40f   :  { %v2115_v60 = vadd.f32 %v2078_v43, %v11131_v49 }
 0x410   :  { %v11245_v17 = vadd.f32 %v2319_v37, %v2236_v55 }
 0x411   :  { %8527 = vmatmul.msk.bf16.gmra.mxu1 %vm597_vm0, %v13022_v26  ;;  %v13025_v26 = vpack.c.bf16 %v13023_v20, %v13024_v14 }
 0x412   :  { %8541 = vmatmul.msk.bf16.gmra.mxu2 %vm597_vm0, %v2512_v57  ;;  %v9914_v57 = vld [vmem:[#allocation3 + $0x63] sm:$0xff] }
 0x413   :  { %8555 = vmatmul.msk.bf16.gmra.mxu3 %vm597_vm0, %v2634_v13  ;;  %v2635_v13 = vpack.c.bf16 %v2622_v30, %v2621_v53  ;;  %v2623_v53 = vld [vmem:[#allocation3 + $0x84] sm:$0xff] }
 0x415   :  { %v2200_v23 = vpop.f32.mrf.mxu2 }
 0x416   :  { %v2237_v7 = vadd.f32 %v2200_v23, %v2115_v60  ;;  %v2322_v27 = vpop.f32.mrf.mxu3  ;;  %v2080_v2 = vpop.f32.mrf.mxu1  ;;  %v2513_v60 = vpack.c.bf16 %v11257_v25, %v9914_v57 }
 0x417   :  { %v2116_v49 = vadd.f32 %v2080_v2, %v11136_v61 }
 0x418   :  { %v11254_v9 = vadd.f32 %v2322_v27, %v2237_v7 }
 0x41d   :  { %v2202_v59 = vpop.f32.mrf.mxu2 }
 0x41e   :  { %v2238_v55 = vadd.f32 %v2202_v59, %v2116_v49  ;;  %v2324_v37 = vpop.f32.mrf.mxu3  ;;  %v2083_v43 = vpop.f32.mrf.mxu1 }
 0x41f   :  { %v2117_v52 = vadd.f32 %v2083_v43, %v11153_v48 }
 0x420   :  { %v11259_v54 = vadd.f32 %v2324_v37, %v2238_v55  ;;  %v2624_v37 = vld [vmem:[#allocation3 + $0x94] sm:$0xff] }
 0x421   :  { %8528 = vmatmul.msk.bf16.gmra.mxu1 %vm597_vm0, %v13025_v26 }
 0x422   :  { %8542 = vmatmul.msk.bf16.gmra.mxu2 %vm597_vm0, %v2513_v60  ;;  %v11275_v60 = vld [vmem:[#allocation3 + $0x92] sm:$0xff] }
 0x423   :  { %8556 = vmatmul.msk.bf16.gmra.mxu3 %vm597_vm0, %v2635_v13  ;;  %v2636_v13 = vpack.c.bf16 %v2624_v37, %v2623_v53 }
 0x425   :  { %v2205_v61 = vpop.f32.mrf.mxu2 }
 0x426   :  { %v2239_v23 = vadd.f32 %v2205_v61, %v2117_v52  ;;  %v2327_v7 = vpop.f32.mrf.mxu3  ;;  %v2085_v27 = vpop.f32.mrf.mxu1  ;;  %v2392_v52 = vpack.c.bf16 %v11275_v60, %v10958_v28 }
 0x427   :  { %v2118_v48 = vadd.f32 %v2085_v27, %v11158_v39  ;;  %v2626_v27 = vld [vmem:[#allocation3 + $0xf4] sm:$0xff] }
 0x428   :  { %v11269_v2 = vadd.f32 %v2327_v7, %v2239_v23 }
 0x42d   :  { %v2207_v49 = vpop.f32.mrf.mxu2 }
 0x42e   :  { %v2240_v59 = vadd.f32 %v2207_v49, %v2118_v48  ;;  %v2329_v55 = vpop.f32.mrf.mxu3  ;;  %v2088_v30 = vpop.f32.mrf.mxu1  ;;  %v2503_v49 = vld [vmem:[#allocation3 + $0xe3] sm:$0xff] }
 0x42f   :  { %v2119_v57 = vadd.f32 %v2088_v30, %v11167_v35  ;;  %v2625_v30 = vld [vmem:[#allocation3 + $0xe4] sm:$0xff] }
 0x430   :  { %v11272_v43 = vadd.f32 %v2329_v55, %v2240_v59  ;;  %v9916_v55 = vld [vmem:[#allocation3 + $0xf3] sm:$0xff] }
 0x431   :  { %8529 = vmatmul.msk.bf16.gmra.mxu1 %vm597_vm0, %v2392_v52  ;;  %v2515_v37 = vpack.c.bf16 %v9916_v55, %v2503_v49  ;;  %v13026_v52 = vpack.c.bf16 %v10526_v22, %v10524_v11  ;;  %v11298_v22 = vld [vmem:[#allocation3 + $0x102] sm:$0xff] }
 0x432   :  { %8543 = vmatmul.msk.bf16.gmra.mxu2 %vm597_vm0, %v11040_v47  ;;  %v9918_v49 = vld [vmem:[#allocation3 + $0x103] sm:$0xff] }
 0x433   :  { %8557 = vmatmul.msk.bf16.gmra.mxu3 %vm597_vm0, %v2636_v13 }
 0x435   :  { %v2210_v39 = vpop.f32.mrf.mxu2 }
 0x436   :  { %v2241_v20 = vadd.f32 %v2210_v39, %v2119_v57  ;;  %v2332_v14 = vpop.f32.mrf.mxu3  ;;  %v2090_v26 = vpop.f32.mrf.mxu1  ;;  %v2637_v57 = vpack.c.bf16 %v2626_v27, %v2625_v30  ;;  %v9917_v27 = vld [vmem:[#allocation3 + $0x112] sm:$0xff] }
 0x437   :  { %v2120_v35 = vadd.f32 %v2090_v26, %v11170_v15 }
 0x438   :  { %v11283_v61 = vadd.f32 %v2332_v14, %v2241_v20 }
 0x43d   :  { %v2212_v23 = vpop.f32.mrf.mxu2 }
 0x43e   :  { %v2242_v7 = vadd.f32 %v2212_v23, %v2120_v35  ;;  %v2334_v28 = vpop.f32.mrf.mxu3  ;;  %v2093_v48 = vpop.f32.mrf.mxu1  ;;  %v2628_v23 = vld [vmem:[#allocation3 + $0x114] sm:$0xff] }
 0x43f   :  { %v2121_v47 = vadd.f32 %v2093_v48, %v11181_v51  ;;  %v11304_v48 = vpack.c.bf16 %v9917_v27, %v11298_v22 }
 0x440   :  { %v11286_v59 = vadd.f32 %v2334_v28, %v2242_v7 }
 0x441   :  { %8530 = vmatmul.msk.bf16.gmra.mxu1 %vm597_vm0, %v13026_v52 }
 0x442   :  { %8544 = vmatmul.msk.bf16.gmra.mxu2 %vm597_vm0, %v2515_v37  ;;  %v2627_v37 = vld [vmem:[#allocation3 + $0x104] sm:$0xff] }
 0x443   :  { %8558 = vmatmul.msk.bf16.gmra.mxu3 %vm597_vm0, %v2637_v57 }
 0x445   :  { %v2215_v15 = vpop.f32.mrf.mxu2 }
 0x446   :  { %v2243_v53 = vadd.f32 %v2215_v15, %v2121_v47  ;;  %v2337_v13 = vpop.f32.mrf.mxu3  ;;  %v2095_v39 = vpop.f32.mrf.mxu1  ;;  %v9919_v47 = vld [vmem:[#allocation3 + $0x113] sm:$0xff] }
 0x447   :  { %v2122_v51 = vadd.f32 %v2095_v39, %v11184_v16  ;;  %v2516_v55 = vpack.c.bf16 %v9919_v47, %v9918_v49  ;;  %v2638_v16 = vpack.c.bf16 %v2628_v23, %v2627_v37  ;;  %v9723_v39 = vld [vmem:[%s12833_s3 + $0x90] sm:$0xff] }
 0x448   :  { %v11295_v20 = vadd.f32 %v2337_v13, %v2243_v53  ;;  %v9722_v13 = vld [vmem:[%s12833_s3 + $0x88] sm:$0xff]  ;;  %3170 = vmatpush.bf16.msrb.mxu3 %v9723_v39 }
 0x449   :  { %3048 = vmatpush.bf16.msrb.mxu2 %v9722_v13  ;;  %v9920_v49 = vld [vmem:[#allocation3 + $0x122] sm:$0xff] }
 0x44d   :  { %v2217_v14 = vpop.f32.mrf.mxu2 }
 0x44e   :  { %v2244_v26 = vadd.f32 %v2217_v14, %v2122_v51  ;;  %v2339_v35 = vpop.f32.mrf.mxu3  ;;  %v2098_v7 = vpop.f32.mrf.mxu1  ;;  %v11319_v14 = vld [vmem:[#allocation3 + $0x132] sm:$0xff] }
 0x44f   :  { %v2123_v28 = vadd.f32 %v2098_v7, %v11194_v8  ;;  %v2630_v7 = vld [vmem:[#allocation3 + $0x134] sm:$0xff]  ;;  %v11327_v47 = vpack.c.bf16 %v11319_v14, %v9920_v49 }
 0x450   :  { %v11300_v11 = vadd.f32 %v2339_v35, %v2244_v26  ;;  %v11321_v26 = vld [vmem:[#allocation3 + $0x133] sm:$0xff] }
 0x451   :  { %8531 = vmatmul.msk.bf16.gmra.mxu1 %vm597_vm0, %v11304_v48  ;;  %v2632_v49 = vld [vmem:[#allocation3 + $0x154] sm:$0xff] }
 0x452   :  { %8545 = vmatmul.msk.bf16.gmra.mxu2 %vm597_vm0, %v2516_v55  ;;  %v9921_v55 = vld [vmem:[#allocation3 + $0x123] sm:$0xff] }
 0x453   :  { %8559 = vmatmul.msk.bf16.gmra.mxu3 %vm597_vm0, %v2638_v16  ;;  %v2517_v37 = vpack.c.bf16 %v11321_v26, %v9921_v55  ;;  %v2629_v16 = vld [vmem:[#allocation3 + $0x124] sm:$0xff] }
 0x455   :  { %v2220_v30 = vpop.f32.mrf.mxu2 }
 0x456   :  { %v2245_v57 = vadd.f32 %v2220_v30, %v2123_v28  ;;  %v2342_v52 = vpop.f32.mrf.mxu3  ;;  %v2100_v8 = vpop.f32.mrf.mxu1  ;;  %v2639_v30 = vpack.c.bf16 %v2630_v7, %v2629_v16 }
 0x457   :  { %v2124_v53 = vadd.f32 %v2100_v8, %v11205_v6 }
 0x458   :  { %v11310_v15 = vadd.f32 %v2342_v52, %v2245_v57 }
 0x45d   :  { %v2222_v51 = vpop.f32.mrf.mxu2 }
 0x45e   :  { %v2246_v35 = vadd.f32 %v2222_v51, %v2124_v53  ;;  %v2344_v23 = vpop.f32.mrf.mxu3  ;;  %v2103_v28 = vpop.f32.mrf.mxu1 }
 0x45f   :  { %v2125_v27 = vadd.f32 %v2103_v28, %v11216_v50  ;;  %v9725_v50 = vld [vmem:[%s12833_s3 + $0xa0] sm:$0xff]  ;;  %v2631_v28 = vld [vmem:[#allocation3 + $0x144] sm:$0xff] }
 0x460   :  { %v11323_v6 = vadd.f32 %v2344_v23, %v2246_v35  ;;  %3415 = vmatpush.bf16.msra.mxu1 %v9725_v50  ;;  %v11340_v35 = vld [vmem:[#allocation3 + $0x152] sm:$0xff] }
 0x461   :  { %8532 = vmatmul.msk.bf16.gmra.mxu1 %vm597_vm0, %v11327_v47 }
 0x462   :  { %8546 = vmatmul.msk.bf16.gmra.mxu2 %vm597_vm0, %v2517_v37 }
 0x463   :  { %8560 = vmatmul.msk.bf16.gmra.mxu3 %vm597_vm0, %v2639_v30  ;;  %v2640_v30 = vpack.c.bf16 %v2632_v49, %v2631_v28  ;;  %v9922_v49 = vld [vmem:[#allocation3 + $0x41] sm:$0xff] }
 0x465   :  { %v2225_v57 = vpop.f32.mrf.mxu2 }
 0x466   :  { %v2247_v52 = vadd.f32 %v2225_v57, %v2125_v27  ;;  %v2347_v8 = vpop.f32.mrf.mxu3  ;;  %v2105_v53 = vpop.f32.mrf.mxu1  ;;  %v2396_v27 = vpack.c.bf16 %v11340_v35, %v11069_v40 }
 0x467   :  { %v2126_v39 = vadd.f32 %v2105_v53, %v11221_v33 }
 0x468   :  { %v11337_v13 = vadd.f32 %v2347_v8, %v2247_v52 }
 0x46d   :  { %v2227_v51 = vpop.f32.mrf.mxu2 }
 0x46e   :  { %v2248_v23 = vadd.f32 %v2227_v51, %v2126_v39  ;;  %v2349_v7 = vpop.f32.mrf.mxu3  ;;  %v2108_v55 = vpop.f32.mrf.mxu1 }
 0x46f   :  { %v2127_v16 = vadd.f32 %v2108_v55, %v11230_v5 }
 0x470   :  { %v11342_v37 = vadd.f32 %v2349_v7, %v2248_v23  ;;  %v2862_v23 = vld [vmem:[#allocation3 + $0x31] sm:$0xff] }
 0x471   :  { %8533 = vmatmul.msk.bf16.gmra.mxu1 %vm597_vm0, %v2396_v27  ;;  %v2984_v7 = vld [vmem:[#allocation3 + $0x32] sm:$0xff]  ;;  %v2878_v55 = vpack.c.bf16 %v9922_v49, %v2862_v23  ;;  %v9923_v27 = vld [vmem:[#allocation3 + $0x42] sm:$0xff] }
 0x472   :  { %8547 = vmatmul.msk.bf16.gmra.mxu2 %vm597_vm0, %v11140_v29 }
 0x473   :  { %8561 = vmatmul.msk.bf16.gmra.mxu3 %vm597_vm0, %v2640_v30  ;;  %v13027_v30 = vld [vmem:[#allocation19_spill] sm:$0xff] }
 0x475   :  { %v2230_v33 = vpop.f32.mrf.mxu2 }
 0x476   :  { %v2249_v50 = vadd.f32 %v2230_v33, %v2127_v16  ;;  %v2352_v57 = vpop.f32.mrf.mxu3  ;;  %v2110_v52 = vpop.f32.mrf.mxu1  ;;  %v3000_v16 = vpack.c.bf16 %v9923_v27, %v2984_v7  ;;  %v9925_v27 = vld [vmem:[#allocation3 + $0x61] sm:$0xff] }
 0x477   :  { %v2128_v53 = vadd.f32 %v2110_v52, %v11233_v34  ;;  %v13028_v34 = vld [vmem:[#allocation18_spill] sm:$0xff] }
 0x478   :  { %v11351_v8 = vadd.f32 %v2352_v57, %v2249_v50  ;;  %v13029_v33 = vpack.c.bf16 %v13027_v30, %v13028_v34  ;;  %v9926_v30 = vld [vmem:[#allocation3 + $0x52] sm:$0xff]  ;;  %v9927_v34 = vld [vmem:[#allocation3 + $0x62] sm:$0xff] }
 0x47d   :  { %v2232_v5 = vpop.f32.mrf.mxu2 }
 0x47e   :  { %v2250_v39 = vadd.f32 %v2232_v5, %v2128_v53  ;;  %v2354_v51 = vpop.f32.mrf.mxu3  ;;  %v2439_v40 = vpop.f32.mrf.mxu1 }
 0x47f   :  { %v2479_v29 = vadd.f32 %v2439_v40, %v11242_v1 }
 0x480   :  { %v11354_v28 = vadd.f32 %v2354_v51, %v2250_v39 }
 0x481   :  { %8582 = vmatmul.msk.bf16.vlgmr.msrb.gmra.mxu1 %vm597_vm0, %v2878_v55  ;;  %v9924_v55 = vld [vmem:[#allocation3 + $0x51] sm:$0xff] }
 0x482   :  { %8596 = vmatmul.msk.bf16.vlgmr.msrb.gmra.mxu2 %vm597_vm0, %v3000_v16  ;;  %v2879_v16 = vpack.c.bf16 %v9925_v27, %v9924_v55  ;;  %v3111_v27 = vld [vmem:[#allocation3 + $0x83] sm:$0xff] }
 0x483   :  { %8610 = vmatmul.msk.bf16.vlgmr.msrb.gmra.mxu3 %vm597_vm0, %v13029_v33  ;;  %v13030_v33 = vld [vmem:[#allocation31_spill] sm:$0xff] }
 0x485   :  { %v2561_v50 = vpop.f32.mrf.mxu2 }
 0x486   :  { %v2601_v57 = vadd.f32 %v2561_v50, %v2479_v29  ;;  %v2683_v52 = vpop.f32.mrf.mxu3  ;;  %v2441_v53 = vpop.f32.mrf.mxu1  ;;  %v3001_v29 = vpack.c.bf16 %v9927_v34, %v9926_v30 }
 0x487   :  { %v2480_v1 = vadd.f32 %v2441_v53, %v11245_v17  ;;  %v13031_v17 = vld [vmem:[#allocation30_spill] sm:$0xff] }
 0x488   :  { %v11363_v5 = vadd.f32 %v2683_v52, %v2601_v57  ;;  %v13032_v50 = vpack.c.bf16 %v13030_v33, %v13031_v17  ;;  %v9929_v33 = vld [vmem:[#allocation3 + $0x72] sm:$0xff]  ;;  %v9930_v17 = vld [vmem:[#allocation3 + $0x82] sm:$0xff] }
 0x48d   :  { %v2563_v39 = vpop.f32.mrf.mxu2 }
 0x48e   :  { %v2602_v51 = vadd.f32 %v2563_v39, %v2480_v1  ;;  %v2685_v40 = vpop.f32.mrf.mxu3  ;;  %v2444_v23 = vpop.f32.mrf.mxu1 }
 0x48f   :  { %v2481_v49 = vadd.f32 %v2444_v23, %v11254_v9 }
 0x490   :  { %v11366_v7 = vadd.f32 %v2685_v40, %v2602_v51  ;;  %v11378_v40 = vld [vmem:[#allocation3 + $0x81] sm:$0xff] }
 0x491   :  { %8583 = vmatmul.msk.bf16.gmra.mxu1 %vm597_vm0, %v2879_v16 }
 0x492   :  { %8597 = vmatmul.msk.bf16.gmra.mxu2 %vm597_vm0, %v3001_v29  ;;  %v9928_v29 = vld [vmem:[#allocation3 + $0x71] sm:$0xff] }
 0x493   :  { %8611 = vmatmul.msk.bf16.gmra.mxu3 %vm597_vm0, %v13032_v50  ;;  %v3002_v50 = vpack.c.bf16 %v9930_v17, %v9929_v33 }
 0x495   :  { %v2566_v57 = vpop.f32.mrf.mxu2 }
 0x496   :  { %v2603_v52 = vadd.f32 %v2566_v57, %v2481_v49  ;;  %v2688_v53 = vpop.f32.mrf.mxu3  ;;  %v2446_v1 = vpop.f32.mrf.mxu1  ;;  %v2880_v49 = vpack.c.bf16 %v11378_v40, %v9928_v29  ;;  %v3124_v57 = vpack.c.bf16 %v3111_v27, %v11257_v25  ;;  %v3113_v29 = vld [vmem:[#allocation3 + $0xa3] sm:$0xff] }
 0x497   :  { %v2482_v39 = vadd.f32 %v2446_v1, %v11259_v54 }
 0x498   :  { %v11375_v9 = vadd.f32 %v2688_v53, %v2603_v52 }
 0x49d   :  { %v2568_v51 = vpop.f32.mrf.mxu2 }
 0x49e   :  { %v2604_v23 = vadd.f32 %v2568_v51, %v2482_v39  ;;  %v2690_v55 = vpop.f32.mrf.mxu3  ;;  %v2449_v16 = vpop.f32.mrf.mxu1 }
 0x49f   :  { %v2483_v34 = vadd.f32 %v2449_v16, %v11269_v2  ;;  %v3112_v16 = vld [vmem:[#allocation3 + $0x93] sm:$0xff] }
 0x4a0   :  { %v11380_v30 = vadd.f32 %v2690_v55, %v2604_v23  ;;  %v11391_v23 = vld [vmem:[#allocation3 + $0xa1] sm:$0xff] }
 0x4a1   :  { %8584 = vmatmul.msk.bf16.gmra.mxu1 %vm597_vm0, %v2880_v49  ;;  %v11393_v55 = vld [vmem:[#allocation3 + $0xa2] sm:$0xff]  ;;  %v2881_v17 = vpack.c.bf16 %v11391_v23, %v11156_v46 }
 0x4a2   :  { %8598 = vmatmul.msk.bf16.gmra.mxu2 %vm597_vm0, %v3002_v50  ;;  %v3125_v50 = vpack.c.bf16 %v3113_v29, %v3112_v16 }
 0x4a3   :  { %8612 = vmatmul.msk.bf16.gmra.mxu3 %vm597_vm0, %v3124_v57 }
 0x4a5   :  { %v2571_v54 = vpop.f32.mrf.mxu2 }
 0x4a6   :  { %v2605_v52 = vadd.f32 %v2571_v54, %v2483_v34  ;;  %v2693_v53 = vpop.f32.mrf.mxu3  ;;  %v2451_v1 = vpop.f32.mrf.mxu1 }
 0x4a7   :  { %v2484_v2 = vadd.f32 %v2451_v1, %v11272_v43  ;;  %v3003_v43 = vpack.c.bf16 %v11393_v55, %v11275_v60  ;;  %v2870_v60 = vld [vmem:[#allocation3 + $0xf1] sm:$0xff] }
 0x4a8   :  { %v11388_v39 = vadd.f32 %v2693_v53, %v2605_v52 }
 0x4ad   :  { %v2573_v51 = vpop.f32.mrf.mxu2 }
 0x4ae   :  { %v2606_v25 = vadd.f32 %v2573_v51, %v2484_v2  ;;  %v2695_v27 = vpop.f32.mrf.mxu3  ;;  %v2454_v49 = vpop.f32.mrf.mxu1 }
 0x4af   :  { %v2485_v34 = vadd.f32 %v2454_v49, %v11283_v61  ;;  %v2882_v49 = vpack.c.bf16 %v11187_v19, %v2870_v60  ;;  %v13037_v60 = vld [vmem:[#allocation49_spill] sm:$0xff] }
 0x4b0   :  { %v11395_v33 = vadd.f32 %v2695_v27, %v2606_v25  ;;  %v2992_v27 = vld [vmem:[#allocation3 + $0xf2] sm:$0xff] }
 0x4b1   :  { %8585 = vmatmul.msk.bf16.gmra.mxu1 %vm597_vm0, %v2881_v17  ;;  %v13033_v17 = vld [vmem:[#allocation43_spill] sm:$0xff] }
 0x4b2   :  { %8599 = vmatmul.msk.bf16.gmra.mxu2 %vm597_vm0, %v3003_v43 }
 0x4b3   :  { %8613 = vmatmul.msk.bf16.gmra.mxu3 %vm597_vm0, %v3125_v50 }
 0x4b5   :  { %v2576_v57 = vpop.f32.mrf.mxu2 }
 0x4b6   :  { %v2607_v54 = vadd.f32 %v2576_v57, %v2485_v34  ;;  %v2698_v52 = vpop.f32.mrf.mxu3  ;;  %v2456_v53 = vpop.f32.mrf.mxu1  ;;  %v3004_v34 = vpack.c.bf16 %v11298_v22, %v2992_v27 }
 0x4b7   :  { %v2486_v61 = vadd.f32 %v2456_v53, %v11286_v59  ;;  %v13034_v59 = vld [vmem:[#allocation42_spill] sm:$0xff] }
 0x4b8   :  { %v11405_v1 = vadd.f32 %v2698_v52, %v2607_v54  ;;  %v13035_v43 = vpack.c.bf16 %v13033_v17, %v13034_v59  ;;  %v13042_v17 = vld [vmem:[#allocation55_spill] sm:$0xff] }
 0x4bd   :  { %v2578_v2 = vpop.f32.mrf.mxu2 }
 0x4be   :  { %v2608_v46 = vadd.f32 %v2578_v2, %v2486_v61  ;;  %v2700_v51 = vpop.f32.mrf.mxu3  ;;  %v2459_v25 = vpop.f32.mrf.mxu1 }
 0x4bf   :  { %v2487_v29 = vadd.f32 %v2459_v25, %v11295_v20  ;;  %v13036_v25 = vld [vmem:[#allocation53_spill] sm:$0xff] }
 0x4c0   :  { %v11408_v16 = vadd.f32 %v2700_v51, %v2608_v46  ;;  %v13038_v27 = vpack.c.bf16 %v13036_v25, %v13037_v60  ;;  %v3119_v60 = vld [vmem:[#allocation3 + $0x143] sm:$0xff] }
 0x4c1   :  { %8586 = vmatmul.msk.bf16.gmra.mxu1 %vm597_vm0, %v2882_v49  ;;  %v13040_v49 = vld [vmem:[#allocation51_spill] sm:$0xff] }
 0x4c2   :  { %8600 = vmatmul.msk.bf16.gmra.mxu2 %vm597_vm0, %v3004_v34 }
 0x4c3   :  { %8614 = vmatmul.msk.bf16.gmra.mxu3 %vm597_vm0, %v13035_v43 }
 0x4c5   :  { %v2581_v50 = vpop.f32.mrf.mxu2 }
 0x4c6   :  { %v2609_v57 = vadd.f32 %v2581_v50, %v2487_v29  ;;  %v2703_v54 = vpop.f32.mrf.mxu3  ;;  %v2461_v52 = vpop.f32.mrf.mxu1  ;;  %v13039_v29 = vld [vmem:[#allocation54_spill] sm:$0xff] }
 0x4c7   :  { %v2488_v20 = vadd.f32 %v2461_v52, %v11300_v11  ;;  %v13041_v34 = vpack.c.bf16 %v13039_v29, %v13040_v49  ;;  %v13043_v11 = vld [vmem:[#allocation52_spill] sm:$0xff] }
 0x4c8   :  { %v11419_v53 = vadd.f32 %v2703_v54, %v2609_v57  ;;  %v13044_v59 = vpack.c.bf16 %v13042_v17, %v13043_v11  ;;  %v3128_v17 = vpack.c.bf16 %v3119_v60, %v11321_v26  ;;  %v9729_v11 = vld [vmem:[%s12833_s3 + $0xc0] sm:$0xff] }
 0x4c9   :  { %3903 = vmatpush.bf16.msrb.mxu1 %v9729_v11 }
 0x4cd   :  { %v2583_v19 = vpop.f32.mrf.mxu2 }
 0x4ce   :  { %v2610_v61 = vadd.f32 %v2583_v19, %v2488_v20  ;;  %v2705_v22 = vpop.f32.mrf.mxu3  ;;  %v2464_v2 = vpop.f32.mrf.mxu1  ;;  %v9726_v20 = vld [vmem:[%s12833_s3 + $0xa8] sm:$0xff]  ;;  %v9727_v19 = vld [vmem:[%s12833_s3 + $0xb0] sm:$0xff] }
 0x4cf   :  { %v2489_v51 = vadd.f32 %v2464_v2, %v11310_v15  ;;  %3537 = vmatpush.bf16.msra.mxu2 %v9726_v20  ;;  %3659 = vmatpush.bf16.msra.mxu3 %v9727_v19  ;;  %v11448_v2 = vld [vmem:[#allocation3 + $0x142] sm:$0xff]  ;;  %v3120_v19 = vld [vmem:[#allocation3 + $0x153] sm:$0xff] }
 0x4d0   :  { %v11422_v46 = vadd.f32 %v2705_v22, %v2610_v61  ;;  %v11446_v22 = vld [vmem:[#allocation3 + $0x141] sm:$0xff] }
 0x4d1   :  { %8587 = vmatmul.msk.bf16.gmra.mxu1 %vm597_vm0, %v13038_v27  ;;  %v2884_v49 = vpack.c.bf16 %v11446_v22, %v11203_v4 }
 0x4d2   :  { %8601 = vmatmul.msk.bf16.gmra.mxu2 %vm597_vm0, %v13041_v34  ;;  %v3006_v34 = vpack.c.bf16 %v11448_v2, %v11319_v14 }
 0x4d3   :  { %8615 = vmatmul.msk.bf16.gmra.mxu3 %vm597_vm0, %v13044_v59 }
 0x4d5   :  { %v2586_v43 = vpop.f32.mrf.mxu2 }
 0x4d6   :  { %v2611_v50 = vadd.f32 %v2586_v43, %v2489_v51  ;;  %v2708_v57 = vpop.f32.mrf.mxu3  ;;  %v2466_v54 = vpop.f32.mrf.mxu1 }
 0x4d7   :  { %v2490_v52 = vadd.f32 %v2466_v54, %v11323_v6  ;;  %v11469_v54 = vld [vmem:[#allocation3 + $0x162] sm:$0xff] }
 0x4d8   :  { %v11437_v15 = vadd.f32 %v2708_v57, %v2611_v50  ;;  %v11467_v57 = vld [vmem:[#allocation3 + $0x161] sm:$0xff] }
 0x4dd   :  { %v2588_v61 = vpop.f32.mrf.mxu2 }
 0x4de   :  { %v2612_v51 = vadd.f32 %v2588_v61, %v2490_v52  ;;  %v2710_v25 = vpop.f32.mrf.mxu3  ;;  %v2469_v27 = vpop.f32.mrf.mxu1  ;;  %v11471_v61 = vld [vmem:[#allocation3 + $0x163] sm:$0xff] }
 0x4df   :  { %v2491_v29 = vadd.f32 %v2469_v27, %v11337_v13  ;;  %v2885_v27 = vpack.c.bf16 %v11467_v57, %v11219_v10 }
 0x4e0   :  { %v11450_v6 = vadd.f32 %v2710_v25, %v2612_v51 }
 0x4e1   :  { %8588 = vmatmul.msk.bf16.gmra.mxu1 %vm597_vm0, %v2884_v49 }
 0x4e2   :  { %8602 = vmatmul.msk.bf16.gmra.mxu2 %vm597_vm0, %v3006_v34 }
 0x4e3   :  { %8616 = vmatmul.msk.bf16.gmra.mxu3 %vm597_vm0, %v3128_v17 }
 0x4e5   :  { %v2591_v59 = vpop.f32.mrf.mxu2 }
 0x4e6   :  { %v2613_v13 = vadd.f32 %v2591_v59, %v2491_v29  ;;  %v2713_v43 = vpop.f32.mrf.mxu3  ;;  %v2471_v4 = vpop.f32.mrf.mxu1  ;;  %v3129_v29 = vpack.c.bf16 %v11471_v61, %v3120_v19 }
 0x4e7   :  { %v2492_v14 = vadd.f32 %v2471_v4, %v11342_v37  ;;  %v3007_v37 = vpack.c.bf16 %v11469_v54, %v11340_v35 }
 0x4e8   :  { %v11464_v50 = vadd.f32 %v2713_v43, %v2613_v13  ;;  %v3352_v13 = vld [vmem:[#allocation3 + $0x50] sm:$0xff] }
 0x4ed   :  { %v2593_v26 = vpop.f32.mrf.mxu2 }
 0x4ee   :  { %v2614_v52 = vadd.f32 %v2593_v26, %v2492_v14  ;;  %v2715_v20 = vpop.f32.mrf.mxu3  ;;  %v2474_v51 = vpop.f32.mrf.mxu1  ;;  %v13045_v14 = vld [vmem:[#allocation68_spill] sm:$0xff] }
 0x4ef   :  { %v2493_v60 = vadd.f32 %v2474_v51, %v11351_v8  ;;  %v2846_v26 = vadd.f32 %v13045_v14, %v11363_v5 }
 0x4f0   :  { %v11473_v25 = vadd.f32 %v2715_v20, %v2614_v52  ;;  %v3351_v20 = vld [vmem:[#allocation3 + $0x40] sm:$0xff] }
 0x4f1   :  { %8589 = vmatmul.msk.bf16.gmra.mxu1 %vm597_vm0, %v2885_v27  ;;  %v3367_v27 = vpack.c.bf16 %v3352_v13, %v3351_v20 }
 0x4f2   :  { %8603 = vmatmul.msk.bf16.gmra.mxu2 %vm597_vm0, %v3007_v37  ;;  %v13047_v37 = vld [vmem:[#allocation26_spill] sm:$0xff] }
 0x4f3   :  { %8617 = vmatmul.msk.bf16.gmra.mxu3 %vm597_vm0, %v3129_v29 }
 0x4f5   :  { %v2596_v49 = vpop.f32.mrf.mxu2 }
 0x4f6   :  { %v2615_v34 = vadd.f32 %v2596_v49, %v2493_v60  ;;  %v2718_v17 = vpop.f32.mrf.mxu3  ;;  %v2476_v11 = vpop.f32.mrf.mxu1  ;;  %v13046_v60 = vld [vmem:[#allocation28_spill] sm:$0xff]  ;;  %v13050_v49 = vld [vmem:[#allocation27_spill] sm:$0xff] }
 0x4f7   :  { %v2494_v8 = vadd.f32 %v2476_v11, %v11354_v28  ;;  %v13048_v29 = vpack.c.bf16 %v13046_v60, %v13047_v37  ;;  %v13049_v28 = vld [vmem:[#allocation29_spill] sm:$0xff] }
 0x4f8   :  { %v11484_v59 = vadd.f32 %v2718_v17, %v2615_v34  ;;  %v13051_v34 = vpack.c.bf16 %v13049_v28, %v13050_v49 }
 0x4fd   :  { %v2598_v10 = vpop.f32.mrf.mxu2 }
 0x4fe   :  { %v2616_v43 = vadd.f32 %v2598_v10, %v2494_v8  ;;  %v2720_v4 = vpop.f32.mrf.mxu3  ;;  %v2928_v52 = vpop.f32.mrf.mxu1  ;;  %v13052_v8 = vld [vmem:[#allocation69_spill] sm:$0xff] }
 0x4ff   :  { %v2968_v51 = vadd.f32 %v2928_v52, %v2846_v26  ;;  %v2847_v10 = vadd.f32 %v13052_v8, %v11366_v7  ;;  %v3354_v26 = vld [vmem:[#allocation3 + $0x70] sm:$0xff]  ;;  %v13054_v7 = vld [vmem:[#allocation38_spill] sm:$0xff] }
 0x500   :  { %v11489_v19 = vadd.f32 %v2720_v4, %v2616_v43 }
 0x501   :  { %8638 = vmatmul.msk.bf16.vlgmr.msra.gmra.mxu1 %vm597_vm0, %v3367_v27  ;;  %v13053_v27 = vld [vmem:[#allocation73_spill] sm:$0xff] }
 0x502   :  { %8652 = vmatmul.msk.bf16.vlgmr.msra.gmra.mxu2 %vm597_vm0, %v13048_v29  ;;  %v2848_v60 = vadd.f32 %v13053_v27, %v11375_v9  ;;  %v3353_v29 = vld [vmem:[#allocation3 + $0x60] sm:$0xff] }
 0x503   :  { %8666 = vmatmul.msk.bf16.vlgmr.msra.gmra.mxu3 %vm597_vm0, %v13051_v34  ;;  %v3368_v49 = vpack.c.bf16 %v3354_v26, %v3353_v29  ;;  %v13055_v34 = vld [vmem:[#allocation36_spill] sm:$0xff] }
 0x505   :  { %v3050_v17 = vpop.f32.mrf.mxu2 }
 0x506   :  { %v3090_v5 = vadd.f32 %v3050_v17, %v2968_v51  ;;  %v3172_v11 = vpop.f32.mrf.mxu3  ;;  %v2930_v43 = vpop.f32.mrf.mxu1  ;;  %v13056_v17 = vpack.c.bf16 %v13054_v7, %v13055_v34  ;;  %v2850_v7 = vadd.f32 %v10884_v3, %v11388_v39  ;;  %v2851_v39 = vadd.f32 %v10902_v18, %v11395_v33 }
 0x507   :  { %v2969_v4 = vadd.f32 %v2930_v43, %v2847_v10 }
 0x508   :  { %v11502_v13 = vadd.f32 %v3172_v11, %v3090_v5  ;;  %v13057_v5 = vld [vmem:[#allocation39_spill] sm:$0xff]  ;;  %v13058_v11 = vld [vmem:[#allocation37_spill] sm:$0xff] }
 0x509   :  { %v13059_v8 = vpack.c.bf16 %v13057_v5, %v13058_v11 }
 0x50d   :  { %v3052_v14 = vpop.f32.mrf.mxu2 }
 0x50e   :  { %v3091_v52 = vadd.f32 %v3052_v14, %v2969_v4  ;;  %v3174_v20 = vpop.f32.mrf.mxu3  ;;  %v2933_v37 = vpop.f32.mrf.mxu1  ;;  %v13060_v4 = vld [vmem:[#allocation78_spill] sm:$0xff] }
 0x50f   :  { %v2970_v51 = vadd.f32 %v2933_v37, %v2848_v60  ;;  %v2849_v14 = vadd.f32 %v13060_v4, %v11380_v30  ;;  %v3356_v60 = vld [vmem:[#allocation3 + $0x90] sm:$0xff] }
 0x510   :  { %v11506_v28 = vadd.f32 %v3174_v20, %v3091_v52  ;;  %v3478_v37 = vld [vmem:[#allocation3 + $0x91] sm:$0xff] }
 0x511   :  { %8639 = vmatmul.msk.bf16.gmra.mxu1 %vm597_vm0, %v3368_v49  ;;  %v3491_v30 = vpack.c.bf16 %v3478_v37, %v11378_v40  ;;  %v3357_v40 = vld [vmem:[#allocation3 + $0xa0] sm:$0xff]  ;;  %v3602_v37 = vld [vmem:[#allocation3 + $0xb2] sm:$0xff] }
 0x512   :  { %8653 = vmatmul.msk.bf16.gmra.mxu2 %vm597_vm0, %v13056_v17  ;;  %v3355_v17 = vld [vmem:[#allocation3 + $0x80] sm:$0xff]  ;;  %v3614_v18 = vpack.c.bf16 %v3602_v37, %v11393_v55 }
 0x513   :  { %8667 = vmatmul.msk.bf16.gmra.mxu3 %vm597_vm0, %v13059_v8  ;;  %v3369_v11 = vpack.c.bf16 %v3356_v60, %v3355_v17  ;;  %v13061_v8 = vld [vmem:[#allocation40_spill] sm:$0xff] }
 0x514   :  { %v3480_v60 = vld [vmem:[#allocation3 + $0xb1] sm:$0xff] }
 0x515   :  { %v3055_v10 = vpop.f32.mrf.mxu2 }
 0x516   :  { %v3092_v9 = vadd.f32 %v3055_v10, %v2970_v51  ;;  %v3177_v43 = vpop.f32.mrf.mxu3  ;;  %v2935_v52 = vpop.f32.mrf.mxu1  ;;  %v13062_v10 = vld [vmem:[#allocation41_spill] sm:$0xff] }
 0x517   :  { %v2971_v20 = vadd.f32 %v2935_v52, %v2849_v14 }
 0x518   :  { %v11519_v26 = vadd.f32 %v3177_v43, %v3092_v9  ;;  %v13063_v9 = vpack.c.bf16 %v13061_v8, %v13062_v10 }
 0x51d   :  { %v3057_v27 = vpop.f32.mrf.mxu2 }
 0x51e   :  { %v3093_v29 = vadd.f32 %v3057_v27, %v2971_v20  ;;  %v3179_v49 = vpop.f32.mrf.mxu3  ;;  %v2938_v34 = vpop.f32.mrf.mxu1  ;;  %v3358_v27 = vld [vmem:[#allocation3 + $0xb0] sm:$0xff] }
 0x51f   :  { %v2972_v51 = vadd.f32 %v2938_v34, %v2850_v7  ;;  %v2852_v34 = vadd.f32 %v10910_v41, %v11405_v1  ;;  %v3370_v17 = vpack.c.bf16 %v3358_v27, %v3357_v40  ;;  %v2853_v41 = vadd.f32 %v10929_v31, %v11408_v16  ;;  %v3359_v27 = vld [vmem:[#allocation3 + $0x100] sm:$0xff] }
 0x520   :  { %v11523_v5 = vadd.f32 %v3179_v49, %v3093_v29 }
 0x521   :  { %8640 = vmatmul.msk.bf16.gmra.mxu1 %vm597_vm0, %v3369_v11 }
 0x522   :  { %8654 = vmatmul.msk.bf16.gmra.mxu2 %vm597_vm0, %v3491_v30 }
 0x523   :  { %8668 = vmatmul.msk.bf16.gmra.mxu3 %vm597_vm0, %v13063_v9 }
 0x525   :  { %v3060_v43 = vpop.f32.mrf.mxu2 }
 0x526   :  { %v3094_v4 = vadd.f32 %v3060_v43, %v2972_v51  ;;  %v3182_v3 = vpop.f32.mrf.mxu3  ;;  %v2940_v14 = vpop.f32.mrf.mxu1  ;;  %v3492_v51 = vpack.c.bf16 %v3480_v60, %v11391_v23  ;;  %v3481_v60 = vld [vmem:[#allocation3 + $0x101] sm:$0xff] }
 0x527   :  { %v2973_v20 = vadd.f32 %v2940_v14, %v2851_v39 }
 0x528   :  { %v11534_v52 = vadd.f32 %v3182_v3, %v3094_v4  ;;  %v3360_v4 = vld [vmem:[#allocation3 + $0x110] sm:$0xff] }
 0x529   :  { %v3482_v3 = vld [vmem:[#allocation3 + $0x111] sm:$0xff] }
 0x52a   :  { %v3493_v31 = vpack.c.bf16 %v3482_v3, %v3481_v60 }
 0x52d   :  { %v3062_v29 = vpop.f32.mrf.mxu2 }
 0x52e   :  { %v3095_v49 = vadd.f32 %v3062_v29, %v2973_v20  ;;  %v3184_v7 = vpop.f32.mrf.mxu3  ;;  %v2943_v11 = vpop.f32.mrf.mxu1  ;;  %v2854_v20 = vadd.f32 %v10950_v0, %v11419_v53  ;;  %v2855_v0 = vadd.f32 %v10962_v24, %v11422_v46 }
 0x52f   :  { %v2974_v30 = vadd.f32 %v2943_v11, %v2852_v34  ;;  %v11569_v46 = vpop.f32.mrf.mxu0 }
 0x530   :  { %v11540_v33 = vadd.f32 %v3184_v7, %v3095_v49  ;;  %v3371_v49 = vpack.c.bf16 %v3360_v4, %v3359_v27 }
 0x531   :  { %8641 = vmatmul.msk.bf16.gmra.mxu1 %vm597_vm0, %v3370_v17 }
 0x532   :  { %8655 = vmatmul.msk.bf16.gmra.mxu2 %vm597_vm0, %v3492_v51 }
 0x533   :  { %8669 = vmatmul.msk.bf16.gmra.mxu3 %vm597_vm0, %v3614_v18  ;;  %v3362_v18 = vld [vmem:[#allocation3 + $0x130] sm:$0xff] }
 0x535   :  { %v3065_v8 = vpop.f32.mrf.mxu2 }
 0x536   :  { %v3096_v10 = vadd.f32 %v3065_v8, %v2974_v30  ;;  %v3187_v9 = vpop.f32.mrf.mxu3  ;;  %v2945_v1 = vpop.f32.mrf.mxu1  ;;  %v3484_v30 = vld [vmem:[#allocation3 + $0x131] sm:$0xff] }
 0x537   :  { %v2975_v43 = vadd.f32 %v2945_v1, %v2853_v41  ;;  %v3483_v41 = vld [vmem:[#allocation3 + $0x121] sm:$0xff]  ;;  %v11582_v27 = vpop.f32.mrf.mxu0 }
 0x538   :  { %v11547_v23 = vadd.f32 %v3187_v9, %v3096_v10  ;;  %v3361_v9 = vld [vmem:[#allocation3 + $0x120] sm:$0xff]  ;;  %v3494_v24 = vpack.c.bf16 %v3484_v30, %v3483_v41 }
 0x53d   :  { %v3067_v55 = vpop.f32.mrf.mxu2 }
 0x53e   :  { %v3097_v39 = vadd.f32 %v3067_v55, %v2975_v43  ;;  %v3189_v14 = vpop.f32.mrf.mxu3  ;;  %v2948_v40 = vpop.f32.mrf.mxu1  ;;  %v3372_v43 = vpack.c.bf16 %v3362_v18, %v3361_v9 }
 0x53f   :  { %v2976_v29 = vadd.f32 %v2948_v40, %v2854_v20  ;;  %v3732_v20 = vld [vmem:[#allocation3 + $0x173] sm:$0xff] }
 0x540   :  { %v11551_v37 = vadd.f32 %v3189_v14, %v3097_v39  ;;  %v3740_v40 = vpack.c.bf16 %v3732_v20, %v11471_v61  ;;  %v3617_v61 = vpack.c.bf16 %v11340_v35, %v11448_v2  ;;  %v3488_v35 = vld [vmem:[#allocation3 + $0x171] sm:$0xff] }
 0x541   :  { %8642 = vmatmul.msk.bf16.gmra.mxu1 %vm597_vm0, %v3371_v49  ;;  %v3486_v49 = vld [vmem:[#allocation3 + $0x151] sm:$0xff] }
 0x542   :  { %8656 = vmatmul.msk.bf16.gmra.mxu2 %vm597_vm0, %v3493_v31  ;;  %8687 = vmatmul.msk.bf16.gmra.mxu0 %vm597_vm0, %v3740_v40  ;;  %v3610_v2 = vld [vmem:[#allocation3 + $0x172] sm:$0xff] }
 0x543   :  { %8670 = vmatmul.msk.bf16.gmra.mxu3 %vm597_vm0, %v11304_v48  ;;  %v2856_v48 = vadd.f32 %v10980_v44, %v11437_v15  ;;  %v2857_v44 = vadd.f32 %v10994_v36, %v11450_v6  ;;  %v2858_v36 = vadd.f32 %v11003_v42, %v11464_v50  ;;  %v2859_v42 = vadd.f32 %v11022_v62, %v11473_v25  ;;  %v3840_v20 = vld [vmem:[#allocation3 + $0x54] sm:$0xff] }
 0x544   :  { %v3618_v25 = vpack.c.bf16 %v3610_v2, %v11469_v54  ;;  %v3334_v54 = vadd.f32 %v11080_v21, %v11502_v13  ;;  %v3846_v2 = vld [vmem:[#allocation3 + $0xb4] sm:$0xff] }
 0x545   :  { %v3070_v16 = vpop.f32.mrf.mxu2 }
 0x546   :  { %v3098_v7 = vadd.f32 %v3070_v16, %v2976_v29  ;;  %v3192_v34 = vpop.f32.mrf.mxu3  ;;  %v2950_v53 = vpop.f32.mrf.mxu1  ;;  %v3364_v29 = vld [vmem:[#allocation3 + $0x150] sm:$0xff] }
 0x547   :  { %v11561_v51 = vadd.f32 %v2950_v53, %v2855_v0 }
 0x548   :  { %v11559_v17 = vadd.f32 %v3192_v34, %v3098_v7  ;;  %v3495_v34 = vpack.c.bf16 %v3486_v49, %v11446_v22  ;;  %v3365_v22 = vld [vmem:[#allocation3 + $0x160] sm:$0xff] }
 0x54d   :  { %v11563_v11 = vpop.f32.mrf.mxu2 }
 0x54e   :  { %v11565_v8 = vpop.f32.mrf.mxu3  ;;  %v2953_v10 = vpop.f32.mrf.mxu1 }
 0x54f   :  { %v2978_v1 = vadd.f32 %v2953_v10, %v2856_v48  ;;  %v3366_v10 = vld [vmem:[#allocation3 + $0x170] sm:$0xff] }
 0x551   :  { %8643 = vmatmul.msk.bf16.gmra.mxu1 %vm597_vm0, %v3372_v43  ;;  %v3374_v43 = vpack.c.bf16 %v3366_v10, %v3365_v22 }
 0x552   :  { %8657 = vmatmul.msk.bf16.gmra.mxu2 %vm597_vm0, %v3494_v24  ;;  %v3496_v24 = vpack.c.bf16 %v3488_v35, %v11467_v57  ;;  %v3845_v35 = vld [vmem:[#allocation3 + $0xa4] sm:$0xff] }
 0x553   :  { %8671 = vmatmul.msk.bf16.gmra.mxu3 %vm597_vm0, %v11327_v47  ;;  %v3363_v47 = vld [vmem:[#allocation3 + $0x140] sm:$0xff] }
 0x554   :  { %v3373_v7 = vpack.c.bf16 %v3364_v29, %v3363_v47  ;;  %v3839_v47 = vld [vmem:[#allocation3 + $0x44] sm:$0xff] }
 0x555   :  { %v3075_v55 = vpop.f32.mrf.mxu2  ;;  %v3855_v49 = vpack.c.bf16 %v3840_v20, %v3839_v47 }
 0x556   :  { %v3100_v4 = vadd.f32 %v3075_v55, %v2978_v1  ;;  %v3197_v3 = vpop.f32.mrf.mxu3  ;;  %v2955_v15 = vpop.f32.mrf.mxu1  ;;  %v2860_v1 = vadd.f32 %v11034_v45, %v11484_v59 }
 0x557   :  { %v11579_v14 = vadd.f32 %v2955_v15, %v2857_v44  ;;  %v2861_v44 = vadd.f32 %v11062_v56, %v11489_v19  ;;  %v3335_v56 = vadd.f32 %v11091_v63, %v11506_v28  ;;  %v3314_v63 = vpop.f32.mrf.mxu0  ;;  %v3844_v28 = vld [vmem:[#allocation3 + $0x94] sm:$0xff] }
 0x558   :  { %v11577_v39 = vadd.f32 %v3197_v3, %v3100_v4 }
 0x55d   :  { %v11585_v60 = vpop.f32.mrf.mxu2 }
 0x55e   :  { %v11587_v31 = vpop.f32.mrf.mxu3  ;;  %v2958_v6 = vpop.f32.mrf.mxu1 }
 0x55f   :  { %v2980_v16 = vadd.f32 %v2958_v6, %v2858_v36  ;;  %v3842_v6 = vld [vmem:[#allocation3 + $0x74] sm:$0xff]  ;;  %v11643_v22 = vpop.f32.mrf.mxu0 }
 0x561   :  { %8644 = vmatmul.msk.bf16.gmra.mxu1 %vm597_vm0, %v3373_v7 }
 0x562   :  { %8658 = vmatmul.msk.bf16.gmra.mxu2 %vm597_vm0, %v3495_v34  ;;  %v3841_v34 = vld [vmem:[#allocation3 + $0x64] sm:$0xff] }
 0x563   :  { %8672 = vmatmul.msk.bf16.gmra.mxu3 %vm597_vm0, %v3617_v61  ;;  %v3856_v13 = vpack.c.bf16 %v3842_v6, %v3841_v34  ;;  %v3337_v61 = vadd.f32 %v11114_v38, %v11523_v5  ;;  %v3339_v38 = vadd.f32 %v11145_v12, %v11540_v33  ;;  %v3852_v34 = vld [vmem:[#allocation3 + $0x154] sm:$0xff] }
 0x565   :  { %v3080_v0 = vpop.f32.mrf.mxu2 }
 0x566   :  { %v3102_v53 = vadd.f32 %v3080_v0, %v2980_v16  ;;  %v3202_v18 = vpop.f32.mrf.mxu3  ;;  %v2960_v50 = vpop.f32.mrf.mxu1  ;;  %v3336_v16 = vadd.f32 %v11109_v58, %v11519_v26  ;;  %v3843_v58 = vld [vmem:[#allocation3 + $0x84] sm:$0xff] }
 0x567   :  { %v11601_v48 = vadd.f32 %v2960_v50, %v2859_v42  ;;  %v3857_v50 = vpack.c.bf16 %v3844_v28, %v3843_v58 }
 0x568   :  { %v11599_v30 = vadd.f32 %v3202_v18, %v3102_v53  ;;  %v3338_v18 = vadd.f32 %v11134_v32, %v11534_v52  ;;  %v3340_v32 = vadd.f32 %v11569_v46, %v11547_v23  ;;  %v3858_v52 = vpack.c.bf16 %v3846_v2, %v3845_v35  ;;  %v3847_v23 = vld [vmem:[#allocation3 + $0x104] sm:$0xff] }
 0x56d   :  { %v11603_v9 = vpop.f32.mrf.mxu2 }
 0x56e   :  { %v11605_v41 = vpop.f32.mrf.mxu3  ;;  %v2963_v62 = vpop.f32.mrf.mxu1 }
 0x56f   :  { %v2982_v55 = vadd.f32 %v2963_v62, %v2860_v1  ;;  %v3341_v62 = vadd.f32 %v11582_v27, %v11551_v37  ;;  %v9731_v37 = vld [vmem:[%s12835_s5 + $0x8] sm:$0xff]  ;;  %v3850_v27 = vld [vmem:[#allocation3 + $0x134] sm:$0xff] }
 0x570   :  { %4190 = vmatpush.bf16.msrb.mxu2 %v9731_v37 }
 0x571   :  { %8645 = vmatmul.msk.bf16.gmra.mxu1 %vm597_vm0, %v3374_v43  ;;  %v3319_v43 = vpop.f32.mrf.mxu0 }
 0x572   :  { %8659 = vmatmul.msk.bf16.gmra.mxu2 %vm597_vm0, %v3496_v24 }
 0x573   :  { %8673 = vmatmul.msk.bf16.gmra.mxu3 %vm597_vm0, %v3618_v25 }
 0x575   :  { %v3085_v4 = vpop.f32.mrf.mxu2 }
 0x576   :  { %v3104_v3 = vadd.f32 %v3085_v4, %v2982_v55  ;;  %v3207_v15 = vpop.f32.mrf.mxu3  ;;  %v2965_v45 = vpop.f32.mrf.mxu1  ;;  %v3848_v55 = vld [vmem:[#allocation3 + $0x114] sm:$0xff]  ;;  %v3342_v4 = vadd.f32 %v3314_v63, %v11559_v17  ;;  %v3344_v17 = vadd.f32 %v3319_v43, %v11577_v39  ;;  %v9735_v43 = vld [vmem:[%s12835_s5 + $0x28] sm:$0xff] }
 0x577   :  { %v11618_v57 = vadd.f32 %v2965_v45, %v2861_v44  ;;  %v3859_v44 = vpack.c.bf16 %v3848_v55, %v3847_v23  ;;  %v9733_v39 = vld [vmem:[%s12835_s5 + $0x18] sm:$0xff]  ;;  %4364 = vmatpush.bf16.msra.mxu0 %v9735_v43 }
 0x578   :  { %v11616_v59 = vadd.f32 %v3207_v15, %v3104_v3  ;;  %4277 = vmatpush.bf16.msrb.mxu3 %v9733_v39 }
 0x579   :  { %v11658_v33 = vpop.f32.mrf.mxu0 }
 0x57e   :  { %v3417_v40 = vpop.f32.mrf.mxu1 }
 0x57f   :  { %v11622_v29 = vadd.f32 %v3417_v40, %v3334_v54  ;;  %v3849_v40 = vld [vmem:[#allocation3 + $0x124] sm:$0xff] }
 0x581   :  { %8694 = vmatmul.msk.bf16.vlgmr.msrb.gmra.mxu1 %vm597_vm0, %v3855_v49  ;;  %v3324_v15 = vpop.f32.mrf.mxu0  ;;  %v3860_v49 = vpack.c.bf16 %v3850_v27, %v3849_v40 }
 0x586   :  { %v3419_v19 = vpop.f32.mrf.mxu1 }
 0x587   :  { %v11627_v36 = vadd.f32 %v3419_v19, %v3335_v56  ;;  %v13064_v19 = vmov 0.0  }
 0x588   :  { %4081 = vst.msk [vmem:[#allocation5] sm:$0xff] %vm3977_vm3, %v13064_v19 }
 0x589   :  { %v11669_v20 = vpop.f32.mrf.mxu0  ;;  %4082 = vst.msk [vmem:[#allocation5 + $0x8] sm:$0xff] %vm3977_vm3, %v13064_v19 }
 0x58a   :  { %4083 = vst.msk [vmem:[#allocation5 + $0x40] sm:$0xff] %vm3977_vm3, %v13064_v19 }
 0x58b   :  { %4084 = vst.msk [vmem:[#allocation5 + $0x48] sm:$0xff] %vm3977_vm3, %v13064_v19 }
 0x58c   :  { %4086 = vst.msk [vmem:[#allocation5 + $0x30] sm:$0xff] %vm3977_vm3, %v13064_v19 }
 0x58d   :  { %4087 = vst.msk [vmem:[#allocation5 + $0x38] sm:$0xff] %vm3977_vm3, %v13064_v19 }
 0x58e   :  { %v3422_v7 = vpop.f32.mrf.mxu1  ;;  %4088 = vst.msk [vmem:[#allocation5 + $0x70] sm:$0xff] %vm3977_vm3, %v13064_v19 }
 0x58f   :  { %v11631_v21 = vadd.f32 %v3422_v7, %v3336_v16  ;;  %v11681_v16 = vpop.f32.mrf.mxu2  ;;  %v3851_v7 = vld [vmem:[#allocation3 + $0x144] sm:$0xff]  ;;  %4089 = vst.msk [vmem:[#allocation5 + $0x78] sm:$0xff] %vm3977_vm3, %v13064_v19 }
 0x590   :  { %v4122_v28 = vld [vmem:[#allocation5 + $0x8] sm:$0xf]  ;;  %4092 = vst.msk [vmem:[#allocation5 + $0x10] sm:$0x3] %vm4091_vm4, %v13064_v19  ;;  %v4381_v40 = vld [vmem:[#allocation5 + $0x3] sm:$0xf] }
 0x591   :  { %8695 = vmatmul.msk.bf16.gmra.mxu1 %vm597_vm0, %v3856_v13  ;;  %v3329_v6 = vpop.f32.mrf.mxu0  ;;  %v3346_v13 = vadd.f32 %v3324_v15, %v11599_v30  ;;  %4139 = vst [vmem:[#allocation1 + $0x1] ss:$2 sm:$0xff] %v4122_v28  ;;  %v4208_v30 = vld [vmem:[#allocation5 + $0x9] sm:$0xf]  ;;  %v4468_v28 = vld [vmem:[#allocation5 + $0x4] sm:$0xf] }
 0x592   :  { %v4295_v23 = vld [vmem:[#allocation5 + $0xa] sm:$0xf]  ;;  %4100 = vst.msk [vmem:[#allocation5 + $0x16] sm:$0x3] %vm4091_vm4, %v13064_v19 }
 0x593   :  { %4093 = vst.msk [vmem:[#allocation5 + $0x18] sm:$0x3] %vm4091_vm4, %v13064_v19 }
 0x594   :  { %4094 = vst.msk [vmem:[#allocation5 + $0x20] sm:$0x3] %vm4091_vm4, %v13064_v19 }
 0x595   :  { %4095 = vst.msk [vmem:[#allocation5 + $0x28] sm:$0x3] %vm4091_vm4, %v13064_v19 }
 0x596   :  { %v3424_v0 = vpop.f32.mrf.mxu1  ;;  %4096 = vst.msk [vmem:[#allocation5 + $0x50] sm:$0x3] %vm4091_vm4, %v13064_v19 }
 0x597   :  { %v11636_v53 = vadd.f32 %v3424_v0, %v3337_v61  ;;  %v4121_v61 = vld [vmem:[#allocation5] sm:$0xf]  ;;  %v11699_v0 = vpop.f32.mrf.mxu3  ;;  %4097 = vst.msk [vmem:[#allocation5 + $0x58] sm:$0x3] %vm4091_vm4, %v13064_v19 }
 0x598   :  { %4137 = vst [vmem:[#allocation1] ss:$2 sm:$0xff] %v4121_v61 }
 0x599   :  { %v11703_v58 = vpop.f32.mrf.mxu0  ;;  %4098 = vst.msk [vmem:[#allocation5 + $0x60] sm:$0x3] %vm4091_vm4, %v13064_v19 }
 0x59a   :  { %4099 = vst.msk [vmem:[#allocation5 + $0x68] sm:$0x3] %vm4091_vm4, %v13064_v19 }
 0x59b   :  { %4101 = vst.msk [vmem:[#allocation5 + $0x1e] sm:$0x3] %vm4091_vm4, %v13064_v19 }
 0x59c   :  { %4102 = vst.msk [vmem:[#allocation5 + $0x26] sm:$0x3] %vm4091_vm4, %v13064_v19 }
 0x59d   :  { %4103 = vst.msk [vmem:[#allocation5 + $0x2e] sm:$0x3] %vm4091_vm4, %v13064_v19 }
 0x59e   :  { %v3427_v42 = vpop.f32.mrf.mxu1  ;;  %4104 = vst.msk [vmem:[#allocation5 + $0x56] sm:$0x3] %vm4091_vm4, %v13064_v19 }
 0x59f   :  { %v11640_v26 = vadd.f32 %v3427_v42, %v3338_v18  ;;  %v3861_v42 = vpack.c.bf16 %v3852_v34, %v3851_v7  ;;  %v11708_v35 = vld.sshfl [vmem:[#allocation1] sm:$0xff pattern:$0x75316420]  ;;  %v3661_v2 = vpop.f32.mrf.mxu3  ;;  %4105 = vst.msk [vmem:[#allocation5 + $0x5e] sm:$0x3] %vm4091_vm4, %v13064_v19 }
 0x5a0   :  { %4225 = vst [vmem:[#allocation1 + $0x1] ss:$2 sm:$0xff] %v4208_v30 }
 0x5a1   :  { %8696 = vmatmul.msk.bf16.gmra.mxu1 %vm597_vm0, %v3857_v50  ;;  %v3539_v50 = vpop.f32.mrf.mxu2  ;;  %4106 = vst.msk [vmem:[#allocation5 + $0x66] sm:$0x3] %vm4091_vm4, %v13064_v19 }
 0x5a2   :  { %4107 = vst.msk [vmem:[#allocation5 + $0x6e] sm:$0x3] %vm4091_vm4, %v13064_v19 }
 0x5a3   :  { %6367 = vst.msk [vmem:[#allocation7] sm:$0x3f] %vm6366_vm6, %v13064_v19 }
 0x5a4   :  { %6368 = vst.msk [vmem:[#allocation7 + $0x8] sm:$0x3f] %vm6366_vm6, %v13064_v19 }
 0x5a5   :  { %6369 = vst.msk [vmem:[#allocation7 + $0x30] sm:$0x3f] %vm6366_vm6, %v13064_v19 }
 0x5a6   :  { %v3429_v5 = vpop.f32.mrf.mxu1  ;;  %6370 = vst.msk [vmem:[#allocation7 + $0x38] sm:$0x3f] %vm6366_vm6, %v13064_v19 }
 0x5a7   :  { %v11647_v10 = vadd.f32 %v3429_v5, %v3339_v38  ;;  %v4207_v38 = vld [vmem:[#allocation5 + $0x1] sm:$0xf]  ;;  %v3663_v37 = vpop.f32.mrf.mxu3  ;;  %6372 = vst.msk [vmem:[#allocation7 + $0x20] sm:$0x3f] %vm6366_vm6, %v13064_v19 }
 0x5a8   :  { %4223 = vst [vmem:[#allocation1] ss:$2 sm:$0xff] %v4207_v38 }
 0x5a9   :  { %6373 = vst.msk [vmem:[#allocation7 + $0x28] sm:$0x3f] %vm6366_vm6, %v13064_v19 }
 0x5aa   :  { %6374 = vst.msk [vmem:[#allocation7 + $0x50] sm:$0x3f] %vm6366_vm6, %v13064_v19 }
 0x5ab   :  { %6375 = vst.msk [vmem:[#allocation7 + $0x58] sm:$0x3f] %vm6366_vm6, %v13064_v19 }
 0x5ac   :  { %6378 = vst.msk [vmem:[#allocation7 + $0x10] sm:$0x3] %vm6377_vm7, %v13064_v19 }
 0x5ad   :  { %6380 = vst.msk [vmem:[#allocation7 + $0x40] sm:$0x3] %vm6377_vm7, %v13064_v19 }
 0x5ae   :  { %v3432_v1 = vpop.f32.mrf.mxu1  ;;  %6382 = vst.msk [vmem:[#allocation7 + $0x14] sm:$0x3] %vm6377_vm7, %v13064_v19 }
 0x5af   :  { %v11651_v24 = vadd.f32 %v3432_v1, %v3340_v32  ;;  %v3853_v32 = vld [vmem:[#allocation3 + $0x164] sm:$0xff]  ;;  %v3783_v1 = vpop.f32.mrf.mxu0  ;;  %v11716_v15 = vld.sshfl [vmem:[#allocation1] sm:$0xff pattern:$0x75316420]  ;;  %6379 = vst.msk [vmem:[#allocation7 + $0x18] sm:$0x3] %vm6377_vm7, %v13064_v19 }
 0x5b0   :  { %4312 = vst [vmem:[#allocation1 + $0x1] ss:$2 sm:$0xff] %v4295_v23 }
 0x5b1   :  { %8697 = vmatmul.msk.bf16.gmra.mxu1 %vm597_vm0, %v3858_v52  ;;  %v3854_v52 = vld [vmem:[#allocation3 + $0x174] sm:$0xff]  ;;  %6381 = vst.msk [vmem:[#allocation7 + $0x48] sm:$0x3] %vm6377_vm7, %v13064_v19 }
 0x5b2   :  { %v3862_v55 = vpack.c.bf16 %v3854_v52, %v3853_v32  ;;  %6383 = vst.msk [vmem:[#allocation7 + $0x1c] sm:$0x3] %vm6377_vm7, %v13064_v19 }
 0x5b3   :  { %6384 = vst.msk [vmem:[#allocation7 + $0x44] sm:$0x3] %vm6377_vm7, %v13064_v19 }
 0x5b4   :  { %6385 = vst.msk [vmem:[#allocation7 + $0x4c] sm:$0x3] %vm6377_vm7, %v13064_v19 }
 0x5b6   :  { %v3434_v25 = vpop.f32.mrf.mxu1 }
 0x5b7   :  { %v11656_v12 = vadd.f32 %v3434_v25, %v3341_v62  ;;  %v3541_v62 = vpop.f32.mrf.mxu2  ;;  %v3348_v25 = vadd.f32 %v3329_v6, %v11616_v59  ;;  %v3785_v27 = vpop.f32.mrf.mxu0 }
 0x5b8   :  { %v3580_v7 = vadd.f32 %v3541_v62, %v11627_v36 }
 0x5ba   :  { %v3702_v36 = vadd.f32 %v3663_v37, %v3580_v7 }
 0x5bc   :  { %v3824_v32 = vadd.f32 %v3785_v27, %v3702_v36 }
 0x5be   :  { %v3437_v3 = vpop.f32.mrf.mxu1 }
 0x5bf   :  { %v11661_v46 = vadd.f32 %v3437_v3, %v3342_v4  ;;  %v4294_v4 = vld [vmem:[#allocation5 + $0x2] sm:$0xf]  ;;  %v3788_v61 = vpop.f32.mrf.mxu0 }
 0x5c0   :  { %4310 = vst [vmem:[#allocation1] ss:$2 sm:$0xff] %v4294_v4 }
 0x5c1   :  { %8698 = vmatmul.msk.bf16.gmra.mxu1 %vm597_vm0, %v3859_v44 }
 0x5c6   :  { %v11664_v45 = vpop.f32.mrf.mxu1 }
 0x5c7   :  { %v11726_v6 = vld.sshfl [vmem:[#allocation1] sm:$0xff pattern:$0x75316420]  ;;  %v3790_v62 = vpop.f32.mrf.mxu0 }
 0x5c8   :  { %4397 = vst [vmem:[#allocation1] ss:$2 sm:$0xff] %v4381_v40 }
 0x5ce   :  { %v3442_v54 = vpop.f32.mrf.mxu1 }
 0x5cf   :  { %v11672_v47 = vadd.f32 %v3442_v54, %v3344_v17  ;;  %v3579_v17 = vadd.f32 %v3539_v50, %v11622_v29  ;;  %v3544_v54 = vpop.f32.mrf.mxu2  ;;  %v3666_v29 = vpop.f32.mrf.mxu3  ;;  %v4469_v50 = vld [vmem:[#allocation5 + $0xc] sm:$0xf] }
 0x5d1   :  { %8699 = vmatmul.msk.bf16.gmra.mxu1 %vm597_vm0, %v3860_v49  ;;  %v4382_v49 = vld [vmem:[#allocation5 + $0xb] sm:$0xf]  ;;  %v3701_v39 = vadd.f32 %v3661_v2, %v3579_v17  ;;  %v3581_v2 = vadd.f32 %v3544_v54, %v11631_v21 }
 0x5d2   :  { %4399 = vst [vmem:[#allocation1 + $0x1] ss:$2 sm:$0xff] %v4382_v49  ;;  %v4556_v21 = vld [vmem:[#allocation5 + $0x8] sm:$0xf] }
 0x5d3   :  { %v3823_v34 = vadd.f32 %v3783_v1, %v3701_v39 }
 0x5d6   :  { %v11675_v56 = vpop.f32.mrf.mxu1 }
 0x5d7   :  { %v3668_v52 = vpop.f32.mrf.mxu3 }
 0x5d9   :  { %v11743_v30 = vld.sshfl [vmem:[#allocation1] sm:$0xff pattern:$0x75316420] }
 0x5da   :  { %4484 = vst [vmem:[#allocation1] ss:$2 sm:$0xff] %v4468_v28 }
 0x5db   :  { %4486 = vst [vmem:[#allocation1 + $0x1] ss:$2 sm:$0xff] %v4469_v50 }
 0x5de   :  { %v3447_v63 = vpop.f32.mrf.mxu1 }
 0x5df   :  { %v11701_v18 = vadd.f32 %v3447_v63, %v3346_v13  ;;  %v3671_v54 = vpop.f32.mrf.mxu3 }
 0x5e1   :  { %8700 = vmatmul.msk.bf16.gmra.mxu1 %vm597_vm0, %v3861_v42  ;;  %v3546_v42 = vpop.f32.mrf.mxu2 }
 0x5e2   :  { %v3582_v23 = vadd.f32 %v3546_v42, %v11636_v53 }
 0x5e4   :  { %v3704_v39 = vadd.f32 %v3668_v52, %v3582_v23 }
 0x5e6   :  { %v11706_v5 = vpop.f32.mrf.mxu1  ;;  %v3826_v42 = vadd.f32 %v3790_v62, %v3704_v39 }
 0x5e9   :  { %v3549_v4 = vpop.f32.mrf.mxu2 }
 0x5ee   :  { %v3452_v3 = vpop.f32.mrf.mxu1 }
 0x5ef   :  { %v11714_v44 = vadd.f32 %v3452_v3, %v3348_v25  ;;  %v3703_v25 = vadd.f32 %v3666_v29, %v3581_v2  ;;  %v11760_v3 = vld.sshfl [vmem:[#allocation1] sm:$0xff pattern:$0x75316420] }
 0x5f0   :  { %4572 = vst [vmem:[#allocation1] ss:$2 sm:$0xff] %v4556_v21 }
 0x5f1   :  { %8701 = vmatmul.msk.bf16.gmra.mxu1 %vm597_vm0, %v3862_v55  ;;  %v3825_v37 = vadd.f32 %v3788_v61, %v3703_v25  ;;  %v3551_v50 = vpop.f32.mrf.mxu2  ;;  %v3583_v61 = vadd.f32 %v3549_v4, %v11640_v26 }
 0x5f3   :  { %v3705_v52 = vadd.f32 %v3671_v54, %v3583_v61 }
 0x5f6   :  { %v11720_v59 = vpop.f32.mrf.mxu1 }
 0x5f9   :  { %v3554_v25 = vpop.f32.mrf.mxu2 }
 0x5fe   :  { %v3905_v13 = vpop.f32.mrf.mxu1 }
 0x5ff   :  { %v3945_v63 = vadd.f32 %v3905_v13, %v3823_v34  ;;  %v3793_v13 = vpop.f32.mrf.mxu0 }
 0x600   :  { %v3827_v23 = vadd.f32 %v3793_v13, %v3705_v52 }
 0x601   :  { %v3961_v38 = vmax.f32 %v3945_v63, 0.0 }
 0x603   :  { %3978 = vst.msk [vmem:[#allocation4] sm:$0xff] %vm3977_vm3, %v3961_v38 }
 0x606   :  { %v3907_v1 = vpop.f32.mrf.mxu1 }
 0x607   :  { %v3946_v43 = vadd.f32 %v3907_v1, %v3824_v32  ;;  %v3673_v32 = vpop.f32.mrf.mxu3  ;;  %v3795_v1 = vpop.f32.mrf.mxu0 }
 0x609   :  { %v3962_v55 = vmax.f32 %v3946_v43, 0.0  ;;  %v3584_v43 = vadd.f32 %v3551_v50, %v11647_v10  ;;  %v9730_v50 = vld [vmem:[%s12835_s5] sm:$0xff] }
 0x60a   :  { %v3994_v40 = vld [vmem:[#allocation4] ss:$2 sm:$0xf]  ;;  %v4026_v49 = vld [vmem:[#allocation4 + $0x1] ss:$2 sm:$0xf]  ;;  %4191 = vmatpush.bf16.msrb.mxu2 %v9730_v50 }
 0x60b   :  { %3979 = vst.msk [vmem:[#allocation4 + $0x8] sm:$0xff] %vm3977_vm3, %v3962_v55  ;;  %v4057_v63 = vmax.f32 %v3994_v40, %v4026_v49  ;;  %v9732_v50 = vld [vmem:[%s12835_s5 + $0x10] sm:$0xff] }
 0x60c   :  { %4278 = vmatpush.bf16.msrb.mxu3 %v9732_v50 }
 0x60e   :  { %v3910_v27 = vpop.f32.mrf.mxu1 }
 0x60f   :  { %v3947_v17 = vadd.f32 %v3910_v27, %v3825_v37  ;;  %v3706_v37 = vadd.f32 %v3673_v32, %v3584_v43 }
 0x611   :  { %v3963_v29 = vmax.f32 %v3947_v17, 0.0  ;;  %v3676_v17 = vpop.f32.mrf.mxu3 }
 0x612   :  { %v3996_v7 = vld [vmem:[#allocation4 + $0x8] ss:$2 sm:$0xf]  ;;  %v4028_v34 = vld [vmem:[#allocation4 + $0x9] ss:$2 sm:$0xf] }
 0x613   :  { %v4058_v28 = vmax.f32 %v3996_v7, %v4028_v34  ;;  %3980 = vst.msk [vmem:[#allocation4 + $0x10] sm:$0xff] %vm3977_vm3, %v3963_v29  ;;  %v3828_v7 = vadd.f32 %v3795_v1, %v3706_v37  ;;  %v4643_v34 = vld [vmem:[#allocation5 + $0x9] sm:$0xf] }
 0x614   :  { %v4730_v1 = vld [vmem:[#allocation5 + $0xa] sm:$0xf] }
 0x615   :  { %v4073_v53 = vmax.f32 %v4057_v63, %v4058_v28  ;;  %v3585_v63 = vadd.f32 %v3554_v25, %v11651_v24 }
 0x616   :  { %v3912_v36 = vpop.f32.mrf.mxu1 }
 0x617   :  { %4109 = vst.msk [vmem:[#allocation5 + $0x12] sm:$0xf] %vm4108_vm5, %v4073_v53  ;;  %v3948_v38 = vadd.f32 %v3912_v36, %v3826_v42  ;;  %v3798_v53 = vpop.f32.mrf.mxu0  ;;  %v3556_v42 = vpop.f32.mrf.mxu2 }
 0x618   :  { %v3586_v24 = vadd.f32 %v3556_v42, %v11656_v12 }
 0x619   :  { %v3964_v2 = vmax.f32 %v3948_v38, 0.0  ;;  %v3678_v32 = vpop.f32.mrf.mxu3 }
 0x61a   :  { %v3998_v4 = vld [vmem:[#allocation4 + $0x10] ss:$2 sm:$0xf]  ;;  %v4030_v27 = vld [vmem:[#allocation4 + $0x11] ss:$2 sm:$0xf]  ;;  %v3708_v25 = vadd.f32 %v3678_v32, %v3586_v24 }
 0x61b   :  { %3981 = vst.msk [vmem:[#allocation4 + $0x18] sm:$0xff] %vm3977_vm3, %v3964_v2  ;;  %v4059_v54 = vmax.f32 %v3998_v4, %v4030_v27  ;;  %v3707_v2 = vadd.f32 %v3676_v17, %v3585_v63  ;;  %v3099_v4 = vadd.f32 %v11563_v11, %v11561_v51 }
 0x61d   :  { %v3829_v43 = vadd.f32 %v3798_v53, %v3707_v2 }
 0x61e   :  { %v4123_v55 = vld [vmem:[#allocation5 + $0x10] sm:$0xf]  ;;  %v3915_v21 = vpop.f32.mrf.mxu1 }
 0x61f   :  { %4141 = vst [vmem:[#allocation1 + $0x10] ss:$2 sm:$0xff] %v4123_v55  ;;  %v4557_v62 = vld [vmem:[#allocation5 + $0x10] sm:$0xf]  ;;  %v3949_v26 = vadd.f32 %v3915_v21, %v3827_v23  ;;  %v3800_v23 = vpop.f32.mrf.mxu0 }
 0x620   :  { %4574 = vst [vmem:[#allocation1 + $0x1] ss:$2 sm:$0xff] %v4557_v62  ;;  %v4644_v61 = vld [vmem:[#allocation5 + $0x11] sm:$0xf]  ;;  %v3559_v62 = vpop.f32.mrf.mxu2  ;;  %v3830_v17 = vadd.f32 %v3800_v23, %v3708_v25 }
 0x621   :  { %v3965_v29 = vmax.f32 %v3949_v26, 0.0  ;;  %v4731_v37 = vld [vmem:[#allocation5 + $0x12] sm:$0xf]  ;;  %v3587_v12 = vadd.f32 %v3559_v62, %v11661_v46 }
 0x622   :  { %v4000_v40 = vld [vmem:[#allocation4 + $0x18] ss:$2 sm:$0xf]  ;;  %v4032_v49 = vld [vmem:[#allocation4 + $0x19] ss:$2 sm:$0xf] }
 0x623   :  { %v4060_v39 = vmax.f32 %v4000_v40, %v4032_v49  ;;  %3982 = vst.msk [vmem:[#allocation4 + $0x20] sm:$0xff] %vm3977_vm3, %v3965_v29  ;;  %v4817_v29 = vld [vmem:[#allocation5 + $0xb] sm:$0xf]  ;;  %v4991_v50 = vld [vmem:[#allocation5 + $0x10] sm:$0xf] }
 0x625   :  { %v4074_v28 = vmax.f32 %v4059_v54, %v4060_v39  ;;  %v3221_v54 = vadd.f32 %v11565_v8, %v3099_v4  ;;  %v3681_v39 = vpop.f32.mrf.mxu3 }
 0x626   :  { %v3917_v10 = vpop.f32.mrf.mxu1 }
 0x627   :  { %v3950_v13 = vadd.f32 %v3917_v10, %v3828_v7  ;;  %v11775_v36 = vld.sshfl [vmem:[#allocation1] sm:$0xff pattern:$0x75316420]  ;;  %4110 = vst.msk [vmem:[#allocation5 + $0x1a] sm:$0xf] %vm4108_vm5, %v4074_v28  ;;  %v3803_v8 = vpop.f32.mrf.mxu0  ;;  %v3343_v53 = vadd.f32 %v11643_v22, %v3221_v54 }
 0x628   :  { %4659 = vst [vmem:[#allocation1] ss:$2 sm:$0xff] %v4643_v34  ;;  %v3709_v34 = vadd.f32 %v3681_v39, %v3587_v12  ;;  %v4818_v10 = vld [vmem:[#allocation5 + $0x13] sm:$0xf] }
 0x629   :  { %v3966_v38 = vmax.f32 %v3950_v13, 0.0  ;;  %4661 = vst [vmem:[#allocation1 + $0x1] ss:$2 sm:$0xff] %v4644_v61  ;;  %v4209_v13 = vld [vmem:[#allocation5 + $0x11] sm:$0xf] }
 0x62a   :  { %v4002_v7 = vld [vmem:[#allocation4 + $0x20] ss:$2 sm:$0xf]  ;;  %v4034_v63 = vld [vmem:[#allocation4 + $0x21] ss:$2 sm:$0xf]  ;;  %v3831_v32 = vadd.f32 %v3803_v8, %v3709_v34 }
 0x62b   :  { %3983 = vst.msk [vmem:[#allocation4 + $0x28] sm:$0xff] %vm3977_vm3, %v3966_v38  ;;  %v4061_v2 = vmax.f32 %v4002_v7, %v4034_v63  ;;  %v4905_v12 = vld [vmem:[#allocation5 + $0x14] sm:$0xf] }
 0x62c   :  { %v4383_v8 = vld [vmem:[#allocation5 + $0x13] sm:$0xf] }
 0x62e   :  { %v3920_v52 = vpop.f32.mrf.mxu1  ;;  %v4124_v26 = vld [vmem:[#allocation5 + $0x18] sm:$0xf] }
 0x62f   :  { %v3951_v21 = vadd.f32 %v3920_v52, %v3829_v43  ;;  %4143 = vst [vmem:[#allocation1 + $0x11] ss:$2 sm:$0xff] %v4124_v26  ;;  %v4210_v38 = vld [vmem:[#allocation5 + $0x19] sm:$0xf]  ;;  %v3561_v52 = vpop.f32.mrf.mxu2  ;;  %v3466_v43 = vadd.f32 %v11664_v45, %v3343_v53  ;;  %v4296_v26 = vld [vmem:[#allocation5 + $0x12] sm:$0xf]  ;;  %v3683_v45 = vpop.f32.mrf.mxu3 }
 0x630   :  { %v11780_v55 = vld.sshfl [vmem:[#allocation1] sm:$0xff pattern:$0x75316420] }
 0x631   :  { %4746 = vst [vmem:[#allocation1] ss:$2 sm:$0xff] %v4730_v1  ;;  %v3967_v27 = vmax.f32 %v3951_v21, 0.0  ;;  %v4125_v21 = vld [vmem:[#allocation5 + $0x40] sm:$0xf]  ;;  %v3588_v23 = vadd.f32 %v3561_v52, %v3466_v43 }
 0x632   :  { %4748 = vst [vmem:[#allocation1 + $0x1] ss:$2 sm:$0xff] %v4731_v37  ;;  %v4004_v11 = vld [vmem:[#allocation4 + $0x28] ss:$2 sm:$0xf]  ;;  %v9734_v37 = vld [vmem:[%s12835_s5 + $0x20] sm:$0xff] }
 0x633   :  { %3984 = vst.msk [vmem:[#allocation4 + $0x30] sm:$0xff] %vm3977_vm3, %v3967_v27  ;;  %v4036_v42 = vld [vmem:[#allocation4 + $0x29] ss:$2 sm:$0xf]  ;;  %v4297_v27 = vld [vmem:[#allocation5 + $0x1a] sm:$0xf]  ;;  %4365 = vmatpush.bf16.msra.mxu0 %v9734_v37 }
 0x634   :  { %v4062_v24 = vmax.f32 %v4004_v11, %v4036_v42  ;;  %4145 = vst [vmem:[#allocation1 + $0x20] ss:$2 sm:$0xff] %v4125_v21  ;;  %v4992_v53 = vld [vmem:[#allocation5 + $0x18] sm:$0xf]  ;;  %v5078_v43 = vld [vmem:[#allocation5 + $0x11] sm:$0xf] }
 0x636   :  { %v3922_v40 = vpop.f32.mrf.mxu1  ;;  %v4153_v46 = vld.sshfl [vmem:[#allocation1 + $0x10] sm:$0xff pattern:$0x75316420]  ;;  %v4075_v25 = vmax.f32 %v4061_v2, %v4062_v24 }
 0x637   :  { %v3952_v49 = vadd.f32 %v3922_v40, %v3830_v17  ;;  %v4160_v61 = vpack.c.bf16 %v4153_v46, %v11708_v35  ;;  %4227 = vst [vmem:[#allocation1 + $0x10] ss:$2 sm:$0xff] %v4209_v13  ;;  %v4904_v35 = vld [vmem:[#allocation5 + $0xc] sm:$0xf]  ;;  %v3710_v17 = vadd.f32 %v3683_v45, %v3588_v23  ;;  %v4126_v24 = vld [vmem:[#allocation5 + $0x48] sm:$0xf] }
 0x638   :  { %4229 = vst [vmem:[#allocation1 + $0x11] ss:$2 sm:$0xff] %v4210_v38  ;;  %v4384_v38 = vld [vmem:[#allocation5 + $0x1b] sm:$0xf]  ;;  %v4470_v23 = vld [vmem:[#allocation5 + $0x14] sm:$0xf] }
 0x639   :  { %v3968_v28 = vmax.f32 %v3952_v49, 0.0  ;;  %v11787_v51 = vld.sshfl [vmem:[#allocation1] sm:$0xff pattern:$0x75316420]  ;;  %8710 = vmatmul.msk.bf16.vlgmr.msrb.gmra.mxu2 %vm3977_vm3, %v4160_v61  ;;  %4111 = vst.msk [vmem:[#allocation5 + $0x22] sm:$0xf] %vm4108_vm5, %v4075_v25  ;;  %v3564_v61 = vpop.f32.mrf.mxu2 }
 0x63a   :  { %4833 = vst [vmem:[#allocation1] ss:$2 sm:$0xff] %v4817_v29  ;;  %v3805_v29 = vpop.f32.mrf.mxu0  ;;  %v4006_v7 = vld [vmem:[#allocation4 + $0x30] ss:$2 sm:$0xf]  ;;  %v3589_v52 = vadd.f32 %v3564_v61, %v11672_v47 }
 0x63b   :  { %4835 = vst [vmem:[#allocation1 + $0x1] ss:$2 sm:$0xff] %v4818_v10  ;;  %v4038_v34 = vld [vmem:[#allocation4 + $0x31] ss:$2 sm:$0xf] }
 0x63c   :  { %3985 = vst.msk [vmem:[#allocation4 + $0x38] sm:$0xff] %vm3977_vm3, %v3968_v28  ;;  %v3832_v28 = vadd.f32 %v3805_v29, %v3710_v17  ;;  %v4063_v13 = vmax.f32 %v4006_v7, %v4038_v34  ;;  %v5165_v45 = vld [vmem:[#allocation5 + $0x12] sm:$0xf]  ;;  %v4211_v7 = vld [vmem:[#allocation5 + $0x41] sm:$0xf] }
 0x63d   :  { %4147 = vst [vmem:[#allocation1 + $0x21] ss:$2 sm:$0xff] %v4126_v24 }
 0x63e   :  { %v3925_v1 = vpop.f32.mrf.mxu1 }
 0x63f   :  { %v3953_v22 = vadd.f32 %v3925_v1, %v3831_v32  ;;  %v4239_v40 = vld.sshfl [vmem:[#allocation1 + $0x10] sm:$0xff pattern:$0x75316420]  ;;  %v3101_v32 = vadd.f32 %v11585_v60, %v11579_v14  ;;  %v3686_v1 = vpop.f32.mrf.mxu3  ;;  %v4471_v60 = vld [vmem:[#allocation5 + $0x1c] sm:$0xf] }
 0x640   :  { %4314 = vst [vmem:[#allocation1 + $0x10] ss:$2 sm:$0xff] %v4296_v26  ;;  %v4246_v54 = vpack.c.bf16 %v4239_v40, %v11716_v15  ;;  %v3711_v14 = vadd.f32 %v3686_v1, %v3589_v52 }
 0x641   :  { %v3969_v62 = vmax.f32 %v3953_v22, 0.0  ;;  %4316 = vst [vmem:[#allocation1 + $0x11] ss:$2 sm:$0xff] %v4297_v27  ;;  %v3223_v21 = vadd.f32 %v11587_v31, %v3101_v32  ;;  %v3566_v37 = vpop.f32.mrf.mxu2  ;;  %v5166_v27 = vld [vmem:[#allocation5 + $0x1a] sm:$0xf] }
 0x642   :  { %v11801_v4 = vld.sshfl [vmem:[#allocation1] sm:$0xff pattern:$0x75316420]  ;;  %8724 = vmatmul.msk.bf16.vlgmr.msrb.gmra.mxu3 %vm3977_vm3, %v4246_v54  ;;  %v3808_v47 = vpop.f32.mrf.mxu0  ;;  %v5252_v32 = vld [vmem:[#allocation5 + $0x13] sm:$0xf] }
 0x643   :  { %3986 = vst.msk [vmem:[#allocation4 + $0x40] sm:$0xff] %vm3977_vm3, %v3969_v62  ;;  %v4008_v49 = vld [vmem:[#allocation4 + $0x38] ss:$2 sm:$0xf]  ;;  %v3345_v26 = vadd.f32 %v11658_v33, %v3223_v21  ;;  %v3833_v31 = vadd.f32 %v3808_v47, %v3711_v14  ;;  %v4298_v14 = vld [vmem:[#allocation5 + $0x42] sm:$0xf] }
 0x644   :  { %4920 = vst [vmem:[#allocation1] ss:$2 sm:$0xff] %v4904_v35  ;;  %v4040_v39 = vld [vmem:[#allocation4 + $0x39] ss:$2 sm:$0xf] }
 0x645   :  { %4922 = vst [vmem:[#allocation1 + $0x1] ss:$2 sm:$0xff] %v4905_v12  ;;  %v4064_v63 = vmax.f32 %v4008_v49, %v4040_v39  ;;  %v5079_v35 = vld [vmem:[#allocation5 + $0x19] sm:$0xf]  ;;  %v4299_v47 = vld [vmem:[#allocation5 + $0x4a] sm:$0xf] }
 0x646   :  { %v3927_v10 = vpop.f32.mrf.mxu1  ;;  %v4558_v54 = vld [vmem:[#allocation5 + $0x18] sm:$0xf] }
 0x647   :  { %v3954_v11 = vadd.f32 %v3927_v10, %v3832_v28  ;;  %v4076_v42 = vmax.f32 %v4063_v13, %v4064_v63  ;;  %v3688_v10 = vpop.f32.mrf.mxu3  ;;  %v4559_v63 = vld [vmem:[#allocation5 + $0x20] sm:$0xf]  ;;  %v5253_v21 = vld [vmem:[#allocation5 + $0x1b] sm:$0xf] }
 0x648   :  { %v4326_v15 = vld.sshfl [vmem:[#allocation1 + $0x10] sm:$0xff pattern:$0x75316420] }
 0x649   :  { %4401 = vst [vmem:[#allocation1 + $0x10] ss:$2 sm:$0xff] %v4383_v8  ;;  %v3970_v2 = vmax.f32 %v3954_v11, 0.0  ;;  %v4333_v22 = vpack.c.bf16 %v4326_v15, %v11726_v6  ;;  %v3468_v6 = vadd.f32 %v11675_v56, %v3345_v26  ;;  %v11826_v11 = vld.sshfl [vmem:[#allocation1 + $0x20] sm:$0xff pattern:$0x75316420]  ;;  %v3569_v61 = vpop.f32.mrf.mxu2 }
 0x64a   :  { %4403 = vst [vmem:[#allocation1 + $0x11] ss:$2 sm:$0xff] %v4384_v38  ;;  %v4010_v17 = vld [vmem:[#allocation4 + $0x40] ss:$2 sm:$0xf]  ;;  %v3810_v15 = vpop.f32.mrf.mxu0  ;;  %v3103_v38 = vadd.f32 %v11603_v9, %v11601_v48 }
 0x64b   :  { %4112 = vst.msk [vmem:[#allocation5 + $0x2a] sm:$0xf] %vm4108_vm5, %v4076_v42  ;;  %8738 = vmatmul.msk.bf16.vlgmr.msra.gmra.mxu0 %vm3977_vm3, %v4333_v22  ;;  %v4042_v40 = vld [vmem:[#allocation4 + $0x41] ss:$2 sm:$0xf]  ;;  %v3590_v49 = vadd.f32 %v3566_v37, %v3468_v6 }
 0x64c   :  { %v11806_v46 = vld.sshfl [vmem:[#allocation1] sm:$0xff pattern:$0x75316420]  ;;  %3987 = vst.msk [vmem:[#allocation4 + $0x48] sm:$0xff] %vm3977_vm3, %v3970_v2  ;;  %v4065_v56 = vmax.f32 %v4010_v17, %v4042_v40  ;;  %v3225_v1 = vadd.f32 %v11605_v41, %v3103_v38  ;;  %v4646_v9 = vld [vmem:[#allocation5 + $0x21] sm:$0xf] }
 0x64d   :  { %5007 = vst [vmem:[#allocation1] ss:$2 sm:$0xff] %v4991_v50  ;;  %v3712_v50 = vadd.f32 %v3688_v10, %v3590_v49  ;;  %v4645_v22 = vld [vmem:[#allocation5 + $0x19] sm:$0xf]  ;;  %v4733_v10 = vld [vmem:[#allocation5 + $0x22] sm:$0xf] }
 0x64e   :  { %5009 = vst [vmem:[#allocation1 + $0x1] ss:$2 sm:$0xff] %v4992_v53  ;;  %v3930_v12 = vpop.f32.mrf.mxu1  ;;  %v4212_v53 = vld [vmem:[#allocation5 + $0x49] sm:$0xf]  ;;  %v3347_v26 = vadd.f32 %v11669_v20, %v3225_v1  ;;  %v4732_v49 = vld [vmem:[#allocation5 + $0x1a] sm:$0xf] }
 0x64f   :  { %v3955_v34 = vadd.f32 %v3930_v12, %v3833_v31  ;;  %4231 = vst [vmem:[#allocation1 + $0x20] ss:$2 sm:$0xff] %v4211_v7  ;;  %v3834_v24 = vadd.f32 %v3810_v15, %v3712_v50 }
 0x650   :  { %4233 = vst [vmem:[#allocation1 + $0x21] ss:$2 sm:$0xff] %v4212_v53  ;;  %v3470_v31 = vadd.f32 %v11706_v5, %v3347_v26  ;;  %v4385_v5 = vld [vmem:[#allocation5 + $0x43] sm:$0xf]  ;;  %v4906_v26 = vld [vmem:[#allocation5 + $0x1c] sm:$0xf] }
 0x651   :  { %v11817_v62 = vld.sshfl [vmem:[#allocation1 + $0x10] sm:$0xff pattern:$0x75316420]  ;;  %v3971_v42 = vmax.f32 %v3955_v34, 0.0 }
 0x652   :  { %4488 = vst [vmem:[#allocation1 + $0x10] ss:$2 sm:$0xff] %v4470_v23  ;;  %v3813_v6 = vpop.f32.mrf.mxu0 }
 0x653   :  { %4490 = vst [vmem:[#allocation1 + $0x11] ss:$2 sm:$0xff] %v4471_v60  ;;  %v4012_v29 = vld [vmem:[#allocation4 + $0x48] ss:$2 sm:$0xf] }
 0x654   :  { %v4044_v28 = vld [vmem:[#allocation4 + $0x49] ss:$2 sm:$0xf]  ;;  %3988 = vst.msk [vmem:[#allocation4 + $0x50] sm:$0xff] %vm3977_vm3, %v3971_v42 }
 0x655   :  { %v11813_v25 = vld.sshfl [vmem:[#allocation1] sm:$0xff pattern:$0x75316420]  ;;  %v4066_v13 = vmax.f32 %v4012_v29, %v4044_v28  ;;  %v4386_v28 = vld [vmem:[#allocation5 + $0x4b] sm:$0xf] }
 0x656   :  { %5094 = vst [vmem:[#allocation1] ss:$2 sm:$0xff] %v5078_v43  ;;  %v3932_v2 = vpop.f32.mrf.mxu1  ;;  %v3591_v43 = vadd.f32 %v3569_v61, %v11701_v18 }
 0x657   :  { %5096 = vst [vmem:[#allocation1 + $0x1] ss:$2 sm:$0xff] %v5079_v35  ;;  %v4077_v8 = vmax.f32 %v4065_v56, %v4066_v13  ;;  %v3956_v23 = vadd.f32 %v3932_v2, %v3834_v24  ;;  %v3691_v35 = vpop.f32.mrf.mxu3  ;;  %v11839_v41 = vld.sshfl [vmem:[#allocation1 + $0x20] sm:$0xff pattern:$0x75316420] }
 0x658   :  { %v3713_v37 = vadd.f32 %v3691_v35, %v3591_v43  ;;  %4318 = vst [vmem:[#allocation1 + $0x20] ss:$2 sm:$0xff] %v4298_v14  ;;  %v5427_v2 = vld [vmem:[#allocation5 + $0x18] sm:$0xf]  ;;  %v4472_v14 = vld [vmem:[#allocation5 + $0x44] sm:$0xf] }
 0x659   :  { %4113 = vst.msk [vmem:[#allocation5 + $0x52] sm:$0xf] %vm4108_vm5, %v4077_v8  ;;  %v3972_v18 = vmax.f32 %v3956_v23, 0.0  ;;  %v4819_v43 = vld [vmem:[#allocation5 + $0x1b] sm:$0xf] }
 0x65a   :  { %v11824_v33 = vld.sshfl [vmem:[#allocation1 + $0x10] sm:$0xff pattern:$0x75316420]  ;;  %4320 = vst [vmem:[#allocation1 + $0x21] ss:$2 sm:$0xff] %v4299_v47  ;;  %v3835_v40 = vadd.f32 %v3813_v6, %v3713_v37  ;;  %v3815_v53 = vpop.f32.mrf.mxu0 }
 0x65b   :  { %4576 = vst [vmem:[#allocation1 + $0x10] ss:$2 sm:$0xff] %v4558_v54  ;;  %v5340_v54 = vld [vmem:[#allocation5 + $0x1c] sm:$0xf] }
 0x65c   :  { %4578 = vst [vmem:[#allocation1 + $0x11] ss:$2 sm:$0xff] %v4559_v63  ;;  %v4014_v13 = vld [vmem:[#allocation4 + $0x50] ss:$2 sm:$0xf] }
 0x65d   :  { %3989 = vst.msk [vmem:[#allocation4 + $0x58] sm:$0xff] %vm3977_vm3, %v3972_v18  ;;  %v4046_v50 = vld [vmem:[#allocation4 + $0x51] ss:$2 sm:$0xf]  ;;  %v5514_v18 = vld [vmem:[#allocation5 + $0x19] sm:$0xf] }
 0x65e   :  { %v11822_v39 = vld.sshfl [vmem:[#allocation1] sm:$0xff pattern:$0x75316420]  ;;  %v3935_v20 = vpop.f32.mrf.mxu1  ;;  %v4067_v24 = vmax.f32 %v4014_v13, %v4046_v50  ;;  %v5602_v13 = vld [vmem:[#allocation5 + $0x22] sm:$0xf] }
 0x65f   :  { %5181 = vst [vmem:[#allocation1] ss:$2 sm:$0xff] %v5165_v45  ;;  %v3571_v45 = vpop.f32.mrf.mxu2  ;;  %v3957_v7 = vadd.f32 %v3935_v20, %v3835_v40  ;;  %v3693_v34 = vpop.f32.mrf.mxu3  ;;  %v4560_v40 = vld [vmem:[#allocation5 + $0x48] sm:$0xf] }
 0x660   :  { %5183 = vst [vmem:[#allocation1 + $0x1] ss:$2 sm:$0xff] %v5166_v27  ;;  %v4127_v60 = vld [vmem:[#allocation5 + $0x50] sm:$0xf]  ;;  %v3592_v12 = vadd.f32 %v3571_v45, %v3470_v31  ;;  %v5339_v27 = vld [vmem:[#allocation5 + $0x14] sm:$0xf] }
 0x661   :  { %4149 = vst [vmem:[#allocation1 + $0x30] ss:$2 sm:$0xff] %v4127_v60  ;;  %v11847_v56 = vld.sshfl [vmem:[#allocation1 + $0x20] sm:$0xff pattern:$0x75316420]  ;;  %v3973_v8 = vmax.f32 %v3957_v7, 0.0 }
 0x662   :  { %v3714_v63 = vadd.f32 %v3693_v34, %v3592_v12  ;;  %4405 = vst [vmem:[#allocation1 + $0x20] ss:$2 sm:$0xff] %v4385_v5  ;;  %v4473_v60 = vld [vmem:[#allocation5 + $0x4c] sm:$0xf]  ;;  %v4907_v45 = vld [vmem:[#allocation5 + $0x24] sm:$0xf]  ;;  %v3818_v50 = vpop.f32.mrf.mxu0 }
 0x663   :  { %v11836_v48 = vld.sshfl [vmem:[#allocation1 + $0x10] sm:$0xff pattern:$0x75316420]  ;;  %4407 = vst [vmem:[#allocation1 + $0x21] ss:$2 sm:$0xff] %v4386_v28 }
 0x664   :  { %4663 = vst [vmem:[#allocation1 + $0x10] ss:$2 sm:$0xff] %v4645_v22  ;;  %v4016_v42 = vld [vmem:[#allocation4 + $0x58] ss:$2 sm:$0xf]  ;;  %v3836_v61 = vadd.f32 %v3815_v53, %v3714_v63 }
 0x665   :  { %4665 = vst [vmem:[#allocation1 + $0x11] ss:$2 sm:$0xff] %v4646_v9  ;;  %v4048_v15 = vld [vmem:[#allocation4 + $0x59] ss:$2 sm:$0xf] }
 0x666   :  { %3990 = vst.msk [vmem:[#allocation4 + $0x60] sm:$0xff] %vm3977_vm3, %v3973_v8  ;;  %v3937_v1 = vpop.f32.mrf.mxu1  ;;  %v5428_v22 = vld [vmem:[#allocation5 + $0x20] sm:$0xf]  ;;  %v4994_v8 = vld [vmem:[#allocation5 + $0x28] sm:$0xf] }
 0x667   :  { %v11832_v52 = vld.sshfl [vmem:[#allocation1] sm:$0xff pattern:$0x75316420]  ;;  %v4820_v9 = vld [vmem:[#allocation5 + $0x23] sm:$0xf]  ;;  %v3574_v12 = vpop.f32.mrf.mxu2  ;;  %v3696_v34 = vpop.f32.mrf.mxu3 }
 0x668   :  { %5268 = vst [vmem:[#allocation1] ss:$2 sm:$0xff] %v5252_v32  ;;  %v4068_v32 = vmax.f32 %v4016_v42, %v4048_v15  ;;  %v5515_v31 = vld [vmem:[#allocation5 + $0x21] sm:$0xf]  ;;  %v3593_v20 = vadd.f32 %v3574_v12, %v11714_v44  ;;  %v4647_v53 = vld [vmem:[#allocation5 + $0x49] sm:$0xf] }
 0x669   :  { %5270 = vst [vmem:[#allocation1 + $0x1] ss:$2 sm:$0xff] %v5253_v21  ;;  %v3958_v21 = vadd.f32 %v3937_v1, %v3836_v61  ;;  %v4993_v63 = vld [vmem:[#allocation5 + $0x20] sm:$0xf] }
 0x66a   :  { %v4078_v35 = vmax.f32 %v4067_v24, %v4068_v32  ;;  %v11854_v37 = vld.sshfl [vmem:[#allocation1 + $0x20] sm:$0xff pattern:$0x75316420]  ;;  %v3715_v5 = vadd.f32 %v3696_v34, %v3593_v20  ;;  %v4648_v32 = vld [vmem:[#allocation5 + $0x51] sm:$0xf] }
 0x66b   :  { %v3974_v47 = vmax.f32 %v3958_v21, 0.0  ;;  %4492 = vst [vmem:[#allocation1 + $0x20] ss:$2 sm:$0xff] %v4472_v14  ;;  %v5080_v21 = vld [vmem:[#allocation5 + $0x21] sm:$0xf] }
 0x66c   :  { %v11845_v29 = vld.sshfl [vmem:[#allocation1 + $0x10] sm:$0xff pattern:$0x75316420]  ;;  %4114 = vst.msk [vmem:[#allocation5 + $0x5a] sm:$0xf] %vm4108_vm5, %v4078_v35  ;;  %v3837_v61 = vadd.f32 %v3818_v50, %v3715_v5 }
 0x66d   :  { %4750 = vst [vmem:[#allocation1 + $0x10] ss:$2 sm:$0xff] %v4732_v49  ;;  %v5081_v14 = vld [vmem:[#allocation5 + $0x29] sm:$0xf]  ;;  %v4300_v20 = vld [vmem:[#allocation5 + $0x52] sm:$0xf] }
 0x66e   :  { %4752 = vst [vmem:[#allocation1 + $0x11] ss:$2 sm:$0xff] %v4733_v10  ;;  %v5601_v10 = vld [vmem:[#allocation5 + $0x1a] sm:$0xf]  ;;  %v3940_v15 = vpop.f32.mrf.mxu1  ;;  %v4735_v34 = vld [vmem:[#allocation5 + $0x52] sm:$0xf] }
 0x66f   :  { %4494 = vst [vmem:[#allocation1 + $0x21] ss:$2 sm:$0xff] %v4473_v60  ;;  %v3959_v1 = vadd.f32 %v3940_v15, %v3837_v61  ;;  %v4734_v60 = vld [vmem:[#allocation5 + $0x4a] sm:$0xf]  ;;  %v5775_v5 = vld [vmem:[#allocation5 + $0x1c] sm:$0xf]  ;;  %v3576_v61 = vpop.f32.mrf.mxu2 }
 0x670   :  { %v11842_v17 = vld.sshfl [vmem:[#allocation1] sm:$0xff pattern:$0x75316420]  ;;  %3991 = vst.msk [vmem:[#allocation4 + $0x68] sm:$0xff] %vm3977_vm3, %v3974_v47 }
 0x671   :  { %5355 = vst [vmem:[#allocation1] ss:$2 sm:$0xff] %v5339_v27 }
 0x672   :  { %5357 = vst [vmem:[#allocation1 + $0x1] ss:$2 sm:$0xff] %v5340_v54  ;;  %v4561_v54 = vld [vmem:[#allocation5 + $0x50] sm:$0xf] }
 0x673   :  { %v4128_v49 = vld [vmem:[#allocation5 + $0x58] sm:$0xf] }
 0x674   :  { %4151 = vst [vmem:[#allocation1 + $0x31] ss:$2 sm:$0xff] %v4128_v49 }
 0x675   :  { %v11852_v23 = vld.sshfl [vmem:[#allocation1 + $0x10] sm:$0xff pattern:$0x75316420] }
 0x676   :  { %4837 = vst [vmem:[#allocation1 + $0x10] ss:$2 sm:$0xff] %v4819_v43  ;;  %v11863_v7 = vld.sshfl [vmem:[#allocation1 + $0x20] sm:$0xff pattern:$0x75316420] }
 0x677   :  { %4839 = vst [vmem:[#allocation1 + $0x11] ss:$2 sm:$0xff] %v4820_v9  ;;  %v4214_v43 = vld [vmem:[#allocation5 + $0x59] sm:$0xf]  ;;  %v5689_v9 = vld [vmem:[#allocation5 + $0x23] sm:$0xf] }
 0x678   :  { %4580 = vst [vmem:[#allocation1 + $0x20] ss:$2 sm:$0xff] %v4560_v40  ;;  %v4020_v47 = vld [vmem:[#allocation4 + $0x68] ss:$2 sm:$0xf] }
 0x679   :  { %v11850_v38 = vld.sshfl [vmem:[#allocation1] sm:$0xff pattern:$0x75316420]  ;;  %4582 = vst [vmem:[#allocation1 + $0x21] ss:$2 sm:$0xff] %v4561_v54 }
 0x67a   :  { %5443 = vst [vmem:[#allocation1] ss:$2 sm:$0xff] %v5427_v2  ;;  %v4213_v2 = vld [vmem:[#allocation5 + $0x51] sm:$0xf] }
 0x67b   :  { %5445 = vst [vmem:[#allocation1 + $0x1] ss:$2 sm:$0xff] %v5428_v22  ;;  %v11869_v44 = vld.sshfl [vmem:[#allocation1 + $0x30] sm:$0xff pattern:$0x75316420] }
 0x67c   :  { %4235 = vst [vmem:[#allocation1 + $0x30] ss:$2 sm:$0xff] %v4213_v2  ;;  %v5688_v22 = vld [vmem:[#allocation5 + $0x1b] sm:$0xf] }
 0x67d   :  { %4237 = vst [vmem:[#allocation1 + $0x31] ss:$2 sm:$0xff] %v4214_v43  ;;  %v4052_v12 = vld [vmem:[#allocation4 + $0x69] ss:$2 sm:$0xf] }
 0x67e   :  { %v11860_v27 = vld.sshfl [vmem:[#allocation1 + $0x10] sm:$0xff pattern:$0x75316420]  ;;  %v4050_v40 = vld [vmem:[#allocation4 + $0x61] ss:$2 sm:$0xf] }
 0x67f   :  { %4924 = vst [vmem:[#allocation1 + $0x10] ss:$2 sm:$0xff] %v4906_v26  ;;  %v3975_v26 = vmax.f32 %v3959_v1, 0.0  ;;  %v5168_v1 = vld [vmem:[#allocation5 + $0x2a] sm:$0xf] }
 0x680   :  { %4926 = vst [vmem:[#allocation1 + $0x11] ss:$2 sm:$0xff] %v4907_v45  ;;  %v11871_v24 = vld.sshfl [vmem:[#allocation1 + $0x20] sm:$0xff pattern:$0x75316420] }
 0x681   :  { %4667 = vst [vmem:[#allocation1 + $0x20] ss:$2 sm:$0xff] %v4647_v53  ;;  %v5776_v53 = vld [vmem:[#allocation5 + $0x24] sm:$0xf]  ;;  %v4821_v43 = vld [vmem:[#allocation5 + $0x4b] sm:$0xf] }
 0x682   :  { %v11858_v6 = vld.sshfl [vmem:[#allocation1] sm:$0xff pattern:$0x75316420]  ;;  %4669 = vst [vmem:[#allocation1 + $0x21] ss:$2 sm:$0xff] %v4648_v32 }
 0x683   :  { %5530 = vst [vmem:[#allocation1] ss:$2 sm:$0xff] %v5514_v18  ;;  %v3105_v18 = vadd.f32 %v11681_v16, %v11618_v57  ;;  %v9737_v16 = vld [vmem:[%s12835_s5 + $0x38] sm:$0xff] }
 0x684   :  { %5532 = vst [vmem:[#allocation1 + $0x1] ss:$2 sm:$0xff] %v5515_v31  ;;  %v4018_v31 = vld [vmem:[#allocation4 + $0x60] ss:$2 sm:$0xf]  ;;  %4451 = vmatpush.bf16.msra.mxu2 %v9737_v16 }
 0x685   :  { %3992 = vst.msk [vmem:[#allocation4 + $0x70] sm:$0xff] %vm3977_vm3, %v3975_v26  ;;  %v3227_v54 = vadd.f32 %v11699_v0, %v3105_v18  ;;  %v4241_v57 = vld.sshfl [vmem:[#allocation1 + $0x30] sm:$0xff pattern:$0x75316420]  ;;  %v4388_v26 = vld [vmem:[#allocation5 + $0x5b] sm:$0xf] }
 0x686   :  { %4322 = vst [vmem:[#allocation1 + $0x30] ss:$2 sm:$0xff] %v4300_v20  ;;  %v5255_v20 = vld [vmem:[#allocation5 + $0x2b] sm:$0xf] }
 0x687   :  { %v11867_v42 = vld.sshfl [vmem:[#allocation1 + $0x10] sm:$0xff pattern:$0x75316420]  ;;  %v3349_v0 = vadd.f32 %v11703_v58, %v3227_v54  ;;  %v3698_v58 = vpop.f32.mrf.mxu3  ;;  %v4247_v54 = vpack.c.bf16 %v4241_v57, %v11839_v41 }
 0x688   :  { %5011 = vst [vmem:[#allocation1 + $0x10] ss:$2 sm:$0xff] %v4993_v63  ;;  %v4301_v63 = vld [vmem:[#allocation5 + $0x5a] sm:$0xf]  ;;  %v9736_v57 = vld [vmem:[%s12835_s5 + $0x30] sm:$0xff] }
 0x689   :  { %5013 = vst [vmem:[#allocation1 + $0x11] ss:$2 sm:$0xff] %v4994_v8  ;;  %v11879_v49 = vld.sshfl [vmem:[#allocation1 + $0x20] sm:$0xff pattern:$0x75316420]  ;;  %v3472_v32 = vadd.f32 %v11720_v59, %v3349_v0  ;;  %8725 = vmatmul.msk.bf16.gmra.mxu3 %vm3977_vm3, %v4247_v54  ;;  %4452 = vmatpush.bf16.msra.mxu2 %v9736_v57 }
 0x68a   :  { %4754 = vst [vmem:[#allocation1 + $0x20] ss:$2 sm:$0xff] %v4734_v60  ;;  %v5167_v8 = vld [vmem:[#allocation5 + $0x22] sm:$0xf]  ;;  %v4822_v60 = vld [vmem:[#allocation5 + $0x53] sm:$0xf] }
 0x68b   :  { %v11865_v28 = vld.sshfl [vmem:[#allocation1] sm:$0xff pattern:$0x75316420]  ;;  %4756 = vst [vmem:[#allocation1 + $0x21] ss:$2 sm:$0xff] %v4735_v34 }
 0x68c   :  { %5617 = vst [vmem:[#allocation1] ss:$2 sm:$0xff] %v5601_v10  ;;  %v4070_v10 = vmax.f32 %v4020_v47, %v4052_v12  ;;  %v5863_v47 = vld [vmem:[#allocation5 + $0x20] sm:$0xf]  ;;  %v5864_v12 = vld [vmem:[#allocation5 + $0x28] sm:$0xf] }
 0x68d   :  { %5619 = vst [vmem:[#allocation1 + $0x1] ss:$2 sm:$0xff] %v5602_v13  ;;  %v4069_v13 = vmax.f32 %v4018_v31, %v4050_v40  ;;  %v4908_v34 = vld [vmem:[#allocation5 + $0x4c] sm:$0xf]  ;;  %v4909_v0 = vld [vmem:[#allocation5 + $0x54] sm:$0xf] }
 0x68e   :  { %4324 = vst [vmem:[#allocation1 + $0x31] ss:$2 sm:$0xff] %v4301_v63  ;;  %v11909_v63 = vld [vmem:[%s12835_s5 + $0xc8] sm:$0xff]  ;;  %v5430_v54 = vld [vmem:[#allocation5 + $0x30] sm:$0xf] }
 0x68f   :  { %v4079_v15 = vmax.f32 %v4069_v13, %v4070_v10  ;;  %v3942_v10 = vpop.f32.mrf.mxu1  ;;  %v4474_v13 = vld [vmem:[#allocation5 + $0x54] sm:$0xf]  ;;  %5235 = vmatpush.bf16.msra.mxu1 %v11909_v63 }
 0x690   :  { %v11877_v45 = vld.sshfl [vmem:[#allocation1 + $0x10] sm:$0xff pattern:$0x75316420] }
 0x691   :  { %5098 = vst [vmem:[#allocation1 + $0x10] ss:$2 sm:$0xff] %v5080_v21  ;;  %v3594_v21 = vadd.f32 %v3576_v61, %v3472_v32  ;;  %v5341_v61 = vld [vmem:[#allocation5 + $0x24] sm:$0xf] }
 0x692   :  { %5100 = vst [vmem:[#allocation1 + $0x11] ss:$2 sm:$0xff] %v5081_v14  ;;  %v4387_v14 = vld [vmem:[#allocation5 + $0x53] sm:$0xf] }
 0x693   :  { %4115 = vst.msk [vmem:[#allocation5 + $0x62] sm:$0xf] %vm4108_vm5, %v4079_v15  ;;  %v3716_v18 = vadd.f32 %v3698_v58, %v3594_v21  ;;  %v4475_v15 = vld [vmem:[#allocation5 + $0x5c] sm:$0xf]  ;;  %v4420_v21 = vpack.c.bf16 %v11817_v62, %v11743_v30  ;;  %v4562_v30 = vld [vmem:[#allocation5 + $0x58] sm:$0xf] }
 0x694   :  { %v11873_v35 = vld.sshfl [vmem:[#allocation1] sm:$0xff pattern:$0x75316420] }
 0x695   :  { %5704 = vst [vmem:[#allocation1] ss:$2 sm:$0xff] %v5688_v22  ;;  %v4161_v22 = vpack.c.bf16 %v11869_v44, %v11826_v11  ;;  %v4328_v59 = vld.sshfl [vmem:[#allocation1 + $0x30] sm:$0xff pattern:$0x75316420]  ;;  %v3820_v11 = vpop.f32.mrf.mxu0 }
 0x696   :  { %5706 = vst [vmem:[#allocation1 + $0x1] ss:$2 sm:$0xff] %v5689_v9  ;;  %v11894_v9 = vld.sshfl [vmem:[#allocation1 + $0x20] sm:$0xff pattern:$0x75316420]  ;;  %v3838_v16 = vadd.f32 %v3820_v11, %v3716_v18 }
 0x697   :  { %8711 = vmatmul.msk.bf16.gmra.mxu2 %vm3977_vm3, %v4161_v22  ;;  %4841 = vst [vmem:[#allocation1 + $0x20] ss:$2 sm:$0xff] %v4821_v43  ;;  %v5254_v44 = vld [vmem:[#allocation5 + $0x23] sm:$0xf]  ;;  %v4334_v22 = vpack.c.bf16 %v4328_v59, %v11847_v56  ;;  %v4995_v56 = vld [vmem:[#allocation5 + $0x50] sm:$0xf] }
 0x698   :  { %4843 = vst [vmem:[#allocation1 + $0x21] ss:$2 sm:$0xff] %v4822_v60  ;;  %v5342_v60 = vld [vmem:[#allocation5 + $0x2c] sm:$0xf]  ;;  %v4996_v62 = vld [vmem:[#allocation5 + $0x58] sm:$0xf] }
 0x699   :  { %v11889_v2 = vld.sshfl [vmem:[#allocation1 + $0x10] sm:$0xff pattern:$0x75316420]  ;;  %4409 = vst [vmem:[#allocation1 + $0x30] ss:$2 sm:$0xff] %v4387_v14  ;;  %v9739_v14 = vld [vmem:[%s12835_s5 + $0x48] sm:$0xff]  ;;  %8739 = vmatmul.msk.bf16.gmra.mxu0 %vm3977_vm3, %v4334_v22 }
 0x69a   :  { %5185 = vst [vmem:[#allocation1 + $0x10] ss:$2 sm:$0xff] %v5167_v8  ;;  %v3960_v8 = vadd.f32 %v3942_v10, %v3838_v16  ;;  %4538 = vmatpush.bf16.msra.mxu3 %v9739_v14  ;;  %v6037_v18 = vld [vmem:[#allocation5 + $0x22] sm:$0xf]  ;;  %v9741_v16 = vld [vmem:[%s12835_s5 + $0x58] sm:$0xff] }
 0x69b   :  { %5187 = vst [vmem:[#allocation1 + $0x11] ss:$2 sm:$0xff] %v5168_v1  ;;  %v5951_v1 = vld [vmem:[#allocation5 + $0x29] sm:$0xf]  ;;  %v4563_v11 = vld [vmem:[#allocation5 + $0x60] sm:$0xf]  ;;  %4626 = vmatpush.bf16.msrb.mxu0 %v9741_v16 }
 0x69c   :  { %4411 = vst [vmem:[#allocation1 + $0x31] ss:$2 sm:$0xff] %v4388_v26  ;;  %v3976_v43 = vmax.f32 %v3960_v8, 0.0  ;;  %v9738_v26 = vld [vmem:[%s12835_s5 + $0x40] sm:$0xff]  ;;  %v4650_v14 = vld [vmem:[#allocation5 + $0x61] sm:$0xf] }
 0x69d   :  { %v11886_v50 = vld.sshfl [vmem:[#allocation1] sm:$0xff pattern:$0x75316420]  ;;  %v4054_v8 = vld [vmem:[#allocation4 + $0x71] ss:$2 sm:$0xf] }
 0x69e   :  { %5791 = vst [vmem:[#allocation1] ss:$2 sm:$0xff] %v5775_v5  ;;  %4539 = vmatpush.bf16.msra.mxu3 %v9738_v26  ;;  %v9743_v16 = vld [vmem:[%s12835_s5 + $0x68] sm:$0xff] }
 0x69f   :  { %5793 = vst [vmem:[#allocation1 + $0x1] ss:$2 sm:$0xff] %v5776_v53  ;;  %v11904_v5 = vld.sshfl [vmem:[#allocation1 + $0x20] sm:$0xff pattern:$0x75316420]  ;;  %4713 = vmatpush.bf16.msrb.mxu2 %v9743_v16 }
 0x6a0   :  { %4928 = vst [vmem:[#allocation1 + $0x20] ss:$2 sm:$0xff] %v4908_v34  ;;  %v5950_v53 = vld [vmem:[#allocation5 + $0x21] sm:$0xf]  ;;  %v4507_v34 = vpack.c.bf16 %v11824_v33, %v11760_v3  ;;  %v9740_v3 = vld [vmem:[%s12835_s5 + $0x50] sm:$0xff]  ;;  %v11955_v33 = vld [vmem:[%s12835_s5 + $0xc0] sm:$0xff] }
 0x6a1   :  { %4930 = vst [vmem:[#allocation1 + $0x21] ss:$2 sm:$0xff] %v4909_v0  ;;  %v4022_v0 = vld [vmem:[#allocation4 + $0x70] ss:$2 sm:$0xf]  ;;  %5236 = vmatpush.bf16.msra.mxu1 %v11955_v33  ;;  %4627 = vmatpush.bf16.msrb.mxu0 %v9740_v3 }
 0x6a2   :  { %v11900_v40 = vld.sshfl [vmem:[#allocation1 + $0x10] sm:$0xff pattern:$0x75316420]  ;;  %3993 = vst.msk [vmem:[#allocation4 + $0x78] sm:$0xff] %vm3977_vm3, %v3976_v43  ;;  %8766 = vmatmul.msk.bf16.vlgmr.msra.gmra.mxu3 %vm3977_vm3, %v4507_v34  ;;  %v4737_v34 = vld [vmem:[#allocation5 + $0x62] sm:$0xf] }
 0x6a3   :  { %5272 = vst [vmem:[#allocation1 + $0x10] ss:$2 sm:$0xff] %v5254_v44  ;;  %v11911_v41 = vld.sshfl [vmem:[#allocation1 + $0x30] sm:$0xff pattern:$0x75316420] }
 0x6a4   :  { %5274 = vst [vmem:[#allocation1 + $0x11] ss:$2 sm:$0xff] %v5255_v20  ;;  %v5429_v44 = vld [vmem:[#allocation5 + $0x28] sm:$0xf] }
 0x6a5   :  { %4496 = vst [vmem:[#allocation1 + $0x30] ss:$2 sm:$0xff] %v4474_v13  ;;  %v6038_v20 = vld [vmem:[#allocation5 + $0x2a] sm:$0xf]  ;;  %v5082_v13 = vld [vmem:[#allocation5 + $0x51] sm:$0xf] }
 0x6a6   :  { %v11898_v31 = vld.sshfl [vmem:[#allocation1] sm:$0xff pattern:$0x75316420]  ;;  %4498 = vst [vmem:[#allocation1 + $0x31] ss:$2 sm:$0xff] %v4475_v15 }
 0x6a7   :  { %5879 = vst [vmem:[#allocation1] ss:$2 sm:$0xff] %v5863_v47  ;;  %8752 = vmatmul.msk.bf16.vlgmr.msra.gmra.mxu2 %vm3977_vm3, %v4420_v21  ;;  %v6124_v21 = vld [vmem:[#allocation5 + $0x23] sm:$0xf] }
 0x6a8   :  { %5881 = vst [vmem:[#allocation1 + $0x1] ss:$2 sm:$0xff] %v5864_v12  ;;  %v11929_v47 = vld.sshfl [vmem:[#allocation1 + $0x20] sm:$0xff pattern:$0x75316420] }
 0x6a9   :  { %5015 = vst [vmem:[#allocation1 + $0x20] ss:$2 sm:$0xff] %v4995_v56  ;;  %v4024_v57 = vld [vmem:[#allocation4 + $0x78] ss:$2 sm:$0xf]  ;;  %v4421_v56 = vpack.c.bf16 %v11911_v41, %v11854_v37 }
 0x6aa   :  { %5017 = vst [vmem:[#allocation1 + $0x21] ss:$2 sm:$0xff] %v4996_v62  ;;  %v5516_v62 = vld [vmem:[#allocation5 + $0x29] sm:$0xf] }
 0x6ab   :  { %v11922_v58 = vld.sshfl [vmem:[#allocation1 + $0x10] sm:$0xff pattern:$0x75316420] }
 0x6ac   :  { %5359 = vst [vmem:[#allocation1 + $0x10] ss:$2 sm:$0xff] %v5341_v61  ;;  %v4649_v61 = vld [vmem:[#allocation5 + $0x59] sm:$0xf] }
 0x6ad   :  { %5361 = vst [vmem:[#allocation1 + $0x11] ss:$2 sm:$0xff] %v5342_v60  ;;  %v11932_v59 = vld.sshfl [vmem:[#allocation1 + $0x30] sm:$0xff pattern:$0x75316420]  ;;  %v4071_v60 = vmax.f32 %v4022_v0, %v4054_v8 }
 0x6ae   :  { %4584 = vst [vmem:[#allocation1 + $0x30] ss:$2 sm:$0xff] %v4562_v30  ;;  %v5204_v30 = vpack.c.bf16 %v11900_v40, %v11832_v52  ;;  %v5169_v52 = vld [vmem:[#allocation5 + $0x52] sm:$0xf]  ;;  %v6211_v40 = vld [vmem:[#allocation5 + $0x24] sm:$0xf] }
 0x6af   :  { %v11917_v32 = vld.sshfl [vmem:[#allocation1] sm:$0xff pattern:$0x75316420]  ;;  %4586 = vst [vmem:[#allocation1 + $0x31] ss:$2 sm:$0xff] %v4563_v11 }
 0x6b0   :  { %5966 = vst [vmem:[#allocation1] ss:$2 sm:$0xff] %v5950_v53  ;;  %v4056_v53 = vld [vmem:[#allocation4 + $0x79] ss:$2 sm:$0xf]  ;;  %8878 = vmatmul.msk.bf16.vlgmr.msra.gmra.mxu1 %vm3977_vm3, %v5204_v30  ;;  %v4682_v30 = vpack.c.bf16 %v11845_v29, %v11780_v55 }
 0x6b1   :  { %5968 = vst [vmem:[#allocation1 + $0x1] ss:$2 sm:$0xff] %v5951_v1  ;;  %v11947_v15 = vld.sshfl [vmem:[#allocation1 + $0x20] sm:$0xff pattern:$0x75316420]  ;;  %v4072_v43 = vmax.f32 %v4024_v57, %v4056_v53 }
 0x6b2   :  { %v5083_v1 = vld [vmem:[#allocation5 + $0x59] sm:$0xf]  ;;  %5102 = vst [vmem:[#allocation1 + $0x20] ss:$2 sm:$0xff] %v5082_v13  ;;  %v5517_v11 = vld [vmem:[#allocation5 + $0x31] sm:$0xf]  ;;  %v4508_v13 = vpack.c.bf16 %v11932_v59, %v11863_v7 }
 0x6b3   :  { %5104 = vst [vmem:[#allocation1 + $0x21] ss:$2 sm:$0xff] %v5083_v1  ;;  %v5603_v0 = vld [vmem:[#allocation5 + $0x2a] sm:$0xf]  ;;  %v5604_v57 = vld [vmem:[#allocation5 + $0x32] sm:$0xf] }
 0x6b4   :  { %v11941_v10 = vld.sshfl [vmem:[#allocation1 + $0x10] sm:$0xff pattern:$0x75316420]  ;;  %8767 = vmatmul.msk.bf16.gmra.mxu3 %vm3977_vm3, %v4508_v13  ;;  %v9742_v7 = vld [vmem:[%s12835_s5 + $0x60] sm:$0xff] }
 0x6b5   :  { %5447 = vst [vmem:[#allocation1 + $0x10] ss:$2 sm:$0xff] %v5429_v44  ;;  %v6125_v44 = vld [vmem:[#allocation5 + $0x2b] sm:$0xf]  ;;  %v4823_v59 = vld [vmem:[#allocation5 + $0x5b] sm:$0xf]  ;;  %4714 = vmatpush.bf16.msrb.mxu2 %v9742_v7 }
 0x6b6   :  { %5449 = vst [vmem:[#allocation1 + $0x11] ss:$2 sm:$0xff] %v5430_v54  ;;  %v11957_v22 = vld.sshfl [vmem:[#allocation1 + $0x30] sm:$0xff pattern:$0x75316420]  ;;  %v4080_v54 = vmax.f32 %v4071_v60, %v4072_v43 }
 0x6b7   :  { %4671 = vst [vmem:[#allocation1 + $0x30] ss:$2 sm:$0xff] %v4649_v61  ;;  %8753 = vmatmul.msk.bf16.gmra.mxu2 %vm3977_vm3, %v4421_v56  ;;  %v6212_v53 = vld [vmem:[#allocation5 + $0x2c] sm:$0xf]  ;;  %v5256_v61 = vld [vmem:[#allocation5 + $0x53] sm:$0xf]  ;;  %v4596_v60 = vpack.c.bf16 %v11957_v22, %v11871_v24 }
 0x6b8   :  { %v11937_v12 = vld.sshfl [vmem:[#allocation1] sm:$0xff pattern:$0x75316420]  ;;  %4673 = vst [vmem:[#allocation1 + $0x31] ss:$2 sm:$0xff] %v4650_v14  ;;  %v9745_v14 = vld [vmem:[%s12835_s5 + $0x78] sm:$0xff] }
 0x6b9   :  { %6053 = vst [vmem:[#allocation1] ss:$2 sm:$0xff] %v6037_v18  ;;  %v4595_v18 = vpack.c.bf16 %v11836_v48, %v11775_v36  ;;  %v4736_v36 = vld [vmem:[#allocation5 + $0x5a] sm:$0xf]  ;;  %v4824_v56 = vld [vmem:[#allocation5 + $0x63] sm:$0xf]  ;;  %4800 = vmatpush.bf16.msrb.mxu3 %v9745_v14 }
 0x6ba   :  { %6055 = vst [vmem:[#allocation1 + $0x1] ss:$2 sm:$0xff] %v6038_v20  ;;  %v11973_v37 = vld.sshfl [vmem:[#allocation1 + $0x20] sm:$0xff pattern:$0x75316420] }
 0x6bb   :  { %8780 = vmatmul.msk.bf16.vlgmr.msrb.gmra.mxu0 %vm3977_vm3, %v4595_v18  ;;  %4116 = vst.msk [vmem:[#allocation5 + $0x6a] sm:$0xf] %vm4108_vm5, %v4080_v54  ;;  %v5170_v48 = vld [vmem:[#allocation5 + $0x5a] sm:$0xf]  ;;  %v5343_v24 = vld [vmem:[#allocation5 + $0x54] sm:$0xf]  ;;  %v4769_v54 = vpack.c.bf16 %v11852_v23, %v11787_v51 }
 0x6bc   :  { %5189 = vst [vmem:[#allocation1 + $0x20] ss:$2 sm:$0xff] %v5169_v52  ;;  %v5257_v43 = vld [vmem:[#allocation5 + $0x5b] sm:$0xf]  ;;  %v5777_v13 = vld [vmem:[#allocation5 + $0x2c] sm:$0xf] }
 0x6bd   :  { %v11970_v20 = vld.sshfl [vmem:[#allocation1 + $0x10] sm:$0xff pattern:$0x75316420]  ;;  %5191 = vst [vmem:[#allocation1 + $0x21] ss:$2 sm:$0xff] %v5170_v48  ;;  %v9746_v51 = vld [vmem:[%s12835_s5 + $0x80] sm:$0xff] }
 0x6be   :  { %5534 = vst [vmem:[#allocation1 + $0x10] ss:$2 sm:$0xff] %v5516_v62  ;;  %v5691_v62 = vld [vmem:[#allocation5 + $0x33] sm:$0xf]  ;;  %v4910_v55 = vld [vmem:[#allocation5 + $0x5c] sm:$0xf] }
 0x6bf   :  { %5536 = vst [vmem:[#allocation1 + $0x11] ss:$2 sm:$0xff] %v5517_v11  ;;  %v11976_v41 = vld.sshfl [vmem:[#allocation1 + $0x30] sm:$0xff pattern:$0x75316420]  ;;  %v9762_v23 = vld [vmem:[%s12835_s5 + $0x100] sm:$0xff] }
 0x6c0   :  { %4758 = vst [vmem:[#allocation1 + $0x30] ss:$2 sm:$0xff] %v4736_v36  ;;  %v5690_v11 = vld [vmem:[#allocation5 + $0x2b] sm:$0xf]  ;;  %v5344_v29 = vld [vmem:[#allocation5 + $0x5c] sm:$0xf] }
 0x6c1   :  { %v11964_v26 = vld.sshfl [vmem:[#allocation1] sm:$0xff pattern:$0x75316420]  ;;  %4760 = vst [vmem:[#allocation1 + $0x31] ss:$2 sm:$0xff] %v4737_v34  ;;  %v9747_v36 = vld [vmem:[%s12835_s5 + $0x88] sm:$0xff] }
 0x6c2   :  { %6140 = vst [vmem:[#allocation1] ss:$2 sm:$0xff] %v6124_v21  ;;  %v4911_v48 = vld [vmem:[#allocation5 + $0x64] sm:$0xf]  ;;  %4887 = vmatpush.bf16.msra.mxu0 %v9747_v36  ;;  %v5778_v34 = vld [vmem:[#allocation5 + $0x34] sm:$0xf] }
 0x6c3   :  { %6142 = vst [vmem:[#allocation1 + $0x1] ss:$2 sm:$0xff] %v6125_v44  ;;  %v9744_v44 = vld [vmem:[%s12835_s5 + $0x70] sm:$0xff]  ;;  %v4997_v7 = vld [vmem:[#allocation5 + $0x60] sm:$0xf] }
 0x6c4   :  { %v11988_v1 = vld.sshfl [vmem:[#allocation1 + $0x20] sm:$0xff pattern:$0x75316420]  ;;  %4801 = vmatpush.bf16.msrb.mxu3 %v9744_v44  ;;  %v5519_v44 = vld [vmem:[#allocation5 + $0x61] sm:$0xf] }
 0x6c5   :  { %5276 = vst [vmem:[#allocation1 + $0x20] ss:$2 sm:$0xff] %v5256_v61  ;;  %v4856_v61 = vpack.c.bf16 %v11860_v27, %v11801_v4  ;;  %v5866_v4 = vld [vmem:[#allocation5 + $0x38] sm:$0xf] }
 0x6c6   :  { %v11986_v3 = vld.sshfl [vmem:[#allocation1 + $0x10] sm:$0xff pattern:$0x75316420]  ;;  %5278 = vst [vmem:[#allocation1 + $0x21] ss:$2 sm:$0xff] %v5257_v43  ;;  %4888 = vmatpush.bf16.msra.mxu0 %v9746_v51  ;;  %v4683_v43 = vpack.c.bf16 %v11976_v41, %v11879_v49  ;;  %v9749_v41 = vld [vmem:[%s12835_s5 + $0x98] sm:$0xff] }
 0x6c7   :  { %5621 = vst [vmem:[#allocation1 + $0x10] ss:$2 sm:$0xff] %v5603_v0  ;;  %8794 = vmatmul.msk.bf16.vlgmr.msrb.gmra.mxu2 %vm3977_vm3, %v4682_v30  ;;  %8808 = vmatmul.msk.bf16.vlgmr.msrb.gmra.mxu3 %vm3977_vm3, %v4769_v54  ;;  %v5553_v0 = vpack.c.bf16 %v11986_v3, %v11865_v28  ;;  %v4998_v28 = vld [vmem:[#allocation5 + $0x68] sm:$0xf]  ;;  %v5865_v3 = vld [vmem:[#allocation5 + $0x30] sm:$0xf] }
 0x6c8   :  { %5623 = vst [vmem:[#allocation1 + $0x11] ss:$2 sm:$0xff] %v5604_v57  ;;  %v11993_v21 = vld.sshfl [vmem:[#allocation1 + $0x30] sm:$0xff pattern:$0x75316420]  ;;  %4974 = vmatpush.bf16.msra.mxu2 %v9749_v41 }
 0x6c9   :  { %4845 = vst [vmem:[#allocation1 + $0x30] ss:$2 sm:$0xff] %v4823_v59  ;;  %v5432_v59 = vld [vmem:[#allocation5 + $0x60] sm:$0xf]  ;;  %v12048_v49 = vld [vmem:[%s12836_s6] ss:$0 sm:$0xff] }
 0x6ca   :  { %v11983_v8 = vld.sshfl [vmem:[#allocation1] sm:$0xff pattern:$0x75316420]  ;;  %4847 = vst [vmem:[#allocation1 + $0x31] ss:$2 sm:$0xff] %v4824_v56  ;;  %v4770_v56 = vpack.c.bf16 %v11993_v21, %v11894_v9  ;;  %v9748_v9 = vld [vmem:[%s12835_s5 + $0x90] sm:$0xff]  ;;  %v4280_v21 = vpop.f32.mrf.mxu3 }
 0x6cb   :  { %6227 = vst [vmem:[#allocation1] ss:$2 sm:$0xff] %v6211_v40  ;;  %8781 = vmatmul.msk.bf16.gmra.mxu0 %vm3977_vm3, %v4596_v60  ;;  %v9763_v40 = vld [vmem:[%s12835_s5 + $0x108] sm:$0xff]  ;;  %v4193_v60 = vpop.f32.mrf.mxu2  ;;  %v5518_v30 = vld [vmem:[#allocation5 + $0x59] sm:$0xf]  ;;  %s9958_s6 = smov [#allocation9]  }
 0x6cc   :  { %6229 = vst [vmem:[#allocation1 + $0x1] ss:$2 sm:$0xff] %v6212_v53  ;;  %5584 = vmatpush.bf16.msrb.mxu1 %v9763_v40  ;;  %v5431_v53 = vld [vmem:[#allocation5 + $0x58] sm:$0xf]  ;;  %v5952_v54 = vld [vmem:[#allocation5 + $0x31] sm:$0xf]  ;;  %4975 = vmatpush.bf16.msra.mxu2 %v9748_v9  ;;  %v4367_v40 = vpop.f32.mrf.mxu0 }
 0x6cd   :  { %v12009_v22 = vld.sshfl [vmem:[#allocation1 + $0x20] sm:$0xff pattern:$0x75316420]  ;;  %v9759_v9 = vld [vmem:[%s12835_s5 + $0xe8] sm:$0xff]  ;;  %s8183_s3 = sshll.u32 %s9958_s6, 4  ;;  %s8184_s3 = int_to_ptr.vmem [resolvable:$true] %s8183_s3 }
 0x6ce   :  { %5363 = vst [vmem:[#allocation1 + $0x20] ss:$2 sm:$0xff] %v5343_v24 }
 0x6cf   :  { %v12004_v18 = vld.sshfl [vmem:[#allocation1 + $0x10] sm:$0xff pattern:$0x75316420]  ;;  %5365 = vst [vmem:[#allocation1 + $0x21] ss:$2 sm:$0xff] %v5344_v29 }
 0x6d0   :  { %5708 = vst [vmem:[#allocation1 + $0x10] ss:$2 sm:$0xff] %v5690_v11  ;;  %5585 = vmatpush.bf16.msrb.mxu1 %v9762_v23  ;;  %v5084_v11 = vld [vmem:[#allocation5 + $0x61] sm:$0xf]  ;;  %v5085_v29 = vld [vmem:[#allocation5 + $0x69] sm:$0xf]  ;;  %9880 = vmatpush.bf16.msrb.mxu2 %v11909_v63 }
 0x6d1   :  { %5710 = vst [vmem:[#allocation1 + $0x11] ss:$2 sm:$0xff] %v5691_v62  ;;  %v12013_v52 = vld.sshfl [vmem:[#allocation1 + $0x30] sm:$0xff pattern:$0x75316420]  ;;  %v9751_v23 = vld [vmem:[%s12835_s5 + $0xa8] sm:$0xff] }
 0x6d2   :  { %4932 = vst [vmem:[#allocation1 + $0x30] ss:$2 sm:$0xff] %v4910_v55  ;;  %v4203_v55 = vadd.f32 %v12048_v49, %v4193_v60  ;;  %5061 = vmatpush.bf16.msra.mxu3 %v9751_v23  ;;  %v6397_v23 = vld [vmem:[#allocation7 + $0x38] sm:$0x3] }
 0x6d3   :  { %4934 = vst [vmem:[#allocation1 + $0x31] ss:$2 sm:$0xff] %v4911_v48  ;;  %8934 = vmatmul.msk.bf16.vlgmr.msrb.gmra.mxu1 %vm3977_vm3, %v5553_v0  ;;  %v5953_v48 = vld [vmem:[#allocation5 + $0x39] sm:$0xf]  ;;  %v4943_v0 = vpack.c.bf16 %v11867_v42, %v11806_v46  ;;  %v6039_v46 = vld [vmem:[#allocation5 + $0x32] sm:$0xf] }
 0x6d4   :  { %v4290_v36 = vadd.f32 %v4280_v21, %v4203_v55  ;;  %9881 = vmatpush.bf16.msrb.mxu2 %v11955_v33  ;;  %v6040_v42 = vld [vmem:[#allocation5 + $0x3a] sm:$0xf]  ;;  %v9753_v33 = vld [vmem:[%s12835_s5 + $0xb8] sm:$0xff] }
 0x6d5   :  { %5148 = vmatpush.bf16.msrb.mxu0 %v9753_v33  ;;  %v5692_v55 = vld [vmem:[#allocation5 + $0x5b] sm:$0xf] }
 0x6d6   :  { %v12032_v57 = vld.sshfl [vmem:[#allocation1 + $0x20] sm:$0xff pattern:$0x75316420]  ;;  %v12066_v51 = vadd.f32 %v4367_v40, %v4290_v36  ;;  %v6395_v36 = vld [vmem:[#allocation7 + $0x8] sm:$0x3] }
 0x6d7   :  { %5451 = vst [vmem:[#allocation1 + $0x20] ss:$2 sm:$0xff] %v5431_v53  ;;  %8795 = vmatmul.msk.bf16.gmra.mxu2 %vm3977_vm3, %v4683_v43  ;;  %8809 = vmatmul.msk.bf16.gmra.mxu3 %vm3977_vm3, %v4770_v56  ;;  %v5605_v53 = vld [vmem:[#allocation5 + $0x5a] sm:$0xf]  ;;  %v5172_v43 = vld [vmem:[#allocation5 + $0x6a] sm:$0xf] }
 0x6d8   :  { %v12028_v16 = vld.sshfl [vmem:[#allocation1 + $0x10] sm:$0xff pattern:$0x75316420]  ;;  %5453 = vst [vmem:[#allocation1 + $0x21] ss:$2 sm:$0xff] %v5432_v59 }
 0x6d9   :  { %5795 = vst [vmem:[#allocation1 + $0x10] ss:$2 sm:$0xff] %v5777_v13  ;;  %v4857_v13 = vpack.c.bf16 %v12013_v52, %v11904_v5  ;;  %v9750_v5 = vld [vmem:[%s12835_s5 + $0xa0] sm:$0xff]  ;;  %v5030_v52 = vpack.c.bf16 %v11877_v45, %v11813_v25  ;;  %v9752_v59 = vld [vmem:[%s12835_s5 + $0xb0] sm:$0xff]  ;;  %v5171_v25 = vld [vmem:[#allocation5 + $0x62] sm:$0xf] }
 0x6da   :  { %5797 = vst [vmem:[#allocation1 + $0x11] ss:$2 sm:$0xff] %v5778_v34  ;;  %v12038_v14 = vld.sshfl [vmem:[#allocation1 + $0x30] sm:$0xff pattern:$0x75316420]  ;;  %5062 = vmatpush.bf16.msra.mxu3 %v9750_v5  ;;  %5149 = vmatpush.bf16.msrb.mxu0 %v9752_v59  ;;  %v9761_v5 = vld [vmem:[%s12835_s5 + $0xf8] sm:$0xff]  ;;  %v12153_v59 = vpop.f32.mrf.mxu2 }
 0x6db   :  { %8822 = vmatmul.msk.bf16.vlgmr.msra.gmra.mxu0 %vm3977_vm3, %v4856_v61  ;;  %5019 = vst [vmem:[#allocation1 + $0x30] ss:$2 sm:$0xff] %v4997_v7  ;;  %v6126_v45 = vld [vmem:[#allocation5 + $0x33] sm:$0xf]  ;;  %v4944_v60 = vpack.c.bf16 %v12038_v14, %v11929_v47  ;;  %v5258_v56 = vld [vmem:[#allocation5 + $0x63] sm:$0xf] }
 0x6dc   :  { %5021 = vst [vmem:[#allocation1 + $0x31] ss:$2 sm:$0xff] %v4998_v28  ;;  %v6127_v28 = vld [vmem:[#allocation5 + $0x3b] sm:$0xf]  ;;  %v5259_v14 = vld [vmem:[#allocation5 + $0x6b] sm:$0xf] }
 0x6dd   :  { %v6396_v40 = vld [vmem:[#allocation7 + $0x30] sm:$0x3] }
 0x6de   :  { %5409 = vmatpush.bf16.msrb.mxu3 %v9759_v9  ;;  %5497 = vmatpush.bf16.msra.mxu0 %v9761_v5  ;;  %v9764_v9 = vld [vmem:[%s12835_s5 + $0x110] sm:$0xff] }
 0x6df   :  { %v12055_v62 = vld.sshfl [vmem:[#allocation1 + $0x20] sm:$0xff pattern:$0x75316420] }
 0x6e0   :  { %5538 = vst [vmem:[#allocation1 + $0x20] ss:$2 sm:$0xff] %v5518_v30 }
 0x6e1   :  { %v12043_v27 = vld.sshfl [vmem:[#allocation1 + $0x10] sm:$0xff pattern:$0x75316420]  ;;  %5540 = vst [vmem:[#allocation1 + $0x21] ss:$2 sm:$0xff] %v5519_v44 }
 0x6e2   :  { %5883 = vst [vmem:[#allocation1 + $0x10] ss:$2 sm:$0xff] %v5865_v3  ;;  %v5606_v3 = vld [vmem:[#allocation5 + $0x62] sm:$0xf] }
 0x6e3   :  { %5885 = vst [vmem:[#allocation1 + $0x11] ss:$2 sm:$0xff] %v5866_v4  ;;  %v12058_v24 = vld.sshfl [vmem:[#allocation1 + $0x30] sm:$0xff pattern:$0x75316420]  ;;  %v5117_v4 = vpack.c.bf16 %v11889_v2, %v11822_v39 }
 0x6e4   :  { %5106 = vst [vmem:[#allocation1 + $0x30] ss:$2 sm:$0xff] %v5084_v11  ;;  %v6213_v11 = vld [vmem:[#allocation5 + $0x34] sm:$0xf]  ;;  %v5031_v44 = vpack.c.bf16 %v12058_v24, %v11947_v15  ;;  %v6214_v39 = vld [vmem:[#allocation5 + $0x3c] sm:$0xf] }
 0x6e5   :  { %5108 = vst [vmem:[#allocation1 + $0x31] ss:$2 sm:$0xff] %v5085_v29  ;;  %v5693_v29 = vld [vmem:[#allocation5 + $0x63] sm:$0xf]  ;;  %v6394_v24 = vld [vmem:[#allocation7] sm:$0x3] }
 0x6e7   :  { %8836 = vmatmul.msk.bf16.vlgmr.msra.gmra.mxu2 %vm3977_vm3, %v4943_v0  ;;  %8850 = vmatmul.msk.bf16.vlgmr.msra.gmra.mxu3 %vm3977_vm3, %v5030_v52  ;;  %v5345_v0 = vld [vmem:[#allocation5 + $0x64] sm:$0xf] }
 0x6e8   :  { %v12077_v61 = vld.sshfl [vmem:[#allocation1 + $0x20] sm:$0xff pattern:$0x75316420]  ;;  %v5780_v52 = vld [vmem:[#allocation5 + $0x64] sm:$0xf] }
 0x6e9   :  { %5625 = vst [vmem:[#allocation1 + $0x20] ss:$2 sm:$0xff] %v5605_v53  ;;  %v5346_v53 = vld [vmem:[#allocation5 + $0x6c] sm:$0xf] }
 0x6ea   :  { %v12064_v34 = vld.sshfl [vmem:[#allocation1 + $0x10] sm:$0xff pattern:$0x75316420]  ;;  %5627 = vst [vmem:[#allocation1 + $0x21] ss:$2 sm:$0xff] %v5606_v3  ;;  %v5466_v3 = vpack.c.bf16 %v11970_v20, %v11858_v6  ;;  %v9765_v6 = vld [vmem:[%s12835_s5 + $0x118] sm:$0xff] }
 0x6eb   :  { %5970 = vst [vmem:[#allocation1 + $0x10] ss:$2 sm:$0xff] %v5952_v54  ;;  %8823 = vmatmul.msk.bf16.gmra.mxu0 %vm3977_vm3, %v4857_v13  ;;  %v12131_v54 = vld.sshfl [vmem:[#allocation1] sm:$0xff pattern:$0x75316420] }
 0x6ec   :  { %5972 = vst [vmem:[#allocation1 + $0x11] ss:$2 sm:$0xff] %v5953_v48  ;;  %v5112_v7 = vld.sshfl [vmem:[#allocation1 + $0x30] sm:$0xff pattern:$0x75316420] }
 0x6ed   :  { %5193 = vst [vmem:[#allocation1 + $0x30] ss:$2 sm:$0xff] %v5171_v25  ;;  %v5118_v15 = vpack.c.bf16 %v5112_v7, %v11973_v37  ;;  %v9758_v37 = vld [vmem:[%s12835_s5 + $0xe0] sm:$0xff]  ;;  %v6462_v7 = vld [vmem:[#allocation7 + $0x1] sm:$0x3]  ;;  %v9756_v25 = vld [vmem:[%s12835_s5 + $0xd0] sm:$0xff] }
 0x6ee   :  { %5195 = vst [vmem:[#allocation1 + $0x31] ss:$2 sm:$0xff] %v5172_v43  ;;  %5410 = vmatpush.bf16.msrb.mxu3 %v9758_v37  ;;  %v6464_v43 = vld [vmem:[#allocation7 + $0x31] sm:$0x3]  ;;  %v5867_v20 = vld [vmem:[#allocation5 + $0x60] sm:$0xf] }
 0x6ef   :  { %v9766_v37 = vld [vmem:[%s12835_s5 + $0x120] sm:$0xff] }
 0x6f1   :  { %v12124_v47 = vld.sshfl [vmem:[#allocation1 + $0x20] sm:$0xff pattern:$0x75316420] }
 0x6f2   :  { %5712 = vst [vmem:[#allocation1 + $0x20] ss:$2 sm:$0xff] %v5692_v55  ;;  %v9769_v55 = vld [vmem:[%s12835_s5 + $0x138] sm:$0xff] }
 0x6f3   :  { %v12092_v63 = vld.sshfl [vmem:[#allocation1 + $0x10] sm:$0xff pattern:$0x75316420]  ;;  %5714 = vst [vmem:[#allocation1 + $0x21] ss:$2 sm:$0xff] %v5693_v29 }
 0x6f4   :  { %6057 = vst [vmem:[#allocation1 + $0x10] ss:$2 sm:$0xff] %v6039_v46  ;;  %v9757_v46 = vld [vmem:[%s12835_s5 + $0xd8] sm:$0xff]  ;;  %v6531_v29 = vld [vmem:[#allocation7 + $0xa] sm:$0x3] }
 0x6f5   :  { %6059 = vst [vmem:[#allocation1 + $0x11] ss:$2 sm:$0xff] %v6040_v42  ;;  %v5199_v30 = vld.sshfl [vmem:[#allocation1 + $0x30] sm:$0xff pattern:$0x75316420]  ;;  %v5378_v42 = vpack.c.bf16 %v11941_v10, %v11850_v38  ;;  %5322 = vmatpush.bf16.msra.mxu2 %v9757_v46 }
 0x6f6   :  { %5280 = vst [vmem:[#allocation1 + $0x30] ss:$2 sm:$0xff] %v5258_v56  ;;  %v5205_v21 = vpack.c.bf16 %v5199_v30, %v11988_v1  ;;  %v5779_v1 = vld [vmem:[#allocation5 + $0x5c] sm:$0xf]  ;;  %v9760_v38 = vld [vmem:[%s12835_s5 + $0xf0] sm:$0xff]  ;;  %v12169_v30 = vpop.f32.mrf.mxu3 }
 0x6f7   :  { %8837 = vmatmul.msk.bf16.gmra.mxu2 %vm3977_vm3, %v4944_v60  ;;  %8851 = vmatmul.msk.bf16.gmra.mxu3 %vm3977_vm3, %v5031_v44  ;;  %5282 = vst [vmem:[#allocation1 + $0x31] ss:$2 sm:$0xff] %v5259_v14  ;;  %v6463_v10 = vld [vmem:[#allocation7 + $0x9] sm:$0x3]  ;;  %v5434_v56 = vld [vmem:[#allocation5 + $0x70] sm:$0xf]  ;;  %v12174_v14 = vpop.f32.mrf.mxu0 }
 0x6f8   :  { %5498 = vmatpush.bf16.msra.mxu0 %v9760_v38  ;;  %v5433_v60 = vld [vmem:[#allocation5 + $0x68] sm:$0xf]  ;;  %v6530_v44 = vld [vmem:[#allocation7 + $0x2] sm:$0x3] }
 0x6f9   :  { %5323 = vmatpush.bf16.msra.mxu2 %v9756_v25  ;;  %v5868_v46 = vld [vmem:[#allocation5 + $0x68] sm:$0xf] }
 0x6fa   :  { %v12150_v33 = vld.sshfl [vmem:[#allocation1 + $0x20] sm:$0xff pattern:$0x75316420] }
 0x6fb   :  { %8864 = vmatmul.msk.bf16.vlgmr.msrb.gmra.mxu0 %vm3977_vm3, %v5117_v4  ;;  %5799 = vst [vmem:[#allocation1 + $0x20] ss:$2 sm:$0xff] %v5779_v1  ;;  %v5291_v4 = vpack.c.bf16 %v11922_v58, %v11842_v17  ;;  %v9767_v17 = vld [vmem:[%s12835_s5 + $0x128] sm:$0xff]  ;;  %v9768_v1 = vld [vmem:[%s12835_s5 + $0x130] sm:$0xff] }
 0x6fc   :  { %v12113_v41 = vld.sshfl [vmem:[#allocation1 + $0x10] sm:$0xff pattern:$0x75316420]  ;;  %5801 = vst [vmem:[#allocation1 + $0x21] ss:$2 sm:$0xff] %v5780_v52  ;;  %v9771_v58 = vld [vmem:[%s12835_s5 + $0x148] sm:$0xff]  ;;  %5758 = vmatpush.bf16.msra.mxu3 %v9767_v17  ;;  %5845 = vmatpush.bf16.msrb.mxu0 %v9769_v55 }
 0x6fd   :  { %6144 = vst [vmem:[#allocation1 + $0x10] ss:$2 sm:$0xff] %v6126_v45  ;;  %5933 = vmatpush.bf16.msra.mxu1 %v9771_v58 }
 0x6fe   :  { %6146 = vst [vmem:[#allocation1 + $0x11] ss:$2 sm:$0xff] %v6127_v28  ;;  %v12137_v13 = vld.sshfl [vmem:[#allocation1 + $0x30] sm:$0xff pattern:$0x75316420] }
 0x6ff   :  { %5367 = vst [vmem:[#allocation1 + $0x30] ss:$2 sm:$0xff] %v5345_v0  ;;  %v6465_v28 = vld [vmem:[#allocation7 + $0x39] sm:$0x3] }
 0x700   :  { %5369 = vst [vmem:[#allocation1 + $0x31] ss:$2 sm:$0xff] %v5346_v53  ;;  %5759 = vmatpush.bf16.msra.mxu3 %v9766_v37  ;;  %5846 = vmatpush.bf16.msrb.mxu0 %v9768_v1  ;;  %v6668_v37 = vld [vmem:[#allocation7 + $0x34] sm:$0x3] }
 0x705   :  { %v12121_v2 = vld.sshfl [vmem:[#allocation1 + $0x10] sm:$0xff pattern:$0x75316420] }
 0x706   :  { %6231 = vst [vmem:[#allocation1 + $0x10] ss:$2 sm:$0xff] %v6213_v11 }
 0x707   :  { %6233 = vst [vmem:[#allocation1 + $0x11] ss:$2 sm:$0xff] %v6214_v39  ;;  %8879 = vmatmul.msk.bf16.vlgmr.msrb.gmra.mxu2 %vm3977_vm3, %v5205_v21  ;;  %8906 = vmatmul.msk.bf16.vlgmr.msrb.gmra.mxu3 %vm3977_vm3, %v5378_v42  ;;  %v5373_v39 = vld.sshfl [vmem:[#allocation1 + $0x30] sm:$0xff pattern:$0x75316420] }
 0x708   :  { %5455 = vst [vmem:[#allocation1 + $0x30] ss:$2 sm:$0xff] %v5433_v60  ;;  %5671 = vmatpush.bf16.msrb.mxu2 %v9765_v6  ;;  %v12191_v21 = vld.sshfl [vmem:[#allocation1 + $0x20] sm:$0xff pattern:$0x75316420] }
 0x709   :  { %5457 = vst [vmem:[#allocation1 + $0x31] ss:$2 sm:$0xff] %v5434_v56  ;;  %v5521_v42 = vld [vmem:[#allocation5 + $0x71] sm:$0xf] }
 0x70a   :  { %5887 = vst [vmem:[#allocation1 + $0x20] ss:$2 sm:$0xff] %v5867_v20  ;;  %v6600_v56 = vld [vmem:[#allocation7 + $0x33] sm:$0x3] }
 0x70b   :  { %8865 = vmatmul.msk.bf16.gmra.mxu0 %vm3977_vm3, %v5118_v15  ;;  %v6532_v15 = vld [vmem:[#allocation7 + $0x32] sm:$0x3]  ;;  %5889 = vst [vmem:[#allocation1 + $0x21] ss:$2 sm:$0xff] %v5868_v46 }
 0x70c   :  { %5672 = vmatpush.bf16.msrb.mxu2 %v9764_v9  ;;  %v4285_v5 = vpop.f32.mrf.mxu3  ;;  %v5954_v9 = vld [vmem:[#allocation5 + $0x61] sm:$0xf]  ;;  %v5695_v46 = vld [vmem:[#allocation5 + $0x73] sm:$0xf] }
 0x70e   :  { %v12134_v48 = vld.sshfl [vmem:[#allocation1 + $0x10] sm:$0xff pattern:$0x75316420] }
 0x70f   :  { %6402 = vst [vmem:[#allocation1] ss:$4 sm:$0xff] %v6394_v24  ;;  %v9770_v24 = vld [vmem:[%s12835_s5 + $0x140] sm:$0xff] }
 0x710   :  { %6404 = vst [vmem:[#allocation1 + $0x1] ss:$4 sm:$0xff] %v6395_v36  ;;  %5934 = vmatpush.bf16.msra.mxu1 %v9770_v24 }
 0x711   :  { %6406 = vst [vmem:[#allocation1 + $0x2] ss:$4 sm:$0xff] %v6396_v40  ;;  %v5379_v40 = vpack.c.bf16 %v5373_v39, %v12032_v57  ;;  %v5520_v57 = vld [vmem:[#allocation5 + $0x69] sm:$0xf]  ;;  %v6601_v39 = vld [vmem:[#allocation7 + $0x3b] sm:$0x3] }
 0x712   :  { %6408 = vst [vmem:[#allocation1 + $0x3] ss:$4 sm:$0xff] %v6397_v23  ;;  %v6533_v23 = vld [vmem:[#allocation7 + $0x3a] sm:$0x3] }
 0x713   :  { %v12220_v55 = vld.sshfl [vmem:[#allocation1 + $0x20] sm:$0xff pattern:$0x75316420] }
 0x714   :  { %5974 = vst [vmem:[#allocation1 + $0x20] ss:$2 sm:$0xff] %v5954_v9 }
 0x716   :  { %v4372_v25 = vpop.f32.mrf.mxu0 }
 0x717   :  { %8892 = vmatmul.msk.bf16.vlgmr.msra.gmra.mxu2 %vm3977_vm3, %v5291_v4  ;;  %8907 = vmatmul.msk.bf16.gmra.mxu3 %vm3977_vm3, %v5379_v40  ;;  %v6667_v40 = vld [vmem:[#allocation7 + $0xc] sm:$0x3] }
 0x719   :  { %v12161_v45 = vld.sshfl [vmem:[#allocation1] sm:$0xff pattern:$0x73625140] }
 0x71a   :  { %6470 = vst [vmem:[#allocation1] ss:$4 sm:$0xff] %v6462_v7  ;;  %v4198_v11 = vpop.f32.mrf.mxu2  ;;  %v5461_v7 = vld.sshfl [vmem:[#allocation1 + $0x30] sm:$0xff pattern:$0x75316420] }
 0x71b   :  { %6472 = vst [vmem:[#allocation1 + $0x1] ss:$4 sm:$0xff] %v6463_v10  ;;  %8920 = vmatmul.msk.bf16.vlgmr.msra.gmra.mxu0 %vm3977_vm3, %v5466_v3  ;;  %v4205_v0 = vadd.f32 %v12048_v49, %v4198_v11  ;;  %v5467_v10 = vpack.c.bf16 %v5461_v7, %v12055_v62  ;;  %v6599_v3 = vld [vmem:[#allocation7 + $0xb] sm:$0x3]  ;;  %v4287_v11 = vpop.f32.mrf.mxu3 }
 0x71c   :  { %6474 = vst [vmem:[#allocation1 + $0x2] ss:$4 sm:$0xff] %v6464_v43  ;;  %v5292_v43 = vpack.c.bf16 %v12137_v13, %v12009_v22  ;;  %v5607_v22 = vld [vmem:[#allocation5 + $0x6a] sm:$0xf]  ;;  %v5608_v13 = vld [vmem:[#allocation5 + $0x72] sm:$0xf] }
 0x71d   :  { %6476 = vst [vmem:[#allocation1 + $0x3] ss:$4 sm:$0xff] %v6465_v28  ;;  %v4292_v52 = vadd.f32 %v4285_v5, %v4205_v0  ;;  %v6598_v28 = vld [vmem:[#allocation7 + $0x3] sm:$0x3]  ;;  %v6669_v0 = vld [vmem:[#allocation7 + $0x3c] sm:$0x3] }
 0x71e   :  { %5542 = vst [vmem:[#allocation1 + $0x30] ss:$2 sm:$0xff] %v5520_v57  ;;  %v12217_v20 = vpop.f32.mrf.mxu0  ;;  %v5694_v5 = vld [vmem:[#allocation5 + $0x6b] sm:$0xf] }
 0x71f   :  { %v12204_v38 = vadd.f32 %v4372_v25, %v4292_v52  ;;  %5544 = vst [vmem:[#allocation1 + $0x31] ss:$2 sm:$0xff] %v5521_v42  ;;  %v6041_v52 = vld [vmem:[#allocation5 + $0x62] sm:$0xf]  ;;  %v6042_v7 = vld [vmem:[#allocation5 + $0x6a] sm:$0xf] }
 0x722   :  { %v4200_v53 = vpop.f32.mrf.mxu2 }
 0x723   :  { %v4206_v4 = vadd.f32 %v12048_v49, %v4200_v53  ;;  %v5640_v53 = vpack.c.bf16 %v12004_v18, %v11873_v35  ;;  %v5782_v18 = vld [vmem:[#allocation5 + $0x74] sm:$0xf] }
 0x724   :  { %v12193_v36 = vld.sshfl [vmem:[#allocation1] sm:$0xff pattern:$0x73625140] }
 0x725   :  { %6538 = vst [vmem:[#allocation1] ss:$4 sm:$0xff] %v6530_v44  ;;  %v12214_v6 = vadd.f32 %v4287_v11, %v4206_v4  ;;  %v4541_v24 = vpop.f32.mrf.mxu3  ;;  %v9775_v4 = vld [vmem:[%s12835_s5 + $0x168] sm:$0xff] }
 0x726   :  { %6540 = vst [vmem:[#allocation1 + $0x1] ss:$4 sm:$0xff] %v6531_v29  ;;  %v5548_v17 = vld.sshfl [vmem:[#allocation1 + $0x30] sm:$0xff pattern:$0x75316420]  ;;  %v5727_v29 = vpack.c.bf16 %v12028_v16, %v11886_v50  ;;  %v5814_v16 = vpack.c.bf16 %v12043_v27, %v11898_v31  ;;  %v5902_v31 = vpack.c.bf16 %v12064_v34, %v11917_v32  ;;  %v9773_v34 = vld [vmem:[%s12835_s5 + $0x158] sm:$0xff]  ;;  %6107 = vmatpush.bf16.msrb.mxu3 %v9775_v4 }
 0x727   :  { %6542 = vst [vmem:[#allocation1 + $0x2] ss:$4 sm:$0xff] %v6532_v15  ;;  %8893 = vmatmul.msk.bf16.gmra.mxu2 %vm3977_vm3, %v5292_v43  ;;  %v5554_v58 = vpack.c.bf16 %v5548_v17, %v12077_v61  ;;  %v6666_v15 = vld [vmem:[#allocation7 + $0x4] sm:$0x3]  ;;  %v5781_v27 = vld [vmem:[#allocation5 + $0x6c] sm:$0xf] }
 0x728   :  { %6544 = vst [vmem:[#allocation1 + $0x3] ss:$4 sm:$0xff] %v6533_v23  ;;  %8962 = vmatmul.msk.bf16.vlgmr.msra.gmra.mxu3 %vm3977_vm3, %v5727_v29  ;;  %v9779_v11 = vld [vmem:[%s12835_s5 + $0x188] sm:$0xff]  ;;  %6020 = vmatpush.bf16.msra.mxu2 %v9773_v34 }
 0x729   :  { %5629 = vst [vmem:[#allocation1 + $0x30] ss:$2 sm:$0xff] %v5607_v22  ;;  %8935 = vmatmul.msk.bf16.gmra.mxu1 %vm3977_vm3, %v5554_v58  ;;  %v5870_v22 = vld [vmem:[#allocation5 + $0x78] sm:$0xf]  ;;  %v6215_v29 = vld [vmem:[#allocation5 + $0x64] sm:$0xf] }
 0x72a   :  { %v4454_v44 = vpop.f32.mrf.mxu2  ;;  %5631 = vst [vmem:[#allocation1 + $0x31] ss:$2 sm:$0xff] %v5608_v13  ;;  %v9772_v13 = vld [vmem:[%s12835_s5 + $0x150] sm:$0xff]  ;;  %6281 = vmatpush.bf16.msrb.mxu1 %v9779_v11  ;;  %v9774_v58 = vld [vmem:[%s12835_s5 + $0x160] sm:$0xff] }
 0x72b   :  { %8921 = vmatmul.msk.bf16.gmra.mxu0 %vm3977_vm3, %v5467_v10  ;;  %v4464_v62 = vadd.f32 %v4454_v44, %v12066_v51  ;;  %v5955_v51 = vld [vmem:[#allocation5 + $0x69] sm:$0xf]  ;;  %v6128_v10 = vld [vmem:[#allocation5 + $0x63] sm:$0xf]  ;;  %v5869_v44 = vld [vmem:[#allocation5 + $0x70] sm:$0xf]  ;;  %6108 = vmatpush.bf16.msrb.mxu3 %v9774_v58 }
 0x72c   :  { %5976 = vst [vmem:[#allocation1 + $0x21] ss:$2 sm:$0xff] %v5955_v51  ;;  %v9776_v51 = vld [vmem:[%s12835_s5 + $0x170] sm:$0xff]  ;;  %6021 = vmatpush.bf16.msra.mxu2 %v9772_v13 }
 0x72d   :  { %v4551_v23 = vadd.f32 %v4541_v24, %v4464_v62  ;;  %v6216_v24 = vld [vmem:[#allocation5 + $0x6c] sm:$0xf] }
 0x72f   :  { %v12212_v60 = vld.sshfl [vmem:[#allocation1] sm:$0xff pattern:$0x73625140] }
 0x730   :  { %6606 = vst [vmem:[#allocation1] ss:$4 sm:$0xff] %v6598_v28 }
 0x731   :  { %6608 = vst [vmem:[#allocation1 + $0x1] ss:$4 sm:$0xff] %v6599_v3  ;;  %v5635_v57 = vld.sshfl [vmem:[#allocation1 + $0x30] sm:$0xff pattern:$0x75316420] }
 0x732   :  { %6610 = vst [vmem:[#allocation1 + $0x2] ss:$4 sm:$0xff] %v6600_v56  ;;  %v12240_v35 = vpop.f32.mrf.mxu2  ;;  %v6129_v3 = vld [vmem:[#allocation5 + $0x6b] sm:$0xf]  ;;  %v5641_v32 = vpack.c.bf16 %v5635_v57, %v12124_v47  ;;  %v9777_v47 = vld [vmem:[%s12835_s5 + $0x178] sm:$0xff]  ;;  %v6076_v57 = vpack.c.bf16 %v12113_v41, %v11964_v26 }
 0x733   :  { %6612 = vst [vmem:[#allocation1 + $0x3] ss:$4 sm:$0xff] %v6601_v39  ;;  %v12236_v42 = vld.sshfl [vmem:[#allocation1 + $0x20] sm:$0xff pattern:$0x75316420]  ;;  %6194 = vmatpush.bf16.msra.mxu0 %v9777_v47 }
 0x734   :  { %5716 = vst [vmem:[#allocation1 + $0x30] ss:$2 sm:$0xff] %v5694_v5  ;;  %v6043_v26 = vld [vmem:[#allocation5 + $0x72] sm:$0xf]  ;;  %v6044_v41 = vld [vmem:[#allocation5 + $0x7a] sm:$0xf] }
 0x735   :  { %5718 = vst [vmem:[#allocation1 + $0x31] ss:$2 sm:$0xff] %v5695_v46  ;;  %v5989_v46 = vpack.c.bf16 %v12092_v63, %v11937_v12 }
 0x736   :  { %6061 = vst [vmem:[#allocation1 + $0x20] ss:$2 sm:$0xff] %v6041_v52 }
 0x737   :  { %8948 = vmatmul.msk.bf16.vlgmr.msrb.gmra.mxu2 %vm3977_vm3, %v5640_v53  ;;  %6063 = vst [vmem:[#allocation1 + $0x21] ss:$2 sm:$0xff] %v6042_v7  ;;  %6195 = vmatpush.bf16.msra.mxu0 %v9776_v51 }
 0x738   :  { %v4629_v1 = vpop.f32.mrf.mxu0 }
 0x739   :  { %v12228_v50 = vadd.f32 %v4629_v1, %v4551_v23  ;;  %8990 = vmatmul.msk.bf16.vlgmr.msra.gmra.mxu1 %vm3977_vm3, %v5902_v31  ;;  %v5956_v1 = vld [vmem:[#allocation5 + $0x71] sm:$0xf] }
 0x73a   :  { %v12226_v61 = vld.sshfl [vmem:[#allocation1] sm:$0xff pattern:$0x73625140]  ;;  %v4459_v56 = vpop.f32.mrf.mxu2 }
 0x73b   :  { %6674 = vst [vmem:[#allocation1] ss:$4 sm:$0xff] %v6666_v15  ;;  %8976 = vmatmul.msk.bf16.vlgmr.msrb.gmra.mxu0 %vm3977_vm3, %v5814_v16  ;;  %v4466_v39 = vadd.f32 %v4459_v56, %v12204_v38  ;;  %v9778_v38 = vld [vmem:[%s12835_s5 + $0x180] sm:$0xff]  ;;  %s8185_s5 = sshll.u32 %s12841_s11, 4  ;;  %s8186_s5 = int_to_ptr.hbm [resolvable:$true] %s8185_s5 }
 0x73c   :  { %6676 = vst [vmem:[#allocation1 + $0x1] ss:$4 sm:$0xff] %v6667_v40  ;;  %v5722_v25 = vld.sshfl [vmem:[#allocation1 + $0x30] sm:$0xff pattern:$0x75316420]  ;;  %6282 = vmatpush.bf16.msrb.mxu1 %v9778_v38 }
 0x73d   :  { %6678 = vst [vmem:[#allocation1 + $0x2] ss:$4 sm:$0xff] %v6668_v37  ;;  %v5728_v43 = vpack.c.bf16 %v5722_v25, %v12150_v33  ;;  %v12254_v33 = vpop.f32.mrf.mxu3 }
 0x73e   :  { %6680 = vst [vmem:[#allocation1 + $0x3] ss:$4 sm:$0xff] %v6669_v0  ;;  %v12244_v28 = vld.sshfl [vmem:[#allocation1 + $0x20] sm:$0xff pattern:$0x75316420] }
 0x73f   :  { %5803 = vst [vmem:[#allocation1 + $0x30] ss:$2 sm:$0xff] %v5781_v27  ;;  %8963 = vmatmul.msk.bf16.gmra.mxu3 %vm3977_vm3, %v5728_v43  ;;  %v5957_v0 = vld [vmem:[#allocation5 + $0x79] sm:$0xf]  ;;  %v6130_v43 = vld [vmem:[#allocation5 + $0x73] sm:$0xf] }
 0x740   :  { %5805 = vst [vmem:[#allocation1 + $0x31] ss:$2 sm:$0xff] %v5782_v18  ;;  %v12260_v62 = vpop.f32.mrf.mxu0 }
 0x741   :  { %6148 = vst [vmem:[#allocation1 + $0x20] ss:$2 sm:$0xff] %v6128_v10 }
 0x742   :  { %6150 = vst [vmem:[#allocation1 + $0x21] ss:$2 sm:$0xff] %v6129_v3  ;;  %v12282_v40 = vpop.f32.mrf.mxu2  ;;  %v6131_v3 = vld [vmem:[#allocation5 + $0x7b] sm:$0xf] }
 0x745   :  { %v4546_v23 = vpop.f32.mrf.mxu3 }
 0x747   :  { %8949 = vmatmul.msk.bf16.gmra.mxu2 %vm3977_vm3, %v5641_v32  ;;  %v5809_v17 = vld.sshfl [vmem:[#allocation1 + $0x30] sm:$0xff pattern:$0x75316420]  ;;  %v6250_v32 = vpack.c.bf16 %v12134_v48, %v12131_v54  ;;  %v6217_v54 = vld [vmem:[#allocation5 + $0x74] sm:$0xf] }
 0x748   :  { %5891 = vst [vmem:[#allocation1 + $0x30] ss:$2 sm:$0xff] %v5869_v44  ;;  %v5815_v9 = vpack.c.bf16 %v5809_v17, %v12191_v21  ;;  %v4553_v21 = vadd.f32 %v4546_v23, %v4466_v39  ;;  %v4634_v37 = vpop.f32.mrf.mxu0  ;;  %v6218_v48 = vld [vmem:[#allocation5 + $0x7c] sm:$0xf] }
 0x749   :  { %5893 = vst [vmem:[#allocation1 + $0x31] ss:$2 sm:$0xff] %v5870_v22  ;;  %v12279_v15 = vld.sshfl [vmem:[#allocation1 + $0x20] sm:$0xff pattern:$0x75316420] }
 0x74a   :  { %6235 = vst [vmem:[#allocation1 + $0x20] ss:$2 sm:$0xff] %v6215_v29  ;;  %v4641_v16 = vadd.f32 %v4634_v37, %v4553_v21  ;;  %v4716_v7 = vpop.f32.mrf.mxu2 }
 0x74b   :  { %8977 = vmatmul.msk.bf16.gmra.mxu0 %vm3977_vm3, %v5815_v9  ;;  %6237 = vst [vmem:[#allocation1 + $0x21] ss:$2 sm:$0xff] %v6216_v24  ;;  %v4726_v31 = vadd.f32 %v4716_v7, %v12228_v50 }
 0x74d   :  { %v12291_v52 = vpop.f32.mrf.mxu3 }
 0x74f   :  { %9018 = vmatmul.msk.bf16.vlgmr.msrb.gmra.mxu3 %vm3977_vm3, %v6076_v57 }
 0x750   :  { %v5897_v53 = vld.sshfl [vmem:[#allocation1 + $0x30] sm:$0xff pattern:$0x75316420]  ;;  %v12294_v18 = vpop.f32.mrf.mxu0 }
 0x751   :  { %v5903_v5 = vpack.c.bf16 %v5897_v53, %v12220_v55  ;;  %5978 = vst [vmem:[#allocation1 + $0x30] ss:$2 sm:$0xff] %v5956_v1  ;;  %v6163_v55 = vpack.c.bf16 %v12121_v2, %v11983_v8  ;;  %v5238_v53 = vpop.f32.mrf.mxu1 }
 0x752   :  { %5980 = vst [vmem:[#allocation1 + $0x31] ss:$2 sm:$0xff] %v5957_v0  ;;  %v12300_v12 = vpop.f32.mrf.mxu2  ;;  %v6244_v38 = vld.sshfl [vmem:[#allocation1 + $0x20] sm:$0xff pattern:$0x75316420] }
 0x753   :  { %8991 = vmatmul.msk.bf16.gmra.mxu1 %vm3977_vm3, %v5903_v5 }
 0x755   :  { %v4803_v63 = vpop.f32.mrf.mxu3 }
 0x756   :  { %v4813_v25 = vadd.f32 %v4803_v63, %v4726_v31 }
 0x757   :  { %9004 = vmatmul.msk.bf16.vlgmr.msra.gmra.mxu2 %vm3977_vm3, %v5989_v46 }
 0x758   :  { %v4890_v10 = vpop.f32.mrf.mxu0 }
 0x759   :  { %v5984_v27 = vld.sshfl [vmem:[#allocation1 + $0x30] sm:$0xff pattern:$0x75316420]  ;;  %v4900_v50 = vadd.f32 %v4890_v10, %v4813_v25 }
 0x75a   :  { %6065 = vst [vmem:[#allocation1 + $0x30] ss:$2 sm:$0xff] %v6043_v26  ;;  %v5990_v2 = vpack.c.bf16 %v5984_v27, %v12236_v42  ;;  %v4721_v4 = vpop.f32.mrf.mxu2 }
 0x75b   :  { %9032 = vmatmul.msk.bf16.vlgmr.msra.gmra.mxu0 %vm3977_vm3, %v6163_v55  ;;  %6067 = vst [vmem:[#allocation1 + $0x31] ss:$2 sm:$0xff] %v6044_v41  ;;  %v4728_v11 = vadd.f32 %v4721_v4, %v4641_v16  ;;  %v5240_v55 = vpop.f32.mrf.mxu1 }
 0x75d   :  { %v12307_v56 = vpop.f32.mrf.mxu3 }
 0x760   :  { %v12309_v44 = vpop.f32.mrf.mxu0 }
 0x762   :  { %v6071_v34 = vld.sshfl [vmem:[#allocation1 + $0x30] sm:$0xff pattern:$0x75316420]  ;;  %v12313_v47 = vpop.f32.mrf.mxu2 }
 0x763   :  { %6152 = vst [vmem:[#allocation1 + $0x30] ss:$2 sm:$0xff] %v6130_v43  ;;  %9046 = vmatmul.msk.bf16.vlgmr.msrb.gmra.mxu1 %vm3977_vm3, %v6250_v32  ;;  %v6077_v8 = vpack.c.bf16 %v6071_v34, %v12244_v28  ;;  %v5587_v43 = vpop.f32.mrf.mxu1 }
 0x764   :  { %6154 = vst [vmem:[#allocation1 + $0x31] ss:$2 sm:$0xff] %v6131_v3 }
 0x765   :  { %9019 = vmatmul.msk.bf16.gmra.mxu3 %vm3977_vm3, %v6077_v8  ;;  %v4808_v28 = vpop.f32.mrf.mxu3 }
 0x766   :  { %v4815_v22 = vadd.f32 %v4808_v28, %v4728_v11  ;;  %v4204_v28 = vadd.f32 %v12048_v49, %v12153_v59 }
 0x767   :  { %9005 = vmatmul.msk.bf16.gmra.mxu2 %vm3977_vm3, %v5990_v2 }
 0x768   :  { %v4895_v13 = vpop.f32.mrf.mxu0 }
 0x769   :  { %v4902_v17 = vadd.f32 %v4895_v13, %v4815_v22  ;;  %v4291_v22 = vadd.f32 %v12169_v30, %v4204_v28 }
 0x76a   :  { %v4977_v9 = vpop.f32.mrf.mxu2 }
 0x76b   :  { %v6158_v39 = vld.sshfl [vmem:[#allocation1 + $0x30] sm:$0xff pattern:$0x75316420]  ;;  %v4987_v24 = vadd.f32 %v4977_v9, %v4900_v50  ;;  %v12330_v8 = vpop.f32.mrf.mxu1  ;;  %v4378_v13 = vadd.f32 %v12174_v14, %v4291_v22 }
 0x76c   :  { %6239 = vst [vmem:[#allocation1 + $0x30] ss:$2 sm:$0xff] %v6217_v54  ;;  %v6164_v42 = vpack.c.bf16 %v6158_v39, %v12279_v15 }
 0x76d   :  { %6241 = vst [vmem:[#allocation1 + $0x31] ss:$2 sm:$0xff] %v6218_v48  ;;  %v12317_v29 = vpop.f32.mrf.mxu3  ;;  %v4465_v9 = vadd.f32 %v12240_v35, %v4378_v13 }
 0x76e   :  { %9033 = vmatmul.msk.bf16.gmra.mxu0 %vm3977_vm3, %v6164_v42 }
 0x770   :  { %v12319_v23 = vpop.f32.mrf.mxu0 }
 0x772   :  { %v4979_v21 = vpop.f32.mrf.mxu2 }
 0x774   :  { %v6245_v58 = vld.sshfl [vmem:[#allocation1 + $0x30] sm:$0xff pattern:$0x75316420] }
 0x775   :  { %v6251_v51 = vpack.c.bf16 %v6245_v58, %v6244_v38  ;;  %v5064_v37 = vpop.f32.mrf.mxu3 }
 0x776   :  { %v5074_v15 = vadd.f32 %v5064_v37, %v4987_v24  ;;  %v4552_v24 = vadd.f32 %v12254_v33, %v4465_v9 }
 0x777   :  { %9047 = vmatmul.msk.bf16.gmra.mxu1 %vm3977_vm3, %v6251_v51 }
 0x778   :  { %v5151_v1 = vpop.f32.mrf.mxu0  ;;  %v4640_v37 = vadd.f32 %v12260_v62, %v4552_v24 }
 0x779   :  { %v5161_v0 = vadd.f32 %v5151_v1, %v5074_v15 }
 0x77a   :  { %v4982_v16 = vpop.f32.mrf.mxu2  ;;  %v4727_v30 = vadd.f32 %v12300_v12, %v4640_v37 }
 0x77b   :  { %v4989_v5 = vadd.f32 %v4982_v16, %v4902_v17  ;;  %v5248_v33 = vadd.f32 %v5238_v53, %v5161_v0 }
 0x77c   :  { %v4814_v1 = vadd.f32 %v12307_v56, %v4727_v30  ;;  %v4380_v56 = vadd.f32 %v12217_v20, %v12214_v6 }
 0x77d   :  { %v5066_v57 = vpop.f32.mrf.mxu3 }
 0x77e   :  { %v4901_v16 = vadd.f32 %v12309_v44, %v4814_v1  ;;  %v4467_v0 = vadd.f32 %v12282_v40, %v4380_v56  ;;  %v6737_v40 = vld [vmem:[#allocation7 + $0x38] sm:$0x3] }
 0x780   :  { %v5153_v46 = vpop.f32.mrf.mxu0  ;;  %v4988_v35 = vadd.f32 %v4979_v21, %v4901_v16  ;;  %v4554_v53 = vadd.f32 %v12291_v52, %v4467_v0 }
 0x782   :  { %v12322_v7 = vpop.f32.mrf.mxu2 }
 0x785   :  { %v5069_v31 = vpop.f32.mrf.mxu3 }
 0x786   :  { %v5076_v26 = vadd.f32 %v5069_v31, %v4989_v5 }
 0x788   :  { %v5156_v41 = vpop.f32.mrf.mxu0 }
 0x789   :  { %v5163_v27 = vadd.f32 %v5156_v41, %v5076_v26  ;;  %v5075_v41 = vadd.f32 %v5066_v57, %v4988_v35  ;;  %v6736_v35 = vld [vmem:[#allocation7 + $0x10] sm:$0x3] }
 0x78a   :  { %v5243_v25 = vpop.f32.mrf.mxu2 }
 0x78b   :  { %v5250_v10 = vadd.f32 %v5243_v25, %v5163_v27  ;;  %v5162_v25 = vadd.f32 %v5153_v46, %v5075_v41 }
 0x78d   :  { %v12324_v63 = vpop.f32.mrf.mxu3  ;;  %v5249_v13 = vadd.f32 %v5240_v55, %v5162_v25  ;;  %v4642_v55 = vadd.f32 %v12294_v18, %v4554_v53 }
 0x78f   :  { %v4729_v6 = vadd.f32 %v12313_v47, %v4642_v55  ;;  %v12384_v47 = vld.sshfl [vmem:[#allocation1] sm:$0xff pattern:$0x73625140] }
 0x790   :  { %v12326_v50 = vpop.f32.mrf.mxu0  ;;  %6747 = vst [vmem:[#allocation1 + $0x2] ss:$4 sm:$0xff] %v6737_v40 }
 0x791   :  { %6745 = vst [vmem:[#allocation1 + $0x1] ss:$4 sm:$0xff] %v6736_v35 }
 0x792   :  { %v12328_v3 = vpop.f32.mrf.mxu2 }
 0x795   :  { %v5412_v32 = vpop.f32.mrf.mxu3 }
 0x798   :  { %v5500_v34 = vpop.f32.mrf.mxu0 }
 0x79a   :  { %v5325_v2 = vpop.f32.mrf.mxu2 }
 0x79b   :  { %v5335_v62 = vadd.f32 %v5325_v2, %v5248_v33 }
 0x79d   :  { %v5414_v4 = vpop.f32.mrf.mxu3  ;;  %v5422_v22 = vadd.f32 %v5412_v32, %v5335_v62 }
 0x79f   :  { %v5510_v21 = vadd.f32 %v5500_v34, %v5422_v22  ;;  %v6735_v34 = vld [vmem:[#allocation7 + $0x8] sm:$0x3] }
 0x7a0   :  { %v5502_v11 = vpop.f32.mrf.mxu0  ;;  %6743 = vst [vmem:[#allocation1] ss:$4 sm:$0xff] %v6735_v34 }
 0x7a1   :  { %v5597_v2 = vadd.f32 %v5587_v43, %v5510_v21  ;;  %v4816_v43 = vadd.f32 %v12317_v29, %v4729_v6 }
 0x7a2   :  { %v5327_v48 = vpop.f32.mrf.mxu2 }
 0x7a3   :  { %v5336_v44 = vadd.f32 %v5327_v48, %v5249_v13  ;;  %v6803_v13 = vld [vmem:[#allocation7 + $0x9] sm:$0x3] }
 0x7a5   :  { %v5417_v39 = vpop.f32.mrf.mxu3  ;;  %v5423_v46 = vadd.f32 %v5414_v4, %v5336_v44 }
 0x7a6   :  { %v12332_v54 = vpop.f32.mrf.mxu1 }
 0x7a7   :  { %v5511_v1 = vadd.f32 %v5502_v11, %v5423_v46 }
 0x7a8   :  { %v12336_v42 = vpop.f32.mrf.mxu0 }
 0x7aa   :  { %v5330_v38 = vpop.f32.mrf.mxu2 }
 0x7ab   :  { %v5337_v30 = vadd.f32 %v5330_v38, %v5250_v10  ;;  %v5598_v10 = vadd.f32 %v12330_v8, %v5511_v1  ;;  %v4903_v38 = vadd.f32 %v12319_v23, %v4816_v43  ;;  %v6738_v23 = vld [vmem:[#allocation7 + $0x40] sm:$0x3] }
 0x7ac   :  { %6749 = vst [vmem:[#allocation1 + $0x3] ss:$4 sm:$0xff] %v6738_v23 }
 0x7ad   :  { %v12342_v58 = vpop.f32.mrf.mxu3  ;;  %v5424_v18 = vadd.f32 %v5417_v39, %v5337_v30  ;;  %v4990_v8 = vadd.f32 %v12322_v7, %v4903_v38 }
 0x7ae   :  { %v12340_v17 = vpop.f32.mrf.mxu1 }
 0x7b0   :  { %v12345_v51 = vpop.f32.mrf.mxu0 }
 0x7b2   :  { %v12349_v49 = vpop.f32.mrf.mxu2 }
 0x7b3   :  { %v12408_v0 = vld.sshfl [vmem:[#allocation1] sm:$0xff pattern:$0x73625140] }
 0x7b4   :  { %6811 = vst [vmem:[#allocation1] ss:$4 sm:$0xff] %v6803_v13  ;;  %v9780_v13 = vld [vmem:[%s12837_s7] sm:$0xff] }
 0x7b5   :  { %v5761_v59 = vpop.f32.mrf.mxu3 }
 0x7b6   :  { %v5936_v14 = vpop.f32.mrf.mxu1 }
 0x7b8   :  { %v5848_v15 = vpop.f32.mrf.mxu0 }
 0x7ba   :  { %v5674_v5 = vpop.f32.mrf.mxu2 }
 0x7bb   :  { %v5684_v32 = vadd.f32 %v5674_v5, %v5597_v2 }
 0x7bd   :  { %v5763_v31 = vpop.f32.mrf.mxu3  ;;  %v5771_v20 = vadd.f32 %v5761_v59, %v5684_v32  ;;  %v5512_v59 = vadd.f32 %v12336_v42, %v5424_v18  ;;  %v5077_v42 = vadd.f32 %v12324_v63, %v4990_v8  ;;  %v6805_v63 = vld [vmem:[#allocation7 + $0x39] sm:$0x3] }
 0x7be   :  { %v12356_v27 = vpop.f32.mrf.mxu1  ;;  %6815 = vst [vmem:[#allocation1 + $0x2] ss:$4 sm:$0xff] %v6805_v63  ;;  %v9786_v63 = vld [vmem:[%s12837_s7 + $0x30] sm:$0xff] }
 0x7bf   :  { %v5858_v11 = vadd.f32 %v5848_v15, %v5771_v20  ;;  %v5599_v33 = vadd.f32 %v12332_v54, %v5512_v59 }
 0x7c0   :  { %v12354_v26 = vpop.f32.mrf.mxu0 }
 0x7c1   :  { %v5946_v5 = vadd.f32 %v5936_v14, %v5858_v11 }
 0x7c2   :  { %v5676_v28 = vpop.f32.mrf.mxu2 }
 0x7c3   :  { %v5685_v4 = vadd.f32 %v5676_v28, %v5598_v10  ;;  %v5164_v28 = vadd.f32 %v12326_v50, %v5077_v42 }
 0x7c5   :  { %v12358_v12 = vpop.f32.mrf.mxu3  ;;  %v5772_v39 = vadd.f32 %v5763_v31, %v5685_v4  ;;  %v5251_v54 = vadd.f32 %v12328_v3, %v5164_v28 }
 0x7c7   :  { %v5859_v31 = vadd.f32 %v12354_v26, %v5772_v39  ;;  %v5338_v19 = vadd.f32 %v12349_v49, %v5251_v54 }
 0x7c8   :  { %v12360_v9 = vpop.f32.mrf.mxu0 }
 0x7c9   :  { %v5947_v21 = vadd.f32 %v12356_v27, %v5859_v31  ;;  %v9783_v27 = vld [vmem:[%s12837_s7 + $0x18] sm:$0xff]  ;;  %v5425_v55 = vadd.f32 %v12342_v58, %v5338_v19 }
 0x7ca   :  { %v5679_v57 = vpop.f32.mrf.mxu2  ;;  %6452 = vmatpush.bf16.msrb.mxu2 %v9783_v27 }
 0x7cb   :  { %v5686_v7 = vadd.f32 %v5679_v57, %v5599_v33  ;;  %v5513_v20 = vadd.f32 %v12345_v51, %v5425_v55 }
 0x7cd   :  { %v12368_v37 = vpop.f32.mrf.mxu3  ;;  %v5773_v56 = vadd.f32 %v12358_v12, %v5686_v7  ;;  %v5600_v59 = vadd.f32 %v12340_v17, %v5513_v20  ;;  %v9782_v17 = vld [vmem:[%s12837_s7 + $0x10] sm:$0xff]  ;;  %v9789_v20 = vld [vmem:[%s12837_s7 + $0x48] sm:$0xff] }
 0x7ce   :  { %6453 = vmatpush.bf16.msrb.mxu2 %v9782_v17  ;;  %v9792_v17 = vld [vmem:[%s12837_s7 + $0x60] sm:$0xff] }
 0x7cf   :  { %v5860_v12 = vadd.f32 %v12360_v9, %v5773_v56 }
 0x7d0   :  { %v12364_v24 = vpop.f32.mrf.mxu1  ;;  %v12371_v16 = vpop.f32.mrf.mxu0 }
 0x7d1   :  { %v5948_v1 = vadd.f32 %v12364_v24, %v5860_v12 }
 0x7d2   :  { %v12376_v52 = vpop.f32.mrf.mxu2 }
 0x7d3   :  { %v5687_v39 = vadd.f32 %v12376_v52, %v5600_v59 }
 0x7d5   :  { %v6110_v29 = vpop.f32.mrf.mxu3  ;;  %v5774_v42 = vadd.f32 %v12368_v37, %v5687_v39  ;;  %v9787_v37 = vld [vmem:[%s12837_s7 + $0x38] sm:$0xff]  ;;  %v6873_v39 = vld [vmem:[#allocation7 + $0x3a] sm:$0x3] }
 0x7d6   :  { %6520 = vmatpush.bf16.msra.mxu3 %v9787_v37  ;;  %v9796_v37 = vld [vmem:[%s12837_s7 + $0x80] sm:$0xff] }
 0x7d7   :  { %v5861_v28 = vadd.f32 %v12371_v16, %v5774_v42  ;;  %v9802_v42 = vld [vmem:[%s12837_s7 + $0xb0] sm:$0xff] }
 0x7d8   :  { %v12374_v48 = vpop.f32.mrf.mxu1  ;;  %v6197_v15 = vpop.f32.mrf.mxu0 }
 0x7da   :  { %v6023_v41 = vpop.f32.mrf.mxu2  ;;  %6521 = vmatpush.bf16.msra.mxu3 %v9786_v63  ;;  %v6683_v63 = vpack.c.bf16 %v12384_v47, %v12384_v47 }
 0x7db   :  { %v6033_v62 = vadd.f32 %v6023_v41, %v5946_v5 }
 0x7dd   :  { %v6120_v14 = vadd.f32 %v6110_v29, %v6033_v62  ;;  %v6112_v57 = vpop.f32.mrf.mxu3 }
 0x7df   :  { %v6207_v22 = vadd.f32 %v6197_v15, %v6120_v14  ;;  %v9781_v14 = vld [vmem:[%s12837_s7 + $0x8] sm:$0xff] }
 0x7e0   :  { %v6284_v25 = vpop.f32.mrf.mxu1  ;;  %v6199_v46 = vpop.f32.mrf.mxu0  ;;  %6454 = vmatpush.bf16.msrb.mxu2 %v9781_v14  ;;  %v9801_v14 = vld [vmem:[%s12837_s7 + $0xa8] sm:$0xff] }
 0x7e1   :  { %v6294_v44 = vadd.f32 %v6284_v25, %v6207_v22 }
 0x7e2   :  { %v6025_v53 = vpop.f32.mrf.mxu2 }
 0x7e3   :  { %v6298_v26 = vmax.f32 %v6294_v44, 0.0  ;;  %v6034_v50 = vadd.f32 %v6025_v53, %v5947_v21  ;;  %v5949_v44 = vadd.f32 %v12374_v48, %v5861_v28  ;;  %v9791_v48 = vld [vmem:[%s12837_s7 + $0x58] sm:$0xff]  ;;  %v6939_v28 = vld [vmem:[#allocation7 + $0xb] sm:$0x3] }
 0x7e4   :  { %6455 = vmatpush.bf16.msrb.mxu2 %v9780_v13  ;;  %v6941_v13 = vld [vmem:[#allocation7 + $0x3b] sm:$0x3] }
 0x7e5   :  { %v6306_v2 = vrot.slane %v6298_v26, 4  ;;  %6315 = vst.msk [vmem:[#allocation6] sm:$0xf] %vm6314_vm8, %v6298_v26  ;;  %v6121_v3 = vadd.f32 %v6112_v57, %v6034_v50  ;;  %v6411_v50 = vpack.c.bf16 %v12161_v45, %v12161_v45 }
 0x7e7   :  { %6316 = vst.msk [vmem:[#allocation6 + $0x4] sm:$0xf] %vm6314_vm8, %v6306_v2  ;;  %v6208_v49 = vadd.f32 %v6199_v46, %v6121_v3  ;;  %v9785_v2 = vld [vmem:[%s12837_s7 + $0x28] sm:$0xff]  ;;  %9064 = vmatmul.msk.bf16.vlgmr.msrb.gmra.mxu2 %vm6444_vm9, %v6411_v50  ;;  %v9818_v50 = vld [vmem:[%s12837_s7 + $0x130] sm:$0xff] }
 0x7e8   :  { %v6286_v32 = vpop.f32.mrf.mxu1  ;;  %v6115_v10 = vpop.f32.mrf.mxu3  ;;  %6522 = vmatpush.bf16.msra.mxu3 %v9785_v2  ;;  %6588 = vmatpush.bf16.msra.mxu2 %v9791_v48  ;;  %v9813_v2 = vld [vmem:[%s12837_s7 + $0x108] sm:$0xff]  ;;  %v9827_v48 = vld [vmem:[%s12837_s7 + $0x178] sm:$0xff] }
 0x7e9   :  { %v6295_v30 = vadd.f32 %v6286_v32, %v6208_v49  ;;  %v9784_v49 = vld [vmem:[%s12837_s7 + $0x20] sm:$0xff] }
 0x7ea   :  { %v6028_v6 = vpop.f32.mrf.mxu2 }
 0x7eb   :  { %v6299_v34 = vmax.f32 %v6295_v30, 0.0  ;;  %v6035_v40 = vadd.f32 %v6028_v6, %v5948_v1  ;;  %v6202_v38 = vpop.f32.mrf.mxu0  ;;  %v9790_v30 = vld [vmem:[%s12837_s7 + $0x50] sm:$0xff]  ;;  %v6479_v6 = vpack.c.bf16 %v12193_v36, %v12193_v36  ;;  %v9788_v36 = vld [vmem:[%s12837_s7 + $0x40] sm:$0xff] }
 0x7ec   :  { %v6323_v43 = vld [vmem:[#allocation6] ss:$2 sm:$0x3]  ;;  %v6339_v18 = vld [vmem:[#allocation6 + $0x1] ss:$2 sm:$0x3]  ;;  %6523 = vmatpush.bf16.msra.mxu3 %v9784_v49  ;;  %6589 = vmatpush.bf16.msra.mxu2 %v9790_v30 }
 0x7ed   :  { %v6307_v4 = vrot.slane %v6299_v34, 4  ;;  %6317 = vst.msk [vmem:[#allocation6 + $0x8] sm:$0xf] %vm6314_vm8, %v6299_v34  ;;  %v6122_v9 = vadd.f32 %v6115_v10, %v6035_v40  ;;  %v6354_v29 = vmax.f32 %v6323_v43, %v6339_v18  ;;  %v9795_v34 = vld [vmem:[%s12837_s7 + $0x78] sm:$0xff]  ;;  %v7009_v49 = vld [vmem:[#allocation7 + $0x3c] sm:$0x3] }
 0x7ee   :  { %v6325_v58 = vld [vmem:[#allocation6 + $0x4] ss:$2 sm:$0x3]  ;;  %v6341_v11 = vld [vmem:[#allocation6 + $0x5] ss:$2 sm:$0x3] }
 0x7ef   :  { %v6355_v8 = vmax.f32 %v6325_v58, %v6341_v11  ;;  %6318 = vst.msk [vmem:[#allocation6 + $0xc] sm:$0xf] %vm6314_vm8, %v6307_v4  ;;  %v6209_v24 = vadd.f32 %v6202_v38, %v6122_v9  ;;  %9089 = vmatmul.msk.bf16.vlgmr.msra.gmra.mxu3 %vm6444_vm9, %v6479_v6  ;;  %v6547_v4 = vpack.c.bf16 %v12212_v60, %v12212_v60  ;;  %v6871_v9 = vld [vmem:[#allocation7 + $0xa] sm:$0x3]  ;;  %v9799_v11 = vld [vmem:[%s12837_s7 + $0x98] sm:$0xff] }
 0x7f0   :  { %v6117_v46 = vpop.f32.mrf.mxu3  ;;  %6590 = vmatpush.bf16.msra.mxu2 %v9789_v20  ;;  %6656 = vmatpush.bf16.msrb.mxu3 %v9795_v34  ;;  %v9794_v58 = vld [vmem:[%s12837_s7 + $0x70] sm:$0xff]  ;;  %v9807_v60 = vld [vmem:[%s12837_s7 + $0xd8] sm:$0xff]  ;;  %v7010_v20 = vld [vmem:[#allocation7 + $0x44] sm:$0x3] }
 0x7f1   :  { %v6362_v5 = vmax.f32 %v6354_v29, %v6355_v8  ;;  %6724 = vmatpush.bf16.msrb.mxu0 %v9799_v11  ;;  %v9831_v6 = vld [vmem:[%s12837_s7 + $0x198] sm:$0xff]  ;;  %v9816_v34 = vld [vmem:[%s12837_s7 + $0x120] sm:$0xff]  ;;  %v9829_v11 = vld [vmem:[%s12837_s7 + $0x188] sm:$0xff] }
 0x7f2   :  { %v6030_v57 = vpop.f32.mrf.mxu2 }
 0x7f3   :  { %6386 = vst.msk [vmem:[#allocation7 + $0x12] sm:$0x3] %vm6377_vm7, %v6362_v5  ;;  %v6036_v26 = vadd.f32 %v6030_v57, %v5949_v44  ;;  %v6204_v12 = vpop.f32.mrf.mxu0  ;;  %v9819_v44 = vld [vmem:[%s12837_s7 + $0x138] sm:$0xff]  ;;  %v9809_v57 = vld [vmem:[%s12837_s7 + $0xe8] sm:$0xff] }
 0x7f4   :  { %v6289_v51 = vpop.f32.mrf.mxu1  ;;  %v6327_v41 = vld [vmem:[#allocation6 + $0x8] ss:$2 sm:$0x3]  ;;  %v6343_v23 = vld [vmem:[#allocation6 + $0x9] ss:$2 sm:$0x3]  ;;  %6591 = vmatpush.bf16.msra.mxu2 %v9788_v36  ;;  %6657 = vmatpush.bf16.msrb.mxu3 %v9794_v58 }
 0x7f5   :  { %v6296_v35 = vadd.f32 %v6289_v51, %v6209_v24  ;;  %v6356_v7 = vmax.f32 %v6327_v41, %v6343_v23  ;;  %v6123_v27 = vadd.f32 %v6117_v46, %v6036_v26  ;;  %v9793_v24 = vld [vmem:[%s12837_s7 + $0x68] sm:$0xff]  ;;  %v9798_v51 = vld [vmem:[%s12837_s7 + $0x90] sm:$0xff]  ;;  %v9808_v46 = vld [vmem:[%s12837_s7 + $0xe0] sm:$0xff] }
 0x7f6   :  { %v6329_v62 = vld [vmem:[#allocation6 + $0xc] ss:$2 sm:$0x3]  ;;  %v6345_v25 = vld [vmem:[#allocation6 + $0xd] ss:$2 sm:$0x3]  ;;  %6725 = vmatpush.bf16.msrb.mxu0 %v9798_v51 }
 0x7f7   :  { %v6300_v15 = vmax.f32 %v6296_v35, 0.0  ;;  %v6357_v52 = vmax.f32 %v6329_v62, %v6345_v25  ;;  %v6210_v32 = vadd.f32 %v6204_v12, %v6123_v27  ;;  %9114 = vmatmul.msk.bf16.vlgmr.msra.gmra.mxu2 %vm6444_vm9, %v6547_v4  ;;  %v9803_v35 = vld [vmem:[%s12837_s7 + $0xb8] sm:$0xff]  ;;  %v9806_v23 = vld [vmem:[%s12837_s7 + $0xd0] sm:$0xff]  ;;  %v9797_v62 = vld [vmem:[%s12837_s7 + $0x88] sm:$0xff] }
 0x7f8   :  { %6861 = vmatpush.bf16.msrb.mxu2 %v9807_v60  ;;  %6793 = vmatpush.bf16.msra.mxu1 %v9803_v35  ;;  %v9811_v25 = vld [vmem:[%s12837_s7 + $0xf8] sm:$0xff]  ;;  %v9821_v27 = vld [vmem:[%s12837_s7 + $0x148] sm:$0xff]  ;;  %v7007_v12 = vld [vmem:[#allocation7 + $0xc] sm:$0x3] }
 0x7f9   :  { %v6308_v33 = vrot.slane %v6300_v15, 4  ;;  %6319 = vst.msk [vmem:[#allocation6 + $0x10] sm:$0xf] %vm6314_vm8, %v6300_v15  ;;  %v6363_v31 = vmax.f32 %v6356_v7, %v6357_v52  ;;  %6658 = vmatpush.bf16.msrb.mxu3 %v9793_v24  ;;  %v9805_v7 = vld [vmem:[%s12837_s7 + $0xc8] sm:$0xff]  ;;  %v6615_v52 = vpack.c.bf16 %v12226_v61, %v12226_v61  ;;  %v9815_v61 = vld [vmem:[%s12837_s7 + $0x118] sm:$0xff]  ;;  %v9824_v4 = vld [vmem:[%s12837_s7 + $0x160] sm:$0xff] }
 0x7fa   :  { %v6804_v22 = vld [vmem:[#allocation7 + $0x11] sm:$0x3]  ;;  %6726 = vmatpush.bf16.msrb.mxu0 %v9797_v62  ;;  %v9828_v60 = vld [vmem:[%s12837_s7 + $0x180] sm:$0xff]  ;;  %v9833_v51 = vld [vmem:[%s12837_s7 + $0x1a8] sm:$0xff] }
 0x7fb   :  { %6320 = vst.msk [vmem:[#allocation6 + $0x14] sm:$0xf] %vm6314_vm8, %v6308_v33  ;;  %v6872_v15 = vld [vmem:[#allocation7 + $0x12] sm:$0x3]  ;;  %v7075_v58 = vld [vmem:[#allocation7 + $0x10] sm:$0x3] }
 0x7fc   :  { %6813 = vst [vmem:[#allocation1 + $0x1] ss:$4 sm:$0xff] %v6804_v22  ;;  %v6291_v55 = vpop.f32.mrf.mxu1  ;;  %6862 = vmatpush.bf16.msrb.mxu2 %v9806_v23  ;;  %6794 = vmatpush.bf16.msra.mxu1 %v9802_v42  ;;  %v9804_v22 = vld [vmem:[%s12837_s7 + $0xc0] sm:$0xff]  ;;  %v9838_v35 = vld [vmem:[%s12837_s7 + $0x1d0] sm:$0xff]  ;;  %v9837_v62 = vld [vmem:[%s12837_s7 + $0x1c8] sm:$0xff] }
 0x7fd   :  { %6387 = vst.msk [vmem:[#allocation7 + $0x1a] sm:$0x3] %vm6377_vm7, %v6363_v31  ;;  %v6297_v45 = vadd.f32 %v6291_v55, %v6210_v32  ;;  %6659 = vmatpush.bf16.msrb.mxu3 %v9792_v17  ;;  %v9810_v31 = vld [vmem:[%s12837_s7 + $0xf0] sm:$0xff]  ;;  %v7008_v32 = vld [vmem:[#allocation7 + $0x14] sm:$0x3]  ;;  %v9812_v55 = vld [vmem:[%s12837_s7 + $0x100] sm:$0xff] }
 0x7fe   :  { %6727 = vmatpush.bf16.msrb.mxu0 %v9796_v37 }
 0x7ff   :  { %v6301_v1 = vmax.f32 %v6297_v45, 0.0  ;;  %v9826_v45 = vld [vmem:[%s12837_s7 + $0x170] sm:$0xff] }
 0x800   :  { %v6331_v54 = vld [vmem:[#allocation6 + $0x10] ss:$2 sm:$0x3]  ;;  %v6347_v56 = vld [vmem:[#allocation6 + $0x11] ss:$2 sm:$0x3]  ;;  %6863 = vmatpush.bf16.msrb.mxu2 %v9805_v7  ;;  %9139 = vmatmul.msk.bf16.vlgmr.msrb.gmra.mxu3 %vm6444_vm9, %v6615_v52 }
 0x801   :  { %v6358_v53 = vmax.f32 %v6331_v54, %v6347_v56  ;;  %v6309_v40 = vrot.slane %v6301_v1, 4  ;;  %6321 = vst.msk [vmem:[#allocation6 + $0x18] sm:$0xf] %vm6314_vm8, %v6301_v1  ;;  %6929 = vmatpush.bf16.msra.mxu3 %v9811_v25  ;;  %6795 = vmatpush.bf16.msra.mxu1 %v9801_v14  ;;  %v9800_v54 = vld [vmem:[%s12837_s7 + $0xa0] sm:$0xff]  ;;  %v9843_v25 = vld [vmem:[%s12837_s7 + $0x1f8] sm:$0xff]  ;;  %v9842_v52 = vld [vmem:[%s12837_s7 + $0x1f0] sm:$0xff] }
 0x802   :  { %v6333_v21 = vld [vmem:[#allocation6 + $0x14] ss:$2 sm:$0x3]  ;;  %v6349_v16 = vld [vmem:[#allocation6 + $0x15] ss:$2 sm:$0x3]  ;;  %6997 = vmatpush.bf16.msra.mxu0 %v9815_v61 }
 0x803   :  { %v6359_v19 = vmax.f32 %v6333_v21, %v6349_v16  ;;  %6322 = vst.msk [vmem:[#allocation6 + $0x1c] sm:$0xf] %vm6314_vm8, %v6309_v40  ;;  %v9823_v21 = vld [vmem:[%s12837_s7 + $0x158] sm:$0xff]  ;;  %9164 = vmatmul.msk.bf16.vlgmr.msrb.gmra.mxu0 %vm6444_vm9, %v6683_v63  ;;  %v9820_v40 = vld [vmem:[%s12837_s7 + $0x140] sm:$0xff] }
 0x804   :  { %v6940_v16 = vld [vmem:[#allocation7 + $0x13] sm:$0x3]  ;;  %6864 = vmatpush.bf16.msrb.mxu2 %v9804_v22  ;;  %v7144_v23 = vld [vmem:[#allocation7 + $0x19] sm:$0x3] }
 0x805   :  { %v6364_v3 = vmax.f32 %v6358_v53, %v6359_v19  ;;  %6930 = vmatpush.bf16.msra.mxu3 %v9810_v31  ;;  %v6752_v53 = vpack.c.bf16 %v12408_v0, %v12408_v0  ;;  %v9814_v19 = vld [vmem:[%s12837_s7 + $0x110] sm:$0xff]  ;;  %6796 = vmatpush.bf16.msra.mxu1 %v9800_v54  ;;  %v9836_v7 = vld [vmem:[%s12837_s7 + $0x1c0] sm:$0xff]  ;;  %v7211_v14 = vld [vmem:[#allocation7 + $0x12] sm:$0x3] }
 0x806   :  { %v9822_v0 = vld [vmem:[%s12837_s7 + $0x150] sm:$0xff]  ;;  %6998 = vmatpush.bf16.msra.mxu0 %v9814_v19  ;;  %v7212_v31 = vld [vmem:[#allocation7 + $0x1a] sm:$0x3]  ;;  %v9847_v63 = vld [vmem:[%s12837_s7 + $0x218] sm:$0xff] }
 0x807   :  { %6388 = vst.msk [vmem:[#allocation7 + $0x42] sm:$0x3] %vm6377_vm7, %v6364_v3  ;;  %v9817_v3 = vld [vmem:[%s12837_s7 + $0x128] sm:$0xff]  ;;  %v9840_v54 = vld [vmem:[%s12837_s7 + $0x1e0] sm:$0xff] }
 0x808   :  { %v6335_v18 = vld [vmem:[#allocation6 + $0x18] ss:$2 sm:$0x3]  ;;  %v6351_v10 = vld [vmem:[#allocation6 + $0x19] ss:$2 sm:$0x3]  ;;  %7133 = vmatpush.bf16.msra.mxu2 %v9823_v21  ;;  %9189 = vmatmul.msk.bf16.vlgmr.msra.gmra.mxu1 %vm6444_vm9, %v6752_v53 }
 0x809   :  { %v6360_v29 = vmax.f32 %v6335_v18, %v6351_v10  ;;  %7065 = vmatpush.bf16.msrb.mxu1 %v9819_v44  ;;  %6931 = vmatpush.bf16.msra.mxu3 %v9809_v57  ;;  %v9830_v18 = vld [vmem:[%s12837_s7 + $0x190] sm:$0xff]  ;;  %v9835_v10 = vld [vmem:[%s12837_s7 + $0x1b8] sm:$0xff]  ;;  %v9845_v19 = vld [vmem:[%s12837_s7 + $0x208] sm:$0xff] }
 0x80a   :  { %v6337_v38 = vld [vmem:[#allocation6 + $0x1c] ss:$2 sm:$0x3]  ;;  %v6353_v59 = vld [vmem:[#allocation6 + $0x1d] ss:$2 sm:$0x3]  ;;  %6999 = vmatpush.bf16.msra.mxu0 %v9813_v2 }
 0x80b   :  { %v6361_v8 = vmax.f32 %v6337_v38, %v6353_v59  ;;  %v7076_v38 = vld [vmem:[#allocation7 + $0x18] sm:$0x3]  ;;  %v7077_v59 = vld [vmem:[#allocation7 + $0x40] sm:$0x3]  ;;  %v7279_v44 = vld [vmem:[#allocation7 + $0x13] sm:$0x3] }
 0x80c   :  { %7134 = vmatpush.bf16.msra.mxu2 %v9822_v0  ;;  %v9850_v0 = vld [vmem:[%s12837_s7 + $0x230] sm:$0xff]  ;;  %v7348_v2 = vld [vmem:[#allocation7 + $0x1c] sm:$0x3] }
 0x80d   :  { %v6365_v41 = vmax.f32 %v6360_v29, %v6361_v8  ;;  %7066 = vmatpush.bf16.msrb.mxu1 %v9818_v50  ;;  %6932 = vmatpush.bf16.msra.mxu3 %v9808_v46  ;;  %v7078_v8 = vld [vmem:[#allocation7 + $0x48] sm:$0x3]  ;;  %v9844_v50 = vld [vmem:[%s12837_s7 + $0x200] sm:$0xff]  ;;  %v7347_v46 = vld [vmem:[#allocation7 + $0x14] sm:$0x3] }
 0x80e   :  { %v6806_v43 = vld [vmem:[#allocation7 + $0x41] sm:$0x3]  ;;  %v6942_v26 = vld [vmem:[#allocation7 + $0x43] sm:$0x3]  ;;  %7000 = vmatpush.bf16.msra.mxu0 %v9812_v55  ;;  %v9855_v55 = vld [vmem:[%s12837_s7 + $0x258] sm:$0xff] }
 0x80f   :  { %6817 = vst [vmem:[#allocation1 + $0x3] ss:$4 sm:$0xff] %v6806_v43  ;;  %v6874_v33 = vld [vmem:[#allocation7 + $0x42] sm:$0x3] }
 0x810   :  { %6389 = vst.msk [vmem:[#allocation7 + $0x4a] sm:$0x3] %vm6377_vm7, %v6365_v41  ;;  %7135 = vmatpush.bf16.msra.mxu2 %v9821_v27  ;;  %v9825_v43 = vld [vmem:[%s12837_s7 + $0x168] sm:$0xff]  ;;  %v7350_v27 = vld [vmem:[#allocation7 + $0x4c] sm:$0x3] }
 0x811   :  { %7201 = vmatpush.bf16.msrb.mxu3 %v9827_v48  ;;  %7067 = vmatpush.bf16.msrb.mxu1 %v9817_v3  ;;  %v7281_v57 = vld [vmem:[#allocation7 + $0x43] sm:$0x3] }
 0x812   :  { %7269 = vmatpush.bf16.msrb.mxu0 %v9831_v6  ;;  %v7349_v48 = vld [vmem:[#allocation7 + $0x44] sm:$0x3] }
 0x814   :  { %7136 = vmatpush.bf16.msra.mxu2 %v9820_v40  ;;  %v7419_v40 = vld [vmem:[#allocation7 + $0x50] sm:$0x3] }
 0x815   :  { %7202 = vmatpush.bf16.msrb.mxu3 %v9826_v45  ;;  %7068 = vmatpush.bf16.msrb.mxu1 %v9816_v34  ;;  %v9848_v45 = vld [vmem:[%s12837_s7 + $0x220] sm:$0xff] }
 0x816   :  { %v12493_v5 = vld.sshfl [vmem:[#allocation1] sm:$0xff pattern:$0x73625140]  ;;  %7270 = vmatpush.bf16.msrb.mxu0 %v9830_v18 }
 0x817   :  { %6879 = vst [vmem:[#allocation1] ss:$4 sm:$0xff] %v6871_v9  ;;  %v6820_v47 = vpack.c.bf16 %v12493_v5, %v12493_v5  ;;  %v9834_v9 = vld [vmem:[%s12837_s7 + $0x1b0] sm:$0xff]  ;;  %v9832_v5 = vld [vmem:[%s12837_s7 + $0x1a0] sm:$0xff] }
 0x818   :  { %6881 = vst [vmem:[#allocation1 + $0x1] ss:$4 sm:$0xff] %v6872_v15  ;;  %v7143_v15 = vld [vmem:[#allocation7 + $0x11] sm:$0x3]  ;;  %v7146_v17 = vld [vmem:[#allocation7 + $0x49] sm:$0x3] }
 0x819   :  { %6883 = vst [vmem:[#allocation1 + $0x2] ss:$4 sm:$0xff] %v6873_v39  ;;  %9214 = vmatmul.msk.bf16.vlgmr.msrb.gmra.mxu2 %vm6444_vm9, %v6820_v47  ;;  %7203 = vmatpush.bf16.msrb.mxu3 %v9825_v43  ;;  %v9839_v39 = vld [vmem:[%s12837_s7 + $0x1d8] sm:$0xff]  ;;  %v7214_v22 = vld [vmem:[#allocation7 + $0x4a] sm:$0x3]  ;;  %v9853_v43 = vld [vmem:[%s12837_s7 + $0x248] sm:$0xff] }
 0x81a   :  { %6885 = vst [vmem:[#allocation1 + $0x3] ss:$4 sm:$0xff] %v6874_v33  ;;  %7337 = vmatpush.bf16.msra.mxu1 %v9835_v10  ;;  %7271 = vmatpush.bf16.msrb.mxu0 %v9829_v11  ;;  %v7145_v33 = vld [vmem:[#allocation7 + $0x41] sm:$0x3]  ;;  %v7282_v53 = vld [vmem:[#allocation7 + $0x4b] sm:$0x3] }
 0x81b   :  { %7405 = vmatpush.bf16.msrb.mxu2 %v9839_v39  ;;  %v9852_v18 = vld [vmem:[%s12837_s7 + $0x240] sm:$0xff]  ;;  %v9858_v10 = vld [vmem:[%s12837_s7 + $0x270] sm:$0xff] }
 0x81c   :  { %v7486_v11 = vld [vmem:[#allocation7 + $0x49] sm:$0x3] }
 0x81d   :  { %7204 = vmatpush.bf16.msrb.mxu3 %v9824_v4  ;;  %v7484_v4 = vld [vmem:[#allocation7 + $0x19] sm:$0x3] }
 0x81e   :  { %7338 = vmatpush.bf16.msra.mxu1 %v9834_v9  ;;  %7272 = vmatpush.bf16.msrb.mxu0 %v9828_v60  ;;  %v9862_v60 = vld [vmem:[%s12837_s7 + $0x290] sm:$0xff] }
 0x81f   :  { %7406 = vmatpush.bf16.msrb.mxu2 %v9838_v35  ;;  %v7554_v35 = vld [vmem:[#allocation7 + $0x4a] sm:$0x3] }
 0x821   :  { %v6886_v56 = vld.sshfl [vmem:[#allocation1] sm:$0xff pattern:$0x73625140] }
 0x822   :  { %6947 = vst [vmem:[#allocation1] ss:$4 sm:$0xff] %v6939_v28  ;;  %v6888_v1 = vpack.c.bf16 %v6886_v56, %v6886_v56  ;;  %7339 = vmatpush.bf16.msra.mxu1 %v9833_v51  ;;  %v7213_v28 = vld [vmem:[#allocation7 + $0x42] sm:$0x3]  ;;  %v9846_v56 = vld [vmem:[%s12837_s7 + $0x210] sm:$0xff] }
 0x823   :  { %6949 = vst [vmem:[#allocation1 + $0x1] ss:$4 sm:$0xff] %v6940_v16  ;;  %7407 = vmatpush.bf16.msrb.mxu2 %v9837_v62  ;;  %v7280_v16 = vld [vmem:[#allocation7 + $0x1b] sm:$0x3] }
 0x824   :  { %6951 = vst [vmem:[#allocation1 + $0x2] ss:$4 sm:$0xff] %v6941_v13  ;;  %9239 = vmatmul.msk.bf16.vlgmr.msra.gmra.mxu3 %vm6444_vm9, %v6888_v1  ;;  %v9841_v13 = vld [vmem:[%s12837_s7 + $0x1e8] sm:$0xff]  ;;  %v7418_v1 = vld [vmem:[#allocation7 + $0x48] sm:$0x3]  ;;  %v9860_v62 = vld [vmem:[%s12837_s7 + $0x280] sm:$0xff] }
 0x825   :  { %6953 = vst [vmem:[#allocation1 + $0x3] ss:$4 sm:$0xff] %v6942_v26  ;;  %7474 = vmatpush.bf16.msra.mxu3 %v9843_v25  ;;  %v9851_v26 = vld [vmem:[%s12837_s7 + $0x238] sm:$0xff]  ;;  %v7552_v51 = vld [vmem:[#allocation7 + $0x1a] sm:$0x3]  ;;  %v9866_v25 = vld [vmem:[%s12837_s7 + $0x2b0] sm:$0xff] }
 0x826   :  { %7340 = vmatpush.bf16.msra.mxu1 %v9832_v5  ;;  %v7553_v5 = vld [vmem:[#allocation7 + $0x22] sm:$0x3] }
 0x827   :  { %7408 = vmatpush.bf16.msrb.mxu2 %v9836_v7 }
 0x829   :  { %7475 = vmatpush.bf16.msra.mxu3 %v9842_v52  ;;  %v7620_v52 = vld [vmem:[#allocation7 + $0x1b] sm:$0x3] }
 0x82c   :  { %v6954_v30 = vld.sshfl [vmem:[#allocation1] sm:$0xff pattern:$0x73625140] }
 0x82d   :  { %7015 = vst [vmem:[#allocation1] ss:$4 sm:$0xff] %v7007_v12  ;;  %v6956_v36 = vpack.c.bf16 %v6954_v30, %v6954_v30  ;;  %7476 = vmatpush.bf16.msra.mxu3 %v9841_v13  ;;  %v7416_v30 = vld [vmem:[#allocation7 + $0x18] sm:$0x3]  ;;  %v7623_v13 = vld [vmem:[#allocation7 + $0x53] sm:$0x3] }
 0x82e   :  { %7017 = vst [vmem:[#allocation1 + $0x1] ss:$4 sm:$0xff] %v7008_v32  ;;  %v9849_v32 = vld [vmem:[%s12837_s7 + $0x228] sm:$0xff] }
 0x82f   :  { %7019 = vst [vmem:[#allocation1 + $0x2] ss:$4 sm:$0xff] %v7009_v49  ;;  %9264 = vmatmul.msk.bf16.vlgmr.msra.gmra.mxu0 %vm6444_vm9, %v6956_v36  ;;  %v9854_v49 = vld [vmem:[%s12837_s7 + $0x250] sm:$0xff]  ;;  %v9859_v36 = vld [vmem:[%s12837_s7 + $0x278] sm:$0xff] }
 0x830   :  { %7021 = vst [vmem:[#allocation1 + $0x3] ss:$4 sm:$0xff] %v7010_v20  ;;  %7542 = vmatpush.bf16.msra.mxu0 %v9847_v63  ;;  %v7417_v20 = vld [vmem:[#allocation7 + $0x20] sm:$0x3] }
 0x831   :  { %7477 = vmatpush.bf16.msra.mxu3 %v9840_v54  ;;  %v9865_v54 = vld [vmem:[%s12837_s7 + $0x2a8] sm:$0xff] }
 0x834   :  { %7543 = vmatpush.bf16.msra.mxu0 %v9846_v56  ;;  %v9871_v56 = vld [vmem:[%s12837_s7 + $0x2d8] sm:$0xff] }
 0x837   :  { %v7022_v29 = vld.sshfl [vmem:[#allocation1] sm:$0xff pattern:$0x73625140] }
 0x838   :  { %v7024_v24 = vpack.c.bf16 %v7022_v29, %v7022_v29  ;;  %7083 = vst [vmem:[#allocation1] ss:$4 sm:$0xff] %v7075_v58  ;;  %7544 = vmatpush.bf16.msra.mxu0 %v9845_v19  ;;  %v7485_v58 = vld [vmem:[#allocation7 + $0x21] sm:$0x3] }
 0x839   :  { %7085 = vst [vmem:[#allocation1 + $0x1] ss:$4 sm:$0xff] %v7076_v38  ;;  %v9857_v29 = vld [vmem:[%s12837_s7 + $0x268] sm:$0xff] }
 0x83a   :  { %9289 = vmatmul.msk.bf16.vlgmr.msrb.gmra.mxu1 %vm6444_vm9, %v7024_v24  ;;  %7087 = vst [vmem:[#allocation1 + $0x2] ss:$4 sm:$0xff] %v7077_v59  ;;  %v7487_v59 = vld [vmem:[#allocation7 + $0x51] sm:$0x3]  ;;  %v9856_v24 = vld [vmem:[%s12837_s7 + $0x260] sm:$0xff] }
 0x83b   :  { %7089 = vst [vmem:[#allocation1 + $0x3] ss:$4 sm:$0xff] %v7078_v8  ;;  %7610 = vmatpush.bf16.msrb.mxu1 %v9851_v26  ;;  %v9863_v8 = vld [vmem:[%s12837_s7 + $0x298] sm:$0xff]  ;;  %v7689_v26 = vld [vmem:[#allocation7 + $0x24] sm:$0x3] }
 0x83c   :  { %7545 = vmatpush.bf16.msra.mxu0 %v9844_v50 }
 0x83f   :  { %7611 = vmatpush.bf16.msrb.mxu1 %v9850_v0 }
 0x842   :  { %v7090_v41 = vld.sshfl [vmem:[#allocation1] sm:$0xff pattern:$0x73625140] }
 0x843   :  { %v7092_v42 = vpack.c.bf16 %v7090_v41, %v7090_v41  ;;  %7151 = vst [vmem:[#allocation1] ss:$4 sm:$0xff] %v7143_v15  ;;  %7612 = vmatpush.bf16.msrb.mxu1 %v9849_v32  ;;  %v7555_v41 = vld [vmem:[#allocation7 + $0x52] sm:$0x3] }
 0x844   :  { %7153 = vst [vmem:[#allocation1 + $0x1] ss:$4 sm:$0xff] %v7144_v23 }
 0x845   :  { %9314 = vmatmul.msk.bf16.vlgmr.msra.gmra.mxu2 %vm6444_vm9, %v7092_v42  ;;  %7155 = vst [vmem:[#allocation1 + $0x2] ss:$4 sm:$0xff] %v7145_v33  ;;  %v9887_v42 = vld [vmem:[%s12838_s8] ss:$0 sm:$0xff]  ;;  %v9861_v33 = vld [vmem:[%s12837_s7 + $0x288] sm:$0xff] }
 0x846   :  { %7157 = vst [vmem:[#allocation1 + $0x3] ss:$4 sm:$0xff] %v7146_v17  ;;  %7678 = vmatpush.bf16.msra.mxu2 %v9855_v55  ;;  %v9867_v17 = vld [vmem:[%s12837_s7 + $0x2b8] sm:$0xff]  ;;  %v7756_v55 = vld [vmem:[#allocation7 + $0x20] sm:$0x3] }
 0x847   :  { %7613 = vmatpush.bf16.msrb.mxu1 %v9848_v45 }
 0x84a   :  { %7679 = vmatpush.bf16.msra.mxu2 %v9854_v49  ;;  %v7757_v49 = vld [vmem:[#allocation7 + $0x28] sm:$0x3] }
 0x84d   :  { %v7158_v37 = vld.sshfl [vmem:[#allocation1] sm:$0xff pattern:$0x73625140] }
 0x84e   :  { %v7160_v61 = vpack.c.bf16 %v7158_v37, %v7158_v37  ;;  %7219 = vst [vmem:[#allocation1] ss:$4 sm:$0xff] %v7211_v14  ;;  %7680 = vmatpush.bf16.msra.mxu2 %v9853_v43  ;;  %v7621_v37 = vld [vmem:[#allocation7 + $0x23] sm:$0x3] }
 0x84f   :  { %7221 = vst [vmem:[#allocation1 + $0x1] ss:$4 sm:$0xff] %v7212_v31  ;;  %v9873_v43 = vld [vmem:[%s12837_s7 + $0x2e8] sm:$0xff] }
 0x850   :  { %9339 = vmatmul.msk.bf16.vlgmr.msrb.gmra.mxu3 %vm6444_vm9, %v7160_v61  ;;  %7223 = vst [vmem:[#allocation1 + $0x2] ss:$4 sm:$0xff] %v7213_v28  ;;  %v7622_v28 = vld [vmem:[#allocation7 + $0x4b] sm:$0x3] }
 0x851   :  { %7225 = vst [vmem:[#allocation1 + $0x3] ss:$4 sm:$0xff] %v7214_v22  ;;  %7746 = vmatpush.bf16.msrb.mxu3 %v9859_v36  ;;  %v9879_v36 = vld [vmem:[%s12837_s7 + $0x318] sm:$0xff] }
 0x852   :  { %7681 = vmatpush.bf16.msra.mxu2 %v9852_v18 }
 0x855   :  { %7747 = vmatpush.bf16.msrb.mxu3 %v9858_v10 }
 0x858   :  { %v7226_v21 = vld.sshfl [vmem:[#allocation1] sm:$0xff pattern:$0x73625140] }
 0x859   :  { %v7228_v47 = vpack.c.bf16 %v7226_v21, %v7226_v21  ;;  %7287 = vst [vmem:[#allocation1] ss:$4 sm:$0xff] %v7279_v44  ;;  %7748 = vmatpush.bf16.msrb.mxu3 %v9857_v29  ;;  %v9864_v44 = vld [vmem:[%s12837_s7 + $0x2a0] sm:$0xff]  ;;  %v9870_v21 = vld [vmem:[%s12837_s7 + $0x2d0] sm:$0xff]  ;;  %v7824_v29 = vld [vmem:[#allocation7 + $0x21] sm:$0x3] }
 0x85a   :  { %7289 = vst [vmem:[#allocation1 + $0x1] ss:$4 sm:$0xff] %v7280_v16 }
 0x85b   :  { %9364 = vmatmul.msk.bf16.vlgmr.msrb.gmra.mxu0 %vm6444_vm9, %v7228_v47  ;;  %7291 = vst [vmem:[#allocation1 + $0x2] ss:$4 sm:$0xff] %v7281_v57  ;;  %v7688_v47 = vld [vmem:[#allocation7 + $0x1c] sm:$0x3]  ;;  %v7690_v57 = vld [vmem:[#allocation7 + $0x4c] sm:$0x3] }
 0x85c   :  { %7293 = vst [vmem:[#allocation1 + $0x3] ss:$4 sm:$0xff] %v7282_v53  ;;  %7814 = vmatpush.bf16.msrb.mxu0 %v9863_v8  ;;  %v7825_v8 = vld [vmem:[#allocation7 + $0x29] sm:$0x3] }
 0x85d   :  { %7749 = vmatpush.bf16.msrb.mxu3 %v9856_v24 }
 0x860   :  { %7815 = vmatpush.bf16.msrb.mxu0 %v9862_v60  ;;  %v7826_v60 = vld [vmem:[#allocation7 + $0x51] sm:$0x3] }
 0x863   :  { %v7294_v3 = vld.sshfl [vmem:[#allocation1] sm:$0xff pattern:$0x73625140] }
 0x864   :  { %v7296_v12 = vpack.c.bf16 %v7294_v3, %v7294_v3  ;;  %7355 = vst [vmem:[#allocation1] ss:$4 sm:$0xff] %v7347_v46  ;;  %7816 = vmatpush.bf16.msrb.mxu0 %v9861_v33  ;;  %v7691_v46 = vld [vmem:[#allocation7 + $0x54] sm:$0x3]  ;;  %v9874_v3 = vld [vmem:[%s12837_s7 + $0x2f0] sm:$0xff]  ;;  %v9876_v33 = vld [vmem:[%s12837_s7 + $0x300] sm:$0xff] }
 0x865   :  { %7357 = vst [vmem:[#allocation1 + $0x1] ss:$4 sm:$0xff] %v7348_v2  ;;  %v9875_v2 = vld [vmem:[%s12837_s7 + $0x2f8] sm:$0xff] }
 0x866   :  { %9389 = vmatmul.msk.bf16.vlgmr.msra.gmra.mxu1 %vm6444_vm9, %v7296_v12  ;;  %7359 = vst [vmem:[#allocation1 + $0x2] ss:$4 sm:$0xff] %v7349_v48  ;;  %v9869_v48 = vld [vmem:[%s12837_s7 + $0x2c8] sm:$0xff] }
 0x867   :  { %7361 = vst [vmem:[#allocation1 + $0x3] ss:$4 sm:$0xff] %v7350_v27  ;;  %7882 = vmatpush.bf16.msra.mxu1 %v9867_v17  ;;  %v9868_v27 = vld [vmem:[%s12837_s7 + $0x2c0] sm:$0xff] }
 0x868   :  { %7817 = vmatpush.bf16.msrb.mxu0 %v9860_v62  ;;  %v7892_v62 = vld [vmem:[#allocation7 + $0x22] sm:$0x3] }
 0x86a   :  { %v6457_v23 = vpop.f32.mrf.mxu2 }
 0x86b   :  { %v6461_v7 = vadd.f32 %v9887_v42, %v6457_v23  ;;  %7883 = vmatpush.bf16.msra.mxu1 %v9866_v25  ;;  %v7893_v25 = vld [vmem:[#allocation7 + $0x2a] sm:$0x3] }
 0x86e   :  { %v7362_v6 = vld.sshfl [vmem:[#allocation1] sm:$0xff pattern:$0x73625140] }
 0x86f   :  { %v7364_v34 = vpack.c.bf16 %v7362_v6, %v7362_v6  ;;  %7424 = vst [vmem:[#allocation1] ss:$4 sm:$0xff] %v7416_v30  ;;  %7884 = vmatpush.bf16.msra.mxu1 %v9865_v54  ;;  %v7758_v6 = vld [vmem:[#allocation7 + $0x50] sm:$0x3] }
 0x870   :  { %7428 = vst [vmem:[#allocation1 + $0x2] ss:$4 sm:$0xff] %v7418_v1 }
 0x871   :  { %9414 = vmatmul.msk.bf16.vlgmr.msrb.gmra.mxu2 %vm6444_vm9, %v7364_v34  ;;  %7426 = vst [vmem:[#allocation1 + $0x1] ss:$4 sm:$0xff] %v7417_v20  ;;  %v7759_v34 = vld [vmem:[#allocation7 + $0x58] sm:$0x3] }
 0x872   :  { %7430 = vst [vmem:[#allocation1 + $0x3] ss:$4 sm:$0xff] %v7419_v40  ;;  %v6459_v31 = vpop.f32.mrf.mxu2  ;;  %v6525_v61 = vpop.f32.mrf.mxu3  ;;  %7950 = vmatpush.bf16.msrb.mxu2 %v9871_v56  ;;  %v7962_v56 = vld [vmem:[#allocation7 + $0x53] sm:$0x3] }
 0x873   :  { %v6529_v63 = vadd.f32 %v6525_v61, %v6461_v7  ;;  %7885 = vmatpush.bf16.msra.mxu1 %v9864_v44 }
 0x876   :  { %7951 = vmatpush.bf16.msrb.mxu2 %v9870_v21  ;;  %v7963_v21 = vld [vmem:[#allocation7 + $0x5b] sm:$0x3] }
 0x879   :  { %v7431_v9 = vld.sshfl [vmem:[#allocation1] sm:$0xff pattern:$0x73625140] }
 0x87a   :  { %v7433_v38 = vpack.c.bf16 %v7431_v9, %v7431_v9  ;;  %7492 = vst [vmem:[#allocation1] ss:$4 sm:$0xff] %v7484_v4  ;;  %v6527_v16 = vpop.f32.mrf.mxu3  ;;  %v6593_v53 = vpop.f32.mrf.mxu2  ;;  %7952 = vmatpush.bf16.msrb.mxu2 %v9869_v48  ;;  %v9872_v9 = vld [vmem:[%s12837_s7 + $0x2e0] sm:$0xff] }
 0x87b   :  { %7496 = vst [vmem:[#allocation1 + $0x2] ss:$4 sm:$0xff] %v7486_v11  ;;  %v6597_v50 = vadd.f32 %v6593_v53, %v6529_v63  ;;  %v7961_v63 = vld [vmem:[#allocation7 + $0x2b] sm:$0x3] }
 0x87c   :  { %9439 = vmatmul.msk.bf16.vlgmr.msra.gmra.mxu3 %vm6444_vm9, %v7433_v38  ;;  %7494 = vst [vmem:[#allocation1 + $0x1] ss:$4 sm:$0xff] %v7485_v58  ;;  %v9878_v58 = vld [vmem:[%s12837_s7 + $0x310] sm:$0xff] }
 0x87d   :  { %7498 = vst [vmem:[#allocation1 + $0x3] ss:$4 sm:$0xff] %v7487_v59  ;;  %8018 = vmatpush.bf16.msra.mxu3 %v9875_v2  ;;  %v8029_v53 = vld [vmem:[#allocation7 + $0x2c] sm:$0x3]  ;;  %v8030_v2 = vld [vmem:[#allocation7 + $0x54] sm:$0x3] }
 0x87e   :  { %7953 = vmatpush.bf16.msrb.mxu2 %v9868_v27 }
 0x880   :  { %v6729_v32 = vpop.f32.mrf.mxu0 }
 0x881   :  { %8019 = vmatpush.bf16.msra.mxu3 %v9874_v3 }
 0x882   :  { %v6595_v12 = vpop.f32.mrf.mxu2 }
 0x883   :  { %v6661_v45 = vpop.f32.mrf.mxu3 }
 0x884   :  { %v7499_v39 = vld.sshfl [vmem:[#allocation1] sm:$0xff pattern:$0x73625140]  ;;  %v6665_v30 = vadd.f32 %v6661_v45, %v6597_v50 }
 0x885   :  { %v7501_v15 = vpack.c.bf16 %v7499_v39, %v7499_v39  ;;  %7560 = vst [vmem:[#allocation1] ss:$4 sm:$0xff] %v7552_v51  ;;  %v6798_v18 = vpop.f32.mrf.mxu1  ;;  %8020 = vmatpush.bf16.msra.mxu3 %v9873_v43  ;;  %v7827_v39 = vld [vmem:[#allocation7 + $0x59] sm:$0x3] }
 0x886   :  { %7564 = vst [vmem:[#allocation1 + $0x2] ss:$4 sm:$0xff] %v7554_v35  ;;  %v6733_v40 = vadd.f32 %v6729_v32, %v6665_v30 }
 0x887   :  { %9464 = vmatmul.msk.bf16.vlgmr.msra.gmra.mxu0 %vm6444_vm9, %v7501_v15  ;;  %7562 = vst [vmem:[#allocation1 + $0x1] ss:$4 sm:$0xff] %v7553_v5  ;;  %v9877_v15 = vld [vmem:[%s12837_s7 + $0x308] sm:$0xff] }
 0x888   :  { %7566 = vst [vmem:[#allocation1 + $0x3] ss:$4 sm:$0xff] %v7555_v41  ;;  %8086 = vmatpush.bf16.msra.mxu0 %v9879_v36  ;;  %v6802_v4 = vadd.f32 %v6798_v18, %v6733_v40  ;;  %v6731_v11 = vpop.f32.mrf.mxu0 }
 0x889   :  { %8021 = vmatpush.bf16.msra.mxu3 %v9872_v9 }
 0x88b   :  { %v6663_v38 = vpop.f32.mrf.mxu3 }
 0x88c   :  { %8087 = vmatpush.bf16.msra.mxu0 %v9878_v58 }
 0x88d   :  { %v6800_v35 = vpop.f32.mrf.mxu1 }
 0x88f   :  { %v7567_v14 = vld.sshfl [vmem:[#allocation1] sm:$0xff pattern:$0x73625140] }
 0x890   :  { %v7569_v22 = vpack.c.bf16 %v7567_v14, %v7567_v14  ;;  %7628 = vst [vmem:[#allocation1] ss:$4 sm:$0xff] %v7620_v52  ;;  %8088 = vmatpush.bf16.msra.mxu0 %v9877_v15  ;;  %v7894_v52 = vld [vmem:[#allocation7 + $0x52] sm:$0x3] }
 0x891   :  { %7632 = vst [vmem:[#allocation1 + $0x2] ss:$4 sm:$0xff] %v7622_v28  ;;  %v8142_v15 = vld [vmem:[%s12839_s9 + $0x58] sm:$0xff] }
 0x892   :  { %9489 = vmatmul.msk.bf16.vlgmr.msrb.gmra.mxu1 %vm6444_vm9, %v7569_v22  ;;  %7630 = vst [vmem:[#allocation1 + $0x1] ss:$4 sm:$0xff] %v7621_v37  ;;  %v7895_v37 = vld [vmem:[#allocation7 + $0x5a] sm:$0x3] }
 0x893   :  { %7634 = vst [vmem:[#allocation1 + $0x3] ss:$4 sm:$0xff] %v7623_v13  ;;  %v7960_v13 = vld [vmem:[#allocation7 + $0x23] sm:$0x3] }
 0x894   :  { %8089 = vmatpush.bf16.msra.mxu0 %v9876_v33  ;;  %v8139_v33 = vld [vmem:[%s12839_s9 + $0x40] sm:$0xff] }
 0x89a   :  { %v7635_v19 = vld.sshfl [vmem:[#allocation1] sm:$0xff pattern:$0x73625140] }
 0x89b   :  { %v7637_v0 = vpack.c.bf16 %v7635_v19, %v7635_v19  ;;  %7696 = vst [vmem:[#allocation1] ss:$4 sm:$0xff] %v7688_v47  ;;  %v8031_v19 = vld [vmem:[#allocation7 + $0x5c] sm:$0x3] }
 0x89c   :  { %7700 = vst [vmem:[#allocation1 + $0x2] ss:$4 sm:$0xff] %v7690_v57  ;;  %v6866_v10 = vpop.f32.mrf.mxu2 }
 0x89d   :  { %9514 = vmatmul.msk.bf16.vlgmr.msra.gmra.mxu2 %vm6444_vm9, %v7637_v0  ;;  %7698 = vst [vmem:[#allocation1 + $0x1] ss:$4 sm:$0xff] %v7689_v26  ;;  %v6870_v59 = vadd.f32 %v6866_v10, %v6802_v4  ;;  %v8028_v0 = vld [vmem:[#allocation7 + $0x24] sm:$0x3] }
 0x89e   :  { %7702 = vst [vmem:[#allocation1 + $0x3] ss:$4 sm:$0xff] %v7691_v46 }
 0x8a4   :  { %v6868_v5 = vpop.f32.mrf.mxu2 }
 0x8a5   :  { %v7703_v1 = vld.sshfl [vmem:[#allocation1] sm:$0xff pattern:$0x73625140] }
 0x8a6   :  { %v7705_v20 = vpack.c.bf16 %v7703_v1, %v7703_v1  ;;  %7764 = vst [vmem:[#allocation1] ss:$4 sm:$0xff] %v7756_v55 }
 0x8a7   :  { %7766 = vst [vmem:[#allocation1 + $0x1] ss:$4 sm:$0xff] %v7757_v49  ;;  %v6934_v41 = vpop.f32.mrf.mxu3 }
 0x8a8   :  { %9539 = vmatmul.msk.bf16.vlgmr.msrb.gmra.mxu3 %vm6444_vm9, %v7705_v20  ;;  %7768 = vst [vmem:[#allocation1 + $0x2] ss:$4 sm:$0xff] %v7758_v6  ;;  %v6938_v42 = vadd.f32 %v6934_v41, %v6870_v59 }
 0x8a9   :  { %7770 = vst [vmem:[#allocation1 + $0x3] ss:$4 sm:$0xff] %v7759_v34 }
 0x8ac   :  { %v7002_v23 = vpop.f32.mrf.mxu0 }
 0x8ad   :  { %v7006_v17 = vadd.f32 %v7002_v23, %v6938_v42  ;;  %v8141_v23 = vld [vmem:[%s12839_s9 + $0x50] sm:$0xff]  ;;  %v8140_v42 = vld [vmem:[%s12839_s9 + $0x48] sm:$0xff] }
 0x8af   :  { %v6936_v31 = vpop.f32.mrf.mxu3 }
 0x8b0   :  { %v7771_v24 = vld.sshfl [vmem:[#allocation1] sm:$0xff pattern:$0x73625140] }
 0x8b1   :  { %v7773_v51 = vpack.c.bf16 %v7771_v24, %v7771_v24  ;;  %7832 = vst [vmem:[#allocation1] ss:$4 sm:$0xff] %v7824_v29  ;;  %v8145_v24 = vld [vmem:[%s12839_s9 + $0x70] sm:$0xff] }
 0x8b2   :  { %7834 = vst [vmem:[#allocation1 + $0x1] ss:$4 sm:$0xff] %v7825_v8  ;;  %v8146_v8 = vld [vmem:[%s12839_s9 + $0x78] sm:$0xff] }
 0x8b3   :  { %9564 = vmatmul.msk.bf16.vlgmr.msrb.gmra.mxu0 %vm6444_vm9, %v7773_v51  ;;  %7836 = vst [vmem:[#allocation1 + $0x2] ss:$4 sm:$0xff] %v7826_v60  ;;  %8157 = vmatpush.msrb.mxu1 %v8146_v8  ;;  %v8144_v60 = vld [vmem:[%s12839_s9 + $0x68] sm:$0xff] }
 0x8b4   :  { %7838 = vst [vmem:[#allocation1 + $0x3] ss:$4 sm:$0xff] %v7827_v39  ;;  %v7004_v61 = vpop.f32.mrf.mxu0  ;;  %v8143_v39 = vld [vmem:[%s12839_s9 + $0x60] sm:$0xff] }
 0x8b5   :  { %8158 = vmatpush.msrb.mxu1 %v8145_v24  ;;  %v8133_v61 = vld [vmem:[%s12839_s9 + $0x10] sm:$0xff] }
 0x8b7   :  { %v7070_v28 = vpop.f32.mrf.mxu1  ;;  %8159 = vmatpush.msrb.mxu1 %v8144_v60 }
 0x8b8   :  { %v7074_v22 = vadd.f32 %v7070_v28, %v7006_v17 }
 0x8b9   :  { %8160 = vmatpush.msrb.mxu1 %v8143_v39 }
 0x8bb   :  { %v7839_v7 = vld.sshfl [vmem:[#allocation1] sm:$0xff pattern:$0x73625140]  ;;  %8161 = vmatpush.msrb.mxu1 %v8142_v15 }
 0x8bc   :  { %v7841_v14 = vpack.c.bf16 %v7839_v7, %v7839_v7  ;;  %7900 = vst [vmem:[#allocation1] ss:$4 sm:$0xff] %v7892_v62  ;;  %v8138_v62 = vld [vmem:[%s12839_s9 + $0x38] sm:$0xff]  ;;  %v8136_v7 = vld [vmem:[%s12839_s9 + $0x28] sm:$0xff] }
 0x8bd   :  { %7902 = vst [vmem:[#allocation1 + $0x1] ss:$4 sm:$0xff] %v7893_v25  ;;  %8162 = vmatpush.msrb.mxu1 %v8141_v23  ;;  %v8137_v25 = vld [vmem:[%s12839_s9 + $0x30] sm:$0xff] }
 0x8be   :  { %9589 = vmatmul.msk.bf16.vlgmr.msra.gmra.mxu1 %vm6444_vm9, %v7841_v14  ;;  %7904 = vst [vmem:[#allocation1 + $0x2] ss:$4 sm:$0xff] %v7894_v52  ;;  %v8135_v52 = vld [vmem:[%s12839_s9 + $0x20] sm:$0xff]  ;;  %v8134_v14 = vld [vmem:[%s12839_s9 + $0x18] sm:$0xff] }
 0x8bf   :  { %7906 = vst [vmem:[#allocation1 + $0x3] ss:$4 sm:$0xff] %v7895_v37  ;;  %v7072_v16 = vpop.f32.mrf.mxu1  ;;  %8163 = vmatpush.msrb.mxu1 %v8140_v42 }
 0x8c1   :  { %8164 = vmatpush.msrb.mxu1 %v8139_v33 }
 0x8c3   :  { %8165 = vmatpush.msrb.mxu1 %v8138_v62 }
 0x8c5   :  { %8166 = vmatpush.msrb.mxu1 %v8137_v25 }
 0x8c6   :  { %v7907_v54 = vld.sshfl [vmem:[#allocation1] sm:$0xff pattern:$0x73625140] }
 0x8c7   :  { %v7909_v44 = vpack.c.bf16 %v7907_v54, %v7907_v54  ;;  %7968 = vst [vmem:[#allocation1] ss:$4 sm:$0xff] %v7960_v13  ;;  %8167 = vmatpush.msrb.mxu1 %v8136_v7 }
 0x8c8   :  { %7970 = vst [vmem:[#allocation1 + $0x1] ss:$4 sm:$0xff] %v7961_v63  ;;  %v7138_v47 = vpop.f32.mrf.mxu2  ;;  %v8131_v63 = vld [vmem:[%s12839_s9] sm:$0xff] }
 0x8c9   :  { %9614 = vmatmul.msk.bf16.vlgmr.msrb.gmra.mxu2 %vm6444_vm9, %v7909_v44  ;;  %7972 = vst [vmem:[#allocation1 + $0x2] ss:$4 sm:$0xff] %v7962_v56  ;;  %v7142_v57 = vadd.f32 %v7138_v47, %v7074_v22  ;;  %8168 = vmatpush.msrb.mxu1 %v8135_v52  ;;  %v8132_v22 = vld [vmem:[%s12839_s9 + $0x8] sm:$0xff] }
 0x8ca   :  { %7974 = vst [vmem:[#allocation1 + $0x3] ss:$4 sm:$0xff] %v7963_v21 }
 0x8cb   :  { %8169 = vmatpush.msrb.mxu1 %v8134_v14 }
 0x8cd   :  { %8170 = vmatpush.msrb.mxu1 %v8133_v61 }
 0x8cf   :  { %8171 = vmatpush.msrb.mxu1 %v8132_v22 }
 0x8d0   :  { %v7140_v26 = vpop.f32.mrf.mxu2 }
 0x8d1   :  { %v7975_v50 = vld.sshfl [vmem:[#allocation1] sm:$0xff pattern:$0x73625140]  ;;  %8172 = vmatpush.msrb.mxu1 %v8131_v63 }
 0x8d2   :  { %v7977_v46 = vpack.c.bf16 %v7975_v50, %v7975_v50  ;;  %8038 = vst [vmem:[#allocation1 + $0x1] ss:$4 sm:$0xff] %v8029_v53 }
 0x8d3   :  { %8042 = vst [vmem:[#allocation1 + $0x3] ss:$4 sm:$0xff] %v8031_v19  ;;  %v7206_v48 = vpop.f32.mrf.mxu3 }
 0x8d4   :  { %9639 = vmatmul.msk.bf16.vlgmr.msra.gmra.mxu3 %vm6444_vm9, %v7977_v46  ;;  %8036 = vst [vmem:[#allocation1] ss:$4 sm:$0xff] %v8028_v0  ;;  %v7210_v3 = vadd.f32 %v7206_v48, %v7142_v57 }
 0x8d5   :  { %8040 = vst [vmem:[#allocation1 + $0x2] ss:$4 sm:$0xff] %v8030_v2 }
 0x8d8   :  { %v7274_v27 = vpop.f32.mrf.mxu0 }
 0x8d9   :  { %v7278_v12 = vadd.f32 %v7274_v27, %v7210_v3 }
 0x8db   :  { %v7208_v32 = vpop.f32.mrf.mxu3 }
 0x8dc   :  { %v8043_v55 = vld.sshfl [vmem:[#allocation1] sm:$0xff pattern:$0x73625140] }
 0x8dd   :  { %v8045_v45 = vpack.c.bf16 %v8043_v55, %v8043_v55 }
 0x8df   :  { %9664 = vmatmul.msk.bf16.vlgmr.msra.gmra.mxu0 %vm6444_vm9, %v8045_v45 }
 0x8e0   :  { %v7276_v49 = vpop.f32.mrf.mxu0 }
 0x8e3   :  { %v7342_v30 = vpop.f32.mrf.mxu1 }
 0x8e4   :  { %v7346_v1 = vadd.f32 %v7342_v30, %v7278_v12 }
 0x8eb   :  { %v7344_v6 = vpop.f32.mrf.mxu1 }
 0x8f4   :  { %v7410_v20 = vpop.f32.mrf.mxu2 }
 0x8f5   :  { %v7414_v34 = vadd.f32 %v7410_v20, %v7346_v1 }
 0x8fc   :  { %v7412_v40 = vpop.f32.mrf.mxu2 }
 0x8ff   :  { %v7479_v43 = vpop.f32.mrf.mxu3 }
 0x900   :  { %v7483_v36 = vadd.f32 %v7479_v43, %v7414_v34 }
 0x904   :  { %v7547_v18 = vpop.f32.mrf.mxu0 }
 0x905   :  { %v7551_v10 = vadd.f32 %v7547_v18, %v7483_v36  ;;  %v9888_v18 = vld [vmem:[%s12840_s10] ss:$0 sm:$0xff] }
 0x907   :  { %v7481_v4 = vpop.f32.mrf.mxu3 }
 0x90c   :  { %v7549_v9 = vpop.f32.mrf.mxu0 }
 0x90f   :  { %v7615_v58 = vpop.f32.mrf.mxu1 }
 0x910   :  { %v7619_v37 = vadd.f32 %v7615_v58, %v7551_v10 }
 0x917   :  { %v7617_v11 = vpop.f32.mrf.mxu1 }
 0x920   :  { %v7683_v38 = vpop.f32.mrf.mxu2 }
 0x921   :  { %v7687_v28 = vadd.f32 %v7683_v38, %v7619_v37 }
 0x928   :  { %v7685_v59 = vpop.f32.mrf.mxu2 }
 0x92b   :  { %v7751_v29 = vpop.f32.mrf.mxu3 }
 0x92c   :  { %v7755_v13 = vadd.f32 %v7751_v29, %v7687_v28 }
 0x930   :  { %v7819_v51 = vpop.f32.mrf.mxu0 }
 0x931   :  { %v7823_v54 = vadd.f32 %v7819_v51, %v7755_v13 }
 0x933   :  { %v7753_v5 = vpop.f32.mrf.mxu3 }
 0x938   :  { %v7821_v35 = vpop.f32.mrf.mxu0 }
 0x93b   :  { %v7887_v41 = vpop.f32.mrf.mxu1 }
 0x93c   :  { %v7891_v44 = vadd.f32 %v7887_v41, %v7823_v54 }
 0x943   :  { %v7889_v17 = vpop.f32.mrf.mxu1 }
 0x94c   :  { %v7955_v31 = vpop.f32.mrf.mxu2 }
 0x94d   :  { %v7959_v21 = vadd.f32 %v7955_v31, %v7891_v44 }
 0x954   :  { %v7957_v56 = vpop.f32.mrf.mxu2 }
 0x957   :  { %v8023_v16 = vpop.f32.mrf.mxu3 }
 0x958   :  { %v8027_v47 = vadd.f32 %v8023_v16, %v7959_v21 }
 0x95c   :  { %v8091_v57 = vpop.f32.mrf.mxu0 }
 0x95d   :  { %v8095_v53 = vadd.f32 %v8091_v57, %v8027_v47 }
 0x95f   :  { %v8096_v19 = vmax.f32 %v8095_v53, 0.0  ;;  %v8025_v26 = vpop.f32.mrf.mxu3 }
 0x961   :  { %v8098_v50 = vrot.slane %v8096_v19, 2  ;;  %v8099_v0 = vrot.slane %v8096_v19, 4  ;;  %v8100_v46 = vrot.slane %v8096_v19, 6  ;;  %8104 = vst [vmem:[#allocation8] sm:$0x3] %v8096_v19 }
 0x963   :  { %8105 = vst [vmem:[#allocation8 + $0x2] sm:$0x3] %v8098_v50 }
 0x964   :  { %8106 = vst [vmem:[#allocation8 + $0x4] sm:$0x3] %v8099_v0  ;;  %v8093_v2 = vpop.f32.mrf.mxu0 }
 0x965   :  { %8107 = vst [vmem:[#allocation8 + $0x6] sm:$0x3] %v8100_v46 }
 0x968   :  { %v8108_v48 = vld [vmem:[#allocation8] ss:$2 sm:$0x1]  ;;  %v8116_v27 = vld [vmem:[#allocation8 + $0x1] ss:$2 sm:$0x1] }
 0x969   :  { %v8123_v20 = vmax.f32 %v8108_v48, %v8116_v27 }
 0x96a   :  { %v8110_v3 = vld [vmem:[#allocation8 + $0x2] ss:$2 sm:$0x1]  ;;  %v8118_v12 = vld [vmem:[#allocation8 + $0x3] ss:$2 sm:$0x1] }
 0x96b   :  { %v8112_v32 = vld [vmem:[#allocation8 + $0x4] ss:$2 sm:$0x1]  ;;  %v8120_v55 = vld [vmem:[#allocation8 + $0x5] ss:$2 sm:$0x1]  ;;  %v8124_v1 = vmax.f32 %v8110_v3, %v8118_v12 }
 0x96c   :  { %v8114_v45 = vld [vmem:[#allocation8 + $0x6] ss:$2 sm:$0x1]  ;;  %v8122_v49 = vld [vmem:[#allocation8 + $0x7] ss:$2 sm:$0x1]  ;;  %v8125_v30 = vmax.f32 %v8112_v32, %v8120_v55 }
 0x96d   :  { %v8126_v6 = vmax.f32 %v8114_v45, %v8122_v49  ;;  %v8127_v40 = vmax.f32 %v8123_v20, %v8124_v1 }
 0x96f   :  { %v8128_v34 = vmax.f32 %v8125_v30, %v8126_v6 }
 0x971   :  { %v8153_v43 = vrot.slane %v8128_v34, 7 }
 0x973   :  { %v8155_v36 = vsel %vm8154_vm10, %v8153_v43, %v8127_v40 }
 0x974   :  { %8173 = vmatmul.f32.vlgmr.msrb.gmra.mxu1 %v8155_v36 }
 0x9f1   :  { %v8174_v10 = vpop.f32.mrf.mxu1 }
 0x9f2   :  { %v8175_v4 = vadd.f32 %v9888_v18, %v8174_v10 }
 0x9f4   :  { %8177 = vst [vmem:[#allocation9] sm:$0x3] %v8175_v4 }
 0x9f5   :  { %8188 = dma.vmem_to_hbm [thread:$0]  %s8184_s3, 32, %s8186_s5, [#allocation10]  }
 0x9f6   :  { %9955 = dma.done.wait [#allocation10], 32  }
 0x9f7   :  { %9956 = vsyncadd [#allocation10], 4294967264 }
 0x9f8   :  { %8193 = vsyncpa [#allocation10], 1 }

</bundles_post_ra>
